<compile_context>
chip_gen: v7x
topology: tpu7x:2x2x1
jax: 0.10.0
libtpu: 0.0.40
codegen_flags: <defaults>
</compile_context>

<pallas_src>
import functools

import numpy as np
import jax
import jax.numpy as jnp
from jax import lax
from jax.experimental import pallas as pl
from jax.experimental.pallas import tpu as pltpu

EEG_20REGION_INDEX = [[3, 0, 1, 2, 4], [5, 6, 7], [8, 9, 10], [11, 12, 13],
                      [14, 15, 16], [17, 18, 19], [20, 21, 22], [23, 24, 25],
                      [26, 27, 28], [29, 30, 31], [32, 33, 34], [35, 36, 37],
                      [38, 39, 40], [41, 42, 43], [44, 45, 46], [47, 48, 49],
                      [50, 51, 57], [52, 53, 54], [55, 56, 61], [58, 59, 60]]

# ----- hyper-parameters (PyTorch module defaults) ---------------------------
DEPTH = 2
NUM_HEADS = 20                 # forced by the 20-region concat (dim = embd*heads)
EMBD_DIM = 4                   # per-head dim
FRE_DIM = 5
NUM_CH = 62
DIM = EMBD_DIM * NUM_HEADS     # 80
MLP_HIDDEN = int(DIM * 4.0)    # 320
SEQ_T = 5                      # pos_emb has 6 slots = cls + 5 tokens
SEQ_S = SEQ_T + 1
FEAT_DIM = 5 * FRE_DIM + 19 * 3 * FRE_DIM   # 310
LN_EPS = 1e-5
SCALE = EMBD_DIM ** (-0.5)


# ============================= in-kernel math ================================

def _erf(x):
    # Abramowitz & Stegun 7.1.26 (|err| < 1.5e-7).
    a1, a2, a3, a4, a5 = 0.254829592, -0.284496736, 1.421413741, -1.453152027, 1.061405429
    p = 0.3275911
    sign = jnp.where(x >= 0.0, 1.0, -1.0)
    ax = jnp.abs(x)
    t = pl.reciprocal(1.0 + p * ax, approx=True)      # EUP slot, off the VALU
    poly = ((((a5 * t + a4) * t + a3) * t + a2) * t + a1) * t
    return sign * (1.0 - poly * jnp.exp(-ax * ax))


def _gelu_exact(x):
    # torch.nn.GELU() default (erf formulation)
    return 0.5 * x * (1.0 + _erf(x * 0.7071067811865476))


def _layernorm_rows(x, w, b):
    mu = jnp.mean(x, axis=-1, keepdims=True)
    var = jnp.mean((x - mu) ** 2, axis=-1, keepdims=True)
    return (x - mu) * lax.rsqrt(var + LN_EPS) * w + b


# ============================== fused kernel =================================

def fused_kernel(*refs, b, t, num_heads, head_dim, depth):
    (x_ref, wemb_ref, row0_ref, tokadd_ref, mask_ref,
     ln1w_r, ln1b_r, wq_r, bq_r, wk_r, bk_r, wv_r, bv_r, wp_r, bp_r, g1_r,
     ln2w_r, ln2b_r, w1_r, b1_r, w2_r, b2_r, g2_r) = refs[:23]
    out_refs = refs[23:23 + depth]
    attn_scr = refs[23 + depth]          # VMEM (B*S, D) f32 scratch

    s = t + 1

    # ---- region-projection matmul (channel gather folded into weight rows) --
    emb = jnp.dot(x_ref[...].astype(jnp.bfloat16), wemb_ref[...],
                  preferred_element_type=jnp.float32)            # (B*T, D) f32

    # ---- build token sequence: [cls+pos0+type, emb_t + b_emb + pos_t + type]
    row0 = row0_ref[...]                                         # (1, D)
    tok_add = tokadd_ref[...]                                    # (T, D)
    parts = []
    for bi in range(b):
        parts.append(row0)
        parts.append(emb[bi * t:(bi + 1) * t, :] + tok_add)
    x = jnp.concatenate(parts, axis=0)                           # (B*S, D) f32

    neg_mask = mask_ref[...]                                     # (B*S, B*S): 0 / -1e30

    for d in range(depth):                                       # unrolled, depth=2
        # ---- LayerNorm 1 + per-head q/k/v (block-diag weights, scale folded) --
        xn = _layernorm_rows(x, ln1w_r[d], ln1b_r[d])
        xnb = xn.astype(jnp.bfloat16)
        q = jnp.dot(xnb, wq_r[d], preferred_element_type=jnp.float32) + bq_r[d]
        k = jnp.dot(xnb, wk_r[d], preferred_element_type=jnp.float32) + bk_r[d]
        v = jnp.dot(xnb, wv_r[d], preferred_element_type=jnp.float32) + bv_r[d]
        qb = q.astype(jnp.bfloat16)
        kb = k.astype(jnp.bfloat16)
        vb = v.astype(jnp.bfloat16)

        # ---- attention: all batches in one matmul per head, cross-batch masked;
        #      per-head outputs written straight into VMEM scratch (no concat) --
        for h in range(num_heads):
            lo, hi = h * head_dim, (h + 1) * head_dim
            sc = lax.dot_general(qb[:, lo:hi], kb[:, lo:hi],
                                 (((1,), (1,)), ((), ())),
                                 preferred_element_type=jnp.float32)   # (BS, BS)
            sc = sc + neg_mask
            sc = sc - jnp.max(sc, axis=-1, keepdims=True)
            e = jnp.exp(sc)
            p = e * pl.reciprocal(jnp.sum(e, axis=-1, keepdims=True), approx=True)
            attn_scr[:, lo:hi] = jnp.dot(p.astype(jnp.bfloat16), vb[:, lo:hi],
                                         preferred_element_type=jnp.float32)

        attn = jnp.dot(attn_scr[...].astype(jnp.bfloat16), wp_r[d],
                       preferred_element_type=jnp.float32) + bp_r[d]
        x = x + g1_r[d] * attn                                   # residual (+ gamma_1)

        # ---- LayerNorm 2 + MLP ----
        xn2 = _layernorm_rows(x, ln2w_r[d], ln2b_r[d])
        h1 = _gelu_exact(jnp.dot(xn2.astype(jnp.bfloat16), w1_r[d],
                                 preferred_element_type=jnp.float32) + b1_r[d])
        h2 = jnp.dot(h1.astype(jnp.bfloat16), w2_r[d],
                     preferred_element_type=jnp.float32) + b2_r[d]
        x = x + g2_r[d] * h2                                     # residual (+ gamma_2)

        # ---- this Block's output, (B, S, D) ----
        for bi in range(b):
            out_refs[d][bi, :, :] = x[bi * s:(bi + 1) * s, :]


def region_transformer_forward(x, kp):
    """Single fused pallas_call; returns list of per-Block outputs (B, S, D)."""
    b, t, _ = x.shape
    s = t + 1
    bs = b * s
    x_flat = x.reshape(b * t, FEAT_DIM)

    # cross-batch attention mask (compile-time constant)
    bid = np.repeat(np.arange(b), s)
    neg_mask = jnp.asarray(
        np.where(bid[:, None] == bid[None, :], 0.0, -1e30).astype(np.float32))

    kernel = functools.partial(fused_kernel, b=b, t=t, num_heads=NUM_HEADS,
                               head_dim=EMBD_DIM, depth=DEPTH)
    outs = pl.pallas_call(
        kernel,
        out_shape=tuple(jax.ShapeDtypeStruct((b, s, DIM), jnp.float32)
                        for _ in range(DEPTH)),
        scratch_shapes=[pltpu.VMEM((bs, DIM), jnp.float32)],
    )(x_flat, kp['w_emb'], kp['row0'], kp['tok_add'], neg_mask,
      kp['ln1w'], kp['ln1b'], kp['wq'], kp['bq'], kp['wk'], kp['bk'],
      kp['wv'], kp['bv'], kp['wp'], kp['bp'], kp['g1'],
      kp['ln2w'], kp['ln2b'], kp['w1'], kp['b1'], kp['w2'], kp['b2'], kp['g2'])
    return list(outs)


# ============================ parameter setup ================================

def trunc_normal(key, shape, std=0.02):
    # timm trunc_normal_ with cutoffs +/-2 at std=0.02 is effectively untruncated.
    return (std * jax.random.normal(key, shape)).astype(jnp.float32)


def init_raw_params(key):
    keys = iter(jax.random.split(key, 64))
    raw = {
        'prj1_w': trunc_normal(next(keys), (EMBD_DIM, 5 * FRE_DIM)),
        'prj1_b': jnp.zeros((EMBD_DIM,), jnp.float32),
        'prj19_w': trunc_normal(next(keys), (EMBD_DIM * 19, 3 * FRE_DIM)),
        'prj19_b': jnp.zeros((EMBD_DIM * 19,), jnp.float32),
        'pos_emb': trunc_normal(next(keys), (1, SEQ_S, DIM)),
        'type_emb': trunc_normal(next(keys), (1, 1, DIM)),
        'cls_token': trunc_normal(next(keys), (1, 1, DIM)),
        'blocks': [],
    }
    for _ in range(DEPTH):
        raw['blocks'].append({
            'ln1_w': jnp.ones((DIM,), jnp.float32),
            'ln1_b': jnp.zeros((DIM,), jnp.float32),
            'to_q_w': trunc_normal(next(keys), (DIM, EMBD_DIM)),
            'to_q_b': jnp.zeros((DIM,), jnp.float32),
            'to_k_w': trunc_normal(next(keys), (DIM, EMBD_DIM)),
            'to_k_b': jnp.zeros((DIM,), jnp.float32),
            'to_v_w': trunc_normal(next(keys), (DIM, EMBD_DIM)),
            'to_v_b': jnp.zeros((DIM,), jnp.float32),
            'proj_w': trunc_normal(next(keys), (DIM, DIM)),
            'proj_b': jnp.zeros((DIM,), jnp.float32),
            'gamma_1': 0.1 * jnp.ones((DIM,), jnp.float32),
            'ln2_w': jnp.ones((DIM,), jnp.float32),
            'ln2_b': jnp.zeros((DIM,), jnp.float32),
            'fc1_w': trunc_normal(next(keys), (MLP_HIDDEN, DIM)),
            'fc1_b': jnp.zeros((MLP_HIDDEN,), jnp.float32),
            'fc2_w': trunc_normal(next(keys), (DIM, MLP_HIDDEN)),
            'fc2_b': jnp.zeros((DIM,), jnp.float32),
            'gamma_2': 0.1 * jnp.ones((DIM,), jnp.float32),
        })
    return raw


def _block_diag_heads(w):
    """Fold Linear(head_dim, head_dim*num_heads) + diagonal head selection into a
    block-diagonal (DIM, DIM) matrix so (x @ W)[:, h*hd:(h+1)*hd] is head h."""
    hd = EMBD_DIM
    blocks = w.reshape(NUM_HEADS, hd, hd)          # [head, out, in]
    out = jnp.zeros((DIM, DIM), jnp.float32)
    for h in range(NUM_HEADS):
        out = out.at[h * hd:(h + 1) * hd, h * hd:(h + 1) * hd].set(blocks[h].T)
    return out


def prepare_kernel_params(raw):
    # Channel/freq gather permutation matching
    # rearrange 'b t (f c) -> b t c f' then per-region 'b t c f -> b t (c f)'.
    perm = []
    for chans in EEG_20REGION_INDEX:
        for c in chans:
            for f in range(FRE_DIM):
                perm.append(f * NUM_CH + c)
    perm = jnp.asarray(np.array(perm, dtype=np.int32))

    # Fused embedding weight in gathered-feature order:
    # block 0 = prj1, blocks 1..19 = diagonal slices of prj19.
    w_emb = jnp.zeros((FEAT_DIM, DIM), jnp.float32)
    w_emb = w_emb.at[:5 * FRE_DIM, :EMBD_DIM].set(raw['prj1_w'].T)
    for i in range(19):
        r0 = 5 * FRE_DIM + i * 3 * FRE_DIM
        c0 = EMBD_DIM + i * EMBD_DIM
        w_emb = w_emb.at[r0:r0 + 3 * FRE_DIM, c0:c0 + EMBD_DIM].set(
            raw['prj19_w'][i * EMBD_DIM:(i + 1) * EMBD_DIM, :].T)
    # Fold the channel gather into the weight rows: x_flat @ w_emb_x == feat @ w_emb.
    w_emb_x = jnp.zeros_like(w_emb).at[perm].set(w_emb)

    b_emb = jnp.concatenate([raw['prj1_b'], raw['prj19_b']]).reshape(1, DIM)
    row0 = raw['cls_token'][0] + raw['pos_emb'][0, :1] + raw['type_emb'][0]   # (1, D)
    tok_add = raw['pos_emb'][0, 1:] + raw['type_emb'][0] + b_emb              # (T, D)

    def stack(fn, bf16=False):
        arr = jnp.stack([fn(p) for p in raw['blocks']], axis=0)
        return arr.astype(jnp.bfloat16) if bf16 else arr

    return {
        'w_emb': w_emb_x.astype(jnp.bfloat16),
        'row0': row0, 'tok_add': tok_add,
        'ln1w': stack(lambda p: p['ln1_w'].reshape(1, DIM)),
        'ln1b': stack(lambda p: p['ln1_b'].reshape(1, DIM)),
        # qk scale folded into q weight/bias at prepare time
        'wq': stack(lambda p: _block_diag_heads(p['to_q_w']) * SCALE, bf16=True),
        'bq': stack(lambda p: p['to_q_b'].reshape(1, DIM) * SCALE),
        'wk': stack(lambda p: _block_diag_heads(p['to_k_w']), bf16=True),
        'bk': stack(lambda p: p['to_k_b'].reshape(1, DIM)),
        'wv': stack(lambda p: _block_diag_heads(p['to_v_w']), bf16=True),
        'bv': stack(lambda p: p['to_v_b'].reshape(1, DIM)),
        'wp': stack(lambda p: p['proj_w'].T, bf16=True),
        'bp': stack(lambda p: p['proj_b'].reshape(1, DIM)),
        'g1': stack(lambda p: p['gamma_1'].reshape(1, DIM)),
        'ln2w': stack(lambda p: p['ln2_w'].reshape(1, DIM)),
        'ln2b': stack(lambda p: p['ln2_b'].reshape(1, DIM)),
        'w1': stack(lambda p: p['fc1_w'].T, bf16=True),
        'b1': stack(lambda p: p['fc1_b'].reshape(1, MLP_HIDDEN)),
        'w2': stack(lambda p: p['fc2_w'].T, bf16=True),
        'b2': stack(lambda p: p['fc2_b'].reshape(1, DIM)),
        'g2': stack(lambda p: p['gamma_2'].reshape(1, DIM)),
    }


# ======================= pure-JAX reference (sanity) =========================

def _layernorm(x, w, b):
    mu = jnp.mean(x, axis=-1, keepdims=True)
    var = jnp.mean((x - mu) ** 2, axis=-1, keepdims=True)
    return (x - mu) / jnp.sqrt(var + LN_EPS) * w + b


def reference_forward(x, raw):
    b, t, _ = x.shape
    xr = x.reshape(b, t, FRE_DIM, NUM_CH).transpose(0, 1, 3, 2)       # b t c f
    r0 = xr[:, :, jnp.array(EEG_20REGION_INDEX[0]), :].reshape(b, t, 5 * FRE_DIM)
    x0 = (r0 @ raw['prj1_w'].T + raw['prj1_b'])[:, :, None, :]
    feats = [xr[:, :, jnp.array(EEG_20REGION_INDEX[i]), :].reshape(b * t, 3 * FRE_DIM)
             for i in range(1, 20)]
    xt = jnp.stack(feats, axis=1) @ raw['prj19_w'].T + raw['prj19_b']
    xt = jnp.stack([xt[:, i, i * EMBD_DIM:(i + 1) * EMBD_DIM] for i in range(19)], axis=1)
    xt = xt.reshape(b, t, 19, EMBD_DIM)
    xs = jnp.concatenate([x0, xt], axis=2).reshape(b, t, DIM)
    cls = jnp.broadcast_to(raw['cls_token'], (b, 1, DIM))
    xs = jnp.concatenate([cls, xs], axis=1) + raw['pos_emb'] + raw['type_emb']

    outs = []
    for blk in raw['blocks']:
        s = xs.shape[1]
        xn = _layernorm(xs, blk['ln1_w'], blk['ln1_b'])
        xh = xn.reshape(b * s, NUM_HEADS, EMBD_DIM)

        def heads(lin_w, lin_b):
            y = xh @ lin_w.T + lin_b
            y = jnp.stack([y[:, i, i * EMBD_DIM:(i + 1) * EMBD_DIM]
                           for i in range(NUM_HEADS)], axis=1)
            return y.reshape(b, s, NUM_HEADS, EMBD_DIM).transpose(0, 2, 1, 3)

        q = heads(blk['to_q_w'], blk['to_q_b']) * SCALE
        k = heads(blk['to_k_w'], blk['to_k_b'])
        v = heads(blk['to_v_w'], blk['to_v_b'])
        a = jax.nn.softmax(jnp.einsum('bhid,bhjd->bhij', q, k), axis=-1)
        o = jnp.einsum('bhij,bhjd->bhid', a, v).transpose(0, 2, 1, 3).reshape(b, s, DIM)
        o = o @ blk['proj_w'].T + blk['proj_b']
        xs = xs + blk['gamma_1'] * o
        xn2 = _layernorm(xs, blk['ln2_w'], blk['ln2_b'])
        h = jax.nn.gelu(xn2 @ blk['fc1_w'].T + blk['fc1_b'], approximate=False)
        xs = xs + blk['gamma_2'] * (h @ blk['fc2_w'].T + blk['fc2_b'])
        outs.append(xs)
    return outs


# ================================== main =====================================

if __name__ == "__main__":
    key = jax.random.PRNGKey(0)
    pkey, xkey = jax.random.split(key)
    raw = init_raw_params(pkey)
    kp = prepare_kernel_params(raw)

    # x: (B, T, 62*fre_dim) = (2, 5, 310); T=5 is forced by pos_emb (6 slots).
    x = jax.random.normal(xkey, (2, SEQ_T, FRE_DIM * NUM_CH), dtype=jnp.float32)

    fwd = jax.jit(region_transformer_forward)
    outs = fwd(x, kp)
    outs = [jax.block_until_ready(o) for o in outs]

    refs = reference_forward(x, raw)
    for o, r in zip(outs, refs):
        np.testing.assert_allclose(np.asarray(o), np.asarray(r), atol=2e-2, rtol=2e-2)

    print("KERNEL_OK")
</pallas_src>

<mosaic_0001>
module attributes {stable_mosaic.version = 11 : i64} {
  func.func @fused_kernel(%arg0: memref<10x310xf32, #tpu.memory_space<vmem>>, %arg1: memref<310x80xbf16, #tpu.memory_space<vmem>>, %arg2: memref<1x80xf32, #tpu.memory_space<vmem>>, %arg3: memref<5x80xf32, #tpu.memory_space<vmem>>, %arg4: memref<12x12xf32, #tpu.memory_space<vmem>>, %arg5: memref<2x1x80xf32, #tpu.memory_space<vmem>>, %arg6: memref<2x1x80xf32, #tpu.memory_space<vmem>>, %arg7: memref<2x80x80xbf16, #tpu.memory_space<vmem>>, %arg8: memref<2x1x80xf32, #tpu.memory_space<vmem>>, %arg9: memref<2x80x80xbf16, #tpu.memory_space<vmem>>, %arg10: memref<2x1x80xf32, #tpu.memory_space<vmem>>, %arg11: memref<2x80x80xbf16, #tpu.memory_space<vmem>>, %arg12: memref<2x1x80xf32, #tpu.memory_space<vmem>>, %arg13: memref<2x80x80xbf16, #tpu.memory_space<vmem>>, %arg14: memref<2x1x80xf32, #tpu.memory_space<vmem>>, %arg15: memref<2x1x80xf32, #tpu.memory_space<vmem>>, %arg16: memref<2x1x80xf32, #tpu.memory_space<vmem>>, %arg17: memref<2x1x80xf32, #tpu.memory_space<vmem>>, %arg18: memref<2x80x320xbf16, #tpu.memory_space<vmem>>, %arg19: memref<2x1x320xf32, #tpu.memory_space<vmem>>, %arg20: memref<2x320x80xbf16, #tpu.memory_space<vmem>>, %arg21: memref<2x1x80xf32, #tpu.memory_space<vmem>>, %arg22: memref<2x1x80xf32, #tpu.memory_space<vmem>>, %arg23: memref<2x6x80xf32, #tpu.memory_space<vmem>>, %arg24: memref<2x6x80xf32, #tpu.memory_space<vmem>>, %arg25: memref<12x80xf32, #tpu.memory_space<vmem>>) attributes {dimension_semantics = [], scalar_prefetch = 0 : i64, scratch_operands = 1 : i64, tpu.core_type = #tpu.core_type<tc>} {
    %c0 = arith.constant 0 : index
    %c0_0 = arith.constant 0 : index
    %0 = vector.load %arg0[%c0, %c0_0] : memref<10x310xf32, #tpu.memory_space<vmem>>, vector<10x310xf32>
    %1 = arith.truncf %0 : vector<10x310xf32> to vector<10x310xbf16>
    %c0_1 = arith.constant 0 : index
    %c0_2 = arith.constant 0 : index
    %2 = vector.load %arg1[%c0_1, %c0_2] : memref<310x80xbf16, #tpu.memory_space<vmem>>, vector<310x80xbf16>
    %cst = arith.constant dense<0.000000e+00> : vector<10x80xf32>
    %3 = tpu.matmul %1, %2, %cst {dimension_numbers = #tpu.dot_dimension_numbers<[1], [0], [0], [1], [0, 0, 1, 1], [], []>} : vector<10x310xbf16>, vector<310x80xbf16>, vector<10x80xf32> -> vector<10x80xf32>
    %c0_3 = arith.constant 0 : index
    %c0_4 = arith.constant 0 : index
    %4 = vector.load %arg2[%c0_3, %c0_4] : memref<1x80xf32, #tpu.memory_space<vmem>>, vector<1x80xf32>
    %c0_5 = arith.constant 0 : index
    %c0_6 = arith.constant 0 : index
    %5 = vector.load %arg3[%c0_5, %c0_6] : memref<5x80xf32, #tpu.memory_space<vmem>>, vector<5x80xf32>
    %6 = vector.extract_strided_slice %3 {offsets = [0, 0], sizes = [5, 80], strides = [1, 1]} : vector<10x80xf32> to vector<5x80xf32>
    %7 = arith.addf %6, %5 : vector<5x80xf32>
    %8 = vector.extract_strided_slice %3 {offsets = [5, 0], sizes = [5, 80], strides = [1, 1]} : vector<10x80xf32> to vector<5x80xf32>
    %9 = arith.addf %8, %5 : vector<5x80xf32>
    %10 = tpu.concatenate %4, %7, %4, %9 in 0 : vector<1x80xf32>, vector<5x80xf32>, vector<1x80xf32>, vector<5x80xf32> -> vector<12x80xf32>
    %c0_7 = arith.constant 0 : index
    %c0_8 = arith.constant 0 : index
    %11 = vector.load %arg4[%c0_7, %c0_8] : memref<12x12xf32, #tpu.memory_space<vmem>>, vector<12x12xf32>
    %c0_9 = arith.constant 0 : index
    %c0_10 = arith.constant 0 : index
    %c0_11 = arith.constant 0 : index
    %12 = vector.load %arg5[%c0_9, %c0_10, %c0_11] : memref<2x1x80xf32, #tpu.memory_space<vmem>>, vector<1x1x80xf32>
    %13 = vector.shape_cast %12 : vector<1x1x80xf32> to vector<1x80xf32>
    %c0_12 = arith.constant 0 : index
    %c0_13 = arith.constant 0 : index
    %c0_14 = arith.constant 0 : index
    %14 = vector.load %arg6[%c0_12, %c0_13, %c0_14] : memref<2x1x80xf32, #tpu.memory_space<vmem>>, vector<1x1x80xf32>
    %15 = vector.shape_cast %14 : vector<1x1x80xf32> to vector<1x80xf32>
    %cst_15 = arith.constant dense<0.000000e+00> : vector<12xf32>
    %16 = vector.multi_reduction <add>, %10, %cst_15 [1] : vector<12x80xf32> to vector<12xf32>
    %17 = vector.shape_cast %16 : vector<12xf32> to vector<12x1xf32>
    %cst_16 = arith.constant 8.000000e+01 : f32
    %18 = vector.broadcast %cst_16 : f32 to vector<12x1xf32>
    %19 = arith.divf %17, %18 : vector<12x1xf32>
    %20 = vector.broadcast %19 : vector<12x1xf32> to vector<12x80xf32>
    %21 = arith.subf %10, %20 : vector<12x80xf32>
    %22 = arith.mulf %21, %21 : vector<12x80xf32>
    %cst_17 = arith.constant dense<0.000000e+00> : vector<12xf32>
    %23 = vector.multi_reduction <add>, %22, %cst_17 [1] : vector<12x80xf32> to vector<12xf32>
    %24 = vector.shape_cast %23 : vector<12xf32> to vector<12x1xf32>
    %cst_18 = arith.constant 8.000000e+01 : f32
    %25 = vector.broadcast %cst_18 : f32 to vector<12x1xf32>
    %26 = arith.divf %24, %25 : vector<12x1xf32>
    %27 = vector.broadcast %19 : vector<12x1xf32> to vector<12x80xf32>
    %28 = arith.subf %10, %27 : vector<12x80xf32>
    %cst_19 = arith.constant 9.99999974E-6 : f32
    %29 = vector.broadcast %cst_19 : f32 to vector<12x1xf32>
    %30 = arith.addf %26, %29 : vector<12x1xf32>
    %31 = math.rsqrt %30 : vector<12x1xf32>
    %32 = vector.broadcast %31 : vector<12x1xf32> to vector<12x80xf32>
    %33 = arith.mulf %28, %32 : vector<12x80xf32>
    %34 = vector.broadcast %13 : vector<1x80xf32> to vector<12x80xf32>
    %35 = arith.mulf %33, %34 : vector<12x80xf32>
    %36 = vector.broadcast %15 : vector<1x80xf32> to vector<12x80xf32>
    %37 = arith.addf %35, %36 : vector<12x80xf32>
    %38 = arith.truncf %37 : vector<12x80xf32> to vector<12x80xbf16>
    %c0_20 = arith.constant 0 : index
    %c0_21 = arith.constant 0 : index
    %c0_22 = arith.constant 0 : index
    %39 = vector.load %arg7[%c0_20, %c0_21, %c0_22] : memref<2x80x80xbf16, #tpu.memory_space<vmem>>, vector<1x80x80xbf16>
    %40 = vector.shape_cast %39 : vector<1x80x80xbf16> to vector<80x80xbf16>
    %cst_23 = arith.constant dense<0.000000e+00> : vector<12x80xf32>
    %41 = tpu.matmul %38, %40, %cst_23 {dimension_numbers = #tpu.dot_dimension_numbers<[1], [0], [0], [1], [0, 0, 1, 1], [], []>} : vector<12x80xbf16>, vector<80x80xbf16>, vector<12x80xf32> -> vector<12x80xf32>
    %c0_24 = arith.constant 0 : index
    %c0_25 = arith.constant 0 : index
    %c0_26 = arith.constant 0 : index
    %42 = vector.load %arg8[%c0_24, %c0_25, %c0_26] : memref<2x1x80xf32, #tpu.memory_space<vmem>>, vector<1x1x80xf32>
    %43 = vector.shape_cast %42 : vector<1x1x80xf32> to vector<1x80xf32>
    %44 = vector.broadcast %43 : vector<1x80xf32> to vector<12x80xf32>
    %45 = arith.addf %41, %44 : vector<12x80xf32>
    %c0_27 = arith.constant 0 : index
    %c0_28 = arith.constant 0 : index
    %c0_29 = arith.constant 0 : index
    %46 = vector.load %arg9[%c0_27, %c0_28, %c0_29] : memref<2x80x80xbf16, #tpu.memory_space<vmem>>, vector<1x80x80xbf16>
    %47 = vector.shape_cast %46 : vector<1x80x80xbf16> to vector<80x80xbf16>
    %cst_30 = arith.constant dense<0.000000e+00> : vector<12x80xf32>
    %48 = tpu.matmul %38, %47, %cst_30 {dimension_numbers = #tpu.dot_dimension_numbers<[1], [0], [0], [1], [0, 0, 1, 1], [], []>} : vector<12x80xbf16>, vector<80x80xbf16>, vector<12x80xf32> -> vector<12x80xf32>
    %c0_31 = arith.constant 0 : index
    %c0_32 = arith.constant 0 : index
    %c0_33 = arith.constant 0 : index
    %49 = vector.load %arg10[%c0_31, %c0_32, %c0_33] : memref<2x1x80xf32, #tpu.memory_space<vmem>>, vector<1x1x80xf32>
    %50 = vector.shape_cast %49 : vector<1x1x80xf32> to vector<1x80xf32>
    %51 = vector.broadcast %50 : vector<1x80xf32> to vector<12x80xf32>
    %52 = arith.addf %48, %51 : vector<12x80xf32>
    %c0_34 = arith.constant 0 : index
    %c0_35 = arith.constant 0 : index
    %c0_36 = arith.constant 0 : index
    %53 = vector.load %arg11[%c0_34, %c0_35, %c0_36] : memref<2x80x80xbf16, #tpu.memory_space<vmem>>, vector<1x80x80xbf16>
    %54 = vector.shape_cast %53 : vector<1x80x80xbf16> to vector<80x80xbf16>
    %cst_37 = arith.constant dense<0.000000e+00> : vector<12x80xf32>
    %55 = tpu.matmul %38, %54, %cst_37 {dimension_numbers = #tpu.dot_dimension_numbers<[1], [0], [0], [1], [0, 0, 1, 1], [], []>} : vector<12x80xbf16>, vector<80x80xbf16>, vector<12x80xf32> -> vector<12x80xf32>
    %c0_38 = arith.constant 0 : index
    %c0_39 = arith.constant 0 : index
    %c0_40 = arith.constant 0 : index
    %56 = vector.load %arg12[%c0_38, %c0_39, %c0_40] : memref<2x1x80xf32, #tpu.memory_space<vmem>>, vector<1x1x80xf32>
    %57 = vector.shape_cast %56 : vector<1x1x80xf32> to vector<1x80xf32>
    %58 = vector.broadcast %57 : vector<1x80xf32> to vector<12x80xf32>
    %59 = arith.addf %55, %58 : vector<12x80xf32>
    %60 = arith.truncf %45 : vector<12x80xf32> to vector<12x80xbf16>
    %61 = arith.truncf %52 : vector<12x80xf32> to vector<12x80xbf16>
    %62 = arith.truncf %59 : vector<12x80xf32> to vector<12x80xbf16>
    %63 = vector.extract_strided_slice %60 {offsets = [0, 0], sizes = [12, 4], strides = [1, 1]} : vector<12x80xbf16> to vector<12x4xbf16>
    %64 = vector.extract_strided_slice %61 {offsets = [0, 0], sizes = [12, 4], strides = [1, 1]} : vector<12x80xbf16> to vector<12x4xbf16>
    %cst_41 = arith.constant dense<0.000000e+00> : vector<12x12xf32>
    %65 = tpu.matmul %63, %64, %cst_41 {dimension_numbers = #tpu.dot_dimension_numbers<[1], [1], [0], [0], [0, 0, 1, 0], [], []>} : vector<12x4xbf16>, vector<12x4xbf16>, vector<12x12xf32> -> vector<12x12xf32>
    %66 = arith.addf %65, %11 : vector<12x12xf32>
    %cst_42 = arith.constant dense<0xFF800000> : vector<12xf32>
    %67 = vector.multi_reduction <maximumf>, %66, %cst_42 [1] : vector<12x12xf32> to vector<12xf32>
    %68 = vector.shape_cast %67 : vector<12xf32> to vector<12x1xf32>
    %69 = vector.broadcast %68 : vector<12x1xf32> to vector<12x12xf32>
    %70 = arith.subf %66, %69 : vector<12x12xf32>
    %71 = math.exp %70 : vector<12x12xf32>
    %cst_43 = arith.constant dense<0.000000e+00> : vector<12xf32>
    %72 = vector.multi_reduction <add>, %71, %cst_43 [1] : vector<12x12xf32> to vector<12xf32>
    %73 = vector.shape_cast %72 : vector<12xf32> to vector<12x1xf32>
    %74 = tpu.reciprocal %73 {approx = true} : vector<12x1xf32> -> vector<12x1xf32>
    %75 = vector.broadcast %74 : vector<12x1xf32> to vector<12x12xf32>
    %76 = arith.mulf %71, %75 : vector<12x12xf32>
    %77 = arith.truncf %76 : vector<12x12xf32> to vector<12x12xbf16>
    %78 = vector.extract_strided_slice %62 {offsets = [0, 0], sizes = [12, 4], strides = [1, 1]} : vector<12x80xbf16> to vector<12x4xbf16>
    %cst_44 = arith.constant dense<0.000000e+00> : vector<12x4xf32>
    %79 = tpu.matmul %77, %78, %cst_44 {dimension_numbers = #tpu.dot_dimension_numbers<[1], [0], [0], [1], [0, 0, 1, 1], [], []>} : vector<12x12xbf16>, vector<12x4xbf16>, vector<12x4xf32> -> vector<12x4xf32>
    %c0_45 = arith.constant 0 : index
    %c0_46 = arith.constant 0 : index
    %80 = vector.load %arg25[%c0_45, %c0_46] : memref<12x80xf32, #tpu.memory_space<vmem>>, vector<12x4xf32>
    tpu.vector_store %arg25[%c0_45, %c0_46], %79 {strides = array<i32>} : memref<12x80xf32, #tpu.memory_space<vmem>>, vector<12x4xf32>,
    %81 = vector.extract_strided_slice %60 {offsets = [0, 4], sizes = [12, 4], strides = [1, 1]} : vector<12x80xbf16> to vector<12x4xbf16>
    %82 = vector.extract_strided_slice %61 {offsets = [0, 4], sizes = [12, 4], strides = [1, 1]} : vector<12x80xbf16> to vector<12x4xbf16>
    %cst_47 = arith.constant dense<0.000000e+00> : vector<12x12xf32>
    %83 = tpu.matmul %81, %82, %cst_47 {dimension_numbers = #tpu.dot_dimension_numbers<[1], [1], [0], [0], [0, 0, 1, 0], [], []>} : vector<12x4xbf16>, vector<12x4xbf16>, vector<12x12xf32> -> vector<12x12xf32>
    %84 = arith.addf %83, %11 : vector<12x12xf32>
    %cst_48 = arith.constant dense<0xFF800000> : vector<12xf32>
    %85 = vector.multi_reduction <maximumf>, %84, %cst_48 [1] : vector<12x12xf32> to vector<12xf32>
    %86 = vector.shape_cast %85 : vector<12xf32> to vector<12x1xf32>
    %87 = vector.broadcast %86 : vector<12x1xf32> to vector<12x12xf32>
    %88 = arith.subf %84, %87 : vector<12x12xf32>
    %89 = math.exp %88 : vector<12x12xf32>
    %cst_49 = arith.constant dense<0.000000e+00> : vector<12xf32>
    %90 = vector.multi_reduction <add>, %89, %cst_49 [1] : vector<12x12xf32> to vector<12xf32>
    %91 = vector.shape_cast %90 : vector<12xf32> to vector<12x1xf32>
    %92 = tpu.reciprocal %91 {approx = true} : vector<12x1xf32> -> vector<12x1xf32>
    %93 = vector.broadcast %92 : vector<12x1xf32> to vector<12x12xf32>
    %94 = arith.mulf %89, %93 : vector<12x12xf32>
    %95 = arith.truncf %94 : vector<12x12xf32> to vector<12x12xbf16>
    %96 = vector.extract_strided_slice %62 {offsets = [0, 4], sizes = [12, 4], strides = [1, 1]} : vector<12x80xbf16> to vector<12x4xbf16>
    %cst_50 = arith.constant dense<0.000000e+00> : vector<12x4xf32>
    %97 = tpu.matmul %95, %96, %cst_50 {dimension_numbers = #tpu.dot_dimension_numbers<[1], [0], [0], [1], [0, 0, 1, 1], [], []>} : vector<12x12xbf16>, vector<12x4xbf16>, vector<12x4xf32> -> vector<12x4xf32>
    %c0_51 = arith.constant 0 : index
    %c4 = arith.constant 4 : index
    %98 = vector.load %arg25[%c0_51, %c4] : memref<12x80xf32, #tpu.memory_space<vmem>>, vector<12x4xf32>
    tpu.vector_store %arg25[%c0_51, %c4], %97 {strides = array<i32>} : memref<12x80xf32, #tpu.memory_space<vmem>>, vector<12x4xf32>,
    %99 = vector.extract_strided_slice %60 {offsets = [0, 8], sizes = [12, 4], strides = [1, 1]} : vector<12x80xbf16> to vector<12x4xbf16>
    %100 = vector.extract_strided_slice %61 {offsets = [0, 8], sizes = [12, 4], strides = [1, 1]} : vector<12x80xbf16> to vector<12x4xbf16>
    %cst_52 = arith.constant dense<0.000000e+00> : vector<12x12xf32>
    %101 = tpu.matmul %99, %100, %cst_52 {dimension_numbers = #tpu.dot_dimension_numbers<[1], [1], [0], [0], [0, 0, 1, 0], [], []>} : vector<12x4xbf16>, vector<12x4xbf16>, vector<12x12xf32> -> vector<12x12xf32>
    %102 = arith.addf %101, %11 : vector<12x12xf32>
    %cst_53 = arith.constant dense<0xFF800000> : vector<12xf32>
    %103 = vector.multi_reduction <maximumf>, %102, %cst_53 [1] : vector<12x12xf32> to vector<12xf32>
    %104 = vector.shape_cast %103 : vector<12xf32> to vector<12x1xf32>
    %105 = vector.broadcast %104 : vector<12x1xf32> to vector<12x12xf32>
    %106 = arith.subf %102, %105 : vector<12x12xf32>
    %107 = math.exp %106 : vector<12x12xf32>
    %cst_54 = arith.constant dense<0.000000e+00> : vector<12xf32>
    %108 = vector.multi_reduction <add>, %107, %cst_54 [1] : vector<12x12xf32> to vector<12xf32>
    %109 = vector.shape_cast %108 : vector<12xf32> to vector<12x1xf32>
    %110 = tpu.reciprocal %109 {approx = true} : vector<12x1xf32> -> vector<12x1xf32>
    %111 = vector.broadcast %110 : vector<12x1xf32> to vector<12x12xf32>
    %112 = arith.mulf %107, %111 : vector<12x12xf32>
    %113 = arith.truncf %112 : vector<12x12xf32> to vector<12x12xbf16>
    %114 = vector.extract_strided_slice %62 {offsets = [0, 8], sizes = [12, 4], strides = [1, 1]} : vector<12x80xbf16> to vector<12x4xbf16>
    %cst_55 = arith.constant dense<0.000000e+00> : vector<12x4xf32>
    %115 = tpu.matmul %113, %114, %cst_55 {dimension_numbers = #tpu.dot_dimension_numbers<[1], [0], [0], [1], [0, 0, 1, 1], [], []>} : vector<12x12xbf16>, vector<12x4xbf16>, vector<12x4xf32> -> vector<12x4xf32>
    %c0_56 = arith.constant 0 : index
    %c8 = arith.constant 8 : index
    %116 = vector.load %arg25[%c0_56, %c8] : memref<12x80xf32, #tpu.memory_space<vmem>>, vector<12x4xf32>
    tpu.vector_store %arg25[%c0_56, %c8], %115 {strides = array<i32>} : memref<12x80xf32, #tpu.memory_space<vmem>>, vector<12x4xf32>,
    %117 = vector.extract_strided_slice %60 {offsets = [0, 12], sizes = [12, 4], strides = [1, 1]} : vector<12x80xbf16> to vector<12x4xbf16>
    %118 = vector.extract_strided_slice %61 {offsets = [0, 12], sizes = [12, 4], strides = [1, 1]} : vector<12x80xbf16> to vector<12x4xbf16>
    %cst_57 = arith.constant dense<0.000000e+00> : vector<12x12xf32>
    %119 = tpu.matmul %117, %118, %cst_57 {dimension_numbers = #tpu.dot_dimension_numbers<[1], [1], [0], [0], [0, 0, 1, 0], [], []>} : vector<12x4xbf16>, vector<12x4xbf16>, vector<12x12xf32> -> vector<12x12xf32>
    %120 = arith.addf %119, %11 : vector<12x12xf32>
    %cst_58 = arith.constant dense<0xFF800000> : vector<12xf32>
    %121 = vector.multi_reduction <maximumf>, %120, %cst_58 [1] : vector<12x12xf32> to vector<12xf32>
    %122 = vector.shape_cast %121 : vector<12xf32> to vector<12x1xf32>
    %123 = vector.broadcast %122 : vector<12x1xf32> to vector<12x12xf32>
    %124 = arith.subf %120, %123 : vector<12x12xf32>
    %125 = math.exp %124 : vector<12x12xf32>
    %cst_59 = arith.constant dense<0.000000e+00> : vector<12xf32>
    %126 = vector.multi_reduction <add>, %125, %cst_59 [1] : vector<12x12xf32> to vector<12xf32>
    %127 = vector.shape_cast %126 : vector<12xf32> to vector<12x1xf32>
    %128 = tpu.reciprocal %127 {approx = true} : vector<12x1xf32> -> vector<12x1xf32>
    %129 = vector.broadcast %128 : vector<12x1xf32> to vector<12x12xf32>
    %130 = arith.mulf %125, %129 : vector<12x12xf32>
    %131 = arith.truncf %130 : vector<12x12xf32> to vector<12x12xbf16>
    %132 = vector.extract_strided_slice %62 {offsets = [0, 12], sizes = [12, 4], strides = [1, 1]} : vector<12x80xbf16> to vector<12x4xbf16>
    %cst_60 = arith.constant dense<0.000000e+00> : vector<12x4xf32>
    %133 = tpu.matmul %131, %132, %cst_60 {dimension_numbers = #tpu.dot_dimension_numbers<[1], [0], [0], [1], [0, 0, 1, 1], [], []>} : vector<12x12xbf16>, vector<12x4xbf16>, vector<12x4xf32> -> vector<12x4xf32>
    %c0_61 = arith.constant 0 : index
    %c12 = arith.constant 12 : index
    %134 = vector.load %arg25[%c0_61, %c12] : memref<12x80xf32, #tpu.memory_space<vmem>>, vector<12x4xf32>
    tpu.vector_store %arg25[%c0_61, %c12], %133 {strides = array<i32>} : memref<12x80xf32, #tpu.memory_space<vmem>>, vector<12x4xf32>,
    %135 = vector.extract_strided_slice %60 {offsets = [0, 16], sizes = [12, 4], strides = [1, 1]} : vector<12x80xbf16> to vector<12x4xbf16>
    %136 = vector.extract_strided_slice %61 {offsets = [0, 16], sizes = [12, 4], strides = [1, 1]} : vector<12x80xbf16> to vector<12x4xbf16>
    %cst_62 = arith.constant dense<0.000000e+00> : vector<12x12xf32>
    %137 = tpu.matmul %135, %136, %cst_62 {dimension_numbers = #tpu.dot_dimension_numbers<[1], [1], [0], [0], [0, 0, 1, 0], [], []>} : vector<12x4xbf16>, vector<12x4xbf16>, vector<12x12xf32> -> vector<12x12xf32>
    %138 = arith.addf %137, %11 : vector<12x12xf32>
    %cst_63 = arith.constant dense<0xFF800000> : vector<12xf32>
    %139 = vector.multi_reduction <maximumf>, %138, %cst_63 [1] : vector<12x12xf32> to vector<12xf32>
    %140 = vector.shape_cast %139 : vector<12xf32> to vector<12x1xf32>
    %141 = vector.broadcast %140 : vector<12x1xf32> to vector<12x12xf32>
    %142 = arith.subf %138, %141 : vector<12x12xf32>
    %143 = math.exp %142 : vector<12x12xf32>
    %cst_64 = arith.constant dense<0.000000e+00> : vector<12xf32>
    %144 = vector.multi_reduction <add>, %143, %cst_64 [1] : vector<12x12xf32> to vector<12xf32>
    %145 = vector.shape_cast %144 : vector<12xf32> to vector<12x1xf32>
    %146 = tpu.reciprocal %145 {approx = true} : vector<12x1xf32> -> vector<12x1xf32>
    %147 = vector.broadcast %146 : vector<12x1xf32> to vector<12x12xf32>
    %148 = arith.mulf %143, %147 : vector<12x12xf32>
    %149 = arith.truncf %148 : vector<12x12xf32> to vector<12x12xbf16>
    %150 = vector.extract_strided_slice %62 {offsets = [0, 16], sizes = [12, 4], strides = [1, 1]} : vector<12x80xbf16> to vector<12x4xbf16>
    %cst_65 = arith.constant dense<0.000000e+00> : vector<12x4xf32>
    %151 = tpu.matmul %149, %150, %cst_65 {dimension_numbers = #tpu.dot_dimension_numbers<[1], [0], [0], [1], [0, 0, 1, 1], [], []>} : vector<12x12xbf16>, vector<12x4xbf16>, vector<12x4xf32> -> vector<12x4xf32>
    %c0_66 = arith.constant 0 : index
    %c16 = arith.constant 16 : index
    %152 = vector.load %arg25[%c0_66, %c16] : memref<12x80xf32, #tpu.memory_space<vmem>>, vector<12x4xf32>
    tpu.vector_store %arg25[%c0_66, %c16], %151 {strides = array<i32>} : memref<12x80xf32, #tpu.memory_space<vmem>>, vector<12x4xf32>,
    %153 = vector.extract_strided_slice %60 {offsets = [0, 20], sizes = [12, 4], strides = [1, 1]} : vector<12x80xbf16> to vector<12x4xbf16>
    %154 = vector.extract_strided_slice %61 {offsets = [0, 20], sizes = [12, 4], strides = [1, 1]} : vector<12x80xbf16> to vector<12x4xbf16>
    %cst_67 = arith.constant dense<0.000000e+00> : vector<12x12xf32>
    %155 = tpu.matmul %153, %154, %cst_67 {dimension_numbers = #tpu.dot_dimension_numbers<[1], [1], [0], [0], [0, 0, 1, 0], [], []>} : vector<12x4xbf16>, vector<12x4xbf16>, vector<12x12xf32> -> vector<12x12xf32>
    %156 = arith.addf %155, %11 : vector<12x12xf32>
    %cst_68 = arith.constant dense<0xFF800000> : vector<12xf32>
    %157 = vector.multi_reduction <maximumf>, %156, %cst_68 [1] : vector<12x12xf32> to vector<12xf32>
    %158 = vector.shape_cast %157 : vector<12xf32> to vector<12x1xf32>
    %159 = vector.broadcast %158 : vector<12x1xf32> to vector<12x12xf32>
    %160 = arith.subf %156, %159 : vector<12x12xf32>
    %161 = math.exp %160 : vector<12x12xf32>
    %cst_69 = arith.constant dense<0.000000e+00> : vector<12xf32>
    %162 = vector.multi_reduction <add>, %161, %cst_69 [1] : vector<12x12xf32> to vector<12xf32>
    %163 = vector.shape_cast %162 : vector<12xf32> to vector<12x1xf32>
    %164 = tpu.reciprocal %163 {approx = true} : vector<12x1xf32> -> vector<12x1xf32>
    %165 = vector.broadcast %164 : vector<12x1xf32> to vector<12x12xf32>
    %166 = arith.mulf %161, %165 : vector<12x12xf32>
    %167 = arith.truncf %166 : vector<12x12xf32> to vector<12x12xbf16>
    %168 = vector.extract_strided_slice %62 {offsets = [0, 20], sizes = [12, 4], strides = [1, 1]} : vector<12x80xbf16> to vector<12x4xbf16>
    %cst_70 = arith.constant dense<0.000000e+00> : vector<12x4xf32>
    %169 = tpu.matmul %167, %168, %cst_70 {dimension_numbers = #tpu.dot_dimension_numbers<[1], [0], [0], [1], [0, 0, 1, 1], [], []>} : vector<12x12xbf16>, vector<12x4xbf16>, vector<12x4xf32> -> vector<12x4xf32>
    %c0_71 = arith.constant 0 : index
    %c20 = arith.constant 20 : index
    %170 = vector.load %arg25[%c0_71, %c20] : memref<12x80xf32, #tpu.memory_space<vmem>>, vector<12x4xf32>
    tpu.vector_store %arg25[%c0_71, %c20], %169 {strides = array<i32>} : memref<12x80xf32, #tpu.memory_space<vmem>>, vector<12x4xf32>,
    %171 = vector.extract_strided_slice %60 {offsets = [0, 24], sizes = [12, 4], strides = [1, 1]} : vector<12x80xbf16> to vector<12x4xbf16>
    %172 = vector.extract_strided_slice %61 {offsets = [0, 24], sizes = [12, 4], strides = [1, 1]} : vector<12x80xbf16> to vector<12x4xbf16>
    %cst_72 = arith.constant dense<0.000000e+00> : vector<12x12xf32>
    %173 = tpu.matmul %171, %172, %cst_72 {dimension_numbers = #tpu.dot_dimension_numbers<[1], [1], [0], [0], [0, 0, 1, 0], [], []>} : vector<12x4xbf16>, vector<12x4xbf16>, vector<12x12xf32> -> vector<12x12xf32>
    %174 = arith.addf %173, %11 : vector<12x12xf32>
    %cst_73 = arith.constant dense<0xFF800000> : vector<12xf32>
    %175 = vector.multi_reduction <maximumf>, %174, %cst_73 [1] : vector<12x12xf32> to vector<12xf32>
    %176 = vector.shape_cast %175 : vector<12xf32> to vector<12x1xf32>
    %177 = vector.broadcast %176 : vector<12x1xf32> to vector<12x12xf32>
    %178 = arith.subf %174, %177 : vector<12x12xf32>
    %179 = math.exp %178 : vector<12x12xf32>
    %cst_74 = arith.constant dense<0.000000e+00> : vector<12xf32>
    %180 = vector.multi_reduction <add>, %179, %cst_74 [1] : vector<12x12xf32> to vector<12xf32>
    %181 = vector.shape_cast %180 : vector<12xf32> to vector<12x1xf32>
    %182 = tpu.reciprocal %181 {approx = true} : vector<12x1xf32> -> vector<12x1xf32>
    %183 = vector.broadcast %182 : vector<12x1xf32> to vector<12x12xf32>
    %184 = arith.mulf %179, %183 : vector<12x12xf32>
    %185 = arith.truncf %184 : vector<12x12xf32> to vector<12x12xbf16>
    %186 = vector.extract_strided_slice %62 {offsets = [0, 24], sizes = [12, 4], strides = [1, 1]} : vector<12x80xbf16> to vector<12x4xbf16>
    %cst_75 = arith.constant dense<0.000000e+00> : vector<12x4xf32>
    %187 = tpu.matmul %185, %186, %cst_75 {dimension_numbers = #tpu.dot_dimension_numbers<[1], [0], [0], [1], [0, 0, 1, 1], [], []>} : vector<12x12xbf16>, vector<12x4xbf16>, vector<12x4xf32> -> vector<12x4xf32>
    %c0_76 = arith.constant 0 : index
    %c24 = arith.constant 24 : index
    %188 = vector.load %arg25[%c0_76, %c24] : memref<12x80xf32, #tpu.memory_space<vmem>>, vector<12x4xf32>
    tpu.vector_store %arg25[%c0_76, %c24], %187 {strides = array<i32>} : memref<12x80xf32, #tpu.memory_space<vmem>>, vector<12x4xf32>,
    %189 = vector.extract_strided_slice %60 {offsets = [0, 28], sizes = [12, 4], strides = [1, 1]} : vector<12x80xbf16> to vector<12x4xbf16>
    %190 = vector.extract_strided_slice %61 {offsets = [0, 28], sizes = [12, 4], strides = [1, 1]} : vector<12x80xbf16> to vector<12x4xbf16>
    %cst_77 = arith.constant dense<0.000000e+00> : vector<12x12xf32>
    %191 = tpu.matmul %189, %190, %cst_77 {dimension_numbers = #tpu.dot_dimension_numbers<[1], [1], [0], [0], [0, 0, 1, 0], [], []>} : vector<12x4xbf16>, vector<12x4xbf16>, vector<12x12xf32> -> vector<12x12xf32>
    %192 = arith.addf %191, %11 : vector<12x12xf32>
    %cst_78 = arith.constant dense<0xFF800000> : vector<12xf32>
    %193 = vector.multi_reduction <maximumf>, %192, %cst_78 [1] : vector<12x12xf32> to vector<12xf32>
    %194 = vector.shape_cast %193 : vector<12xf32> to vector<12x1xf32>
    %195 = vector.broadcast %194 : vector<12x1xf32> to vector<12x12xf32>
    %196 = arith.subf %192, %195 : vector<12x12xf32>
    %197 = math.exp %196 : vector<12x12xf32>
    %cst_79 = arith.constant dense<0.000000e+00> : vector<12xf32>
    %198 = vector.multi_reduction <add>, %197, %cst_79 [1] : vector<12x12xf32> to vector<12xf32>
    %199 = vector.shape_cast %198 : vector<12xf32> to vector<12x1xf32>
    %200 = tpu.reciprocal %199 {approx = true} : vector<12x1xf32> -> vector<12x1xf32>
    %201 = vector.broadcast %200 : vector<12x1xf32> to vector<12x12xf32>
    %202 = arith.mulf %197, %201 : vector<12x12xf32>
    %203 = arith.truncf %202 : vector<12x12xf32> to vector<12x12xbf16>
    %204 = vector.extract_strided_slice %62 {offsets = [0, 28], sizes = [12, 4], strides = [1, 1]} : vector<12x80xbf16> to vector<12x4xbf16>
    %cst_80 = arith.constant dense<0.000000e+00> : vector<12x4xf32>
    %205 = tpu.matmul %203, %204, %cst_80 {dimension_numbers = #tpu.dot_dimension_numbers<[1], [0], [0], [1], [0, 0, 1, 1], [], []>} : vector<12x12xbf16>, vector<12x4xbf16>, vector<12x4xf32> -> vector<12x4xf32>
    %c0_81 = arith.constant 0 : index
    %c28 = arith.constant 28 : index
    %206 = vector.load %arg25[%c0_81, %c28] : memref<12x80xf32, #tpu.memory_space<vmem>>, vector<12x4xf32>
    tpu.vector_store %arg25[%c0_81, %c28], %205 {strides = array<i32>} : memref<12x80xf32, #tpu.memory_space<vmem>>, vector<12x4xf32>,
    %207 = vector.extract_strided_slice %60 {offsets = [0, 32], sizes = [12, 4], strides = [1, 1]} : vector<12x80xbf16> to vector<12x4xbf16>
    %208 = vector.extract_strided_slice %61 {offsets = [0, 32], sizes = [12, 4], strides = [1, 1]} : vector<12x80xbf16> to vector<12x4xbf16>
    %cst_82 = arith.constant dense<0.000000e+00> : vector<12x12xf32>
    %209 = tpu.matmul %207, %208, %cst_82 {dimension_numbers = #tpu.dot_dimension_numbers<[1], [1], [0], [0], [0, 0, 1, 0], [], []>} : vector<12x4xbf16>, vector<12x4xbf16>, vector<12x12xf32> -> vector<12x12xf32>
    %210 = arith.addf %209, %11 : vector<12x12xf32>
    %cst_83 = arith.constant dense<0xFF800000> : vector<12xf32>
    %211 = vector.multi_reduction <maximumf>, %210, %cst_83 [1] : vector<12x12xf32> to vector<12xf32>
    %212 = vector.shape_cast %211 : vector<12xf32> to vector<12x1xf32>
    %213 = vector.broadcast %212 : vector<12x1xf32> to vector<12x12xf32>
    %214 = arith.subf %210, %213 : vector<12x12xf32>
    %215 = math.exp %214 : vector<12x12xf32>
    %cst_84 = arith.constant dense<0.000000e+00> : vector<12xf32>
    %216 = vector.multi_reduction <add>, %215, %cst_84 [1] : vector<12x12xf32> to vector<12xf32>
    %217 = vector.shape_cast %216 : vector<12xf32> to vector<12x1xf32>
    %218 = tpu.reciprocal %217 {approx = true} : vector<12x1xf32> -> vector<12x1xf32>
    %219 = vector.broadcast %218 : vector<12x1xf32> to vector<12x12xf32>
    %220 = arith.mulf %215, %219 : vector<12x12xf32>
    %221 = arith.truncf %220 : vector<12x12xf32> to vector<12x12xbf16>
    %222 = vector.extract_strided_slice %62 {offsets = [0, 32], sizes = [12, 4], strides = [1, 1]} : vector<12x80xbf16> to vector<12x4xbf16>
    %cst_85 = arith.constant dense<0.000000e+00> : vector<12x4xf32>
    %223 = tpu.matmul %221, %222, %cst_85 {dimension_numbers = #tpu.dot_dimension_numbers<[1], [0], [0], [1], [0, 0, 1, 1], [], []>} : vector<12x12xbf16>, vector<12x4xbf16>, vector<12x4xf32> -> vector<12x4xf32>
    %c0_86 = arith.constant 0 : index
    %c32 = arith.constant 32 : index
    %224 = vector.load %arg25[%c0_86, %c32] : memref<12x80xf32, #tpu.memory_space<vmem>>, vector<12x4xf32>
    tpu.vector_store %arg25[%c0_86, %c32], %223 {strides = array<i32>} : memref<12x80xf32, #tpu.memory_space<vmem>>, vector<12x4xf32>,
    %225 = vector.extract_strided_slice %60 {offsets = [0, 36], sizes = [12, 4], strides = [1, 1]} : vector<12x80xbf16> to vector<12x4xbf16>
    %226 = vector.extract_strided_slice %61 {offsets = [0, 36], sizes = [12, 4], strides = [1, 1]} : vector<12x80xbf16> to vector<12x4xbf16>
    %cst_87 = arith.constant dense<0.000000e+00> : vector<12x12xf32>
    %227 = tpu.matmul %225, %226, %cst_87 {dimension_numbers = #tpu.dot_dimension_numbers<[1], [1], [0], [0], [0, 0, 1, 0], [], []>} : vector<12x4xbf16>, vector<12x4xbf16>, vector<12x12xf32> -> vector<12x12xf32>
    %228 = arith.addf %227, %11 : vector<12x12xf32>
    %cst_88 = arith.constant dense<0xFF800000> : vector<12xf32>
    %229 = vector.multi_reduction <maximumf>, %228, %cst_88 [1] : vector<12x12xf32> to vector<12xf32>
    %230 = vector.shape_cast %229 : vector<12xf32> to vector<12x1xf32>
    %231 = vector.broadcast %230 : vector<12x1xf32> to vector<12x12xf32>
    %232 = arith.subf %228, %231 : vector<12x12xf32>
    %233 = math.exp %232 : vector<12x12xf32>
    %cst_89 = arith.constant dense<0.000000e+00> : vector<12xf32>
    %234 = vector.multi_reduction <add>, %233, %cst_89 [1] : vector<12x12xf32> to vector<12xf32>
    %235 = vector.shape_cast %234 : vector<12xf32> to vector<12x1xf32>
    %236 = tpu.reciprocal %235 {approx = true} : vector<12x1xf32> -> vector<12x1xf32>
    %237 = vector.broadcast %236 : vector<12x1xf32> to vector<12x12xf32>
    %238 = arith.mulf %233, %237 : vector<12x12xf32>
    %239 = arith.truncf %238 : vector<12x12xf32> to vector<12x12xbf16>
    %240 = vector.extract_strided_slice %62 {offsets = [0, 36], sizes = [12, 4], strides = [1, 1]} : vector<12x80xbf16> to vector<12x4xbf16>
    %cst_90 = arith.constant dense<0.000000e+00> : vector<12x4xf32>
    %241 = tpu.matmul %239, %240, %cst_90 {dimension_numbers = #tpu.dot_dimension_numbers<[1], [0], [0], [1], [0, 0, 1, 1], [], []>} : vector<12x12xbf16>, vector<12x4xbf16>, vector<12x4xf32> -> vector<12x4xf32>
    %c0_91 = arith.constant 0 : index
    %c36 = arith.constant 36 : index
    %242 = vector.load %arg25[%c0_91, %c36] : memref<12x80xf32, #tpu.memory_space<vmem>>, vector<12x4xf32>
    tpu.vector_store %arg25[%c0_91, %c36], %241 {strides = array<i32>} : memref<12x80xf32, #tpu.memory_space<vmem>>, vector<12x4xf32>,
    %243 = vector.extract_strided_slice %60 {offsets = [0, 40], sizes = [12, 4], strides = [1, 1]} : vector<12x80xbf16> to vector<12x4xbf16>
    %244 = vector.extract_strided_slice %61 {offsets = [0, 40], sizes = [12, 4], strides = [1, 1]} : vector<12x80xbf16> to vector<12x4xbf16>
    %cst_92 = arith.constant dense<0.000000e+00> : vector<12x12xf32>
    %245 = tpu.matmul %243, %244, %cst_92 {dimension_numbers = #tpu.dot_dimension_numbers<[1], [1], [0], [0], [0, 0, 1, 0], [], []>} : vector<12x4xbf16>, vector<12x4xbf16>, vector<12x12xf32> -> vector<12x12xf32>
    %246 = arith.addf %245, %11 : vector<12x12xf32>
    %cst_93 = arith.constant dense<0xFF800000> : vector<12xf32>
    %247 = vector.multi_reduction <maximumf>, %246, %cst_93 [1] : vector<12x12xf32> to vector<12xf32>
    %248 = vector.shape_cast %247 : vector<12xf32> to vector<12x1xf32>
    %249 = vector.broadcast %248 : vector<12x1xf32> to vector<12x12xf32>
    %250 = arith.subf %246, %249 : vector<12x12xf32>
    %251 = math.exp %250 : vector<12x12xf32>
    %cst_94 = arith.constant dense<0.000000e+00> : vector<12xf32>
    %252 = vector.multi_reduction <add>, %251, %cst_94 [1] : vector<12x12xf32> to vector<12xf32>
    %253 = vector.shape_cast %252 : vector<12xf32> to vector<12x1xf32>
    %254 = tpu.reciprocal %253 {approx = true} : vector<12x1xf32> -> vector<12x1xf32>
    %255 = vector.broadcast %254 : vector<12x1xf32> to vector<12x12xf32>
    %256 = arith.mulf %251, %255 : vector<12x12xf32>
    %257 = arith.truncf %256 : vector<12x12xf32> to vector<12x12xbf16>
    %258 = vector.extract_strided_slice %62 {offsets = [0, 40], sizes = [12, 4], strides = [1, 1]} : vector<12x80xbf16> to vector<12x4xbf16>
    %cst_95 = arith.constant dense<0.000000e+00> : vector<12x4xf32>
    %259 = tpu.matmul %257, %258, %cst_95 {dimension_numbers = #tpu.dot_dimension_numbers<[1], [0], [0], [1], [0, 0, 1, 1], [], []>} : vector<12x12xbf16>, vector<12x4xbf16>, vector<12x4xf32> -> vector<12x4xf32>
    %c0_96 = arith.constant 0 : index
    %c40 = arith.constant 40 : index
    %260 = vector.load %arg25[%c0_96, %c40] : memref<12x80xf32, #tpu.memory_space<vmem>>, vector<12x4xf32>
    tpu.vector_store %arg25[%c0_96, %c40], %259 {strides = array<i32>} : memref<12x80xf32, #tpu.memory_space<vmem>>, vector<12x4xf32>,
    %261 = vector.extract_strided_slice %60 {offsets = [0, 44], sizes = [12, 4], strides = [1, 1]} : vector<12x80xbf16> to vector<12x4xbf16>
    %262 = vector.extract_strided_slice %61 {offsets = [0, 44], sizes = [12, 4], strides = [1, 1]} : vector<12x80xbf16> to vector<12x4xbf16>
    %cst_97 = arith.constant dense<0.000000e+00> : vector<12x12xf32>
    %263 = tpu.matmul %261, %262, %cst_97 {dimension_numbers = #tpu.dot_dimension_numbers<[1], [1], [0], [0], [0, 0, 1, 0], [], []>} : vector<12x4xbf16>, vector<12x4xbf16>, vector<12x12xf32> -> vector<12x12xf32>
    %264 = arith.addf %263, %11 : vector<12x12xf32>
    %cst_98 = arith.constant dense<0xFF800000> : vector<12xf32>
    %265 = vector.multi_reduction <maximumf>, %264, %cst_98 [1] : vector<12x12xf32> to vector<12xf32>
    %266 = vector.shape_cast %265 : vector<12xf32> to vector<12x1xf32>
    %267 = vector.broadcast %266 : vector<12x1xf32> to vector<12x12xf32>
    %268 = arith.subf %264, %267 : vector<12x12xf32>
    %269 = math.exp %268 : vector<12x12xf32>
    %cst_99 = arith.constant dense<0.000000e+00> : vector<12xf32>
    %270 = vector.multi_reduction <add>, %269, %cst_99 [1] : vector<12x12xf32> to vector<12xf32>
    %271 = vector.shape_cast %270 : vector<12xf32> to vector<12x1xf32>
    %272 = tpu.reciprocal %271 {approx = true} : vector<12x1xf32> -> vector<12x1xf32>
    %273 = vector.broadcast %272 : vector<12x1xf32> to vector<12x12xf32>
    %274 = arith.mulf %269, %273 : vector<12x12xf32>
    %275 = arith.truncf %274 : vector<12x12xf32> to vector<12x12xbf16>
    %276 = vector.extract_strided_slice %62 {offsets = [0, 44], sizes = [12, 4], strides = [1, 1]} : vector<12x80xbf16> to vector<12x4xbf16>
    %cst_100 = arith.constant dense<0.000000e+00> : vector<12x4xf32>
    %277 = tpu.matmul %275, %276, %cst_100 {dimension_numbers = #tpu.dot_dimension_numbers<[1], [0], [0], [1], [0, 0, 1, 1], [], []>} : vector<12x12xbf16>, vector<12x4xbf16>, vector<12x4xf32> -> vector<12x4xf32>
    %c0_101 = arith.constant 0 : index
    %c44 = arith.constant 44 : index
    %278 = vector.load %arg25[%c0_101, %c44] : memref<12x80xf32, #tpu.memory_space<vmem>>, vector<12x4xf32>
    tpu.vector_store %arg25[%c0_101, %c44], %277 {strides = array<i32>} : memref<12x80xf32, #tpu.memory_space<vmem>>, vector<12x4xf32>,
    %279 = vector.extract_strided_slice %60 {offsets = [0, 48], sizes = [12, 4], strides = [1, 1]} : vector<12x80xbf16> to vector<12x4xbf16>
    %280 = vector.extract_strided_slice %61 {offsets = [0, 48], sizes = [12, 4], strides = [1, 1]} : vector<12x80xbf16> to vector<12x4xbf16>
    %cst_102 = arith.constant dense<0.000000e+00> : vector<12x12xf32>
    %281 = tpu.matmul %279, %280, %cst_102 {dimension_numbers = #tpu.dot_dimension_numbers<[1], [1], [0], [0], [0, 0, 1, 0], [], []>} : vector<12x4xbf16>, vector<12x4xbf16>, vector<12x12xf32> -> vector<12x12xf32>
    %282 = arith.addf %281, %11 : vector<12x12xf32>
    %cst_103 = arith.constant dense<0xFF800000> : vector<12xf32>
    %283 = vector.multi_reduction <maximumf>, %282, %cst_103 [1] : vector<12x12xf32> to vector<12xf32>
    %284 = vector.shape_cast %283 : vector<12xf32> to vector<12x1xf32>
    %285 = vector.broadcast %284 : vector<12x1xf32> to vector<12x12xf32>
    %286 = arith.subf %282, %285 : vector<12x12xf32>
    %287 = math.exp %286 : vector<12x12xf32>
    %cst_104 = arith.constant dense<0.000000e+00> : vector<12xf32>
    %288 = vector.multi_reduction <add>, %287, %cst_104 [1] : vector<12x12xf32> to vector<12xf32>
    %289 = vector.shape_cast %288 : vector<12xf32> to vector<12x1xf32>
    %290 = tpu.reciprocal %289 {approx = true} : vector<12x1xf32> -> vector<12x1xf32>
    %291 = vector.broadcast %290 : vector<12x1xf32> to vector<12x12xf32>
    %292 = arith.mulf %287, %291 : vector<12x12xf32>
    %293 = arith.truncf %292 : vector<12x12xf32> to vector<12x12xbf16>
    %294 = vector.extract_strided_slice %62 {offsets = [0, 48], sizes = [12, 4], strides = [1, 1]} : vector<12x80xbf16> to vector<12x4xbf16>
    %cst_105 = arith.constant dense<0.000000e+00> : vector<12x4xf32>
    %295 = tpu.matmul %293, %294, %cst_105 {dimension_numbers = #tpu.dot_dimension_numbers<[1], [0], [0], [1], [0, 0, 1, 1], [], []>} : vector<12x12xbf16>, vector<12x4xbf16>, vector<12x4xf32> -> vector<12x4xf32>
    %c0_106 = arith.constant 0 : index
    %c48 = arith.constant 48 : index
    %296 = vector.load %arg25[%c0_106, %c48] : memref<12x80xf32, #tpu.memory_space<vmem>>, vector<12x4xf32>
    tpu.vector_store %arg25[%c0_106, %c48], %295 {strides = array<i32>} : memref<12x80xf32, #tpu.memory_space<vmem>>, vector<12x4xf32>,
    %297 = vector.extract_strided_slice %60 {offsets = [0, 52], sizes = [12, 4], strides = [1, 1]} : vector<12x80xbf16> to vector<12x4xbf16>
    %298 = vector.extract_strided_slice %61 {offsets = [0, 52], sizes = [12, 4], strides = [1, 1]} : vector<12x80xbf16> to vector<12x4xbf16>
    %cst_107 = arith.constant dense<0.000000e+00> : vector<12x12xf32>
    %299 = tpu.matmul %297, %298, %cst_107 {dimension_numbers = #tpu.dot_dimension_numbers<[1], [1], [0], [0], [0, 0, 1, 0], [], []>} : vector<12x4xbf16>, vector<12x4xbf16>, vector<12x12xf32> -> vector<12x12xf32>
    %300 = arith.addf %299, %11 : vector<12x12xf32>
    %cst_108 = arith.constant dense<0xFF800000> : vector<12xf32>
    %301 = vector.multi_reduction <maximumf>, %300, %cst_108 [1] : vector<12x12xf32> to vector<12xf32>
    %302 = vector.shape_cast %301 : vector<12xf32> to vector<12x1xf32>
    %303 = vector.broadcast %302 : vector<12x1xf32> to vector<12x12xf32>
    %304 = arith.subf %300, %303 : vector<12x12xf32>
    %305 = math.exp %304 : vector<12x12xf32>
    %cst_109 = arith.constant dense<0.000000e+00> : vector<12xf32>
    %306 = vector.multi_reduction <add>, %305, %cst_109 [1] : vector<12x12xf32> to vector<12xf32>
    %307 = vector.shape_cast %306 : vector<12xf32> to vector<12x1xf32>
    %308 = tpu.reciprocal %307 {approx = true} : vector<12x1xf32> -> vector<12x1xf32>
    %309 = vector.broadcast %308 : vector<12x1xf32> to vector<12x12xf32>
    %310 = arith.mulf %305, %309 : vector<12x12xf32>
    %311 = arith.truncf %310 : vector<12x12xf32> to vector<12x12xbf16>
    %312 = vector.extract_strided_slice %62 {offsets = [0, 52], sizes = [12, 4], strides = [1, 1]} : vector<12x80xbf16> to vector<12x4xbf16>
    %cst_110 = arith.constant dense<0.000000e+00> : vector<12x4xf32>
    %313 = tpu.matmul %311, %312, %cst_110 {dimension_numbers = #tpu.dot_dimension_numbers<[1], [0], [0], [1], [0, 0, 1, 1], [], []>} : vector<12x12xbf16>, vector<12x4xbf16>, vector<12x4xf32> -> vector<12x4xf32>
    %c0_111 = arith.constant 0 : index
    %c52 = arith.constant 52 : index
    %314 = vector.load %arg25[%c0_111, %c52] : memref<12x80xf32, #tpu.memory_space<vmem>>, vector<12x4xf32>
    tpu.vector_store %arg25[%c0_111, %c52], %313 {strides = array<i32>} : memref<12x80xf32, #tpu.memory_space<vmem>>, vector<12x4xf32>,
    %315 = vector.extract_strided_slice %60 {offsets = [0, 56], sizes = [12, 4], strides = [1, 1]} : vector<12x80xbf16> to vector<12x4xbf16>
    %316 = vector.extract_strided_slice %61 {offsets = [0, 56], sizes = [12, 4], strides = [1, 1]} : vector<12x80xbf16> to vector<12x4xbf16>
    %cst_112 = arith.constant dense<0.000000e+00> : vector<12x12xf32>
    %317 = tpu.matmul %315, %316, %cst_112 {dimension_numbers = #tpu.dot_dimension_numbers<[1], [1], [0], [0], [0, 0, 1, 0], [], []>} : vector<12x4xbf16>, vector<12x4xbf16>, vector<12x12xf32> -> vector<12x12xf32>
    %318 = arith.addf %317, %11 : vector<12x12xf32>
    %cst_113 = arith.constant dense<0xFF800000> : vector<12xf32>
    %319 = vector.multi_reduction <maximumf>, %318, %cst_113 [1] : vector<12x12xf32> to vector<12xf32>
    %320 = vector.shape_cast %319 : vector<12xf32> to vector<12x1xf32>
    %321 = vector.broadcast %320 : vector<12x1xf32> to vector<12x12xf32>
    %322 = arith.subf %318, %321 : vector<12x12xf32>
    %323 = math.exp %322 : vector<12x12xf32>
    %cst_114 = arith.constant dense<0.000000e+00> : vector<12xf32>
    %324 = vector.multi_reduction <add>, %323, %cst_114 [1] : vector<12x12xf32> to vector<12xf32>
    %325 = vector.shape_cast %324 : vector<12xf32> to vector<12x1xf32>
    %326 = tpu.reciprocal %325 {approx = true} : vector<12x1xf32> -> vector<12x1xf32>
    %327 = vector.broadcast %326 : vector<12x1xf32> to vector<12x12xf32>
    %328 = arith.mulf %323, %327 : vector<12x12xf32>
    %329 = arith.truncf %328 : vector<12x12xf32> to vector<12x12xbf16>
    %330 = vector.extract_strided_slice %62 {offsets = [0, 56], sizes = [12, 4], strides = [1, 1]} : vector<12x80xbf16> to vector<12x4xbf16>
    %cst_115 = arith.constant dense<0.000000e+00> : vector<12x4xf32>
    %331 = tpu.matmul %329, %330, %cst_115 {dimension_numbers = #tpu.dot_dimension_numbers<[1], [0], [0], [1], [0, 0, 1, 1], [], []>} : vector<12x12xbf16>, vector<12x4xbf16>, vector<12x4xf32> -> vector<12x4xf32>
    %c0_116 = arith.constant 0 : index
    %c56 = arith.constant 56 : index
    %332 = vector.load %arg25[%c0_116, %c56] : memref<12x80xf32, #tpu.memory_space<vmem>>, vector<12x4xf32>
    tpu.vector_store %arg25[%c0_116, %c56], %331 {strides = array<i32>} : memref<12x80xf32, #tpu.memory_space<vmem>>, vector<12x4xf32>,
    %333 = vector.extract_strided_slice %60 {offsets = [0, 60], sizes = [12, 4], strides = [1, 1]} : vector<12x80xbf16> to vector<12x4xbf16>
    %334 = vector.extract_strided_slice %61 {offsets = [0, 60], sizes = [12, 4], strides = [1, 1]} : vector<12x80xbf16> to vector<12x4xbf16>
    %cst_117 = arith.constant dense<0.000000e+00> : vector<12x12xf32>
    %335 = tpu.matmul %333, %334, %cst_117 {dimension_numbers = #tpu.dot_dimension_numbers<[1], [1], [0], [0], [0, 0, 1, 0], [], []>} : vector<12x4xbf16>, vector<12x4xbf16>, vector<12x12xf32> -> vector<12x12xf32>
    %336 = arith.addf %335, %11 : vector<12x12xf32>
    %cst_118 = arith.constant dense<0xFF800000> : vector<12xf32>
    %337 = vector.multi_reduction <maximumf>, %336, %cst_118 [1] : vector<12x12xf32> to vector<12xf32>
    %338 = vector.shape_cast %337 : vector<12xf32> to vector<12x1xf32>
    %339 = vector.broadcast %338 : vector<12x1xf32> to vector<12x12xf32>
    %340 = arith.subf %336, %339 : vector<12x12xf32>
    %341 = math.exp %340 : vector<12x12xf32>
    %cst_119 = arith.constant dense<0.000000e+00> : vector<12xf32>
    %342 = vector.multi_reduction <add>, %341, %cst_119 [1] : vector<12x12xf32> to vector<12xf32>
    %343 = vector.shape_cast %342 : vector<12xf32> to vector<12x1xf32>
    %344 = tpu.reciprocal %343 {approx = true} : vector<12x1xf32> -> vector<12x1xf32>
    %345 = vector.broadcast %344 : vector<12x1xf32> to vector<12x12xf32>
    %346 = arith.mulf %341, %345 : vector<12x12xf32>
    %347 = arith.truncf %346 : vector<12x12xf32> to vector<12x12xbf16>
    %348 = vector.extract_strided_slice %62 {offsets = [0, 60], sizes = [12, 4], strides = [1, 1]} : vector<12x80xbf16> to vector<12x4xbf16>
    %cst_120 = arith.constant dense<0.000000e+00> : vector<12x4xf32>
    %349 = tpu.matmul %347, %348, %cst_120 {dimension_numbers = #tpu.dot_dimension_numbers<[1], [0], [0], [1], [0, 0, 1, 1], [], []>} : vector<12x12xbf16>, vector<12x4xbf16>, vector<12x4xf32> -> vector<12x4xf32>
    %c0_121 = arith.constant 0 : index
    %c60 = arith.constant 60 : index
    %350 = vector.load %arg25[%c0_121, %c60] : memref<12x80xf32, #tpu.memory_space<vmem>>, vector<12x4xf32>
    tpu.vector_store %arg25[%c0_121, %c60], %349 {strides = array<i32>} : memref<12x80xf32, #tpu.memory_space<vmem>>, vector<12x4xf32>,
    %351 = vector.extract_strided_slice %60 {offsets = [0, 64], sizes = [12, 4], strides = [1, 1]} : vector<12x80xbf16> to vector<12x4xbf16>
    %352 = vector.extract_strided_slice %61 {offsets = [0, 64], sizes = [12, 4], strides = [1, 1]} : vector<12x80xbf16> to vector<12x4xbf16>
    %cst_122 = arith.constant dense<0.000000e+00> : vector<12x12xf32>
    %353 = tpu.matmul %351, %352, %cst_122 {dimension_numbers = #tpu.dot_dimension_numbers<[1], [1], [0], [0], [0, 0, 1, 0], [], []>} : vector<12x4xbf16>, vector<12x4xbf16>, vector<12x12xf32> -> vector<12x12xf32>
    %354 = arith.addf %353, %11 : vector<12x12xf32>
    %cst_123 = arith.constant dense<0xFF800000> : vector<12xf32>
    %355 = vector.multi_reduction <maximumf>, %354, %cst_123 [1] : vector<12x12xf32> to vector<12xf32>
    %356 = vector.shape_cast %355 : vector<12xf32> to vector<12x1xf32>
    %357 = vector.broadcast %356 : vector<12x1xf32> to vector<12x12xf32>
    %358 = arith.subf %354, %357 : vector<12x12xf32>
    %359 = math.exp %358 : vector<12x12xf32>
    %cst_124 = arith.constant dense<0.000000e+00> : vector<12xf32>
    %360 = vector.multi_reduction <add>, %359, %cst_124 [1] : vector<12x12xf32> to vector<12xf32>
    %361 = vector.shape_cast %360 : vector<12xf32> to vector<12x1xf32>
    %362 = tpu.reciprocal %361 {approx = true} : vector<12x1xf32> -> vector<12x1xf32>
    %363 = vector.broadcast %362 : vector<12x1xf32> to vector<12x12xf32>
    %364 = arith.mulf %359, %363 : vector<12x12xf32>
    %365 = arith.truncf %364 : vector<12x12xf32> to vector<12x12xbf16>
    %366 = vector.extract_strided_slice %62 {offsets = [0, 64], sizes = [12, 4], strides = [1, 1]} : vector<12x80xbf16> to vector<12x4xbf16>
    %cst_125 = arith.constant dense<0.000000e+00> : vector<12x4xf32>
    %367 = tpu.matmul %365, %366, %cst_125 {dimension_numbers = #tpu.dot_dimension_numbers<[1], [0], [0], [1], [0, 0, 1, 1], [], []>} : vector<12x12xbf16>, vector<12x4xbf16>, vector<12x4xf32> -> vector<12x4xf32>
    %c0_126 = arith.constant 0 : index
    %c64 = arith.constant 64 : index
    %368 = vector.load %arg25[%c0_126, %c64] : memref<12x80xf32, #tpu.memory_space<vmem>>, vector<12x4xf32>
    tpu.vector_store %arg25[%c0_126, %c64], %367 {strides = array<i32>} : memref<12x80xf32, #tpu.memory_space<vmem>>, vector<12x4xf32>,
    %369 = vector.extract_strided_slice %60 {offsets = [0, 68], sizes = [12, 4], strides = [1, 1]} : vector<12x80xbf16> to vector<12x4xbf16>
    %370 = vector.extract_strided_slice %61 {offsets = [0, 68], sizes = [12, 4], strides = [1, 1]} : vector<12x80xbf16> to vector<12x4xbf16>
    %cst_127 = arith.constant dense<0.000000e+00> : vector<12x12xf32>
    %371 = tpu.matmul %369, %370, %cst_127 {dimension_numbers = #tpu.dot_dimension_numbers<[1], [1], [0], [0], [0, 0, 1, 0], [], []>} : vector<12x4xbf16>, vector<12x4xbf16>, vector<12x12xf32> -> vector<12x12xf32>
    %372 = arith.addf %371, %11 : vector<12x12xf32>
    %cst_128 = arith.constant dense<0xFF800000> : vector<12xf32>
    %373 = vector.multi_reduction <maximumf>, %372, %cst_128 [1] : vector<12x12xf32> to vector<12xf32>
    %374 = vector.shape_cast %373 : vector<12xf32> to vector<12x1xf32>
    %375 = vector.broadcast %374 : vector<12x1xf32> to vector<12x12xf32>
    %376 = arith.subf %372, %375 : vector<12x12xf32>
    %377 = math.exp %376 : vector<12x12xf32>
    %cst_129 = arith.constant dense<0.000000e+00> : vector<12xf32>
    %378 = vector.multi_reduction <add>, %377, %cst_129 [1] : vector<12x12xf32> to vector<12xf32>
    %379 = vector.shape_cast %378 : vector<12xf32> to vector<12x1xf32>
    %380 = tpu.reciprocal %379 {approx = true} : vector<12x1xf32> -> vector<12x1xf32>
    %381 = vector.broadcast %380 : vector<12x1xf32> to vector<12x12xf32>
    %382 = arith.mulf %377, %381 : vector<12x12xf32>
    %383 = arith.truncf %382 : vector<12x12xf32> to vector<12x12xbf16>
    %384 = vector.extract_strided_slice %62 {offsets = [0, 68], sizes = [12, 4], strides = [1, 1]} : vector<12x80xbf16> to vector<12x4xbf16>
    %cst_130 = arith.constant dense<0.000000e+00> : vector<12x4xf32>
    %385 = tpu.matmul %383, %384, %cst_130 {dimension_numbers = #tpu.dot_dimension_numbers<[1], [0], [0], [1], [0, 0, 1, 1], [], []>} : vector<12x12xbf16>, vector<12x4xbf16>, vector<12x4xf32> -> vector<12x4xf32>
    %c0_131 = arith.constant 0 : index
    %c68 = arith.constant 68 : index
    %386 = vector.load %arg25[%c0_131, %c68] : memref<12x80xf32, #tpu.memory_space<vmem>>, vector<12x4xf32>
    tpu.vector_store %arg25[%c0_131, %c68], %385 {strides = array<i32>} : memref<12x80xf32, #tpu.memory_space<vmem>>, vector<12x4xf32>,
    %387 = vector.extract_strided_slice %60 {offsets = [0, 72], sizes = [12, 4], strides = [1, 1]} : vector<12x80xbf16> to vector<12x4xbf16>
    %388 = vector.extract_strided_slice %61 {offsets = [0, 72], sizes = [12, 4], strides = [1, 1]} : vector<12x80xbf16> to vector<12x4xbf16>
    %cst_132 = arith.constant dense<0.000000e+00> : vector<12x12xf32>
    %389 = tpu.matmul %387, %388, %cst_132 {dimension_numbers = #tpu.dot_dimension_numbers<[1], [1], [0], [0], [0, 0, 1, 0], [], []>} : vector<12x4xbf16>, vector<12x4xbf16>, vector<12x12xf32> -> vector<12x12xf32>
    %390 = arith.addf %389, %11 : vector<12x12xf32>
    %cst_133 = arith.constant dense<0xFF800000> : vector<12xf32>
    %391 = vector.multi_reduction <maximumf>, %390, %cst_133 [1] : vector<12x12xf32> to vector<12xf32>
    %392 = vector.shape_cast %391 : vector<12xf32> to vector<12x1xf32>
    %393 = vector.broadcast %392 : vector<12x1xf32> to vector<12x12xf32>
    %394 = arith.subf %390, %393 : vector<12x12xf32>
    %395 = math.exp %394 : vector<12x12xf32>
    %cst_134 = arith.constant dense<0.000000e+00> : vector<12xf32>
    %396 = vector.multi_reduction <add>, %395, %cst_134 [1] : vector<12x12xf32> to vector<12xf32>
    %397 = vector.shape_cast %396 : vector<12xf32> to vector<12x1xf32>
    %398 = tpu.reciprocal %397 {approx = true} : vector<12x1xf32> -> vector<12x1xf32>
    %399 = vector.broadcast %398 : vector<12x1xf32> to vector<12x12xf32>
    %400 = arith.mulf %395, %399 : vector<12x12xf32>
    %401 = arith.truncf %400 : vector<12x12xf32> to vector<12x12xbf16>
    %402 = vector.extract_strided_slice %62 {offsets = [0, 72], sizes = [12, 4], strides = [1, 1]} : vector<12x80xbf16> to vector<12x4xbf16>
    %cst_135 = arith.constant dense<0.000000e+00> : vector<12x4xf32>
    %403 = tpu.matmul %401, %402, %cst_135 {dimension_numbers = #tpu.dot_dimension_numbers<[1], [0], [0], [1], [0, 0, 1, 1], [], []>} : vector<12x12xbf16>, vector<12x4xbf16>, vector<12x4xf32> -> vector<12x4xf32>
    %c0_136 = arith.constant 0 : index
    %c72 = arith.constant 72 : index
    %404 = vector.load %arg25[%c0_136, %c72] : memref<12x80xf32, #tpu.memory_space<vmem>>, vector<12x4xf32>
    tpu.vector_store %arg25[%c0_136, %c72], %403 {strides = array<i32>} : memref<12x80xf32, #tpu.memory_space<vmem>>, vector<12x4xf32>,
    %405 = vector.extract_strided_slice %60 {offsets = [0, 76], sizes = [12, 4], strides = [1, 1]} : vector<12x80xbf16> to vector<12x4xbf16>
    %406 = vector.extract_strided_slice %61 {offsets = [0, 76], sizes = [12, 4], strides = [1, 1]} : vector<12x80xbf16> to vector<12x4xbf16>
    %cst_137 = arith.constant dense<0.000000e+00> : vector<12x12xf32>
    %407 = tpu.matmul %405, %406, %cst_137 {dimension_numbers = #tpu.dot_dimension_numbers<[1], [1], [0], [0], [0, 0, 1, 0], [], []>} : vector<12x4xbf16>, vector<12x4xbf16>, vector<12x12xf32> -> vector<12x12xf32>
    %408 = arith.addf %407, %11 : vector<12x12xf32>
    %cst_138 = arith.constant dense<0xFF800000> : vector<12xf32>
    %409 = vector.multi_reduction <maximumf>, %408, %cst_138 [1] : vector<12x12xf32> to vector<12xf32>
    %410 = vector.shape_cast %409 : vector<12xf32> to vector<12x1xf32>
    %411 = vector.broadcast %410 : vector<12x1xf32> to vector<12x12xf32>
    %412 = arith.subf %408, %411 : vector<12x12xf32>
    %413 = math.exp %412 : vector<12x12xf32>
    %cst_139 = arith.constant dense<0.000000e+00> : vector<12xf32>
    %414 = vector.multi_reduction <add>, %413, %cst_139 [1] : vector<12x12xf32> to vector<12xf32>
    %415 = vector.shape_cast %414 : vector<12xf32> to vector<12x1xf32>
    %416 = tpu.reciprocal %415 {approx = true} : vector<12x1xf32> -> vector<12x1xf32>
    %417 = vector.broadcast %416 : vector<12x1xf32> to vector<12x12xf32>
    %418 = arith.mulf %413, %417 : vector<12x12xf32>
    %419 = arith.truncf %418 : vector<12x12xf32> to vector<12x12xbf16>
    %420 = vector.extract_strided_slice %62 {offsets = [0, 76], sizes = [12, 4], strides = [1, 1]} : vector<12x80xbf16> to vector<12x4xbf16>
    %cst_140 = arith.constant dense<0.000000e+00> : vector<12x4xf32>
    %421 = tpu.matmul %419, %420, %cst_140 {dimension_numbers = #tpu.dot_dimension_numbers<[1], [0], [0], [1], [0, 0, 1, 1], [], []>} : vector<12x12xbf16>, vector<12x4xbf16>, vector<12x4xf32> -> vector<12x4xf32>
    %c0_141 = arith.constant 0 : index
    %c76 = arith.constant 76 : index
    %422 = vector.load %arg25[%c0_141, %c76] : memref<12x80xf32, #tpu.memory_space<vmem>>, vector<12x4xf32>
    tpu.vector_store %arg25[%c0_141, %c76], %421 {strides = array<i32>} : memref<12x80xf32, #tpu.memory_space<vmem>>, vector<12x4xf32>,
    %c0_142 = arith.constant 0 : index
    %c0_143 = arith.constant 0 : index
    %423 = vector.load %arg25[%c0_142, %c0_143] : memref<12x80xf32, #tpu.memory_space<vmem>>, vector<12x80xf32>
    %424 = arith.truncf %423 : vector<12x80xf32> to vector<12x80xbf16>
    %c0_144 = arith.constant 0 : index
    %c0_145 = arith.constant 0 : index
    %c0_146 = arith.constant 0 : index
    %425 = vector.load %arg13[%c0_144, %c0_145, %c0_146] : memref<2x80x80xbf16, #tpu.memory_space<vmem>>, vector<1x80x80xbf16>
    %426 = vector.shape_cast %425 : vector<1x80x80xbf16> to vector<80x80xbf16>
    %cst_147 = arith.constant dense<0.000000e+00> : vector<12x80xf32>
    %427 = tpu.matmul %424, %426, %cst_147 {dimension_numbers = #tpu.dot_dimension_numbers<[1], [0], [0], [1], [0, 0, 1, 1], [], []>} : vector<12x80xbf16>, vector<80x80xbf16>, vector<12x80xf32> -> vector<12x80xf32>
    %c0_148 = arith.constant 0 : index
    %c0_149 = arith.constant 0 : index
    %c0_150 = arith.constant 0 : index
    %428 = vector.load %arg14[%c0_148, %c0_149, %c0_150] : memref<2x1x80xf32, #tpu.memory_space<vmem>>, vector<1x1x80xf32>
    %429 = vector.shape_cast %428 : vector<1x1x80xf32> to vector<1x80xf32>
    %430 = vector.broadcast %429 : vector<1x80xf32> to vector<12x80xf32>
    %431 = arith.addf %427, %430 : vector<12x80xf32>
    %c0_151 = arith.constant 0 : index
    %c0_152 = arith.constant 0 : index
    %c0_153 = arith.constant 0 : index
    %432 = vector.load %arg15[%c0_151, %c0_152, %c0_153] : memref<2x1x80xf32, #tpu.memory_space<vmem>>, vector<1x1x80xf32>
    %433 = vector.shape_cast %432 : vector<1x1x80xf32> to vector<1x80xf32>
    %434 = vector.broadcast %433 : vector<1x80xf32> to vector<12x80xf32>
    %435 = arith.mulf %434, %431 : vector<12x80xf32>
    %436 = arith.addf %10, %435 : vector<12x80xf32>
    %c0_154 = arith.constant 0 : index
    %c0_155 = arith.constant 0 : index
    %c0_156 = arith.constant 0 : index
    %437 = vector.load %arg16[%c0_154, %c0_155, %c0_156] : memref<2x1x80xf32, #tpu.memory_space<vmem>>, vector<1x1x80xf32>
    %438 = vector.shape_cast %437 : vector<1x1x80xf32> to vector<1x80xf32>
    %c0_157 = arith.constant 0 : index
    %c0_158 = arith.constant 0 : index
    %c0_159 = arith.constant 0 : index
    %439 = vector.load %arg17[%c0_157, %c0_158, %c0_159] : memref<2x1x80xf32, #tpu.memory_space<vmem>>, vector<1x1x80xf32>
    %440 = vector.shape_cast %439 : vector<1x1x80xf32> to vector<1x80xf32>
    %cst_160 = arith.constant dense<0.000000e+00> : vector<12xf32>
    %441 = vector.multi_reduction <add>, %436, %cst_160 [1] : vector<12x80xf32> to vector<12xf32>
    %442 = vector.shape_cast %441 : vector<12xf32> to vector<12x1xf32>
    %cst_161 = arith.constant 8.000000e+01 : f32
    %443 = vector.broadcast %cst_161 : f32 to vector<12x1xf32>
    %444 = arith.divf %442, %443 : vector<12x1xf32>
    %445 = vector.broadcast %444 : vector<12x1xf32> to vector<12x80xf32>
    %446 = arith.subf %436, %445 : vector<12x80xf32>
    %447 = arith.mulf %446, %446 : vector<12x80xf32>
    %cst_162 = arith.constant dense<0.000000e+00> : vector<12xf32>
    %448 = vector.multi_reduction <add>, %447, %cst_162 [1] : vector<12x80xf32> to vector<12xf32>
    %449 = vector.shape_cast %448 : vector<12xf32> to vector<12x1xf32>
    %cst_163 = arith.constant 8.000000e+01 : f32
    %450 = vector.broadcast %cst_163 : f32 to vector<12x1xf32>
    %451 = arith.divf %449, %450 : vector<12x1xf32>
    %452 = vector.broadcast %444 : vector<12x1xf32> to vector<12x80xf32>
    %453 = arith.subf %436, %452 : vector<12x80xf32>
    %cst_164 = arith.constant 9.99999974E-6 : f32
    %454 = vector.broadcast %cst_164 : f32 to vector<12x1xf32>
    %455 = arith.addf %451, %454 : vector<12x1xf32>
    %456 = math.rsqrt %455 : vector<12x1xf32>
    %457 = vector.broadcast %456 : vector<12x1xf32> to vector<12x80xf32>
    %458 = arith.mulf %453, %457 : vector<12x80xf32>
    %459 = vector.broadcast %438 : vector<1x80xf32> to vector<12x80xf32>
    %460 = arith.mulf %458, %459 : vector<12x80xf32>
    %461 = vector.broadcast %440 : vector<1x80xf32> to vector<12x80xf32>
    %462 = arith.addf %460, %461 : vector<12x80xf32>
    %463 = arith.truncf %462 : vector<12x80xf32> to vector<12x80xbf16>
    %c0_165 = arith.constant 0 : index
    %c0_166 = arith.constant 0 : index
    %c0_167 = arith.constant 0 : index
    %464 = vector.load %arg18[%c0_165, %c0_166, %c0_167] : memref<2x80x320xbf16, #tpu.memory_space<vmem>>, vector<1x80x320xbf16>
    %465 = vector.shape_cast %464 : vector<1x80x320xbf16> to vector<80x320xbf16>
    %cst_168 = arith.constant dense<0.000000e+00> : vector<12x320xf32>
    %466 = tpu.matmul %463, %465, %cst_168 {dimension_numbers = #tpu.dot_dimension_numbers<[1], [0], [0], [1], [0, 0, 1, 1], [], []>} : vector<12x80xbf16>, vector<80x320xbf16>, vector<12x320xf32> -> vector<12x320xf32>
    %c0_169 = arith.constant 0 : index
    %c0_170 = arith.constant 0 : index
    %c0_171 = arith.constant 0 : index
    %467 = vector.load %arg19[%c0_169, %c0_170, %c0_171] : memref<2x1x320xf32, #tpu.memory_space<vmem>>, vector<1x1x320xf32>
    %468 = vector.shape_cast %467 : vector<1x1x320xf32> to vector<1x320xf32>
    %469 = vector.broadcast %468 : vector<1x320xf32> to vector<12x320xf32>
    %470 = arith.addf %466, %469 : vector<12x320xf32>
    %cst_172 = arith.constant 5.000000e-01 : f32
    %471 = vector.broadcast %cst_172 : f32 to vector<12x320xf32>
    %472 = arith.mulf %471, %470 : vector<12x320xf32>
    %cst_173 = arith.constant 0.707106769 : f32
    %473 = vector.broadcast %cst_173 : f32 to vector<12x320xf32>
    %474 = arith.mulf %470, %473 : vector<12x320xf32>
    %cst_174 = arith.constant 0.000000e+00 : f32
    %475 = vector.broadcast %cst_174 : f32 to vector<12x320xf32>
    %476 = arith.cmpf oge, %474, %475 : vector<12x320xf32>
    %cst_175 = arith.constant 1.000000e+00 : f32
    %cst_176 = arith.constant -1.000000e+00 : f32
    %477 = vector.broadcast %cst_175 : f32 to vector<12x320xf32>
    %478 = vector.broadcast %cst_176 : f32 to vector<12x320xf32>
    %479 = arith.select %476, %477, %478 : vector<12x320xi1>, vector<12x320xf32>
    %480 = math.absf %474 : vector<12x320xf32>
    %cst_177 = arith.constant 0.327591091 : f32
    %481 = vector.broadcast %cst_177 : f32 to vector<12x320xf32>
    %482 = arith.mulf %481, %480 : vector<12x320xf32>
    %cst_178 = arith.constant 1.000000e+00 : f32
    %483 = vector.broadcast %cst_178 : f32 to vector<12x320xf32>
    %484 = arith.addf %483, %482 : vector<12x320xf32>
    %485 = tpu.reciprocal %484 {approx = true} : vector<12x320xf32> -> vector<12x320xf32>
    %cst_179 = arith.constant 1.06140542 : f32
    %486 = vector.broadcast %cst_179 : f32 to vector<12x320xf32>
    %487 = arith.mulf %486, %485 : vector<12x320xf32>
    %cst_180 = arith.constant -1.45315206 : f32
    %488 = vector.broadcast %cst_180 : f32 to vector<12x320xf32>
    %489 = arith.addf %487, %488 : vector<12x320xf32>
    %490 = arith.mulf %489, %485 : vector<12x320xf32>
    %cst_181 = arith.constant 1.42141378 : f32
    %491 = vector.broadcast %cst_181 : f32 to vector<12x320xf32>
    %492 = arith.addf %490, %491 : vector<12x320xf32>
    %493 = arith.mulf %492, %485 : vector<12x320xf32>
    %cst_182 = arith.constant -0.284496725 : f32
    %494 = vector.broadcast %cst_182 : f32 to vector<12x320xf32>
    %495 = arith.addf %493, %494 : vector<12x320xf32>
    %496 = arith.mulf %495, %485 : vector<12x320xf32>
    %cst_183 = arith.constant 0.254829586 : f32
    %497 = vector.broadcast %cst_183 : f32 to vector<12x320xf32>
    %498 = arith.addf %496, %497 : vector<12x320xf32>
    %499 = arith.mulf %498, %485 : vector<12x320xf32>
    %cst_184 = arith.constant 0.000000e+00 : f32
    %500 = vector.broadcast %cst_184 : f32 to vector<12x320xf32>
    %501 = arith.subf %500, %480 : vector<12x320xf32>
    %502 = arith.mulf %501, %480 : vector<12x320xf32>
    %503 = math.exp %502 : vector<12x320xf32>
    %504 = arith.mulf %499, %503 : vector<12x320xf32>
    %cst_185 = arith.constant 1.000000e+00 : f32
    %505 = vector.broadcast %cst_185 : f32 to vector<12x320xf32>
    %506 = arith.subf %505, %504 : vector<12x320xf32>
    %507 = arith.mulf %479, %506 : vector<12x320xf32>
    %cst_186 = arith.constant 1.000000e+00 : f32
    %508 = vector.broadcast %cst_186 : f32 to vector<12x320xf32>
    %509 = arith.addf %508, %507 : vector<12x320xf32>
    %510 = arith.mulf %472, %509 : vector<12x320xf32>
    %511 = arith.truncf %510 : vector<12x320xf32> to vector<12x320xbf16>
    %c0_187 = arith.constant 0 : index
    %c0_188 = arith.constant 0 : index
    %c0_189 = arith.constant 0 : index
    %512 = vector.load %arg20[%c0_187, %c0_188, %c0_189] : memref<2x320x80xbf16, #tpu.memory_space<vmem>>, vector<1x320x80xbf16>
    %513 = vector.shape_cast %512 : vector<1x320x80xbf16> to vector<320x80xbf16>
    %cst_190 = arith.constant dense<0.000000e+00> : vector<12x80xf32>
    %514 = tpu.matmul %511, %513, %cst_190 {dimension_numbers = #tpu.dot_dimension_numbers<[1], [0], [0], [1], [0, 0, 1, 1], [], []>} : vector<12x320xbf16>, vector<320x80xbf16>, vector<12x80xf32> -> vector<12x80xf32>
    %c0_191 = arith.constant 0 : index
    %c0_192 = arith.constant 0 : index
    %c0_193 = arith.constant 0 : index
    %515 = vector.load %arg21[%c0_191, %c0_192, %c0_193] : memref<2x1x80xf32, #tpu.memory_space<vmem>>, vector<1x1x80xf32>
    %516 = vector.shape_cast %515 : vector<1x1x80xf32> to vector<1x80xf32>
    %517 = vector.broadcast %516 : vector<1x80xf32> to vector<12x80xf32>
    %518 = arith.addf %514, %517 : vector<12x80xf32>
    %c0_194 = arith.constant 0 : index
    %c0_195 = arith.constant 0 : index
    %c0_196 = arith.constant 0 : index
    %519 = vector.load %arg22[%c0_194, %c0_195, %c0_196] : memref<2x1x80xf32, #tpu.memory_space<vmem>>, vector<1x1x80xf32>
    %520 = vector.shape_cast %519 : vector<1x1x80xf32> to vector<1x80xf32>
    %521 = vector.broadcast %520 : vector<1x80xf32> to vector<12x80xf32>
    %522 = arith.mulf %521, %518 : vector<12x80xf32>
    %523 = arith.addf %436, %522 : vector<12x80xf32>
    %524 = vector.extract_strided_slice %523 {offsets = [0, 0], sizes = [6, 80], strides = [1, 1]} : vector<12x80xf32> to vector<6x80xf32>
    %c0_197 = arith.constant 0 : index
    %c0_198 = arith.constant 0 : index
    %c0_199 = arith.constant 0 : index
    %525 = vector.load %arg23[%c0_197, %c0_198, %c0_199] : memref<2x6x80xf32, #tpu.memory_space<vmem>>, vector<1x6x80xf32>
    %526 = vector.shape_cast %525 : vector<1x6x80xf32> to vector<6x80xf32>
    %527 = vector.shape_cast %524 : vector<6x80xf32> to vector<1x6x80xf32>
    tpu.vector_store %arg23[%c0_197, %c0_198, %c0_199], %527 {strides = array<i32>} : memref<2x6x80xf32, #tpu.memory_space<vmem>>, vector<1x6x80xf32>,
    %528 = vector.extract_strided_slice %523 {offsets = [6, 0], sizes = [6, 80], strides = [1, 1]} : vector<12x80xf32> to vector<6x80xf32>
    %c1 = arith.constant 1 : index
    %c0_200 = arith.constant 0 : index
    %c0_201 = arith.constant 0 : index
    %529 = vector.load %arg23[%c1, %c0_200, %c0_201] : memref<2x6x80xf32, #tpu.memory_space<vmem>>, vector<1x6x80xf32>
    %530 = vector.shape_cast %529 : vector<1x6x80xf32> to vector<6x80xf32>
    %531 = vector.shape_cast %528 : vector<6x80xf32> to vector<1x6x80xf32>
    tpu.vector_store %arg23[%c1, %c0_200, %c0_201], %531 {strides = array<i32>} : memref<2x6x80xf32, #tpu.memory_space<vmem>>, vector<1x6x80xf32>,
    %c1_202 = arith.constant 1 : index
    %c0_203 = arith.constant 0 : index
    %c0_204 = arith.constant 0 : index
    %532 = vector.load %arg5[%c1_202, %c0_203, %c0_204] : memref<2x1x80xf32, #tpu.memory_space<vmem>>, vector<1x1x80xf32>
    %533 = vector.shape_cast %532 : vector<1x1x80xf32> to vector<1x80xf32>
    %c1_205 = arith.constant 1 : index
    %c0_206 = arith.constant 0 : index
    %c0_207 = arith.constant 0 : index
    %534 = vector.load %arg6[%c1_205, %c0_206, %c0_207] : memref<2x1x80xf32, #tpu.memory_space<vmem>>, vector<1x1x80xf32>
    %535 = vector.shape_cast %534 : vector<1x1x80xf32> to vector<1x80xf32>
    %cst_208 = arith.constant dense<0.000000e+00> : vector<12xf32>
    %536 = vector.multi_reduction <add>, %523, %cst_208 [1] : vector<12x80xf32> to vector<12xf32>
    %537 = vector.shape_cast %536 : vector<12xf32> to vector<12x1xf32>
    %cst_209 = arith.constant 8.000000e+01 : f32
    %538 = vector.broadcast %cst_209 : f32 to vector<12x1xf32>
    %539 = arith.divf %537, %538 : vector<12x1xf32>
    %540 = vector.broadcast %539 : vector<12x1xf32> to vector<12x80xf32>
    %541 = arith.subf %523, %540 : vector<12x80xf32>
    %542 = arith.mulf %541, %541 : vector<12x80xf32>
    %cst_210 = arith.constant dense<0.000000e+00> : vector<12xf32>
    %543 = vector.multi_reduction <add>, %542, %cst_210 [1] : vector<12x80xf32> to vector<12xf32>
    %544 = vector.shape_cast %543 : vector<12xf32> to vector<12x1xf32>
    %cst_211 = arith.constant 8.000000e+01 : f32
    %545 = vector.broadcast %cst_211 : f32 to vector<12x1xf32>
    %546 = arith.divf %544, %545 : vector<12x1xf32>
    %547 = vector.broadcast %539 : vector<12x1xf32> to vector<12x80xf32>
    %548 = arith.subf %523, %547 : vector<12x80xf32>
    %cst_212 = arith.constant 9.99999974E-6 : f32
    %549 = vector.broadcast %cst_212 : f32 to vector<12x1xf32>
    %550 = arith.addf %546, %549 : vector<12x1xf32>
    %551 = math.rsqrt %550 : vector<12x1xf32>
    %552 = vector.broadcast %551 : vector<12x1xf32> to vector<12x80xf32>
    %553 = arith.mulf %548, %552 : vector<12x80xf32>
    %554 = vector.broadcast %533 : vector<1x80xf32> to vector<12x80xf32>
    %555 = arith.mulf %553, %554 : vector<12x80xf32>
    %556 = vector.broadcast %535 : vector<1x80xf32> to vector<12x80xf32>
    %557 = arith.addf %555, %556 : vector<12x80xf32>
    %558 = arith.truncf %557 : vector<12x80xf32> to vector<12x80xbf16>
    %c1_213 = arith.constant 1 : index
    %c0_214 = arith.constant 0 : index
    %c0_215 = arith.constant 0 : index
    %559 = vector.load %arg7[%c1_213, %c0_214, %c0_215] : memref<2x80x80xbf16, #tpu.memory_space<vmem>>, vector<1x80x80xbf16>
    %560 = vector.shape_cast %559 : vector<1x80x80xbf16> to vector<80x80xbf16>
    %cst_216 = arith.constant dense<0.000000e+00> : vector<12x80xf32>
    %561 = tpu.matmul %558, %560, %cst_216 {dimension_numbers = #tpu.dot_dimension_numbers<[1], [0], [0], [1], [0, 0, 1, 1], [], []>} : vector<12x80xbf16>, vector<80x80xbf16>, vector<12x80xf32> -> vector<12x80xf32>
    %c1_217 = arith.constant 1 : index
    %c0_218 = arith.constant 0 : index
    %c0_219 = arith.constant 0 : index
    %562 = vector.load %arg8[%c1_217, %c0_218, %c0_219] : memref<2x1x80xf32, #tpu.memory_space<vmem>>, vector<1x1x80xf32>
    %563 = vector.shape_cast %562 : vector<1x1x80xf32> to vector<1x80xf32>
    %564 = vector.broadcast %563 : vector<1x80xf32> to vector<12x80xf32>
    %565 = arith.addf %561, %564 : vector<12x80xf32>
    %c1_220 = arith.constant 1 : index
    %c0_221 = arith.constant 0 : index
    %c0_222 = arith.constant 0 : index
    %566 = vector.load %arg9[%c1_220, %c0_221, %c0_222] : memref<2x80x80xbf16, #tpu.memory_space<vmem>>, vector<1x80x80xbf16>
    %567 = vector.shape_cast %566 : vector<1x80x80xbf16> to vector<80x80xbf16>
    %cst_223 = arith.constant dense<0.000000e+00> : vector<12x80xf32>
    %568 = tpu.matmul %558, %567, %cst_223 {dimension_numbers = #tpu.dot_dimension_numbers<[1], [0], [0], [1], [0, 0, 1, 1], [], []>} : vector<12x80xbf16>, vector<80x80xbf16>, vector<12x80xf32> -> vector<12x80xf32>
    %c1_224 = arith.constant 1 : index
    %c0_225 = arith.constant 0 : index
    %c0_226 = arith.constant 0 : index
    %569 = vector.load %arg10[%c1_224, %c0_225, %c0_226] : memref<2x1x80xf32, #tpu.memory_space<vmem>>, vector<1x1x80xf32>
    %570 = vector.shape_cast %569 : vector<1x1x80xf32> to vector<1x80xf32>
    %571 = vector.broadcast %570 : vector<1x80xf32> to vector<12x80xf32>
    %572 = arith.addf %568, %571 : vector<12x80xf32>
    %c1_227 = arith.constant 1 : index
    %c0_228 = arith.constant 0 : index
    %c0_229 = arith.constant 0 : index
    %573 = vector.load %arg11[%c1_227, %c0_228, %c0_229] : memref<2x80x80xbf16, #tpu.memory_space<vmem>>, vector<1x80x80xbf16>
    %574 = vector.shape_cast %573 : vector<1x80x80xbf16> to vector<80x80xbf16>
    %cst_230 = arith.constant dense<0.000000e+00> : vector<12x80xf32>
    %575 = tpu.matmul %558, %574, %cst_230 {dimension_numbers = #tpu.dot_dimension_numbers<[1], [0], [0], [1], [0, 0, 1, 1], [], []>} : vector<12x80xbf16>, vector<80x80xbf16>, vector<12x80xf32> -> vector<12x80xf32>
    %c1_231 = arith.constant 1 : index
    %c0_232 = arith.constant 0 : index
    %c0_233 = arith.constant 0 : index
    %576 = vector.load %arg12[%c1_231, %c0_232, %c0_233] : memref<2x1x80xf32, #tpu.memory_space<vmem>>, vector<1x1x80xf32>
    %577 = vector.shape_cast %576 : vector<1x1x80xf32> to vector<1x80xf32>
    %578 = vector.broadcast %577 : vector<1x80xf32> to vector<12x80xf32>
    %579 = arith.addf %575, %578 : vector<12x80xf32>
    %580 = arith.truncf %565 : vector<12x80xf32> to vector<12x80xbf16>
    %581 = arith.truncf %572 : vector<12x80xf32> to vector<12x80xbf16>
    %582 = arith.truncf %579 : vector<12x80xf32> to vector<12x80xbf16>
    %583 = vector.extract_strided_slice %580 {offsets = [0, 0], sizes = [12, 4], strides = [1, 1]} : vector<12x80xbf16> to vector<12x4xbf16>
    %584 = vector.extract_strided_slice %581 {offsets = [0, 0], sizes = [12, 4], strides = [1, 1]} : vector<12x80xbf16> to vector<12x4xbf16>
    %cst_234 = arith.constant dense<0.000000e+00> : vector<12x12xf32>
    %585 = tpu.matmul %583, %584, %cst_234 {dimension_numbers = #tpu.dot_dimension_numbers<[1], [1], [0], [0], [0, 0, 1, 0], [], []>} : vector<12x4xbf16>, vector<12x4xbf16>, vector<12x12xf32> -> vector<12x12xf32>
    %586 = arith.addf %585, %11 : vector<12x12xf32>
    %cst_235 = arith.constant dense<0xFF800000> : vector<12xf32>
    %587 = vector.multi_reduction <maximumf>, %586, %cst_235 [1] : vector<12x12xf32> to vector<12xf32>
    %588 = vector.shape_cast %587 : vector<12xf32> to vector<12x1xf32>
    %589 = vector.broadcast %588 : vector<12x1xf32> to vector<12x12xf32>
    %590 = arith.subf %586, %589 : vector<12x12xf32>
    %591 = math.exp %590 : vector<12x12xf32>
    %cst_236 = arith.constant dense<0.000000e+00> : vector<12xf32>
    %592 = vector.multi_reduction <add>, %591, %cst_236 [1] : vector<12x12xf32> to vector<12xf32>
    %593 = vector.shape_cast %592 : vector<12xf32> to vector<12x1xf32>
    %594 = tpu.reciprocal %593 {approx = true} : vector<12x1xf32> -> vector<12x1xf32>
    %595 = vector.broadcast %594 : vector<12x1xf32> to vector<12x12xf32>
    %596 = arith.mulf %591, %595 : vector<12x12xf32>
    %597 = arith.truncf %596 : vector<12x12xf32> to vector<12x12xbf16>
    %598 = vector.extract_strided_slice %582 {offsets = [0, 0], sizes = [12, 4], strides = [1, 1]} : vector<12x80xbf16> to vector<12x4xbf16>
    %cst_237 = arith.constant dense<0.000000e+00> : vector<12x4xf32>
    %599 = tpu.matmul %597, %598, %cst_237 {dimension_numbers = #tpu.dot_dimension_numbers<[1], [0], [0], [1], [0, 0, 1, 1], [], []>} : vector<12x12xbf16>, vector<12x4xbf16>, vector<12x4xf32> -> vector<12x4xf32>
    %c0_238 = arith.constant 0 : index
    %c0_239 = arith.constant 0 : index
    %600 = vector.load %arg25[%c0_238, %c0_239] : memref<12x80xf32, #tpu.memory_space<vmem>>, vector<12x4xf32>
    tpu.vector_store %arg25[%c0_238, %c0_239], %599 {strides = array<i32>} : memref<12x80xf32, #tpu.memory_space<vmem>>, vector<12x4xf32>,
    %601 = vector.extract_strided_slice %580 {offsets = [0, 4], sizes = [12, 4], strides = [1, 1]} : vector<12x80xbf16> to vector<12x4xbf16>
    %602 = vector.extract_strided_slice %581 {offsets = [0, 4], sizes = [12, 4], strides = [1, 1]} : vector<12x80xbf16> to vector<12x4xbf16>
    %cst_240 = arith.constant dense<0.000000e+00> : vector<12x12xf32>
    %603 = tpu.matmul %601, %602, %cst_240 {dimension_numbers = #tpu.dot_dimension_numbers<[1], [1], [0], [0], [0, 0, 1, 0], [], []>} : vector<12x4xbf16>, vector<12x4xbf16>, vector<12x12xf32> -> vector<12x12xf32>
    %604 = arith.addf %603, %11 : vector<12x12xf32>
    %cst_241 = arith.constant dense<0xFF800000> : vector<12xf32>
    %605 = vector.multi_reduction <maximumf>, %604, %cst_241 [1] : vector<12x12xf32> to vector<12xf32>
    %606 = vector.shape_cast %605 : vector<12xf32> to vector<12x1xf32>
    %607 = vector.broadcast %606 : vector<12x1xf32> to vector<12x12xf32>
    %608 = arith.subf %604, %607 : vector<12x12xf32>
    %609 = math.exp %608 : vector<12x12xf32>
    %cst_242 = arith.constant dense<0.000000e+00> : vector<12xf32>
    %610 = vector.multi_reduction <add>, %609, %cst_242 [1] : vector<12x12xf32> to vector<12xf32>
    %611 = vector.shape_cast %610 : vector<12xf32> to vector<12x1xf32>
    %612 = tpu.reciprocal %611 {approx = true} : vector<12x1xf32> -> vector<12x1xf32>
    %613 = vector.broadcast %612 : vector<12x1xf32> to vector<12x12xf32>
    %614 = arith.mulf %609, %613 : vector<12x12xf32>
    %615 = arith.truncf %614 : vector<12x12xf32> to vector<12x12xbf16>
    %616 = vector.extract_strided_slice %582 {offsets = [0, 4], sizes = [12, 4], strides = [1, 1]} : vector<12x80xbf16> to vector<12x4xbf16>
    %cst_243 = arith.constant dense<0.000000e+00> : vector<12x4xf32>
    %617 = tpu.matmul %615, %616, %cst_243 {dimension_numbers = #tpu.dot_dimension_numbers<[1], [0], [0], [1], [0, 0, 1, 1], [], []>} : vector<12x12xbf16>, vector<12x4xbf16>, vector<12x4xf32> -> vector<12x4xf32>
    %c0_244 = arith.constant 0 : index
    %c4_245 = arith.constant 4 : index
    %618 = vector.load %arg25[%c0_244, %c4_245] : memref<12x80xf32, #tpu.memory_space<vmem>>, vector<12x4xf32>
    tpu.vector_store %arg25[%c0_244, %c4_245], %617 {strides = array<i32>} : memref<12x80xf32, #tpu.memory_space<vmem>>, vector<12x4xf32>,
    %619 = vector.extract_strided_slice %580 {offsets = [0, 8], sizes = [12, 4], strides = [1, 1]} : vector<12x80xbf16> to vector<12x4xbf16>
    %620 = vector.extract_strided_slice %581 {offsets = [0, 8], sizes = [12, 4], strides = [1, 1]} : vector<12x80xbf16> to vector<12x4xbf16>
    %cst_246 = arith.constant dense<0.000000e+00> : vector<12x12xf32>
    %621 = tpu.matmul %619, %620, %cst_246 {dimension_numbers = #tpu.dot_dimension_numbers<[1], [1], [0], [0], [0, 0, 1, 0], [], []>} : vector<12x4xbf16>, vector<12x4xbf16>, vector<12x12xf32> -> vector<12x12xf32>
    %622 = arith.addf %621, %11 : vector<12x12xf32>
    %cst_247 = arith.constant dense<0xFF800000> : vector<12xf32>
    %623 = vector.multi_reduction <maximumf>, %622, %cst_247 [1] : vector<12x12xf32> to vector<12xf32>
    %624 = vector.shape_cast %623 : vector<12xf32> to vector<12x1xf32>
    %625 = vector.broadcast %624 : vector<12x1xf32> to vector<12x12xf32>
    %626 = arith.subf %622, %625 : vector<12x12xf32>
    %627 = math.exp %626 : vector<12x12xf32>
    %cst_248 = arith.constant dense<0.000000e+00> : vector<12xf32>
    %628 = vector.multi_reduction <add>, %627, %cst_248 [1] : vector<12x12xf32> to vector<12xf32>
    %629 = vector.shape_cast %628 : vector<12xf32> to vector<12x1xf32>
    %630 = tpu.reciprocal %629 {approx = true} : vector<12x1xf32> -> vector<12x1xf32>
    %631 = vector.broadcast %630 : vector<12x1xf32> to vector<12x12xf32>
    %632 = arith.mulf %627, %631 : vector<12x12xf32>
    %633 = arith.truncf %632 : vector<12x12xf32> to vector<12x12xbf16>
    %634 = vector.extract_strided_slice %582 {offsets = [0, 8], sizes = [12, 4], strides = [1, 1]} : vector<12x80xbf16> to vector<12x4xbf16>
    %cst_249 = arith.constant dense<0.000000e+00> : vector<12x4xf32>
    %635 = tpu.matmul %633, %634, %cst_249 {dimension_numbers = #tpu.dot_dimension_numbers<[1], [0], [0], [1], [0, 0, 1, 1], [], []>} : vector<12x12xbf16>, vector<12x4xbf16>, vector<12x4xf32> -> vector<12x4xf32>
    %c0_250 = arith.constant 0 : index
    %c8_251 = arith.constant 8 : index
    %636 = vector.load %arg25[%c0_250, %c8_251] : memref<12x80xf32, #tpu.memory_space<vmem>>, vector<12x4xf32>
    tpu.vector_store %arg25[%c0_250, %c8_251], %635 {strides = array<i32>} : memref<12x80xf32, #tpu.memory_space<vmem>>, vector<12x4xf32>,
    %637 = vector.extract_strided_slice %580 {offsets = [0, 12], sizes = [12, 4], strides = [1, 1]} : vector<12x80xbf16> to vector<12x4xbf16>
    %638 = vector.extract_strided_slice %581 {offsets = [0, 12], sizes = [12, 4], strides = [1, 1]} : vector<12x80xbf16> to vector<12x4xbf16>
    %cst_252 = arith.constant dense<0.000000e+00> : vector<12x12xf32>
    %639 = tpu.matmul %637, %638, %cst_252 {dimension_numbers = #tpu.dot_dimension_numbers<[1], [1], [0], [0], [0, 0, 1, 0], [], []>} : vector<12x4xbf16>, vector<12x4xbf16>, vector<12x12xf32> -> vector<12x12xf32>
    %640 = arith.addf %639, %11 : vector<12x12xf32>
    %cst_253 = arith.constant dense<0xFF800000> : vector<12xf32>
    %641 = vector.multi_reduction <maximumf>, %640, %cst_253 [1] : vector<12x12xf32> to vector<12xf32>
    %642 = vector.shape_cast %641 : vector<12xf32> to vector<12x1xf32>
    %643 = vector.broadcast %642 : vector<12x1xf32> to vector<12x12xf32>
    %644 = arith.subf %640, %643 : vector<12x12xf32>
    %645 = math.exp %644 : vector<12x12xf32>
    %cst_254 = arith.constant dense<0.000000e+00> : vector<12xf32>
    %646 = vector.multi_reduction <add>, %645, %cst_254 [1] : vector<12x12xf32> to vector<12xf32>
    %647 = vector.shape_cast %646 : vector<12xf32> to vector<12x1xf32>
    %648 = tpu.reciprocal %647 {approx = true} : vector<12x1xf32> -> vector<12x1xf32>
    %649 = vector.broadcast %648 : vector<12x1xf32> to vector<12x12xf32>
    %650 = arith.mulf %645, %649 : vector<12x12xf32>
    %651 = arith.truncf %650 : vector<12x12xf32> to vector<12x12xbf16>
    %652 = vector.extract_strided_slice %582 {offsets = [0, 12], sizes = [12, 4], strides = [1, 1]} : vector<12x80xbf16> to vector<12x4xbf16>
    %cst_255 = arith.constant dense<0.000000e+00> : vector<12x4xf32>
    %653 = tpu.matmul %651, %652, %cst_255 {dimension_numbers = #tpu.dot_dimension_numbers<[1], [0], [0], [1], [0, 0, 1, 1], [], []>} : vector<12x12xbf16>, vector<12x4xbf16>, vector<12x4xf32> -> vector<12x4xf32>
    %c0_256 = arith.constant 0 : index
    %c12_257 = arith.constant 12 : index
    %654 = vector.load %arg25[%c0_256, %c12_257] : memref<12x80xf32, #tpu.memory_space<vmem>>, vector<12x4xf32>
    tpu.vector_store %arg25[%c0_256, %c12_257], %653 {strides = array<i32>} : memref<12x80xf32, #tpu.memory_space<vmem>>, vector<12x4xf32>,
    %655 = vector.extract_strided_slice %580 {offsets = [0, 16], sizes = [12, 4], strides = [1, 1]} : vector<12x80xbf16> to vector<12x4xbf16>
    %656 = vector.extract_strided_slice %581 {offsets = [0, 16], sizes = [12, 4], strides = [1, 1]} : vector<12x80xbf16> to vector<12x4xbf16>
    %cst_258 = arith.constant dense<0.000000e+00> : vector<12x12xf32>
    %657 = tpu.matmul %655, %656, %cst_258 {dimension_numbers = #tpu.dot_dimension_numbers<[1], [1], [0], [0], [0, 0, 1, 0], [], []>} : vector<12x4xbf16>, vector<12x4xbf16>, vector<12x12xf32> -> vector<12x12xf32>
    %658 = arith.addf %657, %11 : vector<12x12xf32>
    %cst_259 = arith.constant dense<0xFF800000> : vector<12xf32>
    %659 = vector.multi_reduction <maximumf>, %658, %cst_259 [1] : vector<12x12xf32> to vector<12xf32>
    %660 = vector.shape_cast %659 : vector<12xf32> to vector<12x1xf32>
    %661 = vector.broadcast %660 : vector<12x1xf32> to vector<12x12xf32>
    %662 = arith.subf %658, %661 : vector<12x12xf32>
    %663 = math.exp %662 : vector<12x12xf32>
    %cst_260 = arith.constant dense<0.000000e+00> : vector<12xf32>
    %664 = vector.multi_reduction <add>, %663, %cst_260 [1] : vector<12x12xf32> to vector<12xf32>
    %665 = vector.shape_cast %664 : vector<12xf32> to vector<12x1xf32>
    %666 = tpu.reciprocal %665 {approx = true} : vector<12x1xf32> -> vector<12x1xf32>
    %667 = vector.broadcast %666 : vector<12x1xf32> to vector<12x12xf32>
    %668 = arith.mulf %663, %667 : vector<12x12xf32>
    %669 = arith.truncf %668 : vector<12x12xf32> to vector<12x12xbf16>
    %670 = vector.extract_strided_slice %582 {offsets = [0, 16], sizes = [12, 4], strides = [1, 1]} : vector<12x80xbf16> to vector<12x4xbf16>
    %cst_261 = arith.constant dense<0.000000e+00> : vector<12x4xf32>
    %671 = tpu.matmul %669, %670, %cst_261 {dimension_numbers = #tpu.dot_dimension_numbers<[1], [0], [0], [1], [0, 0, 1, 1], [], []>} : vector<12x12xbf16>, vector<12x4xbf16>, vector<12x4xf32> -> vector<12x4xf32>
    %c0_262 = arith.constant 0 : index
    %c16_263 = arith.constant 16 : index
    %672 = vector.load %arg25[%c0_262, %c16_263] : memref<12x80xf32, #tpu.memory_space<vmem>>, vector<12x4xf32>
    tpu.vector_store %arg25[%c0_262, %c16_263], %671 {strides = array<i32>} : memref<12x80xf32, #tpu.memory_space<vmem>>, vector<12x4xf32>,
    %673 = vector.extract_strided_slice %580 {offsets = [0, 20], sizes = [12, 4], strides = [1, 1]} : vector<12x80xbf16> to vector<12x4xbf16>
    %674 = vector.extract_strided_slice %581 {offsets = [0, 20], sizes = [12, 4], strides = [1, 1]} : vector<12x80xbf16> to vector<12x4xbf16>
    %cst_264 = arith.constant dense<0.000000e+00> : vector<12x12xf32>
    %675 = tpu.matmul %673, %674, %cst_264 {dimension_numbers = #tpu.dot_dimension_numbers<[1], [1], [0], [0], [0, 0, 1, 0], [], []>} : vector<12x4xbf16>, vector<12x4xbf16>, vector<12x12xf32> -> vector<12x12xf32>
    %676 = arith.addf %675, %11 : vector<12x12xf32>
    %cst_265 = arith.constant dense<0xFF800000> : vector<12xf32>
    %677 = vector.multi_reduction <maximumf>, %676, %cst_265 [1] : vector<12x12xf32> to vector<12xf32>
    %678 = vector.shape_cast %677 : vector<12xf32> to vector<12x1xf32>
    %679 = vector.broadcast %678 : vector<12x1xf32> to vector<12x12xf32>
    %680 = arith.subf %676, %679 : vector<12x12xf32>
    %681 = math.exp %680 : vector<12x12xf32>
    %cst_266 = arith.constant dense<0.000000e+00> : vector<12xf32>
    %682 = vector.multi_reduction <add>, %681, %cst_266 [1] : vector<12x12xf32> to vector<12xf32>
    %683 = vector.shape_cast %682 : vector<12xf32> to vector<12x1xf32>
    %684 = tpu.reciprocal %683 {approx = true} : vector<12x1xf32> -> vector<12x1xf32>
    %685 = vector.broadcast %684 : vector<12x1xf32> to vector<12x12xf32>
    %686 = arith.mulf %681, %685 : vector<12x12xf32>
    %687 = arith.truncf %686 : vector<12x12xf32> to vector<12x12xbf16>
    %688 = vector.extract_strided_slice %582 {offsets = [0, 20], sizes = [12, 4], strides = [1, 1]} : vector<12x80xbf16> to vector<12x4xbf16>
    %cst_267 = arith.constant dense<0.000000e+00> : vector<12x4xf32>
    %689 = tpu.matmul %687, %688, %cst_267 {dimension_numbers = #tpu.dot_dimension_numbers<[1], [0], [0], [1], [0, 0, 1, 1], [], []>} : vector<12x12xbf16>, vector<12x4xbf16>, vector<12x4xf32> -> vector<12x4xf32>
    %c0_268 = arith.constant 0 : index
    %c20_269 = arith.constant 20 : index
    %690 = vector.load %arg25[%c0_268, %c20_269] : memref<12x80xf32, #tpu.memory_space<vmem>>, vector<12x4xf32>
    tpu.vector_store %arg25[%c0_268, %c20_269], %689 {strides = array<i32>} : memref<12x80xf32, #tpu.memory_space<vmem>>, vector<12x4xf32>,
    %691 = vector.extract_strided_slice %580 {offsets = [0, 24], sizes = [12, 4], strides = [1, 1]} : vector<12x80xbf16> to vector<12x4xbf16>
    %692 = vector.extract_strided_slice %581 {offsets = [0, 24], sizes = [12, 4], strides = [1, 1]} : vector<12x80xbf16> to vector<12x4xbf16>
    %cst_270 = arith.constant dense<0.000000e+00> : vector<12x12xf32>
    %693 = tpu.matmul %691, %692, %cst_270 {dimension_numbers = #tpu.dot_dimension_numbers<[1], [1], [0], [0], [0, 0, 1, 0], [], []>} : vector<12x4xbf16>, vector<12x4xbf16>, vector<12x12xf32> -> vector<12x12xf32>
    %694 = arith.addf %693, %11 : vector<12x12xf32>
    %cst_271 = arith.constant dense<0xFF800000> : vector<12xf32>
    %695 = vector.multi_reduction <maximumf>, %694, %cst_271 [1] : vector<12x12xf32> to vector<12xf32>
    %696 = vector.shape_cast %695 : vector<12xf32> to vector<12x1xf32>
    %697 = vector.broadcast %696 : vector<12x1xf32> to vector<12x12xf32>
    %698 = arith.subf %694, %697 : vector<12x12xf32>
    %699 = math.exp %698 : vector<12x12xf32>
    %cst_272 = arith.constant dense<0.000000e+00> : vector<12xf32>
    %700 = vector.multi_reduction <add>, %699, %cst_272 [1] : vector<12x12xf32> to vector<12xf32>
    %701 = vector.shape_cast %700 : vector<12xf32> to vector<12x1xf32>
    %702 = tpu.reciprocal %701 {approx = true} : vector<12x1xf32> -> vector<12x1xf32>
    %703 = vector.broadcast %702 : vector<12x1xf32> to vector<12x12xf32>
    %704 = arith.mulf %699, %703 : vector<12x12xf32>
    %705 = arith.truncf %704 : vector<12x12xf32> to vector<12x12xbf16>
    %706 = vector.extract_strided_slice %582 {offsets = [0, 24], sizes = [12, 4], strides = [1, 1]} : vector<12x80xbf16> to vector<12x4xbf16>
    %cst_273 = arith.constant dense<0.000000e+00> : vector<12x4xf32>
    %707 = tpu.matmul %705, %706, %cst_273 {dimension_numbers = #tpu.dot_dimension_numbers<[1], [0], [0], [1], [0, 0, 1, 1], [], []>} : vector<12x12xbf16>, vector<12x4xbf16>, vector<12x4xf32> -> vector<12x4xf32>
    %c0_274 = arith.constant 0 : index
    %c24_275 = arith.constant 24 : index
    %708 = vector.load %arg25[%c0_274, %c24_275] : memref<12x80xf32, #tpu.memory_space<vmem>>, vector<12x4xf32>
    tpu.vector_store %arg25[%c0_274, %c24_275], %707 {strides = array<i32>} : memref<12x80xf32, #tpu.memory_space<vmem>>, vector<12x4xf32>,
    %709 = vector.extract_strided_slice %580 {offsets = [0, 28], sizes = [12, 4], strides = [1, 1]} : vector<12x80xbf16> to vector<12x4xbf16>
    %710 = vector.extract_strided_slice %581 {offsets = [0, 28], sizes = [12, 4], strides = [1, 1]} : vector<12x80xbf16> to vector<12x4xbf16>
    %cst_276 = arith.constant dense<0.000000e+00> : vector<12x12xf32>
    %711 = tpu.matmul %709, %710, %cst_276 {dimension_numbers = #tpu.dot_dimension_numbers<[1], [1], [0], [0], [0, 0, 1, 0], [], []>} : vector<12x4xbf16>, vector<12x4xbf16>, vector<12x12xf32> -> vector<12x12xf32>
    %712 = arith.addf %711, %11 : vector<12x12xf32>
    %cst_277 = arith.constant dense<0xFF800000> : vector<12xf32>
    %713 = vector.multi_reduction <maximumf>, %712, %cst_277 [1] : vector<12x12xf32> to vector<12xf32>
    %714 = vector.shape_cast %713 : vector<12xf32> to vector<12x1xf32>
    %715 = vector.broadcast %714 : vector<12x1xf32> to vector<12x12xf32>
    %716 = arith.subf %712, %715 : vector<12x12xf32>
    %717 = math.exp %716 : vector<12x12xf32>
    %cst_278 = arith.constant dense<0.000000e+00> : vector<12xf32>
    %718 = vector.multi_reduction <add>, %717, %cst_278 [1] : vector<12x12xf32> to vector<12xf32>
    %719 = vector.shape_cast %718 : vector<12xf32> to vector<12x1xf32>
    %720 = tpu.reciprocal %719 {approx = true} : vector<12x1xf32> -> vector<12x1xf32>
    %721 = vector.broadcast %720 : vector<12x1xf32> to vector<12x12xf32>
    %722 = arith.mulf %717, %721 : vector<12x12xf32>
    %723 = arith.truncf %722 : vector<12x12xf32> to vector<12x12xbf16>
    %724 = vector.extract_strided_slice %582 {offsets = [0, 28], sizes = [12, 4], strides = [1, 1]} : vector<12x80xbf16> to vector<12x4xbf16>
    %cst_279 = arith.constant dense<0.000000e+00> : vector<12x4xf32>
    %725 = tpu.matmul %723, %724, %cst_279 {dimension_numbers = #tpu.dot_dimension_numbers<[1], [0], [0], [1], [0, 0, 1, 1], [], []>} : vector<12x12xbf16>, vector<12x4xbf16>, vector<12x4xf32> -> vector<12x4xf32>
    %c0_280 = arith.constant 0 : index
    %c28_281 = arith.constant 28 : index
    %726 = vector.load %arg25[%c0_280, %c28_281] : memref<12x80xf32, #tpu.memory_space<vmem>>, vector<12x4xf32>
    tpu.vector_store %arg25[%c0_280, %c28_281], %725 {strides = array<i32>} : memref<12x80xf32, #tpu.memory_space<vmem>>, vector<12x4xf32>,
    %727 = vector.extract_strided_slice %580 {offsets = [0, 32], sizes = [12, 4], strides = [1, 1]} : vector<12x80xbf16> to vector<12x4xbf16>
    %728 = vector.extract_strided_slice %581 {offsets = [0, 32], sizes = [12, 4], strides = [1, 1]} : vector<12x80xbf16> to vector<12x4xbf16>
    %cst_282 = arith.constant dense<0.000000e+00> : vector<12x12xf32>
    %729 = tpu.matmul %727, %728, %cst_282 {dimension_numbers = #tpu.dot_dimension_numbers<[1], [1], [0], [0], [0, 0, 1, 0], [], []>} : vector<12x4xbf16>, vector<12x4xbf16>, vector<12x12xf32> -> vector<12x12xf32>
    %730 = arith.addf %729, %11 : vector<12x12xf32>
    %cst_283 = arith.constant dense<0xFF800000> : vector<12xf32>
    %731 = vector.multi_reduction <maximumf>, %730, %cst_283 [1] : vector<12x12xf32> to vector<12xf32>
    %732 = vector.shape_cast %731 : vector<12xf32> to vector<12x1xf32>
    %733 = vector.broadcast %732 : vector<12x1xf32> to vector<12x12xf32>
    %734 = arith.subf %730, %733 : vector<12x12xf32>
    %735 = math.exp %734 : vector<12x12xf32>
    %cst_284 = arith.constant dense<0.000000e+00> : vector<12xf32>
    %736 = vector.multi_reduction <add>, %735, %cst_284 [1] : vector<12x12xf32> to vector<12xf32>
    %737 = vector.shape_cast %736 : vector<12xf32> to vector<12x1xf32>
    %738 = tpu.reciprocal %737 {approx = true} : vector<12x1xf32> -> vector<12x1xf32>
    %739 = vector.broadcast %738 : vector<12x1xf32> to vector<12x12xf32>
    %740 = arith.mulf %735, %739 : vector<12x12xf32>
    %741 = arith.truncf %740 : vector<12x12xf32> to vector<12x12xbf16>
    %742 = vector.extract_strided_slice %582 {offsets = [0, 32], sizes = [12, 4], strides = [1, 1]} : vector<12x80xbf16> to vector<12x4xbf16>
    %cst_285 = arith.constant dense<0.000000e+00> : vector<12x4xf32>
    %743 = tpu.matmul %741, %742, %cst_285 {dimension_numbers = #tpu.dot_dimension_numbers<[1], [0], [0], [1], [0, 0, 1, 1], [], []>} : vector<12x12xbf16>, vector<12x4xbf16>, vector<12x4xf32> -> vector<12x4xf32>
    %c0_286 = arith.constant 0 : index
    %c32_287 = arith.constant 32 : index
    %744 = vector.load %arg25[%c0_286, %c32_287] : memref<12x80xf32, #tpu.memory_space<vmem>>, vector<12x4xf32>
    tpu.vector_store %arg25[%c0_286, %c32_287], %743 {strides = array<i32>} : memref<12x80xf32, #tpu.memory_space<vmem>>, vector<12x4xf32>,
    %745 = vector.extract_strided_slice %580 {offsets = [0, 36], sizes = [12, 4], strides = [1, 1]} : vector<12x80xbf16> to vector<12x4xbf16>
    %746 = vector.extract_strided_slice %581 {offsets = [0, 36], sizes = [12, 4], strides = [1, 1]} : vector<12x80xbf16> to vector<12x4xbf16>
    %cst_288 = arith.constant dense<0.000000e+00> : vector<12x12xf32>
    %747 = tpu.matmul %745, %746, %cst_288 {dimension_numbers = #tpu.dot_dimension_numbers<[1], [1], [0], [0], [0, 0, 1, 0], [], []>} : vector<12x4xbf16>, vector<12x4xbf16>, vector<12x12xf32> -> vector<12x12xf32>
    %748 = arith.addf %747, %11 : vector<12x12xf32>
    %cst_289 = arith.constant dense<0xFF800000> : vector<12xf32>
    %749 = vector.multi_reduction <maximumf>, %748, %cst_289 [1] : vector<12x12xf32> to vector<12xf32>
    %750 = vector.shape_cast %749 : vector<12xf32> to vector<12x1xf32>
    %751 = vector.broadcast %750 : vector<12x1xf32> to vector<12x12xf32>
    %752 = arith.subf %748, %751 : vector<12x12xf32>
    %753 = math.exp %752 : vector<12x12xf32>
    %cst_290 = arith.constant dense<0.000000e+00> : vector<12xf32>
    %754 = vector.multi_reduction <add>, %753, %cst_290 [1] : vector<12x12xf32> to vector<12xf32>
    %755 = vector.shape_cast %754 : vector<12xf32> to vector<12x1xf32>
    %756 = tpu.reciprocal %755 {approx = true} : vector<12x1xf32> -> vector<12x1xf32>
    %757 = vector.broadcast %756 : vector<12x1xf32> to vector<12x12xf32>
    %758 = arith.mulf %753, %757 : vector<12x12xf32>
    %759 = arith.truncf %758 : vector<12x12xf32> to vector<12x12xbf16>
    %760 = vector.extract_strided_slice %582 {offsets = [0, 36], sizes = [12, 4], strides = [1, 1]} : vector<12x80xbf16> to vector<12x4xbf16>
    %cst_291 = arith.constant dense<0.000000e+00> : vector<12x4xf32>
    %761 = tpu.matmul %759, %760, %cst_291 {dimension_numbers = #tpu.dot_dimension_numbers<[1], [0], [0], [1], [0, 0, 1, 1], [], []>} : vector<12x12xbf16>, vector<12x4xbf16>, vector<12x4xf32> -> vector<12x4xf32>
    %c0_292 = arith.constant 0 : index
    %c36_293 = arith.constant 36 : index
    %762 = vector.load %arg25[%c0_292, %c36_293] : memref<12x80xf32, #tpu.memory_space<vmem>>, vector<12x4xf32>
    tpu.vector_store %arg25[%c0_292, %c36_293], %761 {strides = array<i32>} : memref<12x80xf32, #tpu.memory_space<vmem>>, vector<12x4xf32>,
    %763 = vector.extract_strided_slice %580 {offsets = [0, 40], sizes = [12, 4], strides = [1, 1]} : vector<12x80xbf16> to vector<12x4xbf16>
    %764 = vector.extract_strided_slice %581 {offsets = [0, 40], sizes = [12, 4], strides = [1, 1]} : vector<12x80xbf16> to vector<12x4xbf16>
    %cst_294 = arith.constant dense<0.000000e+00> : vector<12x12xf32>
    %765 = tpu.matmul %763, %764, %cst_294 {dimension_numbers = #tpu.dot_dimension_numbers<[1], [1], [0], [0], [0, 0, 1, 0], [], []>} : vector<12x4xbf16>, vector<12x4xbf16>, vector<12x12xf32> -> vector<12x12xf32>
    %766 = arith.addf %765, %11 : vector<12x12xf32>
    %cst_295 = arith.constant dense<0xFF800000> : vector<12xf32>
    %767 = vector.multi_reduction <maximumf>, %766, %cst_295 [1] : vector<12x12xf32> to vector<12xf32>
    %768 = vector.shape_cast %767 : vector<12xf32> to vector<12x1xf32>
    %769 = vector.broadcast %768 : vector<12x1xf32> to vector<12x12xf32>
    %770 = arith.subf %766, %769 : vector<12x12xf32>
    %771 = math.exp %770 : vector<12x12xf32>
    %cst_296 = arith.constant dense<0.000000e+00> : vector<12xf32>
    %772 = vector.multi_reduction <add>, %771, %cst_296 [1] : vector<12x12xf32> to vector<12xf32>
    %773 = vector.shape_cast %772 : vector<12xf32> to vector<12x1xf32>
    %774 = tpu.reciprocal %773 {approx = true} : vector<12x1xf32> -> vector<12x1xf32>
    %775 = vector.broadcast %774 : vector<12x1xf32> to vector<12x12xf32>
    %776 = arith.mulf %771, %775 : vector<12x12xf32>
    %777 = arith.truncf %776 : vector<12x12xf32> to vector<12x12xbf16>
    %778 = vector.extract_strided_slice %582 {offsets = [0, 40], sizes = [12, 4], strides = [1, 1]} : vector<12x80xbf16> to vector<12x4xbf16>
    %cst_297 = arith.constant dense<0.000000e+00> : vector<12x4xf32>
    %779 = tpu.matmul %777, %778, %cst_297 {dimension_numbers = #tpu.dot_dimension_numbers<[1], [0], [0], [1], [0, 0, 1, 1], [], []>} : vector<12x12xbf16>, vector<12x4xbf16>, vector<12x4xf32> -> vector<12x4xf32>
    %c0_298 = arith.constant 0 : index
    %c40_299 = arith.constant 40 : index
    %780 = vector.load %arg25[%c0_298, %c40_299] : memref<12x80xf32, #tpu.memory_space<vmem>>, vector<12x4xf32>
    tpu.vector_store %arg25[%c0_298, %c40_299], %779 {strides = array<i32>} : memref<12x80xf32, #tpu.memory_space<vmem>>, vector<12x4xf32>,
    %781 = vector.extract_strided_slice %580 {offsets = [0, 44], sizes = [12, 4], strides = [1, 1]} : vector<12x80xbf16> to vector<12x4xbf16>
    %782 = vector.extract_strided_slice %581 {offsets = [0, 44], sizes = [12, 4], strides = [1, 1]} : vector<12x80xbf16> to vector<12x4xbf16>
    %cst_300 = arith.constant dense<0.000000e+00> : vector<12x12xf32>
    %783 = tpu.matmul %781, %782, %cst_300 {dimension_numbers = #tpu.dot_dimension_numbers<[1], [1], [0], [0], [0, 0, 1, 0], [], []>} : vector<12x4xbf16>, vector<12x4xbf16>, vector<12x12xf32> -> vector<12x12xf32>
    %784 = arith.addf %783, %11 : vector<12x12xf32>
    %cst_301 = arith.constant dense<0xFF800000> : vector<12xf32>
    %785 = vector.multi_reduction <maximumf>, %784, %cst_301 [1] : vector<12x12xf32> to vector<12xf32>
    %786 = vector.shape_cast %785 : vector<12xf32> to vector<12x1xf32>
    %787 = vector.broadcast %786 : vector<12x1xf32> to vector<12x12xf32>
    %788 = arith.subf %784, %787 : vector<12x12xf32>
    %789 = math.exp %788 : vector<12x12xf32>
    %cst_302 = arith.constant dense<0.000000e+00> : vector<12xf32>
    %790 = vector.multi_reduction <add>, %789, %cst_302 [1] : vector<12x12xf32> to vector<12xf32>
    %791 = vector.shape_cast %790 : vector<12xf32> to vector<12x1xf32>
    %792 = tpu.reciprocal %791 {approx = true} : vector<12x1xf32> -> vector<12x1xf32>
    %793 = vector.broadcast %792 : vector<12x1xf32> to vector<12x12xf32>
    %794 = arith.mulf %789, %793 : vector<12x12xf32>
    %795 = arith.truncf %794 : vector<12x12xf32> to vector<12x12xbf16>
    %796 = vector.extract_strided_slice %582 {offsets = [0, 44], sizes = [12, 4], strides = [1, 1]} : vector<12x80xbf16> to vector<12x4xbf16>
    %cst_303 = arith.constant dense<0.000000e+00> : vector<12x4xf32>
    %797 = tpu.matmul %795, %796, %cst_303 {dimension_numbers = #tpu.dot_dimension_numbers<[1], [0], [0], [1], [0, 0, 1, 1], [], []>} : vector<12x12xbf16>, vector<12x4xbf16>, vector<12x4xf32> -> vector<12x4xf32>
    %c0_304 = arith.constant 0 : index
    %c44_305 = arith.constant 44 : index
    %798 = vector.load %arg25[%c0_304, %c44_305] : memref<12x80xf32, #tpu.memory_space<vmem>>, vector<12x4xf32>
    tpu.vector_store %arg25[%c0_304, %c44_305], %797 {strides = array<i32>} : memref<12x80xf32, #tpu.memory_space<vmem>>, vector<12x4xf32>,
    %799 = vector.extract_strided_slice %580 {offsets = [0, 48], sizes = [12, 4], strides = [1, 1]} : vector<12x80xbf16> to vector<12x4xbf16>
    %800 = vector.extract_strided_slice %581 {offsets = [0, 48], sizes = [12, 4], strides = [1, 1]} : vector<12x80xbf16> to vector<12x4xbf16>
    %cst_306 = arith.constant dense<0.000000e+00> : vector<12x12xf32>
    %801 = tpu.matmul %799, %800, %cst_306 {dimension_numbers = #tpu.dot_dimension_numbers<[1], [1], [0], [0], [0, 0, 1, 0], [], []>} : vector<12x4xbf16>, vector<12x4xbf16>, vector<12x12xf32> -> vector<12x12xf32>
    %802 = arith.addf %801, %11 : vector<12x12xf32>
    %cst_307 = arith.constant dense<0xFF800000> : vector<12xf32>
    %803 = vector.multi_reduction <maximumf>, %802, %cst_307 [1] : vector<12x12xf32> to vector<12xf32>
    %804 = vector.shape_cast %803 : vector<12xf32> to vector<12x1xf32>
    %805 = vector.broadcast %804 : vector<12x1xf32> to vector<12x12xf32>
    %806 = arith.subf %802, %805 : vector<12x12xf32>
    %807 = math.exp %806 : vector<12x12xf32>
    %cst_308 = arith.constant dense<0.000000e+00> : vector<12xf32>
    %808 = vector.multi_reduction <add>, %807, %cst_308 [1] : vector<12x12xf32> to vector<12xf32>
    %809 = vector.shape_cast %808 : vector<12xf32> to vector<12x1xf32>
    %810 = tpu.reciprocal %809 {approx = true} : vector<12x1xf32> -> vector<12x1xf32>
    %811 = vector.broadcast %810 : vector<12x1xf32> to vector<12x12xf32>
    %812 = arith.mulf %807, %811 : vector<12x12xf32>
    %813 = arith.truncf %812 : vector<12x12xf32> to vector<12x12xbf16>
    %814 = vector.extract_strided_slice %582 {offsets = [0, 48], sizes = [12, 4], strides = [1, 1]} : vector<12x80xbf16> to vector<12x4xbf16>
    %cst_309 = arith.constant dense<0.000000e+00> : vector<12x4xf32>
    %815 = tpu.matmul %813, %814, %cst_309 {dimension_numbers = #tpu.dot_dimension_numbers<[1], [0], [0], [1], [0, 0, 1, 1], [], []>} : vector<12x12xbf16>, vector<12x4xbf16>, vector<12x4xf32> -> vector<12x4xf32>
    %c0_310 = arith.constant 0 : index
    %c48_311 = arith.constant 48 : index
    %816 = vector.load %arg25[%c0_310, %c48_311] : memref<12x80xf32, #tpu.memory_space<vmem>>, vector<12x4xf32>
    tpu.vector_store %arg25[%c0_310, %c48_311], %815 {strides = array<i32>} : memref<12x80xf32, #tpu.memory_space<vmem>>, vector<12x4xf32>,
    %817 = vector.extract_strided_slice %580 {offsets = [0, 52], sizes = [12, 4], strides = [1, 1]} : vector<12x80xbf16> to vector<12x4xbf16>
    %818 = vector.extract_strided_slice %581 {offsets = [0, 52], sizes = [12, 4], strides = [1, 1]} : vector<12x80xbf16> to vector<12x4xbf16>
    %cst_312 = arith.constant dense<0.000000e+00> : vector<12x12xf32>
    %819 = tpu.matmul %817, %818, %cst_312 {dimension_numbers = #tpu.dot_dimension_numbers<[1], [1], [0], [0], [0, 0, 1, 0], [], []>} : vector<12x4xbf16>, vector<12x4xbf16>, vector<12x12xf32> -> vector<12x12xf32>
    %820 = arith.addf %819, %11 : vector<12x12xf32>
    %cst_313 = arith.constant dense<0xFF800000> : vector<12xf32>
    %821 = vector.multi_reduction <maximumf>, %820, %cst_313 [1] : vector<12x12xf32> to vector<12xf32>
    %822 = vector.shape_cast %821 : vector<12xf32> to vector<12x1xf32>
    %823 = vector.broadcast %822 : vector<12x1xf32> to vector<12x12xf32>
    %824 = arith.subf %820, %823 : vector<12x12xf32>
    %825 = math.exp %824 : vector<12x12xf32>
    %cst_314 = arith.constant dense<0.000000e+00> : vector<12xf32>
    %826 = vector.multi_reduction <add>, %825, %cst_314 [1] : vector<12x12xf32> to vector<12xf32>
    %827 = vector.shape_cast %826 : vector<12xf32> to vector<12x1xf32>
    %828 = tpu.reciprocal %827 {approx = true} : vector<12x1xf32> -> vector<12x1xf32>
    %829 = vector.broadcast %828 : vector<12x1xf32> to vector<12x12xf32>
    %830 = arith.mulf %825, %829 : vector<12x12xf32>
    %831 = arith.truncf %830 : vector<12x12xf32> to vector<12x12xbf16>
    %832 = vector.extract_strided_slice %582 {offsets = [0, 52], sizes = [12, 4], strides = [1, 1]} : vector<12x80xbf16> to vector<12x4xbf16>
    %cst_315 = arith.constant dense<0.000000e+00> : vector<12x4xf32>
    %833 = tpu.matmul %831, %832, %cst_315 {dimension_numbers = #tpu.dot_dimension_numbers<[1], [0], [0], [1], [0, 0, 1, 1], [], []>} : vector<12x12xbf16>, vector<12x4xbf16>, vector<12x4xf32> -> vector<12x4xf32>
    %c0_316 = arith.constant 0 : index
    %c52_317 = arith.constant 52 : index
    %834 = vector.load %arg25[%c0_316, %c52_317] : memref<12x80xf32, #tpu.memory_space<vmem>>, vector<12x4xf32>
    tpu.vector_store %arg25[%c0_316, %c52_317], %833 {strides = array<i32>} : memref<12x80xf32, #tpu.memory_space<vmem>>, vector<12x4xf32>,
    %835 = vector.extract_strided_slice %580 {offsets = [0, 56], sizes = [12, 4], strides = [1, 1]} : vector<12x80xbf16> to vector<12x4xbf16>
    %836 = vector.extract_strided_slice %581 {offsets = [0, 56], sizes = [12, 4], strides = [1, 1]} : vector<12x80xbf16> to vector<12x4xbf16>
    %cst_318 = arith.constant dense<0.000000e+00> : vector<12x12xf32>
    %837 = tpu.matmul %835, %836, %cst_318 {dimension_numbers = #tpu.dot_dimension_numbers<[1], [1], [0], [0], [0, 0, 1, 0], [], []>} : vector<12x4xbf16>, vector<12x4xbf16>, vector<12x12xf32> -> vector<12x12xf32>
    %838 = arith.addf %837, %11 : vector<12x12xf32>
    %cst_319 = arith.constant dense<0xFF800000> : vector<12xf32>
    %839 = vector.multi_reduction <maximumf>, %838, %cst_319 [1] : vector<12x12xf32> to vector<12xf32>
    %840 = vector.shape_cast %839 : vector<12xf32> to vector<12x1xf32>
    %841 = vector.broadcast %840 : vector<12x1xf32> to vector<12x12xf32>
    %842 = arith.subf %838, %841 : vector<12x12xf32>
    %843 = math.exp %842 : vector<12x12xf32>
    %cst_320 = arith.constant dense<0.000000e+00> : vector<12xf32>
    %844 = vector.multi_reduction <add>, %843, %cst_320 [1] : vector<12x12xf32> to vector<12xf32>
    %845 = vector.shape_cast %844 : vector<12xf32> to vector<12x1xf32>
    %846 = tpu.reciprocal %845 {approx = true} : vector<12x1xf32> -> vector<12x1xf32>
    %847 = vector.broadcast %846 : vector<12x1xf32> to vector<12x12xf32>
    %848 = arith.mulf %843, %847 : vector<12x12xf32>
    %849 = arith.truncf %848 : vector<12x12xf32> to vector<12x12xbf16>
    %850 = vector.extract_strided_slice %582 {offsets = [0, 56], sizes = [12, 4], strides = [1, 1]} : vector<12x80xbf16> to vector<12x4xbf16>
    %cst_321 = arith.constant dense<0.000000e+00> : vector<12x4xf32>
    %851 = tpu.matmul %849, %850, %cst_321 {dimension_numbers = #tpu.dot_dimension_numbers<[1], [0], [0], [1], [0, 0, 1, 1], [], []>} : vector<12x12xbf16>, vector<12x4xbf16>, vector<12x4xf32> -> vector<12x4xf32>
    %c0_322 = arith.constant 0 : index
    %c56_323 = arith.constant 56 : index
    %852 = vector.load %arg25[%c0_322, %c56_323] : memref<12x80xf32, #tpu.memory_space<vmem>>, vector<12x4xf32>
    tpu.vector_store %arg25[%c0_322, %c56_323], %851 {strides = array<i32>} : memref<12x80xf32, #tpu.memory_space<vmem>>, vector<12x4xf32>,
    %853 = vector.extract_strided_slice %580 {offsets = [0, 60], sizes = [12, 4], strides = [1, 1]} : vector<12x80xbf16> to vector<12x4xbf16>
    %854 = vector.extract_strided_slice %581 {offsets = [0, 60], sizes = [12, 4], strides = [1, 1]} : vector<12x80xbf16> to vector<12x4xbf16>
    %cst_324 = arith.constant dense<0.000000e+00> : vector<12x12xf32>
    %855 = tpu.matmul %853, %854, %cst_324 {dimension_numbers = #tpu.dot_dimension_numbers<[1], [1], [0], [0], [0, 0, 1, 0], [], []>} : vector<12x4xbf16>, vector<12x4xbf16>, vector<12x12xf32> -> vector<12x12xf32>
    %856 = arith.addf %855, %11 : vector<12x12xf32>
    %cst_325 = arith.constant dense<0xFF800000> : vector<12xf32>
    %857 = vector.multi_reduction <maximumf>, %856, %cst_325 [1] : vector<12x12xf32> to vector<12xf32>
    %858 = vector.shape_cast %857 : vector<12xf32> to vector<12x1xf32>
    %859 = vector.broadcast %858 : vector<12x1xf32> to vector<12x12xf32>
    %860 = arith.subf %856, %859 : vector<12x12xf32>
    %861 = math.exp %860 : vector<12x12xf32>
    %cst_326 = arith.constant dense<0.000000e+00> : vector<12xf32>
    %862 = vector.multi_reduction <add>, %861, %cst_326 [1] : vector<12x12xf32> to vector<12xf32>
    %863 = vector.shape_cast %862 : vector<12xf32> to vector<12x1xf32>
    %864 = tpu.reciprocal %863 {approx = true} : vector<12x1xf32> -> vector<12x1xf32>
    %865 = vector.broadcast %864 : vector<12x1xf32> to vector<12x12xf32>
    %866 = arith.mulf %861, %865 : vector<12x12xf32>
    %867 = arith.truncf %866 : vector<12x12xf32> to vector<12x12xbf16>
    %868 = vector.extract_strided_slice %582 {offsets = [0, 60], sizes = [12, 4], strides = [1, 1]} : vector<12x80xbf16> to vector<12x4xbf16>
    %cst_327 = arith.constant dense<0.000000e+00> : vector<12x4xf32>
    %869 = tpu.matmul %867, %868, %cst_327 {dimension_numbers = #tpu.dot_dimension_numbers<[1], [0], [0], [1], [0, 0, 1, 1], [], []>} : vector<12x12xbf16>, vector<12x4xbf16>, vector<12x4xf32> -> vector<12x4xf32>
    %c0_328 = arith.constant 0 : index
    %c60_329 = arith.constant 60 : index
    %870 = vector.load %arg25[%c0_328, %c60_329] : memref<12x80xf32, #tpu.memory_space<vmem>>, vector<12x4xf32>
    tpu.vector_store %arg25[%c0_328, %c60_329], %869 {strides = array<i32>} : memref<12x80xf32, #tpu.memory_space<vmem>>, vector<12x4xf32>,
    %871 = vector.extract_strided_slice %580 {offsets = [0, 64], sizes = [12, 4], strides = [1, 1]} : vector<12x80xbf16> to vector<12x4xbf16>
    %872 = vector.extract_strided_slice %581 {offsets = [0, 64], sizes = [12, 4], strides = [1, 1]} : vector<12x80xbf16> to vector<12x4xbf16>
    %cst_330 = arith.constant dense<0.000000e+00> : vector<12x12xf32>
    %873 = tpu.matmul %871, %872, %cst_330 {dimension_numbers = #tpu.dot_dimension_numbers<[1], [1], [0], [0], [0, 0, 1, 0], [], []>} : vector<12x4xbf16>, vector<12x4xbf16>, vector<12x12xf32> -> vector<12x12xf32>
    %874 = arith.addf %873, %11 : vector<12x12xf32>
    %cst_331 = arith.constant dense<0xFF800000> : vector<12xf32>
    %875 = vector.multi_reduction <maximumf>, %874, %cst_331 [1] : vector<12x12xf32> to vector<12xf32>
    %876 = vector.shape_cast %875 : vector<12xf32> to vector<12x1xf32>
    %877 = vector.broadcast %876 : vector<12x1xf32> to vector<12x12xf32>
    %878 = arith.subf %874, %877 : vector<12x12xf32>
    %879 = math.exp %878 : vector<12x12xf32>
    %cst_332 = arith.constant dense<0.000000e+00> : vector<12xf32>
    %880 = vector.multi_reduction <add>, %879, %cst_332 [1] : vector<12x12xf32> to vector<12xf32>
    %881 = vector.shape_cast %880 : vector<12xf32> to vector<12x1xf32>
    %882 = tpu.reciprocal %881 {approx = true} : vector<12x1xf32> -> vector<12x1xf32>
    %883 = vector.broadcast %882 : vector<12x1xf32> to vector<12x12xf32>
    %884 = arith.mulf %879, %883 : vector<12x12xf32>
    %885 = arith.truncf %884 : vector<12x12xf32> to vector<12x12xbf16>
    %886 = vector.extract_strided_slice %582 {offsets = [0, 64], sizes = [12, 4], strides = [1, 1]} : vector<12x80xbf16> to vector<12x4xbf16>
    %cst_333 = arith.constant dense<0.000000e+00> : vector<12x4xf32>
    %887 = tpu.matmul %885, %886, %cst_333 {dimension_numbers = #tpu.dot_dimension_numbers<[1], [0], [0], [1], [0, 0, 1, 1], [], []>} : vector<12x12xbf16>, vector<12x4xbf16>, vector<12x4xf32> -> vector<12x4xf32>
    %c0_334 = arith.constant 0 : index
    %c64_335 = arith.constant 64 : index
    %888 = vector.load %arg25[%c0_334, %c64_335] : memref<12x80xf32, #tpu.memory_space<vmem>>, vector<12x4xf32>
    tpu.vector_store %arg25[%c0_334, %c64_335], %887 {strides = array<i32>} : memref<12x80xf32, #tpu.memory_space<vmem>>, vector<12x4xf32>,
    %889 = vector.extract_strided_slice %580 {offsets = [0, 68], sizes = [12, 4], strides = [1, 1]} : vector<12x80xbf16> to vector<12x4xbf16>
    %890 = vector.extract_strided_slice %581 {offsets = [0, 68], sizes = [12, 4], strides = [1, 1]} : vector<12x80xbf16> to vector<12x4xbf16>
    %cst_336 = arith.constant dense<0.000000e+00> : vector<12x12xf32>
    %891 = tpu.matmul %889, %890, %cst_336 {dimension_numbers = #tpu.dot_dimension_numbers<[1], [1], [0], [0], [0, 0, 1, 0], [], []>} : vector<12x4xbf16>, vector<12x4xbf16>, vector<12x12xf32> -> vector<12x12xf32>
    %892 = arith.addf %891, %11 : vector<12x12xf32>
    %cst_337 = arith.constant dense<0xFF800000> : vector<12xf32>
    %893 = vector.multi_reduction <maximumf>, %892, %cst_337 [1] : vector<12x12xf32> to vector<12xf32>
    %894 = vector.shape_cast %893 : vector<12xf32> to vector<12x1xf32>
    %895 = vector.broadcast %894 : vector<12x1xf32> to vector<12x12xf32>
    %896 = arith.subf %892, %895 : vector<12x12xf32>
    %897 = math.exp %896 : vector<12x12xf32>
    %cst_338 = arith.constant dense<0.000000e+00> : vector<12xf32>
    %898 = vector.multi_reduction <add>, %897, %cst_338 [1] : vector<12x12xf32> to vector<12xf32>
    %899 = vector.shape_cast %898 : vector<12xf32> to vector<12x1xf32>
    %900 = tpu.reciprocal %899 {approx = true} : vector<12x1xf32> -> vector<12x1xf32>
    %901 = vector.broadcast %900 : vector<12x1xf32> to vector<12x12xf32>
    %902 = arith.mulf %897, %901 : vector<12x12xf32>
    %903 = arith.truncf %902 : vector<12x12xf32> to vector<12x12xbf16>
    %904 = vector.extract_strided_slice %582 {offsets = [0, 68], sizes = [12, 4], strides = [1, 1]} : vector<12x80xbf16> to vector<12x4xbf16>
    %cst_339 = arith.constant dense<0.000000e+00> : vector<12x4xf32>
    %905 = tpu.matmul %903, %904, %cst_339 {dimension_numbers = #tpu.dot_dimension_numbers<[1], [0], [0], [1], [0, 0, 1, 1], [], []>} : vector<12x12xbf16>, vector<12x4xbf16>, vector<12x4xf32> -> vector<12x4xf32>
    %c0_340 = arith.constant 0 : index
    %c68_341 = arith.constant 68 : index
    %906 = vector.load %arg25[%c0_340, %c68_341] : memref<12x80xf32, #tpu.memory_space<vmem>>, vector<12x4xf32>
    tpu.vector_store %arg25[%c0_340, %c68_341], %905 {strides = array<i32>} : memref<12x80xf32, #tpu.memory_space<vmem>>, vector<12x4xf32>,
    %907 = vector.extract_strided_slice %580 {offsets = [0, 72], sizes = [12, 4], strides = [1, 1]} : vector<12x80xbf16> to vector<12x4xbf16>
    %908 = vector.extract_strided_slice %581 {offsets = [0, 72], sizes = [12, 4], strides = [1, 1]} : vector<12x80xbf16> to vector<12x4xbf16>
    %cst_342 = arith.constant dense<0.000000e+00> : vector<12x12xf32>
    %909 = tpu.matmul %907, %908, %cst_342 {dimension_numbers = #tpu.dot_dimension_numbers<[1], [1], [0], [0], [0, 0, 1, 0], [], []>} : vector<12x4xbf16>, vector<12x4xbf16>, vector<12x12xf32> -> vector<12x12xf32>
    %910 = arith.addf %909, %11 : vector<12x12xf32>
    %cst_343 = arith.constant dense<0xFF800000> : vector<12xf32>
    %911 = vector.multi_reduction <maximumf>, %910, %cst_343 [1] : vector<12x12xf32> to vector<12xf32>
    %912 = vector.shape_cast %911 : vector<12xf32> to vector<12x1xf32>
    %913 = vector.broadcast %912 : vector<12x1xf32> to vector<12x12xf32>
    %914 = arith.subf %910, %913 : vector<12x12xf32>
    %915 = math.exp %914 : vector<12x12xf32>
    %cst_344 = arith.constant dense<0.000000e+00> : vector<12xf32>
    %916 = vector.multi_reduction <add>, %915, %cst_344 [1] : vector<12x12xf32> to vector<12xf32>
    %917 = vector.shape_cast %916 : vector<12xf32> to vector<12x1xf32>
    %918 = tpu.reciprocal %917 {approx = true} : vector<12x1xf32> -> vector<12x1xf32>
    %919 = vector.broadcast %918 : vector<12x1xf32> to vector<12x12xf32>
    %920 = arith.mulf %915, %919 : vector<12x12xf32>
    %921 = arith.truncf %920 : vector<12x12xf32> to vector<12x12xbf16>
    %922 = vector.extract_strided_slice %582 {offsets = [0, 72], sizes = [12, 4], strides = [1, 1]} : vector<12x80xbf16> to vector<12x4xbf16>
    %cst_345 = arith.constant dense<0.000000e+00> : vector<12x4xf32>
    %923 = tpu.matmul %921, %922, %cst_345 {dimension_numbers = #tpu.dot_dimension_numbers<[1], [0], [0], [1], [0, 0, 1, 1], [], []>} : vector<12x12xbf16>, vector<12x4xbf16>, vector<12x4xf32> -> vector<12x4xf32>
    %c0_346 = arith.constant 0 : index
    %c72_347 = arith.constant 72 : index
    %924 = vector.load %arg25[%c0_346, %c72_347] : memref<12x80xf32, #tpu.memory_space<vmem>>, vector<12x4xf32>
    tpu.vector_store %arg25[%c0_346, %c72_347], %923 {strides = array<i32>} : memref<12x80xf32, #tpu.memory_space<vmem>>, vector<12x4xf32>,
    %925 = vector.extract_strided_slice %580 {offsets = [0, 76], sizes = [12, 4], strides = [1, 1]} : vector<12x80xbf16> to vector<12x4xbf16>
    %926 = vector.extract_strided_slice %581 {offsets = [0, 76], sizes = [12, 4], strides = [1, 1]} : vector<12x80xbf16> to vector<12x4xbf16>
    %cst_348 = arith.constant dense<0.000000e+00> : vector<12x12xf32>
    %927 = tpu.matmul %925, %926, %cst_348 {dimension_numbers = #tpu.dot_dimension_numbers<[1], [1], [0], [0], [0, 0, 1, 0], [], []>} : vector<12x4xbf16>, vector<12x4xbf16>, vector<12x12xf32> -> vector<12x12xf32>
    %928 = arith.addf %927, %11 : vector<12x12xf32>
    %cst_349 = arith.constant dense<0xFF800000> : vector<12xf32>
    %929 = vector.multi_reduction <maximumf>, %928, %cst_349 [1] : vector<12x12xf32> to vector<12xf32>
    %930 = vector.shape_cast %929 : vector<12xf32> to vector<12x1xf32>
    %931 = vector.broadcast %930 : vector<12x1xf32> to vector<12x12xf32>
    %932 = arith.subf %928, %931 : vector<12x12xf32>
    %933 = math.exp %932 : vector<12x12xf32>
    %cst_350 = arith.constant dense<0.000000e+00> : vector<12xf32>
    %934 = vector.multi_reduction <add>, %933, %cst_350 [1] : vector<12x12xf32> to vector<12xf32>
    %935 = vector.shape_cast %934 : vector<12xf32> to vector<12x1xf32>
    %936 = tpu.reciprocal %935 {approx = true} : vector<12x1xf32> -> vector<12x1xf32>
    %937 = vector.broadcast %936 : vector<12x1xf32> to vector<12x12xf32>
    %938 = arith.mulf %933, %937 : vector<12x12xf32>
    %939 = arith.truncf %938 : vector<12x12xf32> to vector<12x12xbf16>
    %940 = vector.extract_strided_slice %582 {offsets = [0, 76], sizes = [12, 4], strides = [1, 1]} : vector<12x80xbf16> to vector<12x4xbf16>
    %cst_351 = arith.constant dense<0.000000e+00> : vector<12x4xf32>
    %941 = tpu.matmul %939, %940, %cst_351 {dimension_numbers = #tpu.dot_dimension_numbers<[1], [0], [0], [1], [0, 0, 1, 1], [], []>} : vector<12x12xbf16>, vector<12x4xbf16>, vector<12x4xf32> -> vector<12x4xf32>
    %c0_352 = arith.constant 0 : index
    %c76_353 = arith.constant 76 : index
    %942 = vector.load %arg25[%c0_352, %c76_353] : memref<12x80xf32, #tpu.memory_space<vmem>>, vector<12x4xf32>
    tpu.vector_store %arg25[%c0_352, %c76_353], %941 {strides = array<i32>} : memref<12x80xf32, #tpu.memory_space<vmem>>, vector<12x4xf32>,
    %c0_354 = arith.constant 0 : index
    %c0_355 = arith.constant 0 : index
    %943 = vector.load %arg25[%c0_354, %c0_355] : memref<12x80xf32, #tpu.memory_space<vmem>>, vector<12x80xf32>
    %944 = arith.truncf %943 : vector<12x80xf32> to vector<12x80xbf16>
    %c1_356 = arith.constant 1 : index
    %c0_357 = arith.constant 0 : index
    %c0_358 = arith.constant 0 : index
    %945 = vector.load %arg13[%c1_356, %c0_357, %c0_358] : memref<2x80x80xbf16, #tpu.memory_space<vmem>>, vector<1x80x80xbf16>
    %946 = vector.shape_cast %945 : vector<1x80x80xbf16> to vector<80x80xbf16>
    %cst_359 = arith.constant dense<0.000000e+00> : vector<12x80xf32>
    %947 = tpu.matmul %944, %946, %cst_359 {dimension_numbers = #tpu.dot_dimension_numbers<[1], [0], [0], [1], [0, 0, 1, 1], [], []>} : vector<12x80xbf16>, vector<80x80xbf16>, vector<12x80xf32> -> vector<12x80xf32>
    %c1_360 = arith.constant 1 : index
    %c0_361 = arith.constant 0 : index
    %c0_362 = arith.constant 0 : index
    %948 = vector.load %arg14[%c1_360, %c0_361, %c0_362] : memref<2x1x80xf32, #tpu.memory_space<vmem>>, vector<1x1x80xf32>
    %949 = vector.shape_cast %948 : vector<1x1x80xf32> to vector<1x80xf32>
    %950 = vector.broadcast %949 : vector<1x80xf32> to vector<12x80xf32>
    %951 = arith.addf %947, %950 : vector<12x80xf32>
    %c1_363 = arith.constant 1 : index
    %c0_364 = arith.constant 0 : index
    %c0_365 = arith.constant 0 : index
    %952 = vector.load %arg15[%c1_363, %c0_364, %c0_365] : memref<2x1x80xf32, #tpu.memory_space<vmem>>, vector<1x1x80xf32>
    %953 = vector.shape_cast %952 : vector<1x1x80xf32> to vector<1x80xf32>
    %954 = vector.broadcast %953 : vector<1x80xf32> to vector<12x80xf32>
    %955 = arith.mulf %954, %951 : vector<12x80xf32>
    %956 = arith.addf %523, %955 : vector<12x80xf32>
    %c1_366 = arith.constant 1 : index
    %c0_367 = arith.constant 0 : index
    %c0_368 = arith.constant 0 : index
    %957 = vector.load %arg16[%c1_366, %c0_367, %c0_368] : memref<2x1x80xf32, #tpu.memory_space<vmem>>, vector<1x1x80xf32>
    %958 = vector.shape_cast %957 : vector<1x1x80xf32> to vector<1x80xf32>
    %c1_369 = arith.constant 1 : index
    %c0_370 = arith.constant 0 : index
    %c0_371 = arith.constant 0 : index
    %959 = vector.load %arg17[%c1_369, %c0_370, %c0_371] : memref<2x1x80xf32, #tpu.memory_space<vmem>>, vector<1x1x80xf32>
    %960 = vector.shape_cast %959 : vector<1x1x80xf32> to vector<1x80xf32>
    %cst_372 = arith.constant dense<0.000000e+00> : vector<12xf32>
    %961 = vector.multi_reduction <add>, %956, %cst_372 [1] : vector<12x80xf32> to vector<12xf32>
    %962 = vector.shape_cast %961 : vector<12xf32> to vector<12x1xf32>
    %cst_373 = arith.constant 8.000000e+01 : f32
    %963 = vector.broadcast %cst_373 : f32 to vector<12x1xf32>
    %964 = arith.divf %962, %963 : vector<12x1xf32>
    %965 = vector.broadcast %964 : vector<12x1xf32> to vector<12x80xf32>
    %966 = arith.subf %956, %965 : vector<12x80xf32>
    %967 = arith.mulf %966, %966 : vector<12x80xf32>
    %cst_374 = arith.constant dense<0.000000e+00> : vector<12xf32>
    %968 = vector.multi_reduction <add>, %967, %cst_374 [1] : vector<12x80xf32> to vector<12xf32>
    %969 = vector.shape_cast %968 : vector<12xf32> to vector<12x1xf32>
    %cst_375 = arith.constant 8.000000e+01 : f32
    %970 = vector.broadcast %cst_375 : f32 to vector<12x1xf32>
    %971 = arith.divf %969, %970 : vector<12x1xf32>
    %972 = vector.broadcast %964 : vector<12x1xf32> to vector<12x80xf32>
    %973 = arith.subf %956, %972 : vector<12x80xf32>
    %cst_376 = arith.constant 9.99999974E-6 : f32
    %974 = vector.broadcast %cst_376 : f32 to vector<12x1xf32>
    %975 = arith.addf %971, %974 : vector<12x1xf32>
    %976 = math.rsqrt %975 : vector<12x1xf32>
    %977 = vector.broadcast %976 : vector<12x1xf32> to vector<12x80xf32>
    %978 = arith.mulf %973, %977 : vector<12x80xf32>
    %979 = vector.broadcast %958 : vector<1x80xf32> to vector<12x80xf32>
    %980 = arith.mulf %978, %979 : vector<12x80xf32>
    %981 = vector.broadcast %960 : vector<1x80xf32> to vector<12x80xf32>
    %982 = arith.addf %980, %981 : vector<12x80xf32>
    %983 = arith.truncf %982 : vector<12x80xf32> to vector<12x80xbf16>
    %c1_377 = arith.constant 1 : index
    %c0_378 = arith.constant 0 : index
    %c0_379 = arith.constant 0 : index
    %984 = vector.load %arg18[%c1_377, %c0_378, %c0_379] : memref<2x80x320xbf16, #tpu.memory_space<vmem>>, vector<1x80x320xbf16>
    %985 = vector.shape_cast %984 : vector<1x80x320xbf16> to vector<80x320xbf16>
    %cst_380 = arith.constant dense<0.000000e+00> : vector<12x320xf32>
    %986 = tpu.matmul %983, %985, %cst_380 {dimension_numbers = #tpu.dot_dimension_numbers<[1], [0], [0], [1], [0, 0, 1, 1], [], []>} : vector<12x80xbf16>, vector<80x320xbf16>, vector<12x320xf32> -> vector<12x320xf32>
    %c1_381 = arith.constant 1 : index
    %c0_382 = arith.constant 0 : index
    %c0_383 = arith.constant 0 : index
    %987 = vector.load %arg19[%c1_381, %c0_382, %c0_383] : memref<2x1x320xf32, #tpu.memory_space<vmem>>, vector<1x1x320xf32>
    %988 = vector.shape_cast %987 : vector<1x1x320xf32> to vector<1x320xf32>
    %989 = vector.broadcast %988 : vector<1x320xf32> to vector<12x320xf32>
    %990 = arith.addf %986, %989 : vector<12x320xf32>
    %cst_384 = arith.constant 5.000000e-01 : f32
    %991 = vector.broadcast %cst_384 : f32 to vector<12x320xf32>
    %992 = arith.mulf %991, %990 : vector<12x320xf32>
    %cst_385 = arith.constant 0.707106769 : f32
    %993 = vector.broadcast %cst_385 : f32 to vector<12x320xf32>
    %994 = arith.mulf %990, %993 : vector<12x320xf32>
    %cst_386 = arith.constant 0.000000e+00 : f32
    %995 = vector.broadcast %cst_386 : f32 to vector<12x320xf32>
    %996 = arith.cmpf oge, %994, %995 : vector<12x320xf32>
    %cst_387 = arith.constant 1.000000e+00 : f32
    %cst_388 = arith.constant -1.000000e+00 : f32
    %997 = vector.broadcast %cst_387 : f32 to vector<12x320xf32>
    %998 = vector.broadcast %cst_388 : f32 to vector<12x320xf32>
    %999 = arith.select %996, %997, %998 : vector<12x320xi1>, vector<12x320xf32>
    %1000 = math.absf %994 : vector<12x320xf32>
    %cst_389 = arith.constant 0.327591091 : f32
    %1001 = vector.broadcast %cst_389 : f32 to vector<12x320xf32>
    %1002 = arith.mulf %1001, %1000 : vector<12x320xf32>
    %cst_390 = arith.constant 1.000000e+00 : f32
    %1003 = vector.broadcast %cst_390 : f32 to vector<12x320xf32>
    %1004 = arith.addf %1003, %1002 : vector<12x320xf32>
    %1005 = tpu.reciprocal %1004 {approx = true} : vector<12x320xf32> -> vector<12x320xf32>
    %cst_391 = arith.constant 1.06140542 : f32
    %1006 = vector.broadcast %cst_391 : f32 to vector<12x320xf32>
    %1007 = arith.mulf %1006, %1005 : vector<12x320xf32>
    %cst_392 = arith.constant -1.45315206 : f32
    %1008 = vector.broadcast %cst_392 : f32 to vector<12x320xf32>
    %1009 = arith.addf %1007, %1008 : vector<12x320xf32>
    %1010 = arith.mulf %1009, %1005 : vector<12x320xf32>
    %cst_393 = arith.constant 1.42141378 : f32
    %1011 = vector.broadcast %cst_393 : f32 to vector<12x320xf32>
    %1012 = arith.addf %1010, %1011 : vector<12x320xf32>
    %1013 = arith.mulf %1012, %1005 : vector<12x320xf32>
    %cst_394 = arith.constant -0.284496725 : f32
    %1014 = vector.broadcast %cst_394 : f32 to vector<12x320xf32>
    %1015 = arith.addf %1013, %1014 : vector<12x320xf32>
    %1016 = arith.mulf %1015, %1005 : vector<12x320xf32>
    %cst_395 = arith.constant 0.254829586 : f32
    %1017 = vector.broadcast %cst_395 : f32 to vector<12x320xf32>
    %1018 = arith.addf %1016, %1017 : vector<12x320xf32>
    %1019 = arith.mulf %1018, %1005 : vector<12x320xf32>
    %cst_396 = arith.constant 0.000000e+00 : f32
    %1020 = vector.broadcast %cst_396 : f32 to vector<12x320xf32>
    %1021 = arith.subf %1020, %1000 : vector<12x320xf32>
    %1022 = arith.mulf %1021, %1000 : vector<12x320xf32>
    %1023 = math.exp %1022 : vector<12x320xf32>
    %1024 = arith.mulf %1019, %1023 : vector<12x320xf32>
    %cst_397 = arith.constant 1.000000e+00 : f32
    %1025 = vector.broadcast %cst_397 : f32 to vector<12x320xf32>
    %1026 = arith.subf %1025, %1024 : vector<12x320xf32>
    %1027 = arith.mulf %999, %1026 : vector<12x320xf32>
    %cst_398 = arith.constant 1.000000e+00 : f32
    %1028 = vector.broadcast %cst_398 : f32 to vector<12x320xf32>
    %1029 = arith.addf %1028, %1027 : vector<12x320xf32>
    %1030 = arith.mulf %992, %1029 : vector<12x320xf32>
    %1031 = arith.truncf %1030 : vector<12x320xf32> to vector<12x320xbf16>
    %c1_399 = arith.constant 1 : index
    %c0_400 = arith.constant 0 : index
    %c0_401 = arith.constant 0 : index
    %1032 = vector.load %arg20[%c1_399, %c0_400, %c0_401] : memref<2x320x80xbf16, #tpu.memory_space<vmem>>, vector<1x320x80xbf16>
    %1033 = vector.shape_cast %1032 : vector<1x320x80xbf16> to vector<320x80xbf16>
    %cst_402 = arith.constant dense<0.000000e+00> : vector<12x80xf32>
    %1034 = tpu.matmul %1031, %1033, %cst_402 {dimension_numbers = #tpu.dot_dimension_numbers<[1], [0], [0], [1], [0, 0, 1, 1], [], []>} : vector<12x320xbf16>, vector<320x80xbf16>, vector<12x80xf32> -> vector<12x80xf32>
    %c1_403 = arith.constant 1 : index
    %c0_404 = arith.constant 0 : index
    %c0_405 = arith.constant 0 : index
    %1035 = vector.load %arg21[%c1_403, %c0_404, %c0_405] : memref<2x1x80xf32, #tpu.memory_space<vmem>>, vector<1x1x80xf32>
    %1036 = vector.shape_cast %1035 : vector<1x1x80xf32> to vector<1x80xf32>
    %1037 = vector.broadcast %1036 : vector<1x80xf32> to vector<12x80xf32>
    %1038 = arith.addf %1034, %1037 : vector<12x80xf32>
    %c1_406 = arith.constant 1 : index
    %c0_407 = arith.constant 0 : index
    %c0_408 = arith.constant 0 : index
    %1039 = vector.load %arg22[%c1_406, %c0_407, %c0_408] : memref<2x1x80xf32, #tpu.memory_space<vmem>>, vector<1x1x80xf32>
    %1040 = vector.shape_cast %1039 : vector<1x1x80xf32> to vector<1x80xf32>
    %1041 = vector.broadcast %1040 : vector<1x80xf32> to vector<12x80xf32>
    %1042 = arith.mulf %1041, %1038 : vector<12x80xf32>
    %1043 = arith.addf %956, %1042 : vector<12x80xf32>
    %1044 = vector.extract_strided_slice %1043 {offsets = [0, 0], sizes = [6, 80], strides = [1, 1]} : vector<12x80xf32> to vector<6x80xf32>
    %c0_409 = arith.constant 0 : index
    %c0_410 = arith.constant 0 : index
    %c0_411 = arith.constant 0 : index
    %1045 = vector.load %arg24[%c0_409, %c0_410, %c0_411] : memref<2x6x80xf32, #tpu.memory_space<vmem>>, vector<1x6x80xf32>
    %1046 = vector.shape_cast %1045 : vector<1x6x80xf32> to vector<6x80xf32>
    %1047 = vector.shape_cast %1044 : vector<6x80xf32> to vector<1x6x80xf32>
    tpu.vector_store %arg24[%c0_409, %c0_410, %c0_411], %1047 {strides = array<i32>} : memref<2x6x80xf32, #tpu.memory_space<vmem>>, vector<1x6x80xf32>,
    %1048 = vector.extract_strided_slice %1043 {offsets = [6, 0], sizes = [6, 80], strides = [1, 1]} : vector<12x80xf32> to vector<6x80xf32>
    %c1_412 = arith.constant 1 : index
    %c0_413 = arith.constant 0 : index
    %c0_414 = arith.constant 0 : index
    %1049 = vector.load %arg24[%c1_412, %c0_413, %c0_414] : memref<2x6x80xf32, #tpu.memory_space<vmem>>, vector<1x6x80xf32>
    %1050 = vector.shape_cast %1049 : vector<1x6x80xf32> to vector<6x80xf32>
    %1051 = vector.shape_cast %1048 : vector<6x80xf32> to vector<1x6x80xf32>
    tpu.vector_store %arg24[%c1_412, %c0_413, %c0_414], %1051 {strides = array<i32>} : memref<2x6x80xf32, #tpu.memory_space<vmem>>, vector<1x6x80xf32>,
    return
  }
}

</mosaic_0001>

<bundles_post_ra>
// kernel: region_transformer_forward.1
= control target key start
LH: loop header
LB: loop body
LE: loop exit
PB: predicated region body
PF: predicated region fallthrough
CT: control target
= control target key end

     0   :  { %v12677_v1 = vmov 0.0   ;;  %vm9809_vm0 = vmmov 0   ;;  %vm246_vm1 = vcmask 1042432   ;;  %vm242_vm2 = vcmask 441344   ;;  %s12662_s25 = smov 124   ;;  %s12648_s28 = smov 88   ;;  %s12606_s1 = inlined_call_operand.vmem [shape: bf16[310,80], index: 1, kind: input, shape index: {}]   ;;  %s12607_s0 = inlined_call_operand.vmem [shape: f32[10,310], index: 0, kind: input, shape index: {}]   ;;  %s12608_s3 = inlined_call_operand.vmem [shape: f32[5,80], index: 3, kind: input, shape index: {}]   ;;  %s12609_s2 = inlined_call_operand.vmem [shape: f32[1,80], index: 2, kind: input, shape index: {}]   ;;  %s12610_s7 = inlined_call_operand.vmem [shape: bf16[2,80,80], index: 7, kind: input, shape index: {}]   ;;  %s12611_s9 = inlined_call_operand.vmem [shape: bf16[2,80,80], index: 9, kind: input, shape index: {}]   ;;  %s12612_s11 = inlined_call_operand.vmem [shape: bf16[2,80,80], index: 11, kind: input, shape index: {}]   ;;  %s12613_s5 = inlined_call_operand.vmem [shape: f32[2,1,80], index: 5, kind: input, shape index: {}]   ;;  %s12614_s6 = inlined_call_operand.vmem [shape: f32[2,1,80], index: 6, kind: input, shape index: {}]   ;;  %s12615_s8 = inlined_call_operand.vmem [shape: f32[2,1,80], index: 8, kind: input, shape index: {}]   ;;  %s12616_s10 = inlined_call_operand.vmem [shape: f32[2,1,80], index: 10, kind: input, shape index: {}]   ;;  %s12617_s12 = inlined_call_operand.vmem [shape: f32[2,1,80], index: 12, kind: input, shape index: {}]   ;;  %s12618_s4 = inlined_call_operand.vmem [shape: f32[12,12], index: 4, kind: input, shape index: {}]   ;;  %s12619_s13 = inlined_call_operand.vmem [shape: bf16[2,80,80], index: 13, kind: input, shape index: {}]   ;;  %s12620_s14 = inlined_call_operand.vmem [shape: f32[2,1,80], index: 14, kind: input, shape index: {}]   ;;  %s12621_s15 = inlined_call_operand.vmem [shape: f32[2,1,80], index: 15, kind: input, shape index: {}]   ;;  %s12622_s18 = inlined_call_operand.vmem [shape: bf16[2,80,320], index: 18, kind: input, shape index: {}]   ;;  %s12623_s16 = inlined_call_operand.vmem [shape: f32[2,1,80], index: 16, kind: input, shape index: {}]   ;;  %s12624_s17 = inlined_call_operand.vmem [shape: f32[2,1,80], index: 17, kind: input, shape index: {}]   ;;  %s12625_s20 = inlined_call_operand.vmem [shape: bf16[2,320,80], index: 20, kind: input, shape index: {}]   ;;  %s12626_s19 = inlined_call_operand.vmem [shape: f32[2,1,320], index: 19, kind: input, shape index: {}]   ;;  %s12627_s21 = inlined_call_operand.vmem [shape: f32[2,1,80], index: 21, kind: input, shape index: {}]   ;;  %s12628_s22 = inlined_call_operand.vmem [shape: f32[2,1,80], index: 22, kind: input, shape index: {}]   ;;  %s12629_s23 = inlined_call_operand.vmem [shape: f32[2,6,80], index: 23, kind: output, shape index: {0}]   ;;  %s12630_s24 = inlined_call_operand.vmem [shape: f32[2,6,80], index: 24, kind: output, shape index: {1}]  }
   0x1   :  { %12759 = sst [smem:[#allocation15_spill]] %s12606_s1  ;;  %8591 = vmatprep.subr.bf16.mxu1 %v12677_v1  ;;  %8599 = vmatprep.mubr.msk.bf16.mxu1 %vm9809_vm0, %v12677_v1  ;;  %v344_v34 = vlaneseq  ;;  %vm357_vm3 = vcmask 1040384   ;;  %vm359_vm4 = vcmask 1045504   ;;  %vm361_vm5 = vcmask 1046528  }
   0x2   :  { %12760 = sst [smem:[#allocation16_spill]] %s12607_s0  ;;  %s12772_s27 = sld [smem:[#allocation15_spill]]  ;;  %vm351_vm6 = vcmask 1041408   ;;  %vm367_vm7 = vcmask 654336   ;;  %vm371_vm8 = vcmask 650240   ;;  %vm683_vm9 = vcmask 31744  }
   0x3   :  { %12761 = sst [smem:[#allocation17_spill]] %s12608_s3  ;;  %s12773_s1 = sld [smem:[#allocation16_spill]]  ;;  %v10061_v37 = vshrl.u32 %v344_v34, 7  ;;  %vm731_vm10 = vcmask 97280   ;;  %vm735_vm11 = vcmask 93184   ;;  %vm804_vm12 = vcmask 27648  }
   0x4   :  { %12762 = sst [smem:[#allocation18_spill]] %s12609_s2  ;;  %s12638_s0 = smov 108   ;;  %vm940_vm13 = vcmask 64544   ;;  %vm12717_vm14 = vcmask 60448   ;;  %vm12715_vm15 = vcmask 97344  }
   0x5   :  { %12763 = sst [smem:[#allocation19_spill]] %s12610_s7  ;;  %s12774_s7 = sld [smem:[#allocation17_spill]]  ;;  %12775 = vst [vmem:[#allocation3_spill] sm:$0xff] %v10061_v37  ;;  %v10064_v44 = vsub.s32 0, %v10061_v37 }
   0x6   :  { %12764 = sst [smem:[#allocation20_spill]] %s12611_s9  ;;  %s12777_s26 = sld [smem:[#allocation18_spill]] }
   0x7   :  { %12765 = sst [smem:[#allocation21_spill]] %s12612_s11  ;;  %12776 = vst [vmem:[#allocation4_spill] sm:$0xff] %v10064_v44  ;;  %s12780_s3 = sld [smem:[#allocation19_spill]] }
   0x8   :  { %12766 = sst [smem:[#allocation22_spill]] %s12613_s5  ;;  %v9282_v0 = vld [vmem:[%s12772_s27 + $0x40] sm:$0xff]   ;;  %v9284_v3 = vld [vmem:[%s12772_s27 + $0x48] sm:$0xff]   ;;  %v9286_v5 = vld [vmem:[%s12772_s27 + $0x50] sm:$0xff]   ;;  %s12781_s30 = sld [smem:[#allocation20_spill]] }
   0x9   :  { %12767 = sst [smem:[#allocation23_spill]] %s12614_s6  ;;  %v9283_v2 = vld [vmem:[%s12772_s27] sm:$0xff]   ;;  %8290 = vmatprep.subr.bf16.mxu0 %v9282_v0  ;;  %v9285_v4 = vld [vmem:[%s12772_s27 + $0x8] sm:$0xff]   ;;  %v9287_v6 = vld [vmem:[%s12772_s27 + $0x10] sm:$0xff]   ;;  %s12784_s29 = sld [smem:[#allocation21_spill]] }
   0xa   :  { %12768 = sst [smem:[#allocation24_spill]] %s12619_s13  ;;  %8291 = vmatpush3.bf16.msra.mxu0 %v9283_v2  ;;  %v9288_v7 = vld [vmem:[%s12772_s27 + $0x58] sm:$0xff]   ;;  %v9292_v8 = vld [vmem:[%s12772_s27 + $0x80] sm:$0xff]   ;;  %v9295_v11 = vld [vmem:[%s12772_s27 + $0x88] sm:$0xff]   ;;  %s12666_s6 = smov 116  }
   0xb   :  { %12769 = sst [smem:[#allocation25_spill]] %s12620_s14  ;;  %8292 = vmatprep.subr.bf16.mxu0 %v9284_v3  ;;  %v9289_v9 = vld [vmem:[%s12772_s27 + $0x18] sm:$0xff]   ;;  %v9290_v10 = vld [vmem:[%s12772_s27 + $0x60] sm:$0xff]   ;;  %8592 = vmatpush3.bf16.msra.mxu1 %v9292_v8  ;;  %v9293_v13 = vld [vmem:[%s12772_s27 + $0x68] sm:$0xff]   ;;  %s12640_s11 = smov 104  }
   0xc   :  { %12770 = sst [smem:[#allocation26_spill]] %s12621_s15  ;;  %8593 = vmatprep.subr.bf16.mxu1 %v12677_v1  ;;  %v9291_v12 = vld [vmem:[%s12772_s27 + $0x20] sm:$0xff]   ;;  %v9298_v14 = vld [vmem:[%s12772_s27 + $0x90] sm:$0xff]   ;;  %v9294_v15 = vld [vmem:[%s12772_s27 + $0x28] sm:$0xff]   ;;  %s12642_s5 = smov 100  }
   0xd   :  { %12771 = sst [smem:[#allocation27_spill]] %s12630_s24  ;;  %v9301_v16 = vld [vmem:[%s12772_s27 + $0x98] ss:$0 sps:$4 sm:$0x77]   ;;  %v78_v17 = vld [vmem:[%s12773_s1 + $0x8] sm:$0xff]  ;;  %v9296_v18 = vld [vmem:[%s12772_s27 + $0x70] sm:$0xff]  }
   0xe   :  { %8293 = vmatpush3.bf16.msra.mxu0 %v9285_v4  ;;  %v81_v19 = vld [vmem:[%s12773_s1 + $0x20] sm:$0x3]  ;;  %v248_v20 = vsel %vm246_vm1, %v9301_v16, 0  ;;  %v79_v22 = vld [vmem:[%s12773_s1 + $0x10] sm:$0xff]  ;;  %v82_v23 = vld [vmem:[%s12773_s1 + $0x28] sm:$0x3] }
   0xf   :  { %8294 = vmatprep.subr.bf16.mxu0 %v9286_v5  ;;  %8594 = vmatpush3.bf16.msra.mxu1 %v9295_v11  ;;  %v84_v21 = vpack.c.bf16 %v81_v19, %v78_v17  ;;  %v9297_v24 = vld [vmem:[%s12772_s27 + $0x30] sm:$0xff]   ;;  %v85_v25 = vpack.c.bf16 %v82_v23, %v79_v22  ;;  %v9299_v26 = vld [vmem:[%s12772_s27 + $0x78] sm:$0xff]   ;;  %v77_v28 = vld [vmem:[%s12773_s1] sm:$0xff]  ;;  %s12644_s2 = smov 96   ;;  %s12646_s9 = smov 92   ;;  %vm12714_vm1 = vcmask 93248  }
  0x10   :  { %8595 = vmatprep.subr.bf16.mxu1 %v12677_v1  ;;  %v9300_v27 = vld [vmem:[%s12772_s27 + $0x38] sm:$0xff]   ;;  %v333_v36 = vld [vmem:[%s12774_s7] sm:$0x1f]  ;;  %v9304_v11 = vld [vmem:[%s12780_s3 + $0x8] sm:$0xff]   ;;  %s12782_s7 = sld [smem:[#allocation22_spill]]  ;;  %s12668_s27 = smov 120  }
  0x11   :  { %282 = vmatprep.mubr.bf16.mxu0 %v84_v21  ;;  %v80_v29 = vld [vmem:[%s12773_s1 + $0x18] sm:$0x3]  ;;  %v336_v41 = vrot.slane %v333_v36, 3  ;;  %v332_v47 = vld [vmem:[%s12777_s26] sm:$0x1]  ;;  %s12783_s26 = sld [smem:[#allocation23_spill]] }
  0x12   :  { %8295 = vmatpush3.bf16.msra.mxu0 %v9287_v6  ;;  %v83_v30 = vpack.c.bf16 %v80_v29, %v77_v28  ;;  %v347_v51 = vrot.slane %v332_v47, %v10064_v44  ;;  %v9309_v16 = vld [vmem:[%s12781_s30 + $0x18] sm:$0xff]   ;;  %v9310_v17 = vld [vmem:[%s12780_s3 + $0x20] sm:$0xff]   ;;  %s12670_s1 = smov 112   ;;  %s12801_s24 = smov 76  }
  0x13   :  { %8296 = vmatprep.subr.bf16.mxu0 %v9288_v7  ;;  %8596 = vmatpush3.bf16.msra.mxu1 %v9298_v14  ;;  %v9307_v14 = vld [vmem:[%s12781_s30 + $0x10] sm:$0xff]  }
  0x14   :  { %8597 = vmatprep.subr.bf16.mxu1 %v12677_v1 }
  0x16   :  { %8297 = vmatpush3.bf16.msra.mxu0 %v9289_v9  ;;  %v9302_v9 = vld [vmem:[%s12780_s3] sm:$0xff]  }
  0x17   :  { %8298 = vmatprep.subr.bf16.mxu0 %v9290_v10  ;;  %8598 = vmatpush3.bf16.msra.mxu1 %v248_v20  ;;  %v9303_v10 = vld [vmem:[%s12781_s30] sm:$0xff]  }
  0x18   :  { %8603 = vmatprep.subr.bf16.mxu1 %v12677_v1 }
  0x1a   :  { %8299 = vmatpush3.bf16.msra.mxu0 %v9291_v12  ;;  %8600 = vmatmul.mubr.msk.bf16.vlgmr.msra.gmra.mrb[0].mxu1 %vm242_vm2, %v85_v25  ;;  %v9305_v12 = vld [vmem:[%s12781_s30 + $0x8] sm:$0xff]   ;;  %vm12713_vm2 = vcmask 130144  }
  0x1b   :  { %8300 = vmatprep.subr.bf16.mxu0 %v9293_v13  ;;  %8613 = vmatprep.mubr.msk.bf16.mxu1 %vm9809_vm0, %v12677_v1  ;;  %v9306_v13 = vld [vmem:[%s12780_s3 + $0x10] sm:$0xff]  }
  0x1c   :  { %8604 = vmatpush3.bf16.msra.mxu1 %v9302_v9 }
  0x1d   :  { %8605 = vmatprep.subr.bf16.mxu1 %v12677_v1 }
  0x1e   :  { %8301 = vmatpush3.bf16.msra.mxu0 %v9294_v15  ;;  %v9308_v15 = vld [vmem:[%s12780_s3 + $0x18] sm:$0xff]  }
  0x1f   :  { %8302 = vmatprep.subr.bf16.mxu0 %v9296_v18  ;;  %v9311_v18 = vld [vmem:[%s12781_s30 + $0x20] sm:$0xff]  }
  0x20   :  { %8606 = vmatpush3.bf16.msra.mxu1 %v9304_v11 }
  0x21   :  { %8607 = vmatprep.subr.bf16.mxu1 %v12677_v1 }
  0x22   :  { %8303 = vmatpush3.bf16.msra.mxu0 %v9297_v24 }
  0x23   :  { %8304 = vmatprep.subr.bf16.mxu0 %v9299_v26 }
  0x24   :  { %8608 = vmatpush3.bf16.msra.mxu1 %v9306_v13 }
  0x25   :  { %8609 = vmatprep.subr.bf16.mxu1 %v12677_v1 }
  0x26   :  { %8305 = vmatpush3.bf16.msra.mxu0 %v9300_v27  ;;  %v7948_v27 = vld [vmem:[%s12782_s7] ss:$0 sm:$0xff] }
  0x27   :  { %8617 = vmatprep.subr.bf16.mxu0 %v12677_v1 }
  0x28   :  { %8610 = vmatpush3.bf16.msra.mxu1 %v9308_v15 }
  0x29   :  { %283 = vmatmul.mubr.bf16.vlgmr.msra.gmra.mrb[0].mxu0 %v83_v30  ;;  %8611 = vmatprep.subr.bf16.mxu1 %v12677_v1 }
  0x2a   :  { %8627 = vmatprep.mubr.msk.bf16.mxu0 %vm9809_vm0, %v12677_v1  ;;  %8618 = vmatpush3.bf16.msra.mxu0 %v9303_v10 }
  0x2b   :  { %8619 = vmatprep.subr.bf16.mxu0 %v12677_v1 }
  0x2c   :  { %8612 = vmatpush3.bf16.msra.mxu1 %v9310_v17 }
  0x2d   :  { %8631 = vmatprep.subr.bf16.mxu1 %v12677_v1 }
  0x2e   :  { %8620 = vmatpush3.bf16.msra.mxu0 %v9305_v12 }
  0x2f   :  { %8621 = vmatprep.subr.bf16.mxu0 %v12677_v1 }
  0x32   :  { %8622 = vmatpush3.bf16.msra.mxu0 %v9307_v14 }
  0x33   :  { %8623 = vmatprep.subr.bf16.mxu0 %v12677_v1 }
  0x36   :  { %8624 = vmatpush3.bf16.msra.mxu0 %v9309_v16 }
  0x37   :  { %8625 = vmatprep.subr.bf16.mxu0 %v12677_v1 }
  0x3a   :  { %8626 = vmatpush3.bf16.msra.mxu0 %v9311_v18 }
  0x3b   :  { %8645 = vmatprep.subr.bf16.mxu0 %v12677_v1 }
  0xed   :  { %v325_v31 = vpop.f32.mrb[0].mxu1 }
  0xee   :  { %v8601_v32 = vpop.f32.mrb[1].mxu1 }
  0xef   :  { %v328_v33 = vpop.f32.mrb[2].mxu1 }
  0xf0   :  { %v8602_v35 = vpop.f32.mrb[3].mxu1 }
  0xf1   :  { %v9312_v35 = vld [vmem:[%s12784_s29] sm:$0xff]  }
  0xfc   :  { %v8306_v38 = vpop.f32.mrb[0].mxu0 }
  0xfd   :  { %v8307_v39 = vpop.f32.mrb[1].mxu0 }
  0xfe   :  { %v8308_v40 = vadd.f32 %v8307_v39, %v8306_v38  ;;  %v8309_v42 = vpop.f32.mrb[2].mxu0  ;;  %v9313_v38 = vld [vmem:[%s12784_s29 + $0x8] sm:$0xff]   ;;  %v9314_v39 = vld [vmem:[%s12784_s29 + $0x10] sm:$0xff]  }
  0xff   :  { %v8310_v43 = vpop.f32.mrb[3].mxu0 }
 0x100   :  { %v326_v45 = vadd.f32 %v8308_v40, %v325_v31  ;;  %v8311_v46 = vadd.f32 %v8310_v43, %v8309_v42  ;;  %v7949_v31 = vld [vmem:[%s12783_s26] ss:$0 sm:$0xff]  ;;  %v9315_v40 = vld [vmem:[%s12784_s29 + $0x18] sm:$0xff]  }
 0x101   :  { %v7950_v42 = vld [vmem:[%s12615_s8] ss:$0 sm:$0xff] }
 0x102   :  { %v334_v48 = vadd.f32 %v333_v36, %v326_v45  ;;  %v338_v49 = vadd.f32 %v336_v41, %v326_v45  ;;  %v329_v50 = vadd.f32 %v8311_v46, %v328_v33  ;;  %v7957_v45 = vld [vmem:[%s12616_s10] ss:$0 sm:$0xff] }
 0x104   :  { %v341_v52 = vrot.slane %v334_v48, 7  ;;  %v339_v53 = vadd.f32 %v336_v41, %v329_v50  ;;  %v352_v54 = vrot.slane %v338_v49, 6  ;;  %v9316_v41 = vld [vmem:[%s12784_s29 + $0x20] sm:$0xff]  }
 0x106   :  { %v353_v55 = vrot.slane %v339_v53, 6  ;;  %v358_v56 = vsel %vm357_vm3, %v332_v47, %v341_v52  ;;  %vm12710_vm3 = vcmask 126048  }
 0x107   :  { %v360_v57 = vsel %vm359_vm4, %v358_v56, %v347_v51 }
 0x108   :  { %v10071_v58 = vsel %vm361_vm5, %v360_v57, %v352_v54  ;;  %v10073_v59 = vsel %vm351_vm6, %v352_v54, %v353_v55  ;;  %vm12711_vm5 = vcmask 162944   ;;  %vm12712_vm6 = vcmask 158848  }
 0x109   :  { %12778 = vst [vmem:[#allocation5_spill] sm:$0xff] %v10071_v58  ;;  %12779 = vst [vmem:[#allocation6_spill] sm:$0xff] %v10073_v59  ;;  %v368_v60 = vsel %vm367_vm7, %v10071_v58, 0.0  ;;  %v372_v61 = vsel %vm371_vm8, %v10073_v59, 0.0 }
 0x10a   :  { %369 = vadd.xlane.f32.xlu0 %v368_v60 }
 0x10e   :  { %373 = vadd.xlane.f32.xlu0 %v372_v61 }
 0x197   :  { %v370_v62 = vpop.xlane.xlu0 %369 }
 0x198   :  { %v376_v63 = vmul.f32 0.0125, %v370_v62  ;;  %v7964_v62 = vld [vmem:[%s12617_s12] ss:$0 sm:$0xff] }
 0x19a   :  { %v378_v0 = vsub.f32 %v10071_v58, %v376_v63 }
 0x19b   :  { %v374_v2 = vpop.xlane.xlu0 %373 }
 0x19c   :  { %v377_v3 = vmul.f32 0.0125, %v374_v2  ;;  %v380_v4 = vmul.f32 %v378_v0, %v378_v0 }
 0x19e   :  { %v379_v5 = vsub.f32 %v10073_v59, %v377_v3  ;;  %v382_v6 = vsel %vm367_vm7, %v380_v4, 0.0 }
 0x19f   :  { %383 = vadd.xlane.f32.xlu1 %v382_v6 }
 0x1a0   :  { %v381_v7 = vmul.f32 %v379_v5, %v379_v5 }
 0x1a2   :  { %v385_v8 = vsel %vm371_vm8, %v381_v7, 0.0 }
 0x1a3   :  { %386 = vadd.xlane.f32.xlu1 %v385_v8 }
 0x22c   :  { %v384_v19 = vpop.xlane.xlu1 %383 }
 0x22d   :  { %v388_v20 = vmul.f32 0.0125, %v384_v19 }
 0x22f   :  { %v390_v21 = vadd.f32 1e-05, %v388_v20 }
 0x230   :  { %v387_v22 = vpop.xlane.xlu1 %386 }
 0x231   :  { %9422 = vrsqrt.f32 %v390_v21  ;;  %v389_v23 = vmul.f32 0.0125, %v387_v22 }
 0x233   :  { %v391_v24 = vadd.f32 1e-05, %v389_v23 }
 0x235   :  { %9424 = vrsqrt.f32 %v391_v24 }
 0x23b   :  { %v9423_v25 = vpop.eup %9422 }
 0x23c   :  { %v394_v26 = vmul.f32 %v9423_v25, %v378_v0 }
 0x23e   :  { %v402_v29 = vmul.f32 %v7948_v27, %v394_v26 }
 0x23f   :  { %v9425_v28 = vpop.eup %9424 }
 0x240   :  { %v395_v30 = vmul.f32 %v9425_v28, %v379_v5  ;;  %v410_v33 = vadd.f32 %v7949_v31, %v402_v29 }
 0x242   :  { %v403_v32 = vmul.f32 %v7948_v27, %v395_v30 }
 0x244   :  { %v411_v34 = vadd.f32 %v7949_v31, %v403_v32 }
 0x246   :  { %v412_v36 = vpack.c.bf16 %v411_v34, %v410_v33 }
 0x248   :  { %8614 = vmatmul.mubr.msk.bf16.vlgmr.msra.gmra.mrb[4].mxu1 %vm367_vm7, %v412_v36  ;;  %8628 = vmatmul.mubr.msk.bf16.vlgmr.msra.gmra.mrb[4].mxu0 %vm367_vm7, %v412_v36 }
 0x249   :  { %8632 = vmatpush3.bf16.msra.mxu1 %v9312_v35  ;;  %8641 = vmatprep.mubr.msk.bf16.mxu1 %vm9809_vm0, %v12677_v1 }
 0x24a   :  { %8633 = vmatprep.subr.bf16.mxu1 %v12677_v1  ;;  %8647 = vmatprep.mubr.msk.bf16.mxu0 %vm9809_vm0, %v12677_v1 }
 0x24d   :  { %8634 = vmatpush3.bf16.msra.mxu1 %v9313_v38 }
 0x24e   :  { %8635 = vmatprep.subr.bf16.mxu1 %v12677_v1 }
 0x251   :  { %8636 = vmatpush3.bf16.msra.mxu1 %v9314_v39 }
 0x252   :  { %8637 = vmatprep.subr.bf16.mxu1 %v12677_v1 }
 0x255   :  { %8638 = vmatpush3.bf16.msra.mxu1 %v9315_v40 }
 0x256   :  { %8639 = vmatprep.subr.bf16.mxu1 %v12677_v1 }
 0x259   :  { %8640 = vmatpush3.bf16.msra.mxu1 %v9316_v41 }
 0x25a   :  { %8651 = vmatprep.subr.bf16.mxu1 %v12677_v1 }
 0x25c   :  { %8642 = vmatmul.mubr.msk.bf16.vlgmr.msra.gmra.mrb[8].mxu1 %vm367_vm7, %v412_v36 }
 0x25d   :  { %8653 = vmatprep.mubr.msk.bf16.mxu1 %vm9809_vm0, %v12677_v1 }
 0x31b   :  { %v497_v43 = vpop.f32.mrb[4].mxu1  ;;  %v585_v46 = vpop.f32.mrb[4].mxu0 }
 0x31c   :  { %v8615_v47 = vpop.f32.mrb[5].mxu1  ;;  %v8629_v48 = vpop.f32.mrb[5].mxu0  ;;  %v498_v51 = vadd.f32 %v7950_v42, %v497_v43  ;;  %v586_v52 = vadd.f32 %v7957_v45, %v585_v46 }
 0x31d   :  { %v500_v49 = vpop.f32.mrb[6].mxu1  ;;  %v588_v50 = vpop.f32.mrb[6].mxu0 }
 0x31e   :  { %v501_v53 = vadd.f32 %v7950_v42, %v500_v49  ;;  %v589_v54 = vadd.f32 %v7957_v45, %v588_v50  ;;  %v8616_v55 = vpop.f32.mrb[7].mxu1  ;;  %v8630_v56 = vpop.f32.mrb[7].mxu0  ;;  %v10348_v50 = vld [vmem:[%s12618_s4] sm:$0xff] }
 0x320   :  { %v10164_v57 = vpack.c.bf16 %v501_v53, %v498_v51  ;;  %v10166_v60 = vpack.c.bf16 %v589_v54, %v586_v52  ;;  %v10355_v53 = vld [vmem:[%s12618_s4 + $0x8] sm:$0xf] }
 0x322   :  { %810 = vrot.lane.b32.xlu0 %v10166_v60, %s12662_s25  ;;  %807 = vrot.lane.b32.xlu1 %v10164_v57, %s12662_s25  ;;  %v688_v61 = vsel %vm683_vm9, %v10166_v60, 0 }
 0x323   :  { %8646 = vmatpush3.bf16.xpose.msra.mxu0 %v688_v61 }
 0x324   :  { %8657 = vmatprep.subr.bf16.mxu0 %v12677_v1 }
 0x326   :  { %1081 = vrot.lane.b32.xlu0 %v10166_v60, %s12666_s6  ;;  %946 = vrot.lane.b32.xlu1 %v10166_v60, %s12668_s27 }
 0x32a   :  { %1216 = vrot.lane.b32.xlu0 %v10166_v60, %s12670_s1  ;;  %944 = vrot.lane.b32.xlu1 %v10164_v57, %s12668_s27 }
 0x32b   :  { %8648 = vmatmul.mubr.msk.bf16.vlgmr.msra.gmra.mrb[8].mxu0 %vm683_vm9, %v10164_v57 }
 0x32c   :  { %8659 = vmatprep.mubr.msk.bf16.mxu0 %vm9809_vm0, %v12677_v1 }
 0x32e   :  { %1351 = vrot.lane.b32.xlu0 %v10166_v60, %s12638_s0  ;;  %1079 = vrot.lane.b32.xlu1 %v10164_v57, %s12666_s6 }
 0x32f   :  { %v673_v63 = vpop.f32.mrb[8].mxu1 }
 0x330   :  { %v8643_v0 = vpop.f32.mrb[9].mxu1  ;;  %v674_v3 = vadd.f32 %v7964_v62, %v673_v63 }
 0x331   :  { %v676_v2 = vpop.f32.mrb[10].mxu1 }
 0x332   :  { %v677_v4 = vadd.f32 %v7964_v62, %v676_v2  ;;  %v8644_v5 = vpop.f32.mrb[11].mxu1  ;;  %1486 = vrot.lane.b32.xlu0 %v10166_v60, %s12640_s11  ;;  %1214 = vrot.lane.b32.xlu1 %v10164_v57, %s12670_s1 }
 0x334   :  { %v10198_v6 = vpack.c.bf16 %v677_v4, %v674_v3 }
 0x336   :  { %1621 = vrot.lane.b32.xlu0 %v10166_v60, %s12642_s5  ;;  %1349 = vrot.lane.b32.xlu1 %v10164_v57, %s12638_s0  ;;  %v760_v7 = vsel %vm359_vm4, %v10198_v6, 0  ;;  %s12650_s0 = smov 84  }
 0x337   :  { %8652 = vmatpush3.bf16.msra.mxu1 %v760_v7 }
 0x338   :  { %8663 = vmatprep.subr.bf16.mxu1 %v12677_v1 }
 0x33a   :  { %1756 = vrot.lane.b32.xlu0 %v10166_v60, %s12644_s2  ;;  %1484 = vrot.lane.b32.xlu1 %v10164_v57, %s12640_s11  ;;  %s12652_s11 = smov 80  }
 0x33e   :  { %1891 = vrot.lane.b32.xlu0 %v10166_v60, %s12646_s9  ;;  %1619 = vrot.lane.b32.xlu1 %v10164_v57, %s12642_s5  ;;  %s12654_s5 = smov 76  }
 0x342   :  { %2026 = vrot.lane.b32.xlu0 %v10166_v60, %s12648_s28  ;;  %1754 = vrot.lane.b32.xlu1 %v10164_v57, %s12644_s2  ;;  %s12674_s2 = smov 72  }
 0x346   :  { %2161 = vrot.lane.b32.xlu0 %v10166_v60, %s12650_s0  ;;  %1889 = vrot.lane.b32.xlu1 %v10164_v57, %s12646_s9  ;;  %s12672_s9 = smov 68  }
 0x34a   :  { %2296 = vrot.lane.b32.xlu0 %v10166_v60, %s12652_s11  ;;  %2024 = vrot.lane.b32.xlu1 %v10164_v57, %s12648_s28  ;;  %s12656_s28 = smov 64  }
 0x34e   :  { %2431 = vrot.lane.b32.xlu0 %v10166_v60, %s12654_s5  ;;  %2159 = vrot.lane.b32.xlu1 %v10164_v57, %s12650_s0  ;;  %s12658_s0 = smov 60  }
 0x352   :  { %2566 = vrot.lane.b32.xlu0 %v10166_v60, %s12674_s2  ;;  %2294 = vrot.lane.b32.xlu1 %v10164_v57, %s12652_s11  ;;  %s12660_s11 = smov 56  }
 0x356   :  { %2701 = vrot.lane.b32.xlu0 %v10166_v60, %s12672_s9  ;;  %2429 = vrot.lane.b32.xlu1 %v10164_v57, %s12654_s5  ;;  %s12664_s5 = smov 52  }
 0x35a   :  { %2836 = vrot.lane.b32.xlu0 %v10166_v60, %s12656_s28  ;;  %2564 = vrot.lane.b32.xlu1 %v10164_v57, %s12674_s2  ;;  %s12804_s2 = smov 68  }
 0x35e   :  { %2971 = vrot.lane.b32.xlu0 %v10166_v60, %s12658_s0  ;;  %2699 = vrot.lane.b32.xlu1 %v10164_v57, %s12672_s9  ;;  %s12805_s9 = smov 64  }
 0x362   :  { %3106 = vrot.lane.b32.xlu0 %v10166_v60, %s12660_s11  ;;  %2834 = vrot.lane.b32.xlu1 %v10164_v57, %s12656_s28  ;;  %s12785_s28 = smov 108  }
 0x366   :  { %3241 = vrot.lane.b32.xlu0 %v10166_v60, %s12664_s5  ;;  %2969 = vrot.lane.b32.xlu1 %v10164_v57, %s12658_s0  ;;  %s12786_s0 = smov 104  }
 0x36a   :  { %3104 = vrot.lane.b32.xlu1 %v10164_v57, %s12660_s11  ;;  %883 = vrot.lane.b32.xlu0 %v10198_v6, %s12662_s25  ;;  %s12787_s11 = smov 100   ;;  %s12788_s25 = smov 96  }
 0x36e   :  { %3239 = vrot.lane.b32.xlu1 %v10164_v57, %s12664_s5  ;;  %1153 = vrot.lane.b32.xlu0 %v10198_v6, %s12666_s6  ;;  %s12789_s5 = smov 92   ;;  %s12790_s6 = smov 88  }
 0x372   :  { %1018 = vrot.lane.b32.xlu1 %v10198_v6, %s12668_s27  ;;  %1288 = vrot.lane.b32.xlu0 %v10198_v6, %s12670_s1  ;;  %s12791_s27 = smov 84   ;;  %s12792_s1 = smov 80  }
 0x376   :  { %1423 = vrot.lane.b32.xlu1 %v10198_v6, %s12785_s28  ;;  %1558 = vrot.lane.b32.xlu0 %v10198_v6, %s12786_s0  ;;  %s12689_s0 = smov 12  }
 0x37a   :  { %1693 = vrot.lane.b32.xlu1 %v10198_v6, %s12787_s11  ;;  %1828 = vrot.lane.b32.xlu0 %v10198_v6, %s12788_s25  ;;  %s12685_s25 = smov 4   ;;  %s12687_s11 = smov 8  }
 0x37e   :  { %1963 = vrot.lane.b32.xlu1 %v10198_v6, %s12789_s5  ;;  %2098 = vrot.lane.b32.xlu0 %v10198_v6, %s12790_s6  ;;  %s12807_s6 = smov 52   ;;  %s12808_s5 = smov 56  }
 0x382   :  { %2233 = vrot.lane.b32.xlu1 %v10198_v6, %s12791_s27  ;;  %2368 = vrot.lane.b32.xlu0 %v10198_v6, %s12792_s1  ;;  %s12802_s1 = smov 72   ;;  %s12806_s27 = smov 60  }
 0x394   :  { %v811_v8 = vpop.permute.xlu0 %810  ;;  %v808_v9 = vpop.permute.xlu1 %807 }
 0x395   :  { %v816_v10 = vsel %vm683_vm9, %v811_v8, 0 }
 0x396   :  { %8658 = vmatpush3.bf16.xpose.msra.mxu0 %v816_v10 }
 0x397   :  { %8669 = vmatprep.subr.bf16.mxu0 %v12677_v1 }
 0x398   :  { %v947_v11 = vpop.permute.xlu1 %946  ;;  %v1082_v13 = vpop.permute.xlu0 %1081 }
 0x399   :  { %v952_v12 = vsel %vm683_vm9, %v947_v11, 0  ;;  %v1087_v15 = vsel %vm683_vm9, %v1082_v13, 0 }
 0x39c   :  { %v945_v14 = vpop.permute.xlu1 %944  ;;  %v1217_v16 = vpop.permute.xlu0 %1216 }
 0x39d   :  { %8660 = vmatmul.mubr.msk.bf16.vlgmr.msra.gmra.mrb[12].mxu0 %vm683_vm9, %v808_v9  ;;  %v1222_v18 = vsel %vm683_vm9, %v1217_v16, 0 }
 0x39e   :  { %8670 = vmatpush3.bf16.xpose.msra.mxu0 %v952_v12  ;;  %8671 = vmatprep.mubr.msk.bf16.mxu0 %vm9809_vm0, %v12677_v1 }
 0x39f   :  { %8681 = vmatprep.subr.bf16.mxu0 %v12677_v1 }
 0x3a0   :  { %v1080_v17 = vpop.permute.xlu1 %1079  ;;  %v1352_v19 = vpop.permute.xlu0 %1351 }
 0x3a1   :  { %v1357_v21 = vsel %vm683_vm9, %v1352_v19, 0 }
 0x3a4   :  { %v1215_v20 = vpop.permute.xlu1 %1214  ;;  %v1487_v22 = vpop.permute.xlu0 %1486 }
 0x3a5   :  { %8672 = vmatmul.mubr.msk.bf16.vlgmr.msra.gmra.mrb[16].mxu0 %vm683_vm9, %v945_v14  ;;  %v1492_v24 = vsel %vm683_vm9, %v1487_v22, 0 }
 0x3a6   :  { %8682 = vmatpush3.bf16.xpose.msra.mxu0 %v1087_v15  ;;  %8683 = vmatprep.mubr.msk.bf16.mxu0 %vm9809_vm0, %v12677_v1 }
 0x3a7   :  { %8693 = vmatprep.subr.bf16.mxu0 %v12677_v1 }
 0x3a8   :  { %v1350_v23 = vpop.permute.xlu1 %1349  ;;  %v1622_v25 = vpop.permute.xlu0 %1621 }
 0x3a9   :  { %v1627_v27 = vsel %vm683_vm9, %v1622_v25, 0 }
 0x3ac   :  { %v1485_v26 = vpop.permute.xlu1 %1484  ;;  %v1757_v28 = vpop.permute.xlu0 %1756 }
 0x3ad   :  { %8684 = vmatmul.mubr.msk.bf16.vlgmr.msra.gmra.mrb[20].mxu0 %vm683_vm9, %v1080_v17  ;;  %v1762_v30 = vsel %vm683_vm9, %v1757_v28, 0 }
 0x3ae   :  { %8694 = vmatpush3.bf16.xpose.msra.mxu0 %v1222_v18  ;;  %8695 = vmatprep.mubr.msk.bf16.mxu0 %vm9809_vm0, %v12677_v1 }
 0x3af   :  { %8705 = vmatprep.subr.bf16.mxu0 %v12677_v1 }
 0x3b0   :  { %v1620_v29 = vpop.permute.xlu1 %1619  ;;  %v1892_v31 = vpop.permute.xlu0 %1891 }
 0x3b1   :  { %v1897_v33 = vsel %vm683_vm9, %v1892_v31, 0 }
 0x3b4   :  { %v1755_v32 = vpop.permute.xlu1 %1754  ;;  %v2027_v34 = vpop.permute.xlu0 %2026 }
 0x3b5   :  { %8696 = vmatmul.mubr.msk.bf16.vlgmr.msra.gmra.mrb[24].mxu0 %vm683_vm9, %v1215_v20  ;;  %v2032_v36 = vsel %vm683_vm9, %v2027_v34, 0 }
 0x3b6   :  { %8706 = vmatpush3.bf16.xpose.msra.mxu0 %v1357_v21  ;;  %8707 = vmatprep.mubr.msk.bf16.mxu0 %vm9809_vm0, %v12677_v1 }
 0x3b7   :  { %8717 = vmatprep.subr.bf16.mxu0 %v12677_v1 }
 0x3b8   :  { %v1890_v35 = vpop.permute.xlu1 %1889  ;;  %v2162_v38 = vpop.permute.xlu0 %2161 }
 0x3b9   :  { %v2167_v40 = vsel %vm683_vm9, %v2162_v38, 0 }
 0x3bc   :  { %v2025_v39 = vpop.permute.xlu1 %2024  ;;  %v2297_v41 = vpop.permute.xlu0 %2296 }
 0x3bd   :  { %8708 = vmatmul.mubr.msk.bf16.vlgmr.msra.gmra.mrb[28].mxu0 %vm683_vm9, %v1350_v23  ;;  %v2302_v43 = vsel %vm683_vm9, %v2297_v41, 0 }
 0x3be   :  { %8718 = vmatpush3.bf16.xpose.msra.mxu0 %v1492_v24  ;;  %8719 = vmatprep.mubr.msk.bf16.mxu0 %vm9809_vm0, %v12677_v1 }
 0x3bf   :  { %8729 = vmatprep.subr.bf16.mxu0 %v12677_v1 }
 0x3c0   :  { %v2160_v42 = vpop.permute.xlu1 %2159  ;;  %v2432_v45 = vpop.permute.xlu0 %2431 }
 0x3c1   :  { %v2437_v47 = vsel %vm683_vm9, %v2432_v45, 0 }
 0x3c4   :  { %v2295_v46 = vpop.permute.xlu1 %2294  ;;  %v2567_v48 = vpop.permute.xlu0 %2566 }
 0x3c5   :  { %8720 = vmatmul.mubr.msk.bf16.vlgmr.msra.gmra.mrb[32].mxu0 %vm683_vm9, %v1485_v26  ;;  %v2572_v51 = vsel %vm683_vm9, %v2567_v48, 0 }
 0x3c6   :  { %8730 = vmatpush3.bf16.xpose.msra.mxu0 %v1627_v27  ;;  %8731 = vmatprep.mubr.msk.bf16.mxu0 %vm9809_vm0, %v12677_v1 }
 0x3c7   :  { %8741 = vmatprep.subr.bf16.mxu0 %v12677_v1 }
 0x3c8   :  { %v2430_v49 = vpop.permute.xlu1 %2429  ;;  %v2702_v62 = vpop.permute.xlu0 %2701 }
 0x3c9   :  { %v2707_v2 = vsel %vm683_vm9, %v2702_v62, 0 }
 0x3cc   :  { %v2565_v0 = vpop.permute.xlu1 %2564  ;;  %v2837_v3 = vpop.permute.xlu0 %2836 }
 0x3cd   :  { %8732 = vmatmul.mubr.msk.bf16.vlgmr.msra.gmra.mrb[36].mxu0 %vm683_vm9, %v1620_v29  ;;  %v2842_v5 = vsel %vm683_vm9, %v2837_v3, 0 }
 0x3ce   :  { %8742 = vmatpush3.bf16.xpose.msra.mxu0 %v1762_v30  ;;  %8743 = vmatprep.mubr.msk.bf16.mxu0 %vm9809_vm0, %v12677_v1 }
 0x3cf   :  { %8753 = vmatprep.subr.bf16.mxu0 %v12677_v1 }
 0x3d0   :  { %v2700_v4 = vpop.permute.xlu1 %2699  ;;  %v2972_v7 = vpop.permute.xlu0 %2971 }
 0x3d1   :  { %v2977_v9 = vsel %vm683_vm9, %v2972_v7, 0 }
 0x3d4   :  { %v2835_v8 = vpop.permute.xlu1 %2834  ;;  %v3107_v10 = vpop.permute.xlu0 %3106 }
 0x3d5   :  { %8744 = vmatmul.mubr.msk.bf16.vlgmr.msra.gmra.mrb[40].mxu0 %vm683_vm9, %v1755_v32  ;;  %v3112_v12 = vsel %vm683_vm9, %v3107_v10, 0 }
 0x3d6   :  { %8754 = vmatpush3.bf16.xpose.msra.mxu0 %v1897_v33  ;;  %8755 = vmatprep.mubr.msk.bf16.mxu0 %vm9809_vm0, %v12677_v1 }
 0x3d7   :  { %8765 = vmatprep.subr.bf16.mxu0 %v12677_v1 }
 0x3d8   :  { %v2970_v11 = vpop.permute.xlu1 %2969  ;;  %v3242_v13 = vpop.permute.xlu0 %3241 }
 0x3d9   :  { %v3247_v15 = vsel %vm683_vm9, %v3242_v13, 0 }
 0x3dc   :  { %v3105_v14 = vpop.permute.xlu1 %3104  ;;  %v10398_v17 = vpop.permute.xlu0 %883 }
 0x3dd   :  { %8756 = vmatmul.mubr.msk.bf16.vlgmr.msra.gmra.mrb[44].mxu0 %vm683_vm9, %v1890_v35 }
 0x3de   :  { %8766 = vmatpush3.bf16.xpose.msra.mxu0 %v2032_v36  ;;  %8767 = vmatprep.mubr.msk.bf16.mxu0 %vm9809_vm0, %v12677_v1 }
 0x3df   :  { %8777 = vmatprep.subr.bf16.mxu0 %v12677_v1 }
 0x3e0   :  { %v3240_v16 = vpop.permute.xlu1 %3239  ;;  %v10400_v18 = vpop.permute.xlu0 %1153 }
 0x3e4   :  { %v10405_v23 = vpop.permute.xlu0 %1288  ;;  %v10412_v27 = vpop.permute.xlu1 %1018 }
 0x3e5   :  { %8768 = vmatmul.mubr.msk.bf16.vlgmr.msra.gmra.mrb[48].mxu0 %vm683_vm9, %v2025_v39 }
 0x3e6   :  { %8778 = vmatpush3.bf16.xpose.msra.mxu0 %v2167_v40  ;;  %8779 = vmatprep.mubr.msk.bf16.mxu0 %vm9809_vm0, %v12677_v1 }
 0x3e7   :  { %8789 = vmatprep.subr.bf16.mxu0 %v12677_v1 }
 0x3e8   :  { %v10416_v30 = vpop.permute.xlu0 %1558  ;;  %v10421_v34 = vpop.permute.xlu1 %1423 }
 0x3e9   :  { %12793 = vst [vmem:[#allocation7_spill] sm:$0xff] %v10416_v30  ;;  %12794 = vst [vmem:[#allocation8_spill] sm:$0xff] %v10421_v34 }
 0x3ec   :  { %v10430_v40 = vpop.permute.xlu0 %1828 }
 0x3ed   :  { %8780 = vmatmul.mubr.msk.bf16.vlgmr.msra.gmra.mrb[52].mxu0 %vm683_vm9, %v2160_v42  ;;  %12795 = vst [vmem:[#allocation9_spill] sm:$0xff] %v10430_v40  ;;  %v10432_v42 = vpop.permute.xlu1 %1693 }
 0x3ee   :  { %8790 = vmatpush3.bf16.xpose.msra.mxu0 %v2302_v43  ;;  %8791 = vmatprep.mubr.msk.bf16.mxu0 %vm9809_vm0, %v12677_v1  ;;  %12796 = vst [vmem:[#allocation10_spill] sm:$0xff] %v10432_v42 }
 0x3ef   :  { %8801 = vmatprep.subr.bf16.mxu0 %v12677_v1 }
 0x3f5   :  { %8792 = vmatmul.mubr.msk.bf16.vlgmr.msra.gmra.mrb[56].mxu0 %vm683_vm9, %v2295_v46 }
 0x3f6   :  { %8802 = vmatpush3.bf16.xpose.msra.mxu0 %v2437_v47  ;;  %8803 = vmatprep.mubr.msk.bf16.mxu0 %vm9809_vm0, %v12677_v1 }
 0x3f7   :  { %8813 = vmatprep.subr.bf16.mxu0 %v12677_v1 }
 0x3fd   :  { %8804 = vmatmul.mubr.msk.bf16.vlgmr.msra.gmra.mrb[60].mxu0 %vm683_vm9, %v2430_v49 }
 0x3fe   :  { %v724_v52 = vpop.f32.mrb[8].mxu0  ;;  %8814 = vmatpush3.bf16.xpose.msra.mxu0 %v2572_v51  ;;  %8815 = vmatprep.mubr.msk.bf16.mxu0 %vm9809_vm0, %v12677_v1  ;;  %v10442_v51 = vpop.permute.xlu0 %2098 }
 0x3ff   :  { %v10360_v54 = vadd.f32 %v724_v52, %v10348_v50  ;;  %v8649_v55 = vpop.f32.mrb[9].mxu0  ;;  %8825 = vmatprep.subr.bf16.mxu0 %v12677_v1  ;;  %12797 = vst [vmem:[#allocation11_spill] sm:$0xff] %v10442_v51 }
 0x400   :  { %v727_v56 = vpop.f32.mrb[10].mxu0  ;;  %v10446_v55 = vpop.permute.xlu1 %1963 }
 0x401   :  { %v10364_v57 = vadd.f32 %v727_v56, %v10355_v53  ;;  %v8650_v60 = vpop.f32.mrb[11].mxu0  ;;  %v732_v61 = vsel %vm731_vm10, %v10360_v54, -inf  ;;  %12798 = vst [vmem:[#allocation12_spill] sm:$0xff] %v10446_v55 }
 0x402   :  { %733 = vmax.xlane.f32.xlu0 %v732_v61 }
 0x403   :  { %v736_v63 = vsel %vm735_vm11, %v10364_v57, -inf }
 0x404   :  { %737 = vmax.xlane.f32.xlu1 %v736_v63  ;;  %v10451_v63 = vpop.permute.xlu0 %2368 }
 0x405   :  { %8816 = vmatmul.mubr.msk.bf16.vlgmr.msra.gmra.mrb[64].mxu0 %vm683_vm9, %v2565_v0  ;;  %12799 = vst [vmem:[#allocation13_spill] sm:$0xff] %v10451_v63 }
 0x406   :  { %8826 = vmatpush3.bf16.xpose.msra.mxu0 %v2707_v2  ;;  %8827 = vmatprep.mubr.msk.bf16.mxu0 %vm9809_vm0, %v12677_v1 }
 0x407   :  { %8837 = vmatprep.subr.bf16.mxu0 %v12677_v1 }
 0x40d   :  { %8828 = vmatmul.mubr.msk.bf16.vlgmr.msra.gmra.mrb[68].mxu0 %vm683_vm9, %v2700_v4  ;;  %v10458_v4 = vpop.permute.xlu1 %2233 }
 0x40e   :  { %8838 = vmatpush3.bf16.xpose.msra.mxu0 %v2842_v5  ;;  %8839 = vmatprep.mubr.msk.bf16.mxu0 %vm9809_vm0, %v12677_v1  ;;  %12800 = vst [vmem:[#allocation14_spill] sm:$0xff] %v10458_v4 }
 0x40f   :  { %8849 = vmatprep.subr.bf16.mxu0 %v12677_v1 }
 0x415   :  { %8840 = vmatmul.mubr.msk.bf16.vlgmr.msra.gmra.mrb[72].mxu0 %vm683_vm9, %v2835_v8 }
 0x416   :  { %8850 = vmatpush3.bf16.xpose.msra.mxu0 %v2977_v9  ;;  %8851 = vmatprep.mubr.msk.bf16.mxu0 %vm9809_vm0, %v12677_v1 }
 0x417   :  { %8861 = vmatprep.subr.bf16.mxu0 %v12677_v1 }
 0x41d   :  { %8852 = vmatmul.mubr.msk.bf16.vlgmr.msra.gmra.mrb[76].mxu0 %vm683_vm9, %v2970_v11 }
 0x41e   :  { %8862 = vmatpush3.bf16.xpose.msra.mxu0 %v3112_v12  ;;  %8863 = vmatprep.mubr.msk.bf16.mxu0 %vm9809_vm0, %v12677_v1 }
 0x41f   :  { %8873 = vmatprep.subr.bf16.mxu0 %v12677_v1 }
 0x425   :  { %8864 = vmatmul.mubr.msk.bf16.vlgmr.msra.gmra.mrb[80].mxu0 %vm683_vm9, %v3105_v14 }
 0x426   :  { %8874 = vmatpush3.bf16.xpose.msra.mxu0 %v3247_v15  ;;  %8875 = vmatprep.mubr.msk.bf16.mxu0 %vm9809_vm0, %v12677_v1 }
 0x427   :  { %8885 = vmatprep.subr.bf16.mxu0 %v12677_v1 }
 0x42d   :  { %8876 = vmatmul.mubr.msk.bf16.vlgmr.msra.gmra.mrb[84].mxu0 %vm683_vm9, %v3240_v16 }
 0x42e   :  { %8895 = vmatprep.mubr.msk.bf16.mxu0 %vm9809_vm0, %v12677_v1 }
 0x470   :  { %v852_v19 = vpop.f32.mrb[12].mxu0 }
 0x471   :  { %v10403_v20 = vadd.f32 %v852_v19, %v10348_v50  ;;  %v8661_v21 = vpop.f32.mrb[13].mxu0 }
 0x472   :  { %v855_v22 = vpop.f32.mrb[14].mxu0 }
 0x473   :  { %v10408_v24 = vadd.f32 %v855_v22, %v10355_v53  ;;  %v8662_v25 = vpop.f32.mrb[15].mxu0  ;;  %v859_v26 = vsel %vm731_vm10, %v10403_v20, -inf }
 0x474   :  { %860 = vmax.xlane.f32.xlu0 %v859_v26 }
 0x475   :  { %v862_v28 = vsel %vm735_vm11, %v10408_v24, -inf }
 0x478   :  { %v988_v29 = vpop.f32.mrb[16].mxu0  ;;  %863 = vmax.xlane.f32.xlu0 %v862_v28 }
 0x479   :  { %v10419_v31 = vadd.f32 %v988_v29, %v10348_v50  ;;  %v8673_v32 = vpop.f32.mrb[17].mxu0 }
 0x47a   :  { %v991_v33 = vpop.f32.mrb[18].mxu0 }
 0x47b   :  { %v10424_v35 = vadd.f32 %v991_v33, %v10355_v53  ;;  %v8674_v36 = vpop.f32.mrb[19].mxu0  ;;  %v995_v38 = vsel %vm731_vm10, %v10419_v31, -inf }
 0x47c   :  { %996 = vmax.xlane.f32.xlu0 %v995_v38 }
 0x47d   :  { %v998_v39 = vsel %vm735_vm11, %v10424_v35, -inf }
 0x47e   :  { %999 = vmax.xlane.f32.xlu1 %v998_v39 }
 0x480   :  { %v1123_v41 = vpop.f32.mrb[20].mxu0 }
 0x481   :  { %v10435_v43 = vadd.f32 %v1123_v41, %v10348_v50  ;;  %v8685_v45 = vpop.f32.mrb[21].mxu0 }
 0x482   :  { %v1126_v46 = vpop.f32.mrb[22].mxu0 }
 0x483   :  { %v10438_v47 = vadd.f32 %v1126_v46, %v10355_v53  ;;  %v8686_v48 = vpop.f32.mrb[23].mxu0  ;;  %v1130_v49 = vsel %vm731_vm10, %v10435_v43, -inf }
 0x484   :  { %1131 = vmax.xlane.f32.xlu0 %v1130_v49 }
 0x485   :  { %v1133_v52 = vsel %vm735_vm11, %v10438_v47, -inf }
 0x486   :  { %1134 = vmax.xlane.f32.xlu1 %v1133_v52 }
 0x488   :  { %v1258_v56 = vpop.f32.mrb[24].mxu0 }
 0x489   :  { %v10449_v60 = vadd.f32 %v1258_v56, %v10348_v50  ;;  %v8697_v61 = vpop.f32.mrb[25].mxu0 }
 0x48a   :  { %v1261_v62 = vpop.f32.mrb[26].mxu0 }
 0x48b   :  { %v10454_v0 = vadd.f32 %v1261_v62, %v10355_v53  ;;  %v8698_v2 = vpop.f32.mrb[27].mxu0  ;;  %v1265_v3 = vsel %vm731_vm10, %v10449_v60, -inf }
 0x48c   :  { %1266 = vmax.xlane.f32.xlu0 %v1265_v3 }
 0x48d   :  { %v1268_v5 = vsel %vm735_vm11, %v10454_v0, -inf }
 0x48e   :  { %1269 = vmax.xlane.f32.xlu1 %v1268_v5 }
 0x48f   :  { %v734_v7 = vpop.xlane.xlu0 %733 }
 0x490   :  { %v739_v8 = vsub.f32 %v10360_v54, %v734_v7  ;;  %v1393_v9 = vpop.f32.mrb[28].mxu0 }
 0x491   :  { %v10464_v10 = vadd.f32 %v1393_v9, %v10348_v50  ;;  %v738_v11 = vpop.xlane.xlu1 %737  ;;  %v8709_v12 = vpop.f32.mrb[29].mxu0 }
 0x492   :  { %v741_v13 = vmul.f32 1.442695, %v739_v8  ;;  %v740_v14 = vsub.f32 %v10364_v57, %v738_v11  ;;  %v1396_v15 = vpop.f32.mrb[30].mxu0 }
 0x493   :  { %v10468_v16 = vadd.f32 %v1396_v15, %v10355_v53  ;;  %v8710_v19 = vpop.f32.mrb[31].mxu0  ;;  %v1400_v21 = vsel %vm731_vm10, %v10464_v10, -inf }
 0x494   :  { %9426 = vpow2.f32 %v741_v13  ;;  %v743_v22 = vmul.f32 1.442695, %v740_v14  ;;  %1401 = vmax.xlane.f32.xlu0 %v1400_v21 }
 0x495   :  { %v1403_v54 = vsel %vm735_vm11, %v10468_v16, -inf }
 0x496   :  { %9428 = vpow2.f32 %v743_v22  ;;  %1404 = vmax.xlane.f32.xlu1 %v1403_v54 }
 0x498   :  { %v1528_v25 = vpop.f32.mrb[32].mxu0 }
 0x499   :  { %v10475_v26 = vadd.f32 %v1528_v25, %v10348_v50  ;;  %v8721_v57 = vpop.f32.mrb[33].mxu0 }
 0x49a   :  { %v1531_v28 = vpop.f32.mrb[34].mxu0 }
 0x49b   :  { %v10478_v29 = vadd.f32 %v1531_v28, %v10355_v53  ;;  %v8722_v32 = vpop.f32.mrb[35].mxu0  ;;  %v1535_v33 = vsel %vm731_vm10, %v10475_v26, -inf }
 0x49c   :  { %1536 = vmax.xlane.f32.xlu0 %v1535_v33 }
 0x49d   :  { %v1538_v36 = vsel %vm735_vm11, %v10478_v29, -inf }
 0x49e   :  { %v10484_v38 = vpop.eup %9426  ;;  %1539 = vmax.xlane.f32.xlu1 %v1538_v36 }
 0x49f   :  { %v745_v39 = vsel %vm731_vm10, %v10484_v38, 0.0 }
 0x4a0   :  { %v10488_v41 = vpop.eup %9428  ;;  %v1663_v45 = vpop.f32.mrb[36].mxu0  ;;  %746 = vadd.xlane.f32.xlu0 %v745_v39 }
 0x4a1   :  { %v10491_v46 = vadd.f32 %v1663_v45, %v10348_v50  ;;  %v8733_v48 = vpop.f32.mrb[37].mxu0  ;;  %v748_v49 = vsel %vm735_vm11, %v10488_v41, 0.0 }
 0x4a2   :  { %v1666_v52 = vpop.f32.mrb[38].mxu0  ;;  %749 = vadd.xlane.f32.xlu1 %v748_v49 }
 0x4a3   :  { %v10496_v56 = vadd.f32 %v1666_v52, %v10355_v53  ;;  %v8734_v61 = vpop.f32.mrb[39].mxu0  ;;  %v1670_v62 = vsel %vm731_vm10, %v10491_v46, -inf }
 0x4a4   :  { %1671 = vmax.xlane.f32.xlu0 %v1670_v62 }
 0x4a5   :  { %v1673_v2 = vsel %vm735_vm11, %v10496_v56, -inf }
 0x4a6   :  { %1674 = vmax.xlane.f32.xlu1 %v1673_v2 }
 0x4a8   :  { %v1798_v3 = vpop.f32.mrb[40].mxu0 }
 0x4a9   :  { %v10503_v5 = vadd.f32 %v1798_v3, %v10348_v50  ;;  %v8745_v7 = vpop.f32.mrb[41].mxu0 }
 0x4aa   :  { %v1801_v8 = vpop.f32.mrb[42].mxu0 }
 0x4ab   :  { %v10506_v9 = vadd.f32 %v1801_v8, %v10355_v53  ;;  %v8746_v11 = vpop.f32.mrb[43].mxu0  ;;  %v1805_v12 = vsel %vm731_vm10, %v10503_v5, -inf }
 0x4ac   :  { %1806 = vmax.xlane.f32.xlu0 %v1805_v12 }
 0x4ad   :  { %v1808_v13 = vsel %vm735_vm11, %v10506_v9, -inf }
 0x4ae   :  { %1809 = vmax.xlane.f32.xlu1 %v1808_v13 }
 0x4b0   :  { %v1933_v14 = vpop.f32.mrb[44].mxu0 }
 0x4b1   :  { %v10513_v15 = vadd.f32 %v1933_v14, %v10348_v50  ;;  %v8757_v19 = vpop.f32.mrb[45].mxu0 }
 0x4b2   :  { %v1936_v21 = vpop.f32.mrb[46].mxu0 }
 0x4b3   :  { %v10516_v22 = vadd.f32 %v1936_v21, %v10355_v53  ;;  %v8758_v54 = vpop.f32.mrb[47].mxu0  ;;  %v1940_v25 = vsel %vm731_vm10, %v10513_v15, -inf }
 0x4b4   :  { %1941 = vmax.xlane.f32.xlu0 %v1940_v25 }
 0x4b5   :  { %v1943_v57 = vsel %vm735_vm11, %v10516_v22, -inf }
 0x4b6   :  { %1944 = vmax.xlane.f32.xlu1 %v1943_v57 }
 0x4b8   :  { %v2068_v28 = vpop.f32.mrb[48].mxu0 }
 0x4b9   :  { %v10523_v32 = vadd.f32 %v2068_v28, %v10348_v50  ;;  %v8769_v33 = vpop.f32.mrb[49].mxu0 }
 0x4ba   :  { %v2071_v36 = vpop.f32.mrb[50].mxu0 }
 0x4bb   :  { %v10526_v39 = vadd.f32 %v2071_v36, %v10355_v53  ;;  %v8770_v45 = vpop.f32.mrb[51].mxu0  ;;  %v2075_v48 = vsel %vm731_vm10, %v10523_v32, -inf }
 0x4bc   :  { %2076 = vmax.xlane.f32.xlu0 %v2075_v48 }
 0x4bd   :  { %v2078_v49 = vsel %vm735_vm11, %v10526_v39, -inf }
 0x4be   :  { %2079 = vmax.xlane.f32.xlu1 %v2078_v49 }
 0x4c0   :  { %v2203_v52 = vpop.f32.mrb[52].mxu0 }
 0x4c1   :  { %v10533_v61 = vadd.f32 %v2203_v52, %v10348_v50  ;;  %v8781_v62 = vpop.f32.mrb[53].mxu0 }
 0x4c2   :  { %v2206_v2 = vpop.f32.mrb[54].mxu0 }
 0x4c3   :  { %v10536_v3 = vadd.f32 %v2206_v2, %v10355_v53  ;;  %v8782_v7 = vpop.f32.mrb[55].mxu0  ;;  %v2210_v8 = vsel %vm731_vm10, %v10533_v61, -inf }
 0x4c4   :  { %2211 = vmax.xlane.f32.xlu0 %v2210_v8 }
 0x4c5   :  { %v2213_v11 = vsel %vm735_vm11, %v10536_v3, -inf }
 0x4c6   :  { %2214 = vmax.xlane.f32.xlu1 %v2213_v11 }
 0x4c8   :  { %v2338_v12 = vpop.f32.mrb[56].mxu0 }
 0x4c9   :  { %v10543_v13 = vadd.f32 %v2338_v12, %v10348_v50  ;;  %v8793_v14 = vpop.f32.mrb[57].mxu0 }
 0x4ca   :  { %v2341_v19 = vpop.f32.mrb[58].mxu0 }
 0x4cb   :  { %v10546_v21 = vadd.f32 %v2341_v19, %v10355_v53  ;;  %v8794_v54 = vpop.f32.mrb[59].mxu0  ;;  %v2345_v25 = vsel %vm731_vm10, %v10543_v13, -inf }
 0x4cc   :  { %2346 = vmax.xlane.f32.xlu0 %v2345_v25 }
 0x4cd   :  { %v2348_v57 = vsel %vm735_vm11, %v10546_v21, -inf }
 0x4ce   :  { %2349 = vmax.xlane.f32.xlu1 %v2348_v57 }
 0x4d0   :  { %v2473_v28 = vpop.f32.mrb[60].mxu0 }
 0x4d1   :  { %v10553_v33 = vadd.f32 %v2473_v28, %v10348_v50  ;;  %v8805_v36 = vpop.f32.mrb[61].mxu0 }
 0x4d2   :  { %v2476_v45 = vpop.f32.mrb[62].mxu0 }
 0x4d3   :  { %v10556_v48 = vadd.f32 %v2476_v45, %v10355_v53  ;;  %v8806_v49 = vpop.f32.mrb[63].mxu0  ;;  %v2480_v52 = vsel %vm731_vm10, %v10553_v33, -inf }
 0x4d4   :  { %2481 = vmax.xlane.f32.xlu0 %v2480_v52 }
 0x4d5   :  { %v2483_v62 = vsel %vm735_vm11, %v10556_v48, -inf }
 0x4d6   :  { %2484 = vmax.xlane.f32.xlu1 %v2483_v62 }
 0x4d8   :  { %v2608_v2 = vpop.f32.mrb[64].mxu0 }
 0x4d9   :  { %v10563_v7 = vadd.f32 %v2608_v2, %v10348_v50  ;;  %v8817_v8 = vpop.f32.mrb[65].mxu0 }
 0x4da   :  { %v2611_v11 = vpop.f32.mrb[66].mxu0 }
 0x4db   :  { %v10566_v12 = vadd.f32 %v2611_v11, %v10355_v53  ;;  %v8818_v14 = vpop.f32.mrb[67].mxu0  ;;  %v2615_v19 = vsel %vm731_vm10, %v10563_v7, -inf }
 0x4dc   :  { %2616 = vmax.xlane.f32.xlu0 %v2615_v19 }
 0x4dd   :  { %v2618_v54 = vsel %vm735_vm11, %v10566_v12, -inf }
 0x4de   :  { %2619 = vmax.xlane.f32.xlu1 %v2618_v54 }
 0x4e0   :  { %v2743_v25 = vpop.f32.mrb[68].mxu0 }
 0x4e1   :  { %v10573_v57 = vadd.f32 %v2743_v25, %v10348_v50  ;;  %v8829_v28 = vpop.f32.mrb[69].mxu0 }
 0x4e2   :  { %v2746_v36 = vpop.f32.mrb[70].mxu0 }
 0x4e3   :  { %v10576_v45 = vadd.f32 %v2746_v36, %v10355_v53  ;;  %v8830_v49 = vpop.f32.mrb[71].mxu0  ;;  %v2750_v52 = vsel %vm731_vm10, %v10573_v57, -inf }
 0x4e4   :  { %2751 = vmax.xlane.f32.xlu0 %v2750_v52 }
 0x4e5   :  { %v2753_v62 = vsel %vm735_vm11, %v10576_v45, -inf }
 0x4e6   :  { %2754 = vmax.xlane.f32.xlu1 %v2753_v62 }
 0x4e8   :  { %v2878_v2 = vpop.f32.mrb[72].mxu0 }
 0x4e9   :  { %v10583_v8 = vadd.f32 %v2878_v2, %v10348_v50  ;;  %v8841_v11 = vpop.f32.mrb[73].mxu0 }
 0x4ea   :  { %v2881_v14 = vpop.f32.mrb[74].mxu0 }
 0x4eb   :  { %v10586_v19 = vadd.f32 %v2881_v14, %v10355_v53  ;;  %v8842_v54 = vpop.f32.mrb[75].mxu0  ;;  %v2885_v25 = vsel %vm731_vm10, %v10583_v8, -inf }
 0x4ec   :  { %2886 = vmax.xlane.f32.xlu1 %v2885_v25 }
 0x4ed   :  { %v2888_v28 = vsel %vm735_vm11, %v10586_v19, -inf }
 0x4f0   :  { %v3013_v36 = vpop.f32.mrb[76].mxu0  ;;  %2889 = vmax.xlane.f32.xlu1 %v2888_v28 }
 0x4f1   :  { %v10593_v49 = vadd.f32 %v3013_v36, %v10348_v50  ;;  %v8853_v52 = vpop.f32.mrb[77].mxu0 }
 0x4f2   :  { %v3016_v62 = vpop.f32.mrb[78].mxu0 }
 0x4f3   :  { %v10596_v2 = vadd.f32 %v3016_v62, %v10355_v53  ;;  %v8854_v11 = vpop.f32.mrb[79].mxu0  ;;  %v3020_v14 = vsel %vm731_vm10, %v10593_v49, -inf }
 0x4f4   :  { %3021 = vmax.xlane.f32.xlu0 %v3020_v14 }
 0x4f5   :  { %v3023_v54 = vsel %vm735_vm11, %v10596_v2, -inf }
 0x4f8   :  { %v3148_v25 = vpop.f32.mrb[80].mxu0  ;;  %3024 = vmax.xlane.f32.xlu0 %v3023_v54 }
 0x4f9   :  { %v10603_v28 = vadd.f32 %v3148_v25, %v10348_v50  ;;  %v8865_v36 = vpop.f32.mrb[81].mxu0 }
 0x4fa   :  { %v3151_v1 = vpop.f32.mrb[82].mxu0 }
 0x4fb   :  { %v10606_v52 = vadd.f32 %v3151_v1, %v10355_v53  ;;  %v8866_v62 = vpop.f32.mrb[83].mxu0  ;;  %v3155_v11 = vsel %vm731_vm10, %v10603_v28, -inf }
 0x4fc   :  { %3156 = vmax.xlane.f32.xlu1 %v3155_v11 }
 0x4fd   :  { %v3158_v14 = vsel %vm735_vm11, %v10606_v52, -inf }
 0x500   :  { %v3283_v44 = vpop.f32.mrb[84].mxu0  ;;  %3159 = vmax.xlane.f32.xlu1 %v3158_v14 }
 0x501   :  { %v10613_v54 = vadd.f32 %v3283_v44, %v10348_v50  ;;  %v8877_v25 = vpop.f32.mrb[85].mxu0  ;;  %v861_v37 = vpop.xlane.xlu0 %860 }
 0x502   :  { %v865_v36 = vsub.f32 %v10403_v20, %v861_v37  ;;  %v3286_v59 = vpop.f32.mrb[86].mxu0 }
 0x503   :  { %v10617_v1 = vadd.f32 %v3286_v59, %v10355_v53  ;;  %v8878_v62 = vpop.f32.mrb[87].mxu0  ;;  %v3290_v11 = vsel %vm731_vm10, %v10613_v54, -inf }
 0x504   :  { %v867_v58 = vmul.f32 1.442695, %v865_v36  ;;  %3291 = vmax.xlane.f32.xlu1 %v3290_v11 }
 0x505   :  { %v864_v63 = vpop.xlane.xlu0 %863  ;;  %v3293_v44 = vsel %vm735_vm11, %v10617_v1, -inf }
 0x506   :  { %9430 = vpow2.f32 %v867_v58  ;;  %v866_v14 = vsub.f32 %v10408_v24, %v864_v63 }
 0x508   :  { %v869_v50 = vmul.f32 1.442695, %v866_v14  ;;  %3294 = vmax.xlane.f32.xlu1 %v3293_v44 }
 0x509   :  { %v997_v37 = vpop.xlane.xlu0 %996 }
 0x50a   :  { %9432 = vpow2.f32 %v869_v50  ;;  %v1001_v59 = vsub.f32 %v10419_v31, %v997_v37 }
 0x50b   :  { %v1000_v50 = vpop.xlane.xlu1 %999 }
 0x50c   :  { %v1003_v53 = vmul.f32 1.442695, %v1001_v59 }
 0x50e   :  { %9434 = vpow2.f32 %v1003_v53 }
 0x510   :  { %v10625_v20 = vpop.eup %9430 }
 0x511   :  { %v1132_v25 = vpop.xlane.xlu0 %1131  ;;  %v871_v36 = vsel %vm731_vm10, %v10625_v20, 0.0 }
 0x512   :  { %v1136_v58 = vsub.f32 %v10435_v43, %v1132_v25  ;;  %872 = vadd.xlane.f32.xlu0 %v871_v36 }
 0x513   :  { %v1135_v37 = vpop.xlane.xlu1 %1134 }
 0x514   :  { %v10630_v24 = vpop.eup %9432  ;;  %v1138_v63 = vmul.f32 1.442695, %v1136_v58  ;;  %v1137_v51 = vsub.f32 %v10438_v47, %v1135_v37 }
 0x515   :  { %v874_v62 = vsel %vm735_vm11, %v10630_v24, 0.0 }
 0x516   :  { %9436 = vpow2.f32 %v1138_v63  ;;  %875 = vadd.xlane.f32.xlu1 %v874_v62  ;;  %v1140_v30 = vmul.f32 1.442695, %v1137_v51 }
 0x518   :  { %v10634_v31 = vpop.eup %9434 }
 0x519   :  { %v1267_v11 = vpop.xlane.xlu0 %1266  ;;  %v1007_v14 = vsel %vm731_vm10, %v10634_v31, 0.0 }
 0x51a   :  { %v1271_v44 = vsub.f32 %v10449_v60, %v1267_v11  ;;  %1008 = vadd.xlane.f32.xlu0 %v1007_v14 }
 0x51b   :  { %v1270_v25 = vpop.xlane.xlu1 %1269 }
 0x51c   :  { %v1273_v43 = vmul.f32 1.442695, %v1271_v44 }
 0x51e   :  { %9438 = vpow2.f32 %v1273_v43  ;;  %v1002_v43 = vsub.f32 %v10424_v35, %v1000_v50 }
 0x520   :  { %v10639_v59 = vpop.eup %9436  ;;  %v1005_v4 = vmul.f32 1.442695, %v1002_v43 }
 0x521   :  { %v1142_v53 = vsel %vm731_vm10, %v10639_v59, 0.0  ;;  %v1402_v36 = vpop.xlane.xlu0 %1401 }
 0x522   :  { %1143 = vadd.xlane.f32.xlu0 %v1142_v53  ;;  %v1406_v47 = vsub.f32 %v10464_v10, %v1402_v36 }
 0x523   :  { %v1405_v58 = vpop.xlane.xlu1 %1404 }
 0x527   :  { %2503 = vrot.lane.b32.xlu1 %v10198_v6, %s12801_s24 }
 0x528   :  { %v10645_v63 = vpop.eup %9438 }
 0x529   :  { %v1537_v60 = vpop.xlane.xlu0 %1536  ;;  %v1277_v62 = vsel %vm731_vm10, %v10645_v63, 0.0 }
 0x52a   :  { %1278 = vadd.xlane.f32.xlu0 %v1277_v62  ;;  %v1272_v62 = vsub.f32 %v10454_v0, %v1270_v25 }
 0x52b   :  { %v1540_v11 = vpop.xlane.xlu1 %1539 }
 0x52c   :  { %v1275_v35 = vmul.f32 1.442695, %v1272_v62  ;;  %v1542_v0 = vsub.f32 %v10478_v29, %v1540_v11 }
 0x52d   :  { %v747_v14 = vpop.xlane.xlu0 %746 }
 0x52e   :  { %9440 = vrcp.f32 %v747_v14  ;;  %v889_v14 = vsel %vm359_vm4, %v10398_v17, 0  ;;  %v1545_v25 = vmul.f32 1.442695, %v1542_v0 }
 0x52f   :  { %v750_v44 = vpop.xlane.xlu1 %749 }
 0x530   :  { %9442 = vrcp.f32 %v750_v44 }
 0x531   :  { %9444 = vpow2.f32 %v1005_v4  ;;  %v1672_v17 = vpop.xlane.xlu0 %1671 }
 0x532   :  { %9446 = vpow2.f32 %v1140_v30 }
 0x533   :  { %9448 = vpow2.f32 %v1275_v35  ;;  %v1675_v51 = vpop.xlane.xlu1 %1674 }
 0x534   :  { %v1677_v44 = vsub.f32 %v10496_v56, %v1675_v51 }
 0x536   :  { %v1680_v35 = vmul.f32 1.442695, %v1677_v44 }
 0x538   :  { %v9441_v53 = vpop.eup %9440 }
 0x539   :  { %v753_v40 = vmul.f32 %v9441_v53, %v10484_v38  ;;  %v12803_v38 = vmov 0.0   ;;  %v1807_v4 = vpop.xlane.xlu0 %1806 }
 0x53a   :  { %v9443_v55 = vpop.eup %9442 }
 0x53b   :  { %v754_v42 = vmul.f32 %v9443_v55, %v10488_v41  ;;  %v1541_v55 = vsub.f32 %v10475_v26, %v1537_v60  ;;  %v1810_v10 = vpop.xlane.xlu1 %1809 }
 0x53c   :  { %v1812_v36 = vsub.f32 %v10506_v9, %v1810_v10 }
 0x53d   :  { %v755_v34 = vpack.c.bf16 %v754_v42, %v753_v40  ;;  %v1408_v40 = vmul.f32 1.442695, %v1406_v47  ;;  %v1407_v42 = vsub.f32 %v10468_v16, %v1405_v58  ;;  %v1543_v37 = vmul.f32 1.442695, %v1541_v55 }
 0x53e   :  { %v1676_v16 = vsub.f32 %v10491_v46, %v1672_v17  ;;  %v1815_v43 = vmul.f32 1.442695, %v1812_v36  ;;  %v1811_v47 = vsub.f32 %v10503_v5, %v1807_v4 }
 0x53f   :  { %8654 = vmatmul.mubr.msk.bf16.vlgmr.msra.gmra.mrb[12].mxu1 %vm731_vm10, %v755_v34  ;;  %v10664_v34 = vpop.eup %9444  ;;  %9450 = vpow2.f32 %v1408_v40  ;;  %v1410_v30 = vmul.f32 1.442695, %v1407_v42 }
 0x540   :  { %2638 = vrot.lane.b32.xlu0 %v10198_v6, %s12802_s1  ;;  %8664 = vmatpush3.bf16.msra.mxu1 %v889_v14  ;;  %v1010_v41 = vsel %vm735_vm11, %v10664_v34, 0.0  ;;  %v10670_v50 = vpop.eup %9446  ;;  %v1678_v11 = vmul.f32 1.442695, %v1676_v16  ;;  %v1813_v55 = vmul.f32 1.442695, %v1811_v47 }
 0x541   :  { %8665 = vmatprep.mubr.msk.bf16.mxu1 %vm9809_vm0, %v12803_v38  ;;  %8675 = vmatprep.subr.bf16.mxu1 %v12803_v38  ;;  %9452 = vpow2.f32 %v1410_v30  ;;  %v1942_v26 = vpop.xlane.xlu0 %1941  ;;  %v1145_v29 = vsel %vm735_vm11, %v10670_v50, 0.0  ;;  %v10676_v60 = vpop.eup %9448 }
 0x542   :  { %9454 = vpow2.f32 %v1543_v37  ;;  %v1280_v9 = vsel %vm735_vm11, %v10676_v60, 0.0  ;;  %v1946_v30 = vsub.f32 %v10513_v15, %v1942_v26 }
 0x543   :  { %v1945_v58 = vpop.xlane.xlu1 %1944  ;;  %9456 = vpow2.f32 %v1545_v25 }
 0x544   :  { %v1947_v46 = vsub.f32 %v10516_v22, %v1945_v58  ;;  %9458 = vpow2.f32 %v1678_v11  ;;  %v1948_v37 = vmul.f32 1.442695, %v1946_v30 }
 0x545   :  { %9460 = vpow2.f32 %v1815_v43 }
 0x546   :  { %v1950_v40 = vmul.f32 1.442695, %v1947_v46  ;;  %9462 = vpow2.f32 %v1680_v35 }
 0x548   :  { %9464 = vpow2.f32 %v1950_v40 }
 0x549   :  { %v2077_v53 = vpop.xlane.xlu0 %2076  ;;  %v10682_v14 = vpop.eup %9450  ;;  %9466 = vpow2.f32 %v1813_v55 }
 0x54a   :  { %v2081_v56 = vsub.f32 %v10523_v32, %v2077_v53  ;;  %v1412_v22 = vsel %vm731_vm10, %v10682_v14, 0.0 }
 0x54b   :  { %1011 = vadd.xlane.f32.xlu1 %v1010_v41  ;;  %v2080_v62 = vpop.xlane.xlu1 %2079  ;;  %v10688_v51 = vpop.eup %9452 }
 0x54c   :  { %v2083_v0 = vmul.f32 1.442695, %v2081_v56  ;;  %v10692_v4 = vpop.eup %9454  ;;  %v1415_v32 = vsel %vm735_vm11, %v10688_v51, 0.0  ;;  %v2082_v16 = vsub.f32 %v10526_v39, %v2080_v62 }
 0x54d   :  { %v10696_v41 = vpop.eup %9456  ;;  %v1547_v26 = vsel %vm731_vm10, %v10692_v4, 0.0 }
 0x54e   :  { %9468 = vpow2.f32 %v2083_v0  ;;  %v10700_v36 = vpop.eup %9458  ;;  %v2085_v11 = vmul.f32 1.442695, %v2082_v16 }
 0x54f   :  { %1146 = vadd.xlane.f32.xlu1 %v1145_v29  ;;  %v10706_v58 = vpop.eup %9460  ;;  %9470 = vpow2.f32 %v1948_v37  ;;  %v1682_v46 = vsel %vm731_vm10, %v10700_v36, 0.0 }
 0x550   :  { %v1820_v43 = vsel %vm735_vm11, %v10706_v58, 0.0 }
 0x551   :  { %v2212_v42 = vpop.xlane.xlu0 %2211 }
 0x552   :  { %v2216_v39 = vsub.f32 %v10533_v61, %v2212_v42 }
 0x553   :  { %1281 = vadd.xlane.f32.xlu1 %v1280_v9  ;;  %v2215_v17 = vpop.xlane.xlu1 %2214 }
 0x554   :  { %v2217_v5 = vsub.f32 %v10536_v3, %v2215_v17  ;;  %v1550_v3 = vsel %vm735_vm11, %v10696_v41, 0.0  ;;  %v2218_v9 = vmul.f32 1.442695, %v2216_v39 }
 0x556   :  { %v2220_v25 = vmul.f32 1.442695, %v2217_v5 }
 0x557   :  { %1413 = vadd.xlane.f32.xlu1 %v1412_v22 }
 0x558   :  { %9472 = vpow2.f32 %v2220_v25 }
 0x559   :  { %v2347_v10 = vpop.xlane.xlu0 %2346  ;;  %9474 = vpow2.f32 %v2085_v11 }
 0x55a   :  { %v2351_v15 = vsub.f32 %v10543_v13, %v2347_v10  ;;  %v10709_v13 = vpop.eup %9462 }
 0x55b   :  { %1416 = vadd.xlane.f32.xlu1 %v1415_v32  ;;  %v2350_v29 = vpop.xlane.xlu1 %2349  ;;  %v10715_v53 = vpop.eup %9464  ;;  %v1685_v17 = vsel %vm735_vm11, %v10709_v13, 0.0 }
 0x55c   :  { %v2353_v44 = vmul.f32 1.442695, %v2351_v15  ;;  %v2352_v61 = vsub.f32 %v10546_v21, %v2350_v29  ;;  %v10719_v40 = vpop.eup %9466  ;;  %v1955_v42 = vsel %vm735_vm11, %v10715_v53, 0.0 }
 0x55d   :  { %v10725_v22 = vpop.eup %9468  ;;  %v1817_v5 = vsel %vm731_vm10, %v10719_v40, 0.0 }
 0x55e   :  { %9476 = vpow2.f32 %v2353_v44  ;;  %v2355_v55 = vmul.f32 1.442695, %v2352_v61  ;;  %v10728_v30 = vpop.eup %9470  ;;  %v2087_v10 = vsel %vm731_vm10, %v10725_v22, 0.0 }
 0x55f   :  { %1551 = vadd.xlane.f32.xlu1 %v1550_v3  ;;  %1548 = vadd.xlane.f32.xlu0 %v1547_v26  ;;  %9478 = vpow2.f32 %v2218_v9 }
 0x561   :  { %v2482_v47 = vpop.xlane.xlu0 %2481 }
 0x562   :  { %v10735_v32 = vpop.eup %9472 }
 0x563   :  { %v2485_v62 = vpop.xlane.xlu1 %2484  ;;  %1821 = vadd.xlane.f32.xlu0 %v1820_v43  ;;  %1683 = vadd.xlane.f32.xlu1 %v1682_v46  ;;  %v10738_v15 = vpop.eup %9474  ;;  %v2225_v3 = vsel %vm735_vm11, %v10735_v32, 0.0 }
 0x564   :  { %v2487_v35 = vsub.f32 %v10556_v48, %v2485_v62  ;;  %v2486_v48 = vsub.f32 %v10553_v33, %v2482_v47  ;;  %v2090_v44 = vsel %vm735_vm11, %v10738_v15, 0.0 }
 0x566   :  { %v2490_v56 = vmul.f32 1.442695, %v2487_v35  ;;  %v2488_v33 = vmul.f32 1.442695, %v2486_v48 }
 0x567   :  { %1956 = vadd.xlane.f32.xlu0 %v1955_v42  ;;  %1686 = vadd.xlane.f32.xlu1 %v1685_v17 }
 0x568   :  { %9480 = vpow2.f32 %v2490_v56  ;;  %v10744_v26 = vpop.eup %9476 }
 0x569   :  { %v2617_v21 = vpop.xlane.xlu0 %2616  ;;  %9482 = vpow2.f32 %v2355_v55  ;;  %v10746_v39 = vpop.eup %9478  ;;  %v2357_v43 = vsel %vm731_vm10, %v10744_v26, 0.0 }
 0x56a   :  { %v2621_v0 = vsub.f32 %v10563_v7, %v2617_v21  ;;  %v1952_v7 = vsel %vm731_vm10, %v10728_v30, 0.0  ;;  %v2222_v47 = vsel %vm731_vm10, %v10746_v39, 0.0 }
 0x56b   :  { %v2620_v37 = vpop.xlane.xlu1 %2619  ;;  %1818 = vadd.xlane.f32.xlu1 %v1817_v5  ;;  %2088 = vadd.xlane.f32.xlu0 %v2087_v10 }
 0x56c   :  { %v2623_v16 = vmul.f32 1.442695, %v2621_v0  ;;  %v2622_v25 = vsub.f32 %v10566_v12, %v2620_v37 }
 0x56e   :  { %9484 = vpow2.f32 %v2623_v16  ;;  %v2625_v29 = vmul.f32 1.442695, %v2622_v25 }
 0x56f   :  { %1953 = vadd.xlane.f32.xlu1 %v1952_v7  ;;  %2226 = vadd.xlane.f32.xlu0 %v2225_v3  ;;  %9486 = vpow2.f32 %v2488_v33 }
 0x570   :  { %9488 = vpow2.f32 %v2625_v29 }
 0x571   :  { %v2752_v11 = vpop.xlane.xlu0 %2751 }
 0x572   :  { %v2756_v12 = vsub.f32 %v10573_v57, %v2752_v11  ;;  %v10753_v46 = vpop.eup %9480 }
 0x573   :  { %v2755_v62 = vpop.xlane.xlu1 %2754  ;;  %2091 = vadd.xlane.f32.xlu1 %v2090_v44  ;;  %2358 = vadd.xlane.f32.xlu0 %v2357_v43  ;;  %v2495_v57 = vsel %vm735_vm11, %v10753_v46, 0.0  ;;  %v10760_v56 = vpop.eup %9482 }
 0x574   :  { %v2757_v9 = vsub.f32 %v10576_v45, %v2755_v62  ;;  %v2758_v35 = vmul.f32 1.442695, %v2756_v12  ;;  %v2360_v48 = vsel %vm735_vm11, %v10760_v56, 0.0 }
 0x576   :  { %v2760_v61 = vmul.f32 1.442695, %v2757_v9 }
 0x577   :  { %2223 = vadd.xlane.f32.xlu1 %v2222_v47  ;;  %2496 = vadd.xlane.f32.xlu0 %v2495_v57 }
 0x578   :  { %v10762_v42 = vpop.eup %9484  ;;  %9490 = vpow2.f32 %v2760_v61 }
 0x579   :  { %9492 = vpow2.f32 %v2758_v35  ;;  %v2887_v17 = vpop.xlane.xlu1 %2886  ;;  %v2627_v45 = vsel %vm731_vm10, %v10762_v42, 0.0  ;;  %v10769_v21 = vpop.eup %9486 }
 0x57a   :  { %v2891_v55 = vsub.f32 %v10583_v8, %v2887_v17  ;;  %v2492_v37 = vsel %vm731_vm10, %v10769_v21, 0.0  ;;  %v10774_v16 = vpop.eup %9488 }
 0x57b   :  { %2361 = vadd.xlane.f32.xlu1 %v2360_v48  ;;  %2628 = vadd.xlane.f32.xlu0 %v2627_v45  ;;  %v2630_v25 = vsel %vm735_vm11, %v10774_v16, 0.0 }
 0x57c   :  { %v2893_v0 = vmul.f32 1.442695, %v2891_v55 }
 0x57d   :  { %v2890_v5 = vpop.xlane.xlu1 %2889 }
 0x57e   :  { %9494 = vpow2.f32 %v2893_v0  ;;  %v2892_v10 = vsub.f32 %v10586_v19, %v2890_v5 }
 0x57f   :  { %2493 = vadd.xlane.f32.xlu1 %v2492_v37 }
 0x580   :  { %v2895_v33 = vmul.f32 1.442695, %v2892_v10 }
 0x581   :  { %v3022_v9 = vpop.xlane.xlu0 %3021 }
 0x582   :  { %v10776_v8 = vpop.eup %9490  ;;  %9496 = vpow2.f32 %v2895_v33  ;;  %v3026_v55 = vsub.f32 %v10593_v49, %v3022_v9 }
 0x583   :  { %v10780_v7 = vpop.eup %9492  ;;  %2631 = vadd.xlane.f32.xlu1 %v2630_v25  ;;  %v2765_v3 = vsel %vm735_vm11, %v10776_v8, 0.0 }
 0x584   :  { %2766 = vadd.xlane.f32.xlu0 %v2765_v3  ;;  %v2762_v19 = vsel %vm731_vm10, %v10780_v7, 0.0  ;;  %v3028_v37 = vmul.f32 1.442695, %v3026_v55 }
 0x585   :  { %v3025_v61 = vpop.xlane.xlu0 %3024 }
 0x586   :  { %v3027_v48 = vsub.f32 %v10596_v2, %v3025_v61 }
 0x587   :  { %2763 = vadd.xlane.f32.xlu1 %v2762_v19 }
 0x588   :  { %v10786_v29 = vpop.eup %9494  ;;  %v3030_v25 = vmul.f32 1.442695, %v3027_v48 }
 0x589   :  { %v2897_v11 = vsel %vm731_vm10, %v10786_v29, 0.0  ;;  %v3157_v44 = vpop.xlane.xlu1 %3156 }
 0x58a   :  { %2898 = vadd.xlane.f32.xlu0 %v2897_v11  ;;  %v3161_v33 = vsub.f32 %v10603_v28, %v3157_v44  ;;  %v1024_v11 = vsel %vm359_vm4, %v10412_v27, 0 }
 0x58c   :  { %v10790_v12 = vpop.eup %9496  ;;  %v3163_v49 = vmul.f32 1.442695, %v3161_v33 }
 0x58d   :  { %v2900_v43 = vsel %vm735_vm11, %v10790_v12, 0.0  ;;  %v3160_v62 = vpop.xlane.xlu1 %3159 }
 0x58e   :  { %2901 = vadd.xlane.f32.xlu1 %v2900_v43  ;;  %v3162_v3 = vsub.f32 %v10606_v52, %v3160_v62 }
 0x591   :  { %v3292_v35 = vpop.xlane.xlu1 %3291 }
 0x592   :  { %v3296_v2 = vsub.f32 %v10613_v54, %v3292_v35 }
 0x594   :  { %v3298_v52 = vmul.f32 1.442695, %v3296_v2 }
 0x595   :  { %v3295_v47 = vpop.xlane.xlu1 %3294 }
 0x596   :  { %v3297_v28 = vsub.f32 %v10617_v1, %v3295_v47 }
 0x598   :  { %v3300_v27 = vmul.f32 1.442695, %v3297_v28 }
 0x59f   :  { %2773 = vrot.lane.b32.xlu1 %v10198_v6, %s12804_s2  ;;  %v873_v57 = vpop.xlane.xlu0 %872 }
 0x5a0   :  { %2908 = vrot.lane.b32.xlu0 %v10198_v6, %s12805_s9  ;;  %9498 = vrcp.f32 %v873_v57 }
 0x5a3   :  { %v876_v17 = vpop.xlane.xlu1 %875 }
 0x5a4   :  { %9500 = vrcp.f32 %v876_v17  ;;  %3043 = vrot.lane.b32.xlu0 %v10198_v6, %s12806_s27 }
 0x5a5   :  { %9502 = vpow2.f32 %v3028_v37 }
 0x5a6   :  { %9504 = vpow2.f32 %v3030_v25 }
 0x5a7   :  { %9506 = vpow2.f32 %v3163_v49  ;;  %v1009_v55 = vpop.xlane.xlu0 %1008 }
 0x5aa   :  { %v9499_v45 = vpop.eup %9498 }
 0x5ab   :  { %v879_v5 = vmul.f32 %v9499_v45, %v10625_v20  ;;  %v3165_v20 = vmul.f32 1.442695, %v3162_v3  ;;  %v10838_v45 = vpop.permute.xlu1 %2503 }
 0x5ad   :  { %9508 = vpow2.f32 %v3165_v20  ;;  %v1159_v20 = vsel %vm359_vm4, %v10400_v18, 0 }
 0x5ae   :  { %v9501_v0 = vpop.eup %9500  ;;  %9510 = vpow2.f32 %v3298_v52 }
 0x5af   :  { %v880_v10 = vmul.f32 %v9501_v0, %v10630_v24  ;;  %9512 = vpow2.f32 %v3300_v27  ;;  %v10814_v24 = vpop.eup %9502  ;;  %v1144_v0 = vpop.xlane.xlu0 %1143 }
 0x5b0   :  { %v10816_v44 = vpop.eup %9504  ;;  %v3032_v43 = vsel %vm731_vm10, %v10814_v24, 0.0  ;;  %9514 = vrcp.f32 %v1009_v55 }
 0x5b1   :  { %v881_v19 = vpack.c.bf16 %v880_v10, %v879_v5  ;;  %v10818_v54 = vpop.eup %9506  ;;  %v3035_v1 = vsel %vm735_vm11, %v10816_v44, 0.0 }
 0x5b2   :  { %v3167_v61 = vsel %vm731_vm10, %v10818_v54, 0.0 }
 0x5b3   :  { %8666 = vmatmul.mubr.msk.bf16.vlgmr.msra.gmra.mrb[16].mxu1 %vm731_vm10, %v881_v19 }
 0x5b4   :  { %8676 = vmatpush3.bf16.msra.mxu1 %v1024_v11  ;;  %8677 = vmatprep.mubr.msk.bf16.mxu1 %vm9809_vm0, %v12803_v38 }
 0x5b5   :  { %8687 = vmatprep.subr.bf16.mxu1 %v12803_v38 }
 0x5b7   :  { %v10824_v62 = vpop.eup %9508  ;;  %v1279_v3 = vpop.xlane.xlu0 %1278 }
 0x5b8   :  { %v10826_v9 = vpop.eup %9510  ;;  %v3170_v35 = vsel %vm735_vm11, %v10824_v62, 0.0 }
 0x5b9   :  { %v10832_v47 = vpop.eup %9512  ;;  %v3302_v57 = vsel %vm731_vm10, %v10826_v9, 0.0 }
 0x5ba   :  { %v3305_v17 = vsel %vm735_vm11, %v10832_v47, 0.0  ;;  %v9515_v37 = vpop.eup %9514 }
 0x5bb   :  { %v1015_v25 = vmul.f32 %v9515_v37, %v10634_v31 }
 0x5c3   :  { %3033 = vadd.xlane.f32.xlu1 %v3032_v43  ;;  %3036 = vadd.xlane.f32.xlu0 %v3035_v1  ;;  %v1294_v1 = vsel %vm359_vm4, %v10405_v23, 0  ;;  %v12809_v23 = vld [vmem:[#allocation8_spill] sm:$0xff] }
 0x5c7   :  { %3171 = vadd.xlane.f32.xlu1 %v3170_v35  ;;  %3168 = vadd.xlane.f32.xlu0 %v3167_v61 }
 0x5cb   :  { %3303 = vadd.xlane.f32.xlu1 %v3302_v57  ;;  %3306 = vadd.xlane.f32.xlu0 %v3305_v17 }
 0x5d8   :  { %v1012_v48 = vpop.xlane.xlu1 %1011 }
 0x5d9   :  { %9516 = vrcp.f32 %v1012_v48  ;;  %v1429_v48 = vsel %vm359_vm4, %v12809_v23, 0 }
 0x5dc   :  { %v1147_v5 = vpop.xlane.xlu1 %1146  ;;  %3313 = vrot.lane.b32.xlu1 %v10198_v6, %s12807_s6 }
 0x5dd   :  { %9518 = vrcp.f32 %v1147_v5 }
 0x5de   :  { %9520 = vrcp.f32 %v1144_v0 }
 0x5e0   :  { %v1282_v10 = vpop.xlane.xlu1 %1281 }
 0x5e1   :  { %3178 = vrot.lane.b32.xlu0 %v10198_v6, %s12808_s5  ;;  %9522 = vrcp.f32 %v1282_v10 }
 0x5e2   :  { %9524 = vrcp.f32 %v1279_v3 }
 0x5e3   :  { %v9517_v33 = vpop.eup %9516 }
 0x5e4   :  { %v1016_v19 = vmul.f32 %v9517_v33, %v10664_v34  ;;  %v1414_v11 = vpop.xlane.xlu1 %1413  ;;  %v10854_v34 = vpop.permute.xlu0 %2638 }
 0x5e6   :  { %v1017_v49 = vpack.c.bf16 %v1016_v19, %v1015_v25  ;;  %v12810_v25 = vld [vmem:[#allocation7_spill] sm:$0xff] }
 0x5e7   :  { %v9519_v2 = vpop.eup %9518  ;;  %v1564_v3 = vsel %vm359_vm4, %v12810_v25, 0  ;;  %v12814_v25 = vld [vmem:[#allocation11_spill] sm:$0xff] }
 0x5e8   :  { %v1417_v28 = vpop.xlane.xlu1 %1416  ;;  %8678 = vmatmul.mubr.msk.bf16.vlgmr.msra.gmra.mrb[20].mxu1 %vm731_vm10, %v1017_v49  ;;  %v9521_v52 = vpop.eup %9520  ;;  %v1151_v6 = vmul.f32 %v9519_v2, %v10670_v50 }
 0x5e9   :  { %8688 = vmatpush3.bf16.msra.mxu1 %v1159_v20  ;;  %8689 = vmatprep.mubr.msk.bf16.mxu1 %vm9809_vm0, %v12803_v38  ;;  %v1150_v31 = vmul.f32 %v9521_v52, %v10639_v59  ;;  %9526 = vrcp.f32 %v1417_v28  ;;  %v12811_v20 = vld [vmem:[#allocation10_spill] sm:$0xff] }
 0x5ea   :  { %8699 = vmatprep.subr.bf16.mxu1 %v12803_v38  ;;  %9528 = vrcp.f32 %v1414_v11  ;;  %v1699_v28 = vsel %vm359_vm4, %v12811_v20, 0 }
 0x5eb   :  { %v1152_v43 = vpack.c.bf16 %v1151_v6, %v1150_v31  ;;  %v9523_v18 = vpop.eup %9522 }
 0x5ec   :  { %v1552_v27 = vpop.xlane.xlu1 %1551  ;;  %v9525_v35 = vpop.eup %9524  ;;  %v1286_v50 = vmul.f32 %v9523_v18, %v10676_v60  ;;  %v12812_v18 = vld [vmem:[#allocation9_spill] sm:$0xff] }
 0x5ed   :  { %v1549_v59 = vpop.xlane.xlu0 %1548  ;;  %v1285_v61 = vmul.f32 %v9525_v35, %v10645_v63  ;;  %9530 = vrcp.f32 %v1552_v27 }
 0x5ee   :  { %9532 = vrcp.f32 %v1549_v59 }
 0x5ef   :  { %v1287_v17 = vpack.c.bf16 %v1286_v50, %v1285_v61 }
 0x5f0   :  { %8690 = vmatmul.mubr.msk.bf16.vlgmr.msra.gmra.mrb[24].mxu1 %vm731_vm10, %v1152_v43  ;;  %v1684_v57 = vpop.xlane.xlu1 %1683 }
 0x5f1   :  { %8700 = vmatpush3.bf16.msra.mxu1 %v1294_v1  ;;  %8701 = vmatprep.mubr.msk.bf16.mxu1 %vm9809_vm0, %v12803_v38  ;;  %v1834_v1 = vsel %vm359_vm4, %v12812_v18, 0 }
 0x5f2   :  { %8711 = vmatprep.subr.bf16.mxu1 %v12803_v38 }
 0x5f3   :  { %v9527_v55 = vpop.eup %9526 }
 0x5f4   :  { %v9529_v0 = vpop.eup %9528  ;;  %v1421_v60 = vmul.f32 %v9527_v55, %v10688_v51  ;;  %v1687_v5 = vpop.xlane.xlu1 %1686 }
 0x5f5   :  { %v1420_v63 = vmul.f32 %v9529_v0, %v10682_v14  ;;  %9534 = vrcp.f32 %v1687_v5  ;;  %v1822_v14 = vpop.xlane.xlu0 %1821 }
 0x5f6   :  { %9536 = vrcp.f32 %v1684_v57 }
 0x5f7   :  { %v9531_v10 = vpop.eup %9530  ;;  %v1422_v37 = vpack.c.bf16 %v1421_v60, %v1420_v63 }
 0x5f8   :  { %8702 = vmatmul.mubr.msk.bf16.vlgmr.msra.gmra.mrb[28].mxu1 %vm731_vm10, %v1287_v17  ;;  %v9533_v33 = vpop.eup %9532  ;;  %v1556_v51 = vmul.f32 %v9531_v10, %v10696_v41  ;;  %v1819_v11 = vpop.xlane.xlu1 %1818 }
 0x5f9   :  { %8712 = vmatpush3.bf16.msra.mxu1 %v1429_v48  ;;  %8713 = vmatprep.mubr.msk.bf16.mxu1 %vm9809_vm0, %v12803_v38  ;;  %v1555_v19 = vmul.f32 %v9533_v33, %v10692_v4  ;;  %9538 = vrcp.f32 %v1819_v11  ;;  %v1957_v31 = vpop.xlane.xlu0 %1956 }
 0x5fa   :  { %8723 = vmatprep.subr.bf16.mxu1 %v12803_v38  ;;  %9540 = vrcp.f32 %v1822_v14 }
 0x5fb   :  { %v1557_v49 = vpack.c.bf16 %v1556_v51, %v1555_v19 }
 0x5fc   :  { %v1954_v41 = vpop.xlane.xlu1 %1953 }
 0x5fd   :  { %9542 = vrcp.f32 %v1954_v41  ;;  %v2089_v61 = vpop.xlane.xlu0 %2088 }
 0x5fe   :  { %9544 = vrcp.f32 %v1957_v31  ;;  %v12816_v31 = vld [vmem:[#allocation13_spill] sm:$0xff] }
 0x5ff   :  { %v9535_v2 = vpop.eup %9534 }
 0x600   :  { %8714 = vmatmul.mubr.msk.bf16.vlgmr.msra.gmra.mrb[32].mxu1 %vm731_vm10, %v1422_v37  ;;  %v9537_v52 = vpop.eup %9536  ;;  %v1691_v4 = vmul.f32 %v9535_v2, %v10709_v13  ;;  %v2092_v50 = vpop.xlane.xlu1 %2091  ;;  %v12815_v2 = vld [vmem:[#allocation14_spill] sm:$0xff] }
 0x601   :  { %8724 = vmatpush3.bf16.msra.mxu1 %v1564_v3  ;;  %8725 = vmatprep.mubr.msk.bf16.mxu1 %vm9809_vm0, %v12803_v38  ;;  %v1690_v6 = vmul.f32 %v9537_v52, %v10700_v36  ;;  %9546 = vrcp.f32 %v2092_v50  ;;  %v2227_v10 = vpop.xlane.xlu0 %2226  ;;  %v2104_v3 = vsel %vm359_vm4, %v12814_v25, 0  ;;  %v2239_v20 = vsel %vm359_vm4, %v12815_v2, 0 }
 0x602   :  { %8735 = vmatprep.subr.bf16.mxu1 %v12803_v38  ;;  %9548 = vrcp.f32 %v2089_v61  ;;  %v2509_v50 = vsel %vm359_vm4, %v10838_v45, 0 }
 0x603   :  { %v1692_v27 = vpack.c.bf16 %v1691_v4, %v1690_v6  ;;  %v9539_v43 = vpop.eup %9538 }
 0x604   :  { %v9541_v35 = vpop.eup %9540  ;;  %v1825_v13 = vmul.f32 %v9539_v43, %v10719_v40  ;;  %v12813_v40 = vld [vmem:[#allocation12_spill] sm:$0xff]  ;;  %v2224_v5 = vpop.xlane.xlu1 %2223 }
 0x605   :  { %v1826_v59 = vmul.f32 %v9541_v35, %v10706_v58  ;;  %v1969_v0 = vsel %vm359_vm4, %v12813_v40, 0  ;;  %9550 = vrcp.f32 %v2224_v5  ;;  %v2359_v11 = vpop.xlane.xlu0 %2358 }
 0x606   :  { %9552 = vrcp.f32 %v2227_v10 }
 0x607   :  { %v1827_v23 = vpack.c.bf16 %v1826_v59, %v1825_v13  ;;  %v9543_v48 = vpop.eup %9542 }
 0x608   :  { %8726 = vmatmul.mubr.msk.bf16.vlgmr.msra.gmra.mrb[36].mxu1 %vm731_vm10, %v1557_v49  ;;  %v9545_v60 = vpop.eup %9544  ;;  %v1960_v58 = vmul.f32 %v9543_v48, %v10728_v30  ;;  %v2362_v19 = vpop.xlane.xlu1 %2361 }
 0x609   :  { %8736 = vmatpush3.bf16.msra.mxu1 %v1699_v28  ;;  %8737 = vmatprep.mubr.msk.bf16.mxu1 %vm9809_vm0, %v12803_v38  ;;  %v1961_v63 = vmul.f32 %v9545_v60, %v10715_v53  ;;  %9554 = vrcp.f32 %v2362_v19  ;;  %v2497_v4 = vpop.xlane.xlu0 %2496 }
 0x60a   :  { %8747 = vmatprep.subr.bf16.mxu1 %v12803_v38  ;;  %9556 = vrcp.f32 %v2359_v11 }
 0x60b   :  { %v1962_v37 = vpack.c.bf16 %v1961_v63, %v1960_v58  ;;  %v9547_v33 = vpop.eup %9546 }
 0x60c   :  { %v9549_v51 = vpop.eup %9548  ;;  %v2096_v30 = vmul.f32 %v9547_v33, %v10738_v15  ;;  %v2494_v52 = vpop.xlane.xlu1 %2493 }
 0x60d   :  { %v2095_v53 = vmul.f32 %v9549_v51, %v10725_v22  ;;  %9558 = vrcp.f32 %v2494_v52 }
 0x60e   :  { %9560 = vrcp.f32 %v2497_v4 }
 0x60f   :  { %v2097_v14 = vpack.c.bf16 %v2096_v30, %v2095_v53  ;;  %v9551_v49 = vpop.eup %9550 }
 0x610   :  { %8738 = vmatmul.mubr.msk.bf16.vlgmr.msra.gmra.mrb[40].mxu1 %vm731_vm10, %v1692_v27  ;;  %v9553_v28 = vpop.eup %9552  ;;  %v2230_v15 = vmul.f32 %v9551_v49, %v10746_v39  ;;  %v2374_v27 = vsel %vm359_vm4, %v12816_v31, 0  ;;  %v2632_v18 = vpop.xlane.xlu1 %2631 }
 0x611   :  { %8748 = vmatpush3.bf16.msra.mxu1 %v1834_v1  ;;  %8749 = vmatprep.mubr.msk.bf16.mxu1 %vm9809_vm0, %v12803_v38  ;;  %v2231_v22 = vmul.f32 %v9553_v28, %v10735_v32  ;;  %v2629_v1 = vpop.xlane.xlu0 %2628  ;;  %9562 = vrcp.f32 %v2632_v18 }
 0x612   :  { %8759 = vmatprep.subr.bf16.mxu1 %v12803_v38  ;;  %v796_v36 = vpop.f32.mrb[12].mxu1  ;;  %9564 = vrcp.f32 %v2629_v1 }
 0x613   :  { %803 = vst.msk [vmem:[#allocation2] sm:$0xff] %vm683_vm9, %v796_v36  ;;  %v8655_v57 = vpop.f32.mrb[13].mxu1  ;;  %v2232_v41 = vpack.c.bf16 %v2231_v22, %v2230_v15  ;;  %v9555_v6 = vpop.eup %9554 }
 0x614   :  { %v799_v17 = vpop.f32.mrb[14].mxu1  ;;  %v9557_v43 = vpop.eup %9556  ;;  %v2366_v39 = vmul.f32 %v9555_v6, %v10760_v56 }
 0x615   :  { %805 = vst.msk [vmem:[#allocation2 + $0x8] sm:$0xf] %vm804_vm12, %v799_v17  ;;  %v8656_v55 = vpop.f32.mrb[15].mxu1  ;;  %v2365_v32 = vmul.f32 %v9557_v43, %v10744_v26  ;;  %v2764_v59 = vpop.xlane.xlu1 %2763 }
 0x616   :  { %v2767_v61 = vpop.xlane.xlu0 %2766  ;;  %9566 = vrcp.f32 %v2764_v59  ;;  %v2644_v55 = vsel %vm359_vm4, %v10854_v34, 0 }
 0x617   :  { %v2367_v35 = vpack.c.bf16 %v2366_v39, %v2365_v32  ;;  %v9559_v13 = vpop.eup %9558  ;;  %9568 = vrcp.f32 %v2767_v61 }
 0x618   :  { %8750 = vmatmul.mubr.msk.bf16.vlgmr.msra.gmra.mrb[44].mxu1 %vm731_vm10, %v1827_v23  ;;  %v9561_v36 = vpop.eup %9560  ;;  %v2500_v56 = vmul.f32 %v9559_v13, %v10769_v21 }
 0x619   :  { %8760 = vmatpush3.bf16.msra.mxu1 %v1969_v0  ;;  %8761 = vmatprep.mubr.msk.bf16.mxu1 %vm9809_vm0, %v12803_v38  ;;  %v2501_v26 = vmul.f32 %v9561_v36, %v10753_v46 }
 0x61a   :  { %8771 = vmatprep.subr.bf16.mxu1 %v12803_v38  ;;  %v2899_v23 = vpop.xlane.xlu0 %2898 }
 0x61b   :  { %v2502_v57 = vpack.c.bf16 %v2501_v26, %v2500_v56  ;;  %v9563_v17 = vpop.eup %9562  ;;  %v2902_v45 = vpop.xlane.xlu1 %2901 }
 0x61c   :  { %v9565_v48 = vpop.eup %9564  ;;  %v2636_v21 = vmul.f32 %v9563_v17, %v10774_v16  ;;  %9570 = vrcp.f32 %v2902_v45 }
 0x61d   :  { %v2635_v46 = vmul.f32 %v9565_v48, %v10762_v42  ;;  %9572 = vrcp.f32 %v2899_v23 }
 0x61e   :  { %v2909_v0 = vpop.permute.xlu0 %2908 }
 0x61f   :  { %v2774_v40 = vpop.permute.xlu1 %2773  ;;  %v2637_v60 = vpack.c.bf16 %v2636_v21, %v2635_v46  ;;  %v2914_v33 = vsel %vm359_vm4, %v2909_v0, 0 }
 0x620   :  { %8762 = vmatmul.mubr.msk.bf16.vlgmr.msra.gmra.mrb[48].mxu1 %vm731_vm10, %v1962_v37  ;;  %v9567_v58 = vpop.eup %9566  ;;  %v2779_v34 = vsel %vm359_vm4, %v2774_v40, 0 }
 0x621   :  { %8772 = vmatpush3.bf16.msra.mxu1 %v2104_v3  ;;  %8773 = vmatprep.mubr.msk.bf16.mxu1 %vm9809_vm0, %v12803_v38  ;;  %v9569_v5 = vpop.eup %9568  ;;  %v2770_v16 = vmul.f32 %v9567_v58, %v10780_v7 }
 0x622   :  { %8783 = vmatprep.subr.bf16.mxu1 %v12803_v38  ;;  %v2771_v42 = vmul.f32 %v9569_v5, %v10776_v8  ;;  %v3044_v63 = vpop.permute.xlu0 %3043 }
 0x623   :  { %v3049_v11 = vsel %vm359_vm4, %v3044_v63, 0 }
 0x624   :  { %v2772_v10 = vpack.c.bf16 %v2771_v42, %v2770_v16 }
 0x626   :  { %v9571_v37 = vpop.eup %9570 }
 0x627   :  { %v9573_v51 = vpop.eup %9572  ;;  %v2906_v7 = vmul.f32 %v9571_v37, %v10790_v12 }
 0x628   :  { %8774 = vmatmul.mubr.msk.bf16.vlgmr.msra.gmra.mrb[52].mxu1 %vm731_vm10, %v2097_v14  ;;  %v2905_v8 = vmul.f32 %v9573_v51, %v10786_v29 }
 0x629   :  { %8784 = vmatpush3.bf16.msra.mxu1 %v2239_v20  ;;  %8785 = vmatprep.mubr.msk.bf16.mxu1 %vm9809_vm0, %v12803_v38 }
 0x62a   :  { %8795 = vmatprep.subr.bf16.mxu1 %v12803_v38  ;;  %v2907_v53 = vpack.c.bf16 %v2906_v7, %v2905_v8 }
 0x630   :  { %8786 = vmatmul.mubr.msk.bf16.vlgmr.msra.gmra.mrb[56].mxu1 %vm731_vm10, %v2232_v41 }
 0x631   :  { %8796 = vmatpush3.bf16.msra.mxu1 %v2374_v27  ;;  %8797 = vmatprep.mubr.msk.bf16.mxu1 %vm9809_vm0, %v12803_v38 }
 0x632   :  { %8807 = vmatprep.subr.bf16.mxu1 %v12803_v38 }
 0x638   :  { %8798 = vmatmul.mubr.msk.bf16.vlgmr.msra.gmra.mrb[60].mxu1 %vm731_vm10, %v2367_v35 }
 0x639   :  { %8808 = vmatpush3.bf16.msra.mxu1 %v2509_v50  ;;  %8809 = vmatprep.mubr.msk.bf16.mxu1 %vm9809_vm0, %v12803_v38 }
 0x63a   :  { %8819 = vmatprep.subr.bf16.mxu1 %v12803_v38 }
 0x640   :  { %8810 = vmatmul.mubr.msk.bf16.vlgmr.msra.gmra.mrb[64].mxu1 %vm731_vm10, %v2502_v57 }
 0x641   :  { %8820 = vmatpush3.bf16.msra.mxu1 %v2644_v55  ;;  %8821 = vmatprep.mubr.msk.bf16.mxu1 %vm9809_vm0, %v12803_v38 }
 0x642   :  { %8831 = vmatprep.subr.bf16.mxu1 %v12803_v38 }
 0x648   :  { %8822 = vmatmul.mubr.msk.bf16.vlgmr.msra.gmra.mrb[68].mxu1 %vm731_vm10, %v2637_v60 }
 0x649   :  { %8832 = vmatpush3.bf16.msra.mxu1 %v2779_v34  ;;  %8833 = vmatprep.mubr.msk.bf16.mxu1 %vm9809_vm0, %v12803_v38 }
 0x64a   :  { %8843 = vmatprep.subr.bf16.mxu1 %v12803_v38 }
 0x650   :  { %v3034_v25 = vpop.xlane.xlu1 %3033  ;;  %v3037_v3 = vpop.xlane.xlu0 %3036  ;;  %8834 = vmatmul.mubr.msk.bf16.vlgmr.msra.gmra.mrb[72].mxu1 %vm731_vm10, %v2772_v10 }
 0x651   :  { %9574 = vrcp.f32 %v3034_v25  ;;  %8844 = vmatpush3.bf16.msra.mxu1 %v2914_v33  ;;  %8845 = vmatprep.mubr.msk.bf16.mxu1 %vm9809_vm0, %v12803_v38 }
 0x652   :  { %9576 = vrcp.f32 %v3037_v3  ;;  %8855 = vmatprep.subr.bf16.mxu1 %v12803_v38 }
 0x654   :  { %v3172_v30 = vpop.xlane.xlu1 %3171  ;;  %v3169_v19 = vpop.xlane.xlu0 %3168 }
 0x655   :  { %9578 = vrcp.f32 %v3172_v30 }
 0x656   :  { %9580 = vrcp.f32 %v3169_v19 }
 0x658   :  { %v3307_v14 = vpop.xlane.xlu0 %3306  ;;  %8846 = vmatmul.mubr.msk.bf16.vlgmr.msra.gmra.mrb[76].mxu1 %vm731_vm10, %v2907_v53  ;;  %v3304_v12 = vpop.xlane.xlu1 %3303 }
 0x659   :  { %8856 = vmatpush3.bf16.msra.mxu1 %v3049_v11  ;;  %8857 = vmatprep.mubr.msk.bf16.mxu1 %vm9809_vm0, %v12803_v38  ;;  %9582 = vrcp.f32 %v3304_v12 }
 0x65a   :  { %8867 = vmatprep.subr.bf16.mxu1 %v12803_v38  ;;  %9584 = vrcp.f32 %v3307_v14 }
 0x65b   :  { %v9575_v49 = vpop.eup %9574 }
 0x65c   :  { %v9577_v2 = vpop.eup %9576  ;;  %v3040_v29 = vmul.f32 %v9575_v49, %v10814_v24  ;;  %v3179_v28 = vpop.permute.xlu0 %3178 }
 0x65d   :  { %v3041_v20 = vmul.f32 %v9577_v2, %v10816_v44  ;;  %v3184_v4 = vsel %vm359_vm4, %v3179_v28, 0  ;;  %v3314_v44 = vpop.permute.xlu1 %3313 }
 0x65e   :  { %v3319_v43 = vsel %vm359_vm4, %v3314_v44, 0 }
 0x65f   :  { %v9579_v15 = vpop.eup %9578  ;;  %v3042_v52 = vpack.c.bf16 %v3041_v20, %v3040_v29 }
 0x660   :  { %v9581_v22 = vpop.eup %9580  ;;  %v3176_v41 = vmul.f32 %v9579_v15, %v10824_v62 }
 0x661   :  { %8858 = vmatmul.mubr.msk.bf16.vlgmr.msra.gmra.mrb[80].mxu1 %vm731_vm10, %v3042_v52  ;;  %v3175_v24 = vmul.f32 %v9581_v22, %v10818_v54 }
 0x662   :  { %8868 = vmatpush3.bf16.msra.mxu1 %v3184_v4  ;;  %8869 = vmatprep.mubr.msk.bf16.mxu1 %vm9809_vm0, %v12803_v38 }
 0x663   :  { %8879 = vmatprep.subr.bf16.mxu1 %v12803_v38  ;;  %v9583_v6 = vpop.eup %9582  ;;  %v3177_v31 = vpack.c.bf16 %v3176_v41, %v3175_v24 }
 0x664   :  { %v9585_v27 = vpop.eup %9584  ;;  %v3310_v39 = vmul.f32 %v9583_v6, %v10826_v9 }
 0x665   :  { %v3311_v62 = vmul.f32 %v9585_v27, %v10832_v47 }
 0x667   :  { %v3312_v18 = vpack.c.bf16 %v3311_v62, %v3310_v39 }
 0x669   :  { %8870 = vmatmul.mubr.msk.bf16.vlgmr.msra.gmra.mrb[84].mxu1 %vm731_vm10, %v3177_v31 }
 0x66a   :  { %8880 = vmatpush3.bf16.msra.mxu1 %v3319_v43  ;;  %8881 = vmatprep.mubr.msk.bf16.mxu1 %vm9809_vm0, %v12803_v38 }
 0x671   :  { %8882 = vmatmul.mubr.msk.bf16.vlgmr.msra.gmra.mrb[88].mxu1 %vm731_vm10, %v3312_v18 }
 0x686   :  { %v925_v54 = vpop.f32.mrb[16].mxu1 }
 0x687   :  { %934 = vrot.lane.b32.xlu0 %v925_v54, %s12685_s25  ;;  %v8667_v32 = vpop.f32.mrb[17].mxu1 }
 0x688   :  { %v928_v1 = vpop.f32.mrb[18].mxu1 }
 0x689   :  { %v8668_v35 = vpop.f32.mrb[19].mxu1 }
 0x68b   :  { %936 = vrot.lane.b32.xlu0 %v928_v1, %s12685_s25  ;;  %s12691_s25 = smov 16  }
 0x6bb   :  { %v1060_v13 = vpop.f32.mrb[20].mxu1 }
 0x6bc   :  { %1069 = vrot.lane.b32.xlu0 %v1060_v13, %s12687_s11  ;;  %v8679_v50 = vpop.f32.mrb[21].mxu1  ;;  %v9317_v13 = vld [vmem:[%s12619_s13] sm:$0xff]  }
 0x6bd   :  { %v1063_v9 = vpop.f32.mrb[22].mxu1  ;;  %8886 = vmatpush3.bf16.msra.mxu0 %v9317_v13 }
 0x6be   :  { %v8680_v36 = vpop.f32.mrb[23].mxu1  ;;  %8887 = vmatprep.subr.bf16.mxu0 %v12803_v38 }
 0x6c0   :  { %1071 = vrot.lane.b32.xlu0 %v1063_v9, %s12687_s11  ;;  %s12693_s11 = smov 20   ;;  %v9318_v9 = vld [vmem:[%s12619_s13 + $0x8] sm:$0xff]  }
 0x6c1   :  { %8888 = vmatpush3.bf16.msra.mxu0 %v9318_v9 }
 0x6c2   :  { %8889 = vmatprep.subr.bf16.mxu0 %v12803_v38 }
 0x6c3   :  { %v1195_v47 = vpop.f32.mrb[24].mxu1 }
 0x6c4   :  { %1204 = vrot.lane.b32.xlu1 %v1195_v47, %s12689_s0  ;;  %v8691_v56 = vpop.f32.mrb[25].mxu1 }
 0x6c5   :  { %v1198_v59 = vpop.f32.mrb[26].mxu1 }
 0x6c6   :  { %1206 = vrot.lane.b32.xlu0 %v1198_v59, %s12689_s0  ;;  %v8692_v26 = vpop.f32.mrb[27].mxu1  ;;  %s12695_s0 = smov 24  }
 0x6cb   :  { %v1330_v61 = vpop.f32.mrb[28].mxu1 }
 0x6cc   :  { %1339 = vrot.lane.b32.xlu1 %v1330_v61, %s12691_s25  ;;  %v8703_v57 = vpop.f32.mrb[29].mxu1 }
 0x6cd   :  { %v1333_v17 = vpop.f32.mrb[30].mxu1  ;;  %v9319_v57 = vld [vmem:[%s12619_s13 + $0x10] sm:$0xff]  }
 0x6ce   :  { %1341 = vrot.lane.b32.xlu0 %v1333_v17, %s12691_s25  ;;  %v8704_v45 = vpop.f32.mrb[31].mxu1  ;;  %s12697_s25 = smov 28   ;;  %8890 = vmatpush3.bf16.msra.mxu0 %v9319_v57 }
 0x6cf   :  { %8891 = vmatprep.subr.bf16.mxu0 %v12803_v38  ;;  %v9320_v45 = vld [vmem:[%s12619_s13 + $0x18] sm:$0xff]  }
 0x6d2   :  { %8892 = vmatpush3.bf16.msra.mxu0 %v9320_v45 }
 0x6d3   :  { %v1465_v55 = vpop.f32.mrb[32].mxu1  ;;  %8893 = vmatprep.subr.bf16.mxu0 %v12803_v38 }
 0x6d4   :  { %1474 = vrot.lane.b32.xlu1 %v1465_v55, %s12693_s11  ;;  %v8715_v23 = vpop.f32.mrb[33].mxu1 }
 0x6d5   :  { %v1468_v48 = vpop.f32.mrb[34].mxu1 }
 0x6d6   :  { %1476 = vrot.lane.b32.xlu0 %v1468_v48, %s12693_s11  ;;  %v8716_v21 = vpop.f32.mrb[35].mxu1  ;;  %s12701_s11 = smov 32  }
 0x6db   :  { %v1600_v46 = vpop.f32.mrb[36].mxu1 }
 0x6dc   :  { %1609 = vrot.lane.b32.xlu1 %v1600_v46, %s12695_s0  ;;  %v8727_v40 = vpop.f32.mrb[37].mxu1 }
 0x6dd   :  { %v1603_v0 = vpop.f32.mrb[38].mxu1  ;;  %v9321_v40 = vld [vmem:[%s12619_s13 + $0x20] sm:$0xff]   ;;  %s12850_s13 = smov 16  }
 0x6de   :  { %1611 = vrot.lane.b32.xlu0 %v1603_v0, %s12695_s0  ;;  %v8728_v60 = vpop.f32.mrb[39].mxu1  ;;  %s12699_s0 = smov 36   ;;  %8894 = vmatpush3.bf16.msra.mxu0 %v9321_v40 }
 0x6df   :  { %8899 = vmatprep.subr.bf16.mxu0 %v12803_v38 }
 0x6e3   :  { %v1735_v58 = vpop.f32.mrb[40].mxu1 }
 0x6e4   :  { %1744 = vrot.lane.b32.xlu1 %v1735_v58, %s12697_s25  ;;  %v8739_v34 = vpop.f32.mrb[41].mxu1 }
 0x6e5   :  { %v1738_v5 = vpop.f32.mrb[42].mxu1 }
 0x6e6   :  { %1746 = vrot.lane.b32.xlu0 %v1738_v5, %s12697_s25  ;;  %v8740_v16 = vpop.f32.mrb[43].mxu1  ;;  %s12707_s25 = smov 40  }
 0x6eb   :  { %v1870_v42 = vpop.f32.mrb[44].mxu1 }
 0x6ec   :  { %1879 = vrot.lane.b32.xlu1 %v1870_v42, %s12701_s11  ;;  %v8751_v63 = vpop.f32.mrb[45].mxu1 }
 0x6ed   :  { %v1873_v10 = vpop.f32.mrb[46].mxu1 }
 0x6ee   :  { %1881 = vrot.lane.b32.xlu0 %v1873_v10, %s12701_s11  ;;  %v8752_v37 = vpop.f32.mrb[47].mxu1  ;;  %s12703_s11 = smov 48  }
 0x6f3   :  { %v2005_v33 = vpop.f32.mrb[48].mxu1 }
 0x6f4   :  { %2014 = vrot.lane.b32.xlu1 %v2005_v33, %s12699_s0  ;;  %v8763_v25 = vpop.f32.mrb[49].mxu1 }
 0x6f5   :  { %v2008_v3 = vpop.f32.mrb[50].mxu1 }
 0x6f6   :  { %2016 = vrot.lane.b32.xlu0 %v2008_v3, %s12699_s0  ;;  %v8764_v51 = vpop.f32.mrb[51].mxu1  ;;  %s12705_s0 = smov 44  }
 0x6f9   :  { %v935_v7 = vpop.permute.xlu0 %934 }
 0x6fa   :  { %941 = vst.msk [vmem:[#allocation2] sm:$0xff] %vm940_vm13, %v935_v7 }
 0x6fb   :  { %v2140_v8 = vpop.f32.mrb[52].mxu1 }
 0x6fc   :  { %2149 = vrot.lane.b32.xlu1 %v2140_v8, %s12707_s25  ;;  %v8775_v30 = vpop.f32.mrb[53].mxu1 }
 0x6fd   :  { %v937_v19 = vpop.permute.xlu0 %936  ;;  %v2143_v53 = vpop.f32.mrb[54].mxu1 }
 0x6fe   :  { %943 = vst.msk [vmem:[#allocation2 + $0x8] sm:$0xf] %vm12717_vm14, %v937_v19  ;;  %2151 = vrot.lane.b32.xlu0 %v2143_v53, %s12707_s25  ;;  %v8776_v11 = vpop.f32.mrb[55].mxu1  ;;  %vm12725_vm14 = vcmask 290048   ;;  %s12835_s25 = smov 60  }
 0x703   :  { %v2275_v14 = vpop.f32.mrb[56].mxu1 }
 0x704   :  { %2284 = vrot.lane.b32.xlu1 %v2275_v14, %s12705_s0  ;;  %v8787_v12 = vpop.f32.mrb[57].mxu1 }
 0x705   :  { %v2278_v49 = vpop.f32.mrb[58].mxu1 }
 0x706   :  { %2286 = vrot.lane.b32.xlu0 %v2278_v49, %s12705_s0  ;;  %v8788_v2 = vpop.f32.mrb[59].mxu1  ;;  %s12830_s0 = smov 92  }
 0x70b   :  { %v2410_v29 = vpop.f32.mrb[60].mxu1 }
 0x70c   :  { %2419 = vrot.lane.b32.xlu1 %v2410_v29, %s12703_s11  ;;  %v8799_v20 = vpop.f32.mrb[61].mxu1 }
 0x70d   :  { %v2413_v28 = vpop.f32.mrb[62].mxu1 }
 0x70e   :  { %2421 = vrot.lane.b32.xlu0 %v2413_v28, %s12703_s11  ;;  %v8800_v15 = vpop.f32.mrb[63].mxu1  ;;  %s12831_s11 = smov 88  }
 0x713   :  { %v2545_v52 = vpop.f32.mrb[64].mxu1 }
 0x714   :  { %2554 = vrot.lane.b32.xlu1 %v2545_v52, %s12807_s6  ;;  %v8811_v22 = vpop.f32.mrb[65].mxu1 }
 0x715   :  { %v2548_v4 = vpop.f32.mrb[66].mxu1 }
 0x716   :  { %2556 = vrot.lane.b32.xlu0 %v2548_v4, %s12807_s6  ;;  %v8812_v41 = vpop.f32.mrb[67].mxu1  ;;  %s12829_s6 = smov 96  }
 0x71b   :  { %v2680_v24 = vpop.f32.mrb[68].mxu1 }
 0x71c   :  { %2689 = vrot.lane.b32.xlu1 %v2680_v24, %s12808_s5  ;;  %v8823_v44 = vpop.f32.mrb[69].mxu1 }
 0x71d   :  { %v2683_v6 = vpop.f32.mrb[70].mxu1 }
 0x71e   :  { %2691 = vrot.lane.b32.xlu0 %v2683_v6, %s12808_s5  ;;  %v8824_v31 = vpop.f32.mrb[71].mxu1  ;;  %s12826_s5 = smov 112  }
 0x723   :  { %v2815_v27 = vpop.f32.mrb[72].mxu1 }
 0x724   :  { %2824 = vrot.lane.b32.xlu1 %v2815_v27, %s12806_s27  ;;  %v8835_v43 = vpop.f32.mrb[73].mxu1 }
 0x725   :  { %v2818_v39 = vpop.f32.mrb[74].mxu1  ;;  %v8011_v43 = vld [vmem:[%s12620_s14] ss:$0 sm:$0xff]  ;;  %s12832_s14 = smov 84  }
 0x726   :  { %2826 = vrot.lane.b32.xlu0 %v2818_v39, %s12806_s27  ;;  %v8836_v62 = vpop.f32.mrb[75].mxu1  ;;  %s12824_s27 = smov 120  }
 0x727   :  { %v8018_v62 = vld [vmem:[%s12621_s15] ss:$0 sm:$0xff]  ;;  %s12833_s15 = smov 80  }
 0x72b   :  { %v2950_v18 = vpop.f32.mrb[76].mxu1 }
 0x72c   :  { %2959 = vrot.lane.b32.xlu1 %v2950_v18, %s12805_s9  ;;  %v8847_v54 = vpop.f32.mrb[77].mxu1 }
 0x72d   :  { %v2953_v32 = vpop.f32.mrb[78].mxu1 }
 0x72e   :  { %v1070_v1 = vpop.permute.xlu0 %1069  ;;  %2961 = vrot.lane.b32.xlu0 %v2953_v32, %s12805_s9  ;;  %v8848_v35 = vpop.f32.mrb[79].mxu1  ;;  %s12828_s9 = smov 100  }
 0x72f   :  { %1076 = vst.msk [vmem:[#allocation2] sm:$0xff] %vm12715_vm15, %v1070_v1  ;;  %vm12723_vm15 = vcmask 257248  }
 0x732   :  { %v1072_v50 = vpop.permute.xlu0 %1071 }
 0x733   :  { %1078 = vst.msk [vmem:[#allocation2 + $0x8] sm:$0xf] %vm12714_vm1, %v1072_v50  ;;  %vm12720_vm1 = vcmask 261344   ;;  %v12817_v50 = vld [vmem:[#allocation5_spill] sm:$0xff] }
 0x734   :  { %v3085_v36 = vpop.f32.mrb[80].mxu1 }
 0x735   :  { %3094 = vrot.lane.b32.xlu1 %v3085_v36, %s12804_s2  ;;  %v8859_v47 = vpop.f32.mrb[81].mxu1 }
 0x736   :  { %v3088_v56 = vpop.f32.mrb[82].mxu1  ;;  %v1205_v59 = vpop.permute.xlu1 %1204  ;;  %v12818_v47 = vld [vmem:[#allocation6_spill] sm:$0xff] }
 0x737   :  { %1211 = vst.msk [vmem:[#allocation2] sm:$0xff] %vm12713_vm2, %v1205_v59  ;;  %3096 = vrot.lane.b32.xlu0 %v3088_v56, %s12804_s2  ;;  %v8860_v26 = vpop.f32.mrb[83].mxu1  ;;  %vm12721_vm2 = vcmask 224448  }
 0x738   :  { %v1207_v61 = vpop.permute.xlu0 %1206 }
 0x739   :  { %1213 = vst.msk [vmem:[#allocation2 + $0x8] sm:$0xf] %vm12710_vm3, %v1207_v61  ;;  %vm12716_vm3 = vcmask 195744  }
 0x73c   :  { %v3220_v17 = vpop.f32.mrb[84].mxu1 }
 0x73d   :  { %3229 = vrot.lane.b32.xlu1 %v3220_v17, %s12802_s1  ;;  %v8871_v55 = vpop.f32.mrb[85].mxu1 }
 0x73e   :  { %v3223_v23 = vpop.f32.mrb[86].mxu1  ;;  %v1340_v48 = vpop.permute.xlu1 %1339 }
 0x73f   :  { %1346 = vst.msk [vmem:[#allocation2] sm:$0xff] %vm12711_vm5, %v1340_v48  ;;  %3231 = vrot.lane.b32.xlu0 %v3223_v23, %s12802_s1  ;;  %v8872_v21 = vpop.f32.mrb[87].mxu1  ;;  %vm12719_vm5 = vcmask 191648  }
 0x740   :  { %v1342_v46 = vpop.permute.xlu0 %1341 }
 0x741   :  { %1348 = vst.msk [vmem:[#allocation2 + $0x8] sm:$0xf] %vm12712_vm6, %v1342_v46  ;;  %vm12718_vm6 = vcmask 228544  }
 0x744   :  { %v3355_v0 = vpop.f32.mrb[88].mxu1 }
 0x745   :  { %3364 = vrot.lane.b32.xlu1 %v3355_v0, %s12801_s24  ;;  %v8883_v60 = vpop.f32.mrb[89].mxu1  ;;  %v9324_v0 = vld [vmem:[%s12622_s18 + $0x4] ss:$12 sps:$4 sm:$0xff]  }
 0x746   :  { %v3358_v58 = vpop.f32.mrb[90].mxu1  ;;  %v1475_v34 = vpop.permute.xlu1 %1474  ;;  %v9322_v60 = vld [vmem:[%s12622_s18] ss:$12 sps:$4 sm:$0xff]   ;;  %3644 = vmatprep.subr.bf16.mxu1 %v9324_v0 }
 0x747   :  { %1481 = vst.msk [vmem:[#allocation2] sm:$0xff] %vm12716_vm3, %v1475_v34  ;;  %3366 = vrot.lane.b32.xlu0 %v3358_v58, %s12801_s24  ;;  %v8884_v5 = vpop.f32.mrb[91].mxu1  ;;  %vm12722_vm3 = vcmask 294144   ;;  %v9325_v58 = vld [vmem:[%s12622_s18 + $0x8] ss:$12 sps:$4 sm:$0xff]   ;;  %3645 = vmatpush1.bf16.msra.mxu1 %v9322_v60 }
 0x748   :  { %v1477_v16 = vpop.permute.xlu0 %1476  ;;  %v9328_v34 = vld [vmem:[%s12622_s18 + $0x1c] ss:$12 sps:$4 sm:$0xff]   ;;  %v9326_v5 = vld [vmem:[%s12622_s18 + $0x18] ss:$12 sps:$4 sm:$0xff]  }
 0x749   :  { %1483 = vst.msk [vmem:[#allocation2 + $0x8] sm:$0xf] %vm12719_vm5, %v1477_v16  ;;  %vm12727_vm5 = vcmask 322848   ;;  %v9329_v16 = vld [vmem:[%s12622_s18 + $0x20] ss:$12 sps:$4 sm:$0xff]   ;;  %3646 = vmatprep.subr.bf16.mxu1 %v9328_v34 }
 0x74b   :  { %3647 = vmatpush1.bf16.msra.mxu1 %v9326_v5 }
 0x74e   :  { %v1610_v42 = vpop.permute.xlu1 %1609 }
 0x74f   :  { %1616 = vst.msk [vmem:[#allocation2] sm:$0xff] %vm12718_vm6, %v1610_v42  ;;  %vm12724_vm6 = vcmask 326944   ;;  %v9332_v42 = vld [vmem:[%s12622_s18 + $0x34] ss:$12 sps:$4 sm:$0xff]  }
 0x750   :  { %v1612_v63 = vpop.permute.xlu0 %1611  ;;  %3648 = vmatprep.subr.bf16.mxu1 %v9332_v42 }
 0x751   :  { %1618 = vst.msk [vmem:[#allocation2 + $0x8] sm:$0xf] %vm12721_vm2, %v1612_v63  ;;  %vm12729_vm2 = vcmask 355648   ;;  %v9330_v63 = vld [vmem:[%s12622_s18 + $0x30] ss:$12 sps:$4 sm:$0xff]  }
 0x752   :  { %3649 = vmatpush1.bf16.msra.mxu1 %v9330_v63 }
 0x756   :  { %v1745_v10 = vpop.permute.xlu1 %1744 }
 0x757   :  { %1751 = vst.msk [vmem:[#allocation2] sm:$0xff] %vm12720_vm1, %v1745_v10  ;;  %vm12726_vm1 = vcmask 359744   ;;  %v9333_v10 = vld [vmem:[%s12622_s18 + $0x38] ss:$12 sps:$4 sm:$0xff]  }
 0x758   :  { %v1747_v37 = vpop.permute.xlu0 %1746 }
 0x759   :  { %1753 = vst.msk [vmem:[#allocation2 + $0x8] sm:$0xf] %vm12723_vm15, %v1747_v37  ;;  %vm12731_vm15 = vcmask 388448   ;;  %v9336_v37 = vld [vmem:[%s12622_s18 + $0x4c] ss:$12 sps:$4 sm:$0xff]  }
 0x75a   :  { %3650 = vmatprep.subr.bf16.mxu1 %v9336_v37 }
 0x75e   :  { %v1880_v33 = vpop.permute.xlu1 %1879 }
 0x75f   :  { %1886 = vst.msk [vmem:[#allocation2] sm:$0xff] %vm12722_vm3, %v1880_v33  ;;  %vm12728_vm3 = vcmask 392544   ;;  %v9334_v33 = vld [vmem:[%s12622_s18 + $0x48] ss:$12 sps:$4 sm:$0xff]  }
 0x760   :  { %v1882_v25 = vpop.permute.xlu0 %1881  ;;  %3651 = vmatpush1.bf16.msra.mxu1 %v9334_v33 }
 0x761   :  { %1888 = vst.msk [vmem:[#allocation2 + $0x8] sm:$0xf] %vm12725_vm14, %v1882_v25  ;;  %vm12733_vm14 = vcmask 421248   ;;  %v9337_v25 = vld [vmem:[%s12622_s18 + $0x50] ss:$12 sps:$4 sm:$0xff]  }
 0x766   :  { %v2015_v3 = vpop.permute.xlu1 %2014 }
 0x767   :  { %2021 = vst.msk [vmem:[#allocation2] sm:$0xff] %vm12724_vm6, %v2015_v3  ;;  %vm12730_vm6 = vcmask 425344   ;;  %v9338_v3 = vld [vmem:[%s12622_s18 + $0x60] ss:$12 sps:$4 sm:$0xff]  }
 0x768   :  { %v2017_v51 = vpop.permute.xlu0 %2016 }
 0x769   :  { %2023 = vst.msk [vmem:[#allocation2 + $0x8] sm:$0xf] %vm12727_vm5, %v2017_v51  ;;  %vm12735_vm5 = vcmask 454048   ;;  %v9340_v51 = vld [vmem:[%s12622_s18 + $0x64] ss:$12 sps:$4 sm:$0xff]  }
 0x76a   :  { %3652 = vmatprep.subr.bf16.mxu1 %v9340_v51 }
 0x76b   :  { %3653 = vmatpush1.bf16.msra.mxu1 %v9338_v3 }
 0x76e   :  { %v2150_v7 = vpop.permute.xlu1 %2149 }
 0x76f   :  { %2156 = vst.msk [vmem:[#allocation2] sm:$0xff] %vm12726_vm1, %v2150_v7  ;;  %vm12732_vm1 = vcmask 458144   ;;  %v9341_v7 = vld [vmem:[%s12622_s18 + $0x68] ss:$12 sps:$4 sm:$0xff]  }
 0x770   :  { %v2152_v8 = vpop.permute.xlu0 %2151 }
 0x771   :  { %2158 = vst.msk [vmem:[#allocation2 + $0x8] sm:$0xf] %vm12729_vm2, %v2152_v8  ;;  %vm12737_vm2 = vcmask 486848   ;;  %v12755_v8 = vmov 0  }
 0x772   :  { %3676 = vmatprep.mubr.bf16.mxu1 %v12755_v8 }
 0x776   :  { %v2285_v30 = vpop.permute.xlu1 %2284 }
 0x777   :  { %2291 = vst.msk [vmem:[#allocation2] sm:$0xff] %vm12728_vm3, %v2285_v30  ;;  %vm12734_vm3 = vcmask 490944  }
 0x778   :  { %v2287_v19 = vpop.permute.xlu0 %2286 }
 0x779   :  { %2293 = vst.msk [vmem:[#allocation2 + $0x8] sm:$0xf] %vm12731_vm15, %v2287_v19  ;;  %vm12739_vm15 = vcmask 519648  }
 0x77e   :  { %v2420_v53 = vpop.permute.xlu1 %2419 }
 0x77f   :  { %2426 = vst.msk [vmem:[#allocation2] sm:$0xff] %vm12730_vm6, %v2420_v53  ;;  %vm12736_vm6 = vcmask 523744  }
 0x780   :  { %v2422_v11 = vpop.permute.xlu0 %2421 }
 0x781   :  { %2428 = vst.msk [vmem:[#allocation2 + $0x8] sm:$0xf] %vm12733_vm14, %v2422_v11  ;;  %vm2967_vm14 = vcmask 552448  }
 0x786   :  { %v2555_v14 = vpop.permute.xlu1 %2554 }
 0x787   :  { %2561 = vst.msk [vmem:[#allocation2] sm:$0xff] %vm12732_vm1, %v2555_v14  ;;  %vm12738_vm1 = vcmask 556544  }
 0x788   :  { %v2557_v12 = vpop.permute.xlu0 %2556 }
 0x789   :  { %2563 = vst.msk [vmem:[#allocation2 + $0x8] sm:$0xf] %vm12735_vm5, %v2557_v12  ;;  %vm3102_vm5 = vcmask 585248  }
 0x78e   :  { %v2690_v49 = vpop.permute.xlu1 %2689 }
 0x78f   :  { %2696 = vst.msk [vmem:[#allocation2] sm:$0xff] %vm12734_vm3, %v2690_v49  ;;  %vm3100_vm3 = vcmask 589344  }
 0x790   :  { %v2692_v2 = vpop.permute.xlu0 %2691 }
 0x791   :  { %2698 = vst.msk [vmem:[#allocation2 + $0x8] sm:$0xf] %vm12737_vm2, %v2692_v2  ;;  %vm12749_vm2 = vcmask 618048  }
 0x796   :  { %v2825_v29 = vpop.permute.xlu1 %2824 }
 0x797   :  { %2831 = vst.msk [vmem:[#allocation2] sm:$0xff] %vm12736_vm6, %v2825_v29  ;;  %vm12750_vm6 = vcmask 622144   ;;  %v8019_v29 = vld [vmem:[%s12623_s16] ss:$0 sm:$0xff] }
 0x798   :  { %v2827_v20 = vpop.permute.xlu0 %2826 }
 0x799   :  { %2833 = vst.msk [vmem:[#allocation2 + $0x8] sm:$0xf] %vm12739_vm15, %v2827_v20  ;;  %vm12747_vm15 = vcmask 650848  }
 0x79e   :  { %v2960_v28 = vpop.permute.xlu1 %2959 }
 0x79f   :  { %2966 = vst.msk [vmem:[#allocation2] sm:$0xff] %vm12738_vm1, %v2960_v28  ;;  %vm12748_vm1 = vcmask 654944  }
 0x7a0   :  { %v2962_v15 = vpop.permute.xlu0 %2961 }
 0x7a1   :  { %2968 = vst.msk [vmem:[#allocation2 + $0x8] sm:$0xf] %vm2967_vm14, %v2962_v15 }
 0x7a7   :  { %v3095_v52 = vpop.permute.xlu1 %3094 }
 0x7a8   :  { %3101 = vst.msk [vmem:[#allocation2] sm:$0xff] %vm3100_vm3, %v3095_v52  ;;  %v8020_v52 = vld [vmem:[%s12624_s17] ss:$0 sm:$0xff] }
 0x7a9   :  { %v3097_v22 = vpop.permute.xlu0 %3096 }
 0x7aa   :  { %3103 = vst.msk [vmem:[#allocation2 + $0x8] sm:$0xf] %vm3102_vm5, %v3097_v22 }
 0x7af   :  { %v3230_v4 = vpop.permute.xlu1 %3229 }
 0x7b0   :  { %3236 = vst.msk [vmem:[#allocation2] sm:$0xff] %vm12750_vm6, %v3230_v4 }
 0x7b1   :  { %v3232_v41 = vpop.permute.xlu0 %3231 }
 0x7b2   :  { %3238 = vst.msk [vmem:[#allocation2 + $0x8] sm:$0xf] %vm12749_vm2, %v3232_v41 }
 0x7b7   :  { %v3365_v24 = vpop.permute.xlu1 %3364 }
 0x7b8   :  { %3371 = vst.msk [vmem:[#allocation2] sm:$0xff] %vm12748_vm1, %v3365_v24 }
 0x7b9   :  { %v3367_v44 = vpop.permute.xlu0 %3366 }
 0x7ba   :  { %3373 = vst.msk [vmem:[#allocation2 + $0x8] sm:$0xf] %vm12747_vm15, %v3367_v44  ;;  %v9342_v44 = vld [vmem:[%s12625_s20 + $0x40] sm:$0xff]  }
 0x7bb   :  { %8427 = vmatprep.subr.bf16.mxu1 %v9342_v44 }
 0x7bf   :  { %v3374_v31 = vld [vmem:[#allocation2] sm:$0xff] }
 0x7c1   :  { %v3375_v6 = vld [vmem:[#allocation2 + $0x8] sm:$0xf] }
 0x7c2   :  { %v3376_v27 = vpack.c.bf16 %v3375_v6, %v3374_v31  ;;  %v9343_v6 = vld [vmem:[%s12625_s20] sm:$0xff]   ;;  %v9344_v31 = vld [vmem:[%s12625_s20 + $0x48] sm:$0xff]  }
 0x7c4   :  { %8896 = vmatmul.mubr.msk.bf16.vlgmr.msra.gmra.mrb[88].mxu0 %vm367_vm7, %v3376_v27  ;;  %v9345_v27 = vld [vmem:[%s12625_s20 + $0x8] sm:$0xff]  }
 0x7c5   :  { %8909 = vmatprep.mubr.msk.bf16.mxu0 %vm9809_vm0, %v12803_v38  ;;  %8900 = vmatpush3.bf16.msra.mxu0 %v9325_v58 }
 0x7c6   :  { %8901 = vmatprep.subr.bf16.mxu0 %v12803_v38 }
 0x7c9   :  { %8902 = vmatpush3.bf16.msra.mxu0 %v9329_v16 }
 0x7ca   :  { %8903 = vmatprep.subr.bf16.mxu0 %v12803_v38 }
 0x7cd   :  { %8904 = vmatpush3.bf16.msra.mxu0 %v9333_v10 }
 0x7ce   :  { %8905 = vmatprep.subr.bf16.mxu0 %v12803_v38 }
 0x7d1   :  { %8906 = vmatpush3.bf16.msra.mxu0 %v9337_v25 }
 0x7d2   :  { %8907 = vmatprep.subr.bf16.mxu0 %v12803_v38 }
 0x7d5   :  { %8908 = vmatpush3.bf16.msra.mxu0 %v9341_v7 }
 0x7d6   :  { %8913 = vmatprep.subr.bf16.mxu0 %v12803_v38 }
 0x897   :  { %v3461_v39 = vpop.f32.mrb[88].mxu0 }
 0x898   :  { %v3462_v18 = vadd.f32 %v8011_v43, %v3461_v39  ;;  %v8897_v54 = vpop.f32.mrb[89].mxu0  ;;  %v9347_v39 = vld [vmem:[%s12625_s20 + $0x10] sm:$0xff]  }
 0x899   :  { %v3464_v32 = vpop.f32.mrb[90].mxu0  ;;  %v9350_v54 = vld [vmem:[%s12625_s20 + $0x80] sm:$0xff]  }
 0x89a   :  { %v3475_v1 = vmul.f32 %v8018_v62, %v3462_v18  ;;  %v3465_v35 = vadd.f32 %v8011_v43, %v3464_v32  ;;  %v8898_v13 = vpop.f32.mrb[91].mxu0  ;;  %v9346_v43 = vld [vmem:[%s12625_s20 + $0x50] sm:$0xff]   ;;  %v9349_v18 = vld [vmem:[%s12625_s20 + $0x18] sm:$0xff]   ;;  %v9351_v32 = vld [vmem:[%s12625_s20 + $0x60] sm:$0xff]  }
 0x89b   :  { %v9354_v13 = vld [vmem:[%s12625_s20 + $0x68] sm:$0xff]  }
 0x89c   :  { %v11087_v9 = vadd.f32 %v3475_v1, %v12817_v50  ;;  %v3476_v36 = vmul.f32 %v8018_v62, %v3465_v35  ;;  %v9348_v62 = vld [vmem:[%s12625_s20 + $0x58] sm:$0xff]   ;;  %v9352_v1 = vld [vmem:[%s12625_s20 + $0x20] sm:$0xff]   ;;  %v9353_v35 = vld [vmem:[%s12625_s20 + $0x88] sm:$0xff]  }
 0x89d   :  { %v9355_v50 = vld [vmem:[%s12625_s20 + $0x28] sm:$0xff]  }
 0x89e   :  { %v11090_v56 = vadd.f32 %v3476_v36, %v12818_v47  ;;  %v3481_v59 = vsel %vm367_vm7, %v11087_v9, 0.0  ;;  %v9356_v36 = vld [vmem:[%s12625_s20 + $0x90] sm:$0xff]  }
 0x89f   :  { %3482 = vadd.xlane.f32.xlu1 %v3481_v59  ;;  %v9357_v47 = vld [vmem:[%s12625_s20 + $0x70] sm:$0xff]  }
 0x8a0   :  { %v3484_v26 = vsel %vm371_vm8, %v11090_v56, 0.0  ;;  %v9358_v59 = vld [vmem:[%s12625_s20 + $0x30] sm:$0xff]  }
 0x8a1   :  { %3485 = vadd.xlane.f32.xlu0 %v3484_v26  ;;  %v9359_v26 = vld [vmem:[%s12625_s20 + $0x98] sm:$0xff]  }
 0x92c   :  { %v3483_v61 = vpop.xlane.xlu1 %3482 }
 0x92d   :  { %v3487_v57 = vmul.f32 0.0125, %v3483_v61  ;;  %v9360_v61 = vld [vmem:[%s12625_s20 + $0x78] sm:$0xff]  }
 0x92e   :  { %v3486_v17 = vpop.xlane.xlu0 %3485 }
 0x92f   :  { %v3489_v45 = vsub.f32 %v11087_v9, %v3487_v57  ;;  %v3488_v55 = vmul.f32 0.0125, %v3486_v17  ;;  %v9361_v57 = vld [vmem:[%s12625_s20 + $0x38] sm:$0xff]  }
 0x930   :  { %v12819_v17 = vld [vmem:[#allocation3_spill] sm:$0xff] }
 0x931   :  { %v3490_v23 = vsub.f32 %v11090_v56, %v3488_v55  ;;  %v3491_v48 = vmul.f32 %v3489_v45, %v3489_v45  ;;  %v3544_v55 = vld [vmem:[%s12626_s19] sm:$0x7] }
 0x933   :  { %v3493_v21 = vsel %vm367_vm7, %v3491_v48, 0.0  ;;  %v3492_v46 = vmul.f32 %v3490_v23, %v3490_v23  ;;  %v12820_v48 = vld [vmem:[#allocation4_spill] sm:$0xff] }
 0x934   :  { %3494 = vadd.xlane.f32.xlu0 %v3493_v21  ;;  %v3549_v21 = vrot.slane %v3544_v55, %v12820_v48 }
 0x935   :  { %v3496_v40 = vsel %vm371_vm8, %v3492_v46, 0.0 }
 0x938   :  { %3497 = vadd.xlane.f32.xlu0 %v3496_v40 }
 0x9c1   :  { %v3495_v30 = vpop.xlane.xlu0 %3494 }
 0x9c2   :  { %v3499_v19 = vmul.f32 0.0125, %v3495_v30 }
 0x9c4   :  { %v3501_v53 = vadd.f32 1e-05, %v3499_v19 }
 0x9c5   :  { %v3498_v11 = vpop.xlane.xlu0 %3497 }
 0x9c6   :  { %9586 = vrsqrt.f32 %v3501_v53  ;;  %v3500_v14 = vmul.f32 0.0125, %v3498_v11 }
 0x9c8   :  { %v3502_v12 = vadd.f32 1e-05, %v3500_v14 }
 0x9ca   :  { %9588 = vrsqrt.f32 %v3502_v12 }
 0x9d0   :  { %v9587_v49 = vpop.eup %9586 }
 0x9d1   :  { %v3505_v2 = vmul.f32 %v9587_v49, %v3489_v45  ;;  %v12754_v45 = vsub.s32 2, %v12819_v17 }
 0x9d3   :  { %v3513_v28 = vmul.f32 %v8019_v29, %v3505_v2  ;;  %v3557_v46 = vrot.slane %v3544_v55, %v12754_v45 }
 0x9d4   :  { %v9589_v20 = vpop.eup %9588 }
 0x9d5   :  { %v3506_v15 = vmul.f32 %v9589_v20, %v3490_v23  ;;  %v3521_v4 = vadd.f32 %v8020_v52, %v3513_v28  ;;  %v12753_v23 = vsub.s32 1, %v12819_v17 }
 0x9d7   :  { %v3514_v22 = vmul.f32 %v8019_v29, %v3506_v15  ;;  %v3553_v40 = vrot.slane %v3544_v55, %v12753_v23 }
 0x9d9   :  { %v3522_v41 = vadd.f32 %v8020_v52, %v3514_v22 }
 0x9db   :  { %v3523_v24 = vpack.c.bf16 %v3522_v41, %v3521_v4 }
 0x9dd   :  { %8036 = vmatmul.mubr.msk.bf16.vlgmr.msra.gmra.mrb[92].mxu1 %vm367_vm7, %v3523_v24  ;;  %8910 = vmatmul.mubr.msk.bf16.vlgmr.msra.gmra.mrb[92].mxu0 %vm367_vm7, %v3523_v24 }
 0x9de   :  { %8921 = vmatprep.mubr.msk.bf16.mxu0 %vm9809_vm0, %v12803_v38  ;;  %8428 = vmatpush3.bf16.msra.mxu1 %v9343_v6 }
 0x9df   :  { %8429 = vmatprep.subr.bf16.mxu1 %v9344_v31  ;;  %8914 = vmatpush3.bf16.msra.mxu0 %v9350_v54 }
 0x9e0   :  { %8915 = vmatprep.subr.bf16.mxu0 %v12803_v38 }
 0x9e2   :  { %8430 = vmatpush3.bf16.msra.mxu1 %v9345_v27 }
 0x9e3   :  { %8431 = vmatprep.subr.bf16.mxu1 %v9346_v43  ;;  %8916 = vmatpush3.bf16.msra.mxu0 %v9353_v35 }
 0x9e4   :  { %8917 = vmatprep.subr.bf16.mxu0 %v12803_v38 }
 0x9e6   :  { %8432 = vmatpush3.bf16.msra.mxu1 %v9347_v39 }
 0x9e7   :  { %8433 = vmatprep.subr.bf16.mxu1 %v9348_v62  ;;  %8918 = vmatpush3.bf16.msra.mxu0 %v9356_v36 }
 0x9e8   :  { %8919 = vmatprep.subr.bf16.mxu0 %v12803_v38 }
 0x9ea   :  { %8434 = vmatpush3.bf16.msra.mxu1 %v9349_v18 }
 0x9eb   :  { %8435 = vmatprep.subr.bf16.mxu1 %v9351_v32  ;;  %8920 = vmatpush3.bf16.msra.mxu0 %v9359_v26 }
 0x9ec   :  { %8925 = vmatprep.subr.bf16.mxu0 %v12803_v38 }
 0x9ee   :  { %8436 = vmatpush3.bf16.msra.mxu1 %v9352_v1 }
 0x9ef   :  { %8437 = vmatprep.subr.bf16.mxu1 %v9354_v13 }
 0x9f2   :  { %8438 = vmatpush3.bf16.msra.mxu1 %v9355_v50 }
 0x9f3   :  { %8439 = vmatprep.subr.bf16.mxu1 %v9357_v47 }
 0x9f6   :  { %8440 = vmatpush3.bf16.msra.mxu1 %v9358_v59 }
 0x9f7   :  { %8441 = vmatprep.subr.bf16.mxu1 %v9360_v61 }
 0x9fa   :  { %8442 = vmatpush3.bf16.msra.mxu1 %v9361_v57 }
 0x9fb   :  { %8939 = vmatprep.subr.bf16.mxu1 %v12803_v38 }
 0xab0   :  { %v3678_v0 = vpop.f32.mrb[92].mxu1  ;;  %v3721_v60 = vpop.f32.mrb[92].mxu0 }
 0xab1   :  { %v11236_v58 = vadd.f32 %v3678_v0, %v3549_v21  ;;  %v11238_v34 = vadd.f32 %v3721_v60, %v3557_v46  ;;  %v3680_v5 = vpop.f32.mrb[93].mxu1  ;;  %v8911_v16 = vpop.f32.mrb[93].mxu0 }
 0xab2   :  { %v11240_v42 = vadd.f32 %v3680_v5, %v3553_v40  ;;  %v3682_v63 = vpop.f32.mrb[94].mxu1  ;;  %v3724_v10 = vpop.f32.mrb[94].mxu0 }
 0xab3   :  { %v11243_v37 = vmul.f32 0.70710677, %v11236_v58  ;;  %v11246_v33 = vmul.f32 0.70710677, %v11238_v34  ;;  %v3684_v3 = vpop.f32.mrb[95].mxu1  ;;  %v8912_v51 = vpop.f32.mrb[95].mxu0  ;;  %v11254_v53 = vadd.f32 %v3682_v63, %v3549_v21  ;;  %v11256_v12 = vadd.f32 %v3724_v10, %v3557_v46 }
 0xab4   :  { %v11249_v25 = vmul.f32 0.70710677, %v11240_v42  ;;  %v11266_v24 = vadd.f32 %v3684_v3, %v3553_v40 }
 0xab5   :  { %v3752_v7 = vand.u32 2147483647, %v11243_v37  ;;  %v3754_v30 = vand.u32 2147483647, %v11246_v33  ;;  %v11259_v20 = vmul.f32 0.70710677, %v11254_v53 }
 0xab6   :  { %v3753_v19 = vand.u32 2147483647, %v11249_v25  ;;  %v11262_v15 = vmul.f32 0.70710677, %v11256_v12  ;;  %v11269_v27 = vmul.f32 0.70710677, %v11266_v24 }
 0xab7   :  { %v3758_v11 = vmul.f32 0.3275911, %v3752_v7  ;;  %v3760_v14 = vmul.f32 0.3275911, %v3754_v30  ;;  %v3755_v52 = vand.u32 2147483647, %v11259_v20 }
 0xab8   :  { %v3759_v49 = vmul.f32 0.3275911, %v3753_v19  ;;  %v3757_v22 = vand.u32 2147483647, %v11262_v15  ;;  %v3830_v6 = vsub.f32 0.0, %v3752_v7  ;;  %v3832_v43 = vsub.f32 0.0, %v3754_v30 }
 0xab9   :  { %v3764_v2 = vadd.f32 1.0, %v3758_v11  ;;  %v3766_v29 = vadd.f32 1.0, %v3760_v14  ;;  %v3761_v4 = vmul.f32 0.3275911, %v3755_v52  ;;  %v3756_v39 = vand.u32 2147483647, %v11269_v27 }
 0xaba   :  { %v3765_v28 = vadd.f32 1.0, %v3759_v49  ;;  %v3763_v41 = vmul.f32 0.3275911, %v3757_v22  ;;  %v3831_v62 = vsub.f32 0.0, %v3753_v19  ;;  %v3836_v54 = vmul.f32 %v3830_v6, %v3752_v7 }
 0xabb   :  { %9590 = vrcp.f32 %v3764_v2  ;;  %v3767_v44 = vadd.f32 1.0, %v3761_v4  ;;  %v3762_v32 = vmul.f32 0.3275911, %v3756_v39  ;;  %v3838_v13 = vmul.f32 %v3832_v43, %v3754_v30 }
 0xabc   :  { %9592 = vrcp.f32 %v3766_v29  ;;  %v3769_v31 = vadd.f32 1.0, %v3763_v41  ;;  %v3833_v36 = vsub.f32 0.0, %v3755_v52  ;;  %v3837_v26 = vmul.f32 %v3831_v62, %v3753_v19 }
 0xabd   :  { %9594 = vrcp.f32 %v3765_v28  ;;  %v3768_v47 = vadd.f32 1.0, %v3762_v32  ;;  %v3842_v57 = vmul.f32 1.442695, %v3836_v54  ;;  %v3835_v21 = vsub.f32 0.0, %v3757_v22 }
 0xabe   :  { %9596 = vrcp.f32 %v3767_v44  ;;  %v3846_v40 = vmul.f32 1.442695, %v3838_v13  ;;  %v3839_v5 = vmul.f32 %v3833_v36, %v3755_v52  ;;  %v3844_v3 = vmul.f32 1.442695, %v3837_v26 }
 0xabf   :  { %9598 = vrcp.f32 %v3769_v31  ;;  %v3841_v19 = vmul.f32 %v3835_v21, %v3757_v22  ;;  %v3834_v52 = vsub.f32 0.0, %v3756_v39  ;;  %vm3740_vm15 = vcmp.ge.f32.partialorder %v11243_v37, 0.0 }
 0xac0   :  { %9600 = vrcp.f32 %v3768_v47  ;;  %v3848_v28 = vmul.f32 1.442695, %v3839_v5  ;;  %vm3742_vm1 = vcmp.ge.f32.partialorder %v11246_v33, 0.0  ;;  %vm3743_vm2 = vcmp.ge.f32.partialorder %v11259_v20, 0.0 }
 0xac1   :  { %9602 = vpow2.f32 %v3842_v57  ;;  %v3852_v43 = vmul.f32 1.442695, %v3841_v19  ;;  %vm3745_vm6 = vcmp.ge.f32.partialorder %v11262_v15, 0.0 }
 0xac2   :  { %9604 = vpow2.f32 %v3846_v40 }
 0xac3   :  { %9606 = vpow2.f32 %v3844_v3 }
 0xac4   :  { %9608 = vpow2.f32 %v3848_v28 }
 0xac5   :  { %v9591_v18 = vpop.eup %9590  ;;  %9610 = vpow2.f32 %v3852_v43 }
 0xac6   :  { %v9593_v1 = vpop.eup %9592  ;;  %v3776_v35 = vmul.f32 1.0614054, %v9591_v18 }
 0xac7   :  { %v3778_v50 = vmul.f32 1.0614054, %v9593_v1  ;;  %v11272_v61 = vpop.eup %9594 }
 0xac8   :  { %v3782_v59 = vadd.f32 -1.4531521, %v3776_v35  ;;  %v3777_v0 = vmul.f32 1.0614054, %v11272_v61  ;;  %v11275_v16 = vpop.eup %9596 }
 0xac9   :  { %v3784_v55 = vadd.f32 -1.4531521, %v3778_v50  ;;  %v11277_v51 = vpop.eup %9598  ;;  %v3779_v30 = vmul.f32 1.0614054, %v11275_v16 }
 0xaca   :  { %v3788_v46 = vmul.f32 %v9591_v18, %v3782_v59  ;;  %v3783_v10 = vadd.f32 -1.4531521, %v3777_v0  ;;  %v3781_v49 = vmul.f32 1.0614054, %v11277_v51  ;;  %v11285_v32 = vpop.eup %9600  ;;  %v3840_v59 = vmul.f32 %v3834_v52, %v3756_v39 }
 0xacb   :  { %v3790_v60 = vmul.f32 %v9593_v1, %v3784_v55  ;;  %v3785_v29 = vadd.f32 -1.4531521, %v3779_v30  ;;  %v3780_v55 = vmul.f32 1.0614054, %v11285_v32  ;;  %v9603_v0 = vpop.eup %9602 }
 0xacc   :  { %v3794_v63 = vadd.f32 1.4214138, %v3788_v46  ;;  %v3789_v14 = vmul.f32 %v11272_v61, %v3783_v10  ;;  %v3787_v44 = vadd.f32 -1.4531521, %v3781_v49  ;;  %v9605_v10 = vpop.eup %9604  ;;  %v3850_v39 = vmul.f32 1.442695, %v3840_v59 }
 0xacd   :  { %v3796_v7 = vadd.f32 1.4214138, %v3790_v60  ;;  %v3791_v31 = vmul.f32 %v11275_v16, %v3785_v29  ;;  %v9607_v28 = vpop.eup %9606 }
 0xace   :  { %v3800_v11 = vmul.f32 %v9591_v18, %v3794_v63  ;;  %v3795_v41 = vadd.f32 1.4214138, %v3789_v14  ;;  %v3793_v54 = vmul.f32 %v11277_v51, %v3787_v44  ;;  %v3786_v63 = vadd.f32 -1.4531521, %v3780_v55 }
 0xacf   :  { %v3802_v2 = vmul.f32 %v9593_v1, %v3796_v7  ;;  %v3797_v13 = vadd.f32 1.4214138, %v3791_v31  ;;  %9612 = vpow2.f32 %v3850_v39  ;;  %v12751_v44 = vmov -1.0  }
 0xad0   :  { %v3806_v4 = vadd.f32 -0.28449672, %v3800_v11  ;;  %v3801_v22 = vmul.f32 %v11272_v61, %v3795_v41  ;;  %v3799_v47 = vadd.f32 1.4214138, %v3793_v54  ;;  %v3792_v14 = vmul.f32 %v11285_v32, %v3786_v63  ;;  %v9609_v41 = vpop.eup %9608 }
 0xad1   :  { %v3808_v6 = vadd.f32 -0.28449672, %v3802_v2  ;;  %v3803_v57 = vmul.f32 %v11275_v16, %v3797_v13  ;;  %v3748_v33 = vsel %vm3742_vm1, 1.0, %v12751_v44  ;;  %v9611_v43 = vpop.eup %9610  ;;  %v3751_v20 = vsel %vm3745_vm6, 1.0, %v12751_v44 }
 0xad2   :  { %v3812_v62 = vmul.f32 %v9591_v18, %v3806_v4  ;;  %v3807_v36 = vadd.f32 -0.28449672, %v3801_v22  ;;  %v3805_v40 = vmul.f32 %v11277_v51, %v3799_v47  ;;  %v3798_v29 = vadd.f32 1.4214138, %v3792_v14 }
 0xad3   :  { %v3814_v35 = vmul.f32 %v9593_v1, %v3808_v6  ;;  %v3809_v5 = vadd.f32 -0.28449672, %v3803_v57  ;;  %v3746_v6 = vsel %vm3740_vm15, 1.0, %v12751_v44  ;;  %vm3741_vm15 = vcmp.ge.f32.partialorder %v11249_v25, 0.0 }
 0xad4   :  { %v3818_v50 = vadd.f32 0.2548296, %v3812_v62  ;;  %v3813_v46 = vmul.f32 %v11272_v61, %v3807_v36  ;;  %v3811_v30 = vadd.f32 -0.28449672, %v3805_v40  ;;  %v3804_v37 = vmul.f32 %v11285_v32, %v3798_v29 }
 0xad5   :  { %v3820_v26 = vadd.f32 0.2548296, %v3814_v35  ;;  %v3815_v11 = vmul.f32 %v11275_v16, %v3809_v5  ;;  %v3749_v47 = vsel %vm3743_vm2, 1.0, %v12751_v44  ;;  %v3728_v55 = vmul.f32 0.5, %v11236_v58 }
 0xad6   :  { %v3824_v21 = vmul.f32 %v9591_v18, %v3818_v50  ;;  %v3819_v7 = vadd.f32 0.2548296, %v3813_v46  ;;  %v3817_v18 = vmul.f32 %v11277_v51, %v3811_v30  ;;  %v3810_v35 = vadd.f32 -0.28449672, %v3804_v37 }
 0xad7   :  { %v3826_v60 = vmul.f32 %v9593_v1, %v3820_v26  ;;  %v3821_v2 = vadd.f32 0.2548296, %v3815_v11  ;;  %v3730_v40 = vmul.f32 0.5, %v11238_v34  ;;  %vm3744_vm1 = vcmp.ge.f32.partialorder %v11269_v27, 0.0 }
 0xad8   :  { %v3854_v3 = vmul.f32 %v9603_v0, %v3824_v21  ;;  %v3825_v1 = vmul.f32 %v11272_v61, %v3819_v7  ;;  %v3823_v4 = vadd.f32 0.2548296, %v3817_v18  ;;  %v3731_v0 = vmul.f32 0.5, %v11254_v53 }
 0xad9   :  { %v3856_v19 = vmul.f32 %v9605_v10, %v3826_v60  ;;  %v3827_v31 = vmul.f32 %v11275_v16, %v3821_v2  ;;  %v3816_v16 = vmul.f32 %v11285_v32, %v3810_v35  ;;  %v9613_v63 = vpop.eup %9612  ;;  %v3747_v10 = vsel %vm3741_vm15, 1.0, %v12751_v44 }
 0xada   :  { %v3860_v49 = vsub.f32 1.0, %v3854_v3  ;;  %v3829_v61 = vmul.f32 %v11277_v51, %v3823_v4  ;;  %v3855_v22 = vmul.f32 %v9607_v28, %v3825_v1  ;;  %v3733_v3 = vmul.f32 0.5, %v11256_v12 }
 0xadb   :  { %v3862_v52 = vsub.f32 1.0, %v3856_v19  ;;  %v3857_v54 = vmul.f32 %v9609_v41, %v3827_v31  ;;  %v3822_v57 = vadd.f32 0.2548296, %v3816_v16  ;;  %vm4054_vm2 = vcmask 523264  }
 0xadc   :  { %v3866_v62 = vmul.f32 %v3860_v49, %v3746_v6  ;;  %v3859_v50 = vmul.f32 %v9611_v43, %v3829_v61  ;;  %v3861_v26 = vsub.f32 1.0, %v3855_v22  ;;  %v3750_v18 = vsel %vm3744_vm1, 1.0, %v12751_v44  ;;  %v8060_v22 = vld [vmem:[%s12628_s22] ss:$0 sm:$0xff] }
 0xadd   :  { %v3868_v13 = vmul.f32 %v3862_v52, %v3748_v33  ;;  %v3863_v36 = vsub.f32 1.0, %v3857_v54  ;;  %v3828_v5 = vmul.f32 %v11285_v32, %v3822_v57  ;;  %v3729_v12 = vmul.f32 0.5, %v11240_v42  ;;  %v8038_v42 = vld [vmem:[%s12627_s21] ss:$0 sm:$0xff] }
 0xade   :  { %v3865_v59 = vsub.f32 1.0, %v3859_v50  ;;  %v3872_v15 = vadd.f32 1.0, %v3866_v62  ;;  %v3867_v30 = vmul.f32 %v3861_v26, %v3747_v10  ;;  %v3732_v27 = vmul.f32 0.5, %v11266_v24  ;;  %v9366_v10 = vld [vmem:[%s12780_s3 + $0x38] sm:$0xff]  }
 0xadf   :  { %v3869_v51 = vmul.f32 %v3863_v36, %v3749_v47  ;;  %v3874_v21 = vadd.f32 1.0, %v3868_v13  ;;  %v3858_v19 = vmul.f32 %v9613_v63, %v3828_v5  ;;  %vm4151_vm6 = vcmask 652288   ;;  %v9364_v5 = vld [vmem:[%s12780_s3 + $0x30] sm:$0xff]  }
 0xae0   :  { %v3871_v46 = vmul.f32 %v3865_v59, %v3751_v20  ;;  %v3878_v58 = vmul.f32 %v3872_v15, %v3728_v55  ;;  %v3873_v49 = vadd.f32 1.0, %v3867_v30  ;;  %vm4154_vm15 = vcmask 654342   ;;  %v9365_v63 = vld [vmem:[%s12781_s30 + $0x30] sm:$0xff]   ;;  %v9370_v30 = vld [vmem:[%s12780_s3 + $0x48] sm:$0xff]  }
 0xae1   :  { %v3875_v60 = vadd.f32 1.0, %v3869_v51  ;;  %v3880_v34 = vmul.f32 %v3874_v21, %v3730_v40  ;;  %v3864_v14 = vsub.f32 1.0, %v3858_v19  ;;  %vm12865_vm1 = vcmask 158848  }
 0xae2   :  { %v3877_v7 = vadd.f32 1.0, %v3871_v46  ;;  %v3879_v2 = vmul.f32 %v3873_v49, %v3729_v12  ;;  %v8065_v49 = vld [vmem:[%s12782_s7 + $0x1] ss:$0 sm:$0xff]  ;;  %s12825_s7 = smov 116  }
 0xae3   :  { %v3881_v39 = vmul.f32 %v3875_v60, %v3731_v0  ;;  %v3870_v25 = vmul.f32 %v3864_v14, %v3750_v18  ;;  %v9362_v0 = vld [vmem:[%s12780_s3 + $0x28] sm:$0xff]  }
 0xae4   :  { %v3883_v11 = vmul.f32 %v3877_v7, %v3733_v3  ;;  %v9363_v60 = vld [vmem:[%s12781_s30 + $0x28] sm:$0xff]   ;;  %v9367_v3 = vld [vmem:[%s12781_s30 + $0x38] sm:$0xff]   ;;  %v9368_v7 = vld [vmem:[%s12780_s3 + $0x40] sm:$0xff]   ;;  %s12834_s3 = smov 64  }
 0xae5   :  { %v3884_v53 = vpack.c.bf16 %v3881_v39, %v3878_v58  ;;  %v3876_v1 = vadd.f32 1.0, %v3870_v25  ;;  %v9369_v58 = vld [vmem:[%s12781_s30 + $0x40] sm:$0xff]   ;;  %v9371_v39 = vld [vmem:[%s12781_s30 + $0x48] sm:$0xff]   ;;  %s12836_s30 = smov 56  }
 0xae6   :  { %v3886_v32 = vpack.c.bf16 %v3883_v11, %v3880_v34 }
 0xae7   :  { %v3882_v29 = vmul.f32 %v3876_v1, %v3732_v27 }
 0xae8   :  { %8922 = vmatmul.mubr.msk.bf16.vlgmr.msra.gmra.mrb[96].mxu0 %vm4054_vm2, %v3886_v32 }
 0xae9   :  { %8935 = vmatprep.mubr.msk.bf16.mxu0 %vm9809_vm0, %v12803_v38  ;;  %v3885_v28 = vpack.c.bf16 %v3882_v29, %v3879_v2  ;;  %8926 = vmatpush3.bf16.msra.mxu0 %v9362_v0  ;;  %v8066_v2 = vld [vmem:[%s12783_s26 + $0x1] ss:$0 sm:$0xff]  ;;  %s12827_s26 = smov 104  }
 0xaea   :  { %8927 = vmatprep.subr.bf16.mxu0 %v12803_v38 }
 0xaeb   :  { %4090 = vmatprep.mubr.bf16.mxu1 %v3885_v28 }
 0xaec   :  { %4091 = vmatmul.mubr.bf16.vlgmr.msra.gmra.mrb[96].mxu1 %v3884_v53 }
 0xaed   :  { %8949 = vmatprep.mubr.msk.bf16.mxu1 %vm9809_vm0, %v12803_v38  ;;  %8940 = vmatpush3.bf16.msra.mxu1 %v9363_v60 }
 0xaee   :  { %8941 = vmatprep.subr.bf16.mxu1 %v12803_v38  ;;  %8928 = vmatpush3.bf16.msra.mxu0 %v9364_v5 }
 0xaef   :  { %8929 = vmatprep.subr.bf16.mxu0 %v12803_v38 }
 0xaf1   :  { %8942 = vmatpush3.bf16.msra.mxu1 %v9365_v63 }
 0xaf2   :  { %8943 = vmatprep.subr.bf16.mxu1 %v12803_v38  ;;  %8930 = vmatpush3.bf16.msra.mxu0 %v9366_v10  ;;  %v11463_v10 = vld [vmem:[%s12618_s4] sm:$0xff] }
 0xaf3   :  { %8931 = vmatprep.subr.bf16.mxu0 %v12803_v38 }
 0xaf5   :  { %8944 = vmatpush3.bf16.msra.mxu1 %v9367_v3 }
 0xaf6   :  { %8945 = vmatprep.subr.bf16.mxu1 %v12803_v38  ;;  %8932 = vmatpush3.bf16.msra.mxu0 %v9368_v7 }
 0xaf7   :  { %8933 = vmatprep.subr.bf16.mxu0 %v12803_v38 }
 0xaf9   :  { %8946 = vmatpush3.bf16.msra.mxu1 %v9369_v58 }
 0xafa   :  { %8947 = vmatprep.subr.bf16.mxu1 %v12803_v38  ;;  %8934 = vmatpush3.bf16.msra.mxu0 %v9370_v30  ;;  %v11469_v30 = vld [vmem:[%s12618_s4 + $0x8] sm:$0xf]  ;;  %s12823_s4 = smov 124  }
 0xafb   :  { %8953 = vmatprep.subr.bf16.mxu0 %v12803_v38 }
 0xafd   :  { %8948 = vmatpush3.bf16.msra.mxu1 %v9371_v39 }
 0xafe   :  { %8967 = vmatprep.subr.bf16.mxu1 %v12803_v38 }
 0xbbb   :  { %v4133_v52 = vpop.f32.mrb[96].mxu0 }
 0xbbc   :  { %v8923_v4 = vpop.f32.mrb[97].mxu0 }
 0xbbd   :  { %v4136_v41 = vpop.f32.mrb[98].mxu0  ;;  %v9372_v4 = vld [vmem:[%s12784_s29 + $0x28] sm:$0xff]  }
 0xbbe   :  { %v8924_v6 = vpop.f32.mrb[99].mxu0 }
 0xbbf   :  { %v8443_v31 = vpop.f32.mrb[96].mxu1  ;;  %v9373_v6 = vld [vmem:[%s12784_s29 + $0x30] sm:$0xff]  }
 0xbc0   :  { %v8444_v24 = vpop.f32.mrb[97].mxu1 }
 0xbc1   :  { %v8445_v37 = vadd.f32 %v8444_v24, %v8443_v31  ;;  %v8446_v33 = vpop.f32.mrb[98].mxu1  ;;  %v9374_v31 = vld [vmem:[%s12784_s29 + $0x38] sm:$0xff]   ;;  %v9376_v24 = vld [vmem:[%s12784_s29 + $0x48] sm:$0xff]  }
 0xbc2   :  { %v8447_v61 = vpop.f32.mrb[99].mxu1 }
 0xbc3   :  { %v4093_v43 = vadd.f32 %v8445_v37, %v8038_v42  ;;  %v8448_v62 = vadd.f32 %v8447_v61, %v8446_v33  ;;  %v8078_v37 = vld [vmem:[%s12615_s8 + $0x1] ss:$0 sm:$0xff]  ;;  %s12837_s8 = smov 52  }
 0xbc4   :  { %v8096_v61 = vld [vmem:[%s12616_s10 + $0x1] ss:$0 sm:$0xff]  ;;  %s12848_s10 = smov 8  }
 0xbc5   :  { %v4134_v54 = vadd.f32 %v4133_v52, %v4093_v43  ;;  %v4096_v35 = vadd.f32 %v8448_v62, %v8038_v42  ;;  %v9375_v42 = vld [vmem:[%s12784_s29 + $0x40] sm:$0xff]   ;;  %s12849_s29 = smov 12  }
 0xbc7   :  { %v4147_v13 = vmul.f32 %v8060_v22, %v4134_v54  ;;  %v4137_v50 = vadd.f32 %v4136_v41, %v4096_v35 }
 0xbc9   :  { %v11332_v36 = vadd.f32 %v4147_v13, %v11087_v9  ;;  %v4148_v16 = vmul.f32 %v8060_v22, %v4137_v50 }
 0xbcb   :  { %12821 = vst [vmem:[#allocation8_spill] sm:$0xff] %v11332_v36  ;;  %v11335_v47 = vadd.f32 %v4148_v16, %v11090_v56  ;;  %v4161_v20 = vsel %vm367_vm7, %v11332_v36, 0.0  ;;  %4152 = vst.msk [vmem:[%s12629_s23] sm:$0x3f] %vm4151_vm6, %v11332_v36 }
 0xbcc   :  { %8061 = vst.msk [vmem:[%s12629_s23 + $0x2] sm:$0xc0] %vm4154_vm15, %v11332_v36  ;;  %4162 = vadd.xlane.f32.xlu1 %v4161_v20 }
 0xbcd   :  { %12822 = vst [vmem:[#allocation7_spill] sm:$0xff] %v11335_v47  ;;  %8062 = vst.msk [vmem:[%s12629_s23 + $0xa] sm:$0xf] %vm371_vm8, %v11335_v47  ;;  %v4164_v9 = vsel %vm371_vm8, %v11335_v47, 0.0  ;;  %s12852_s23 = smov 24  }
 0xbce   :  { %4165 = vadd.xlane.f32.xlu0 %v4164_v9 }
 0xc59   :  { %v4163_v56 = vpop.xlane.xlu1 %4162 }
 0xc5a   :  { %v4167_v59 = vmul.f32 0.0125, %v4163_v56 }
 0xc5b   :  { %v4166_v15 = vpop.xlane.xlu0 %4165 }
 0xc5c   :  { %v4169_v26 = vsub.f32 %v11332_v36, %v4167_v59  ;;  %v4168_v51 = vmul.f32 0.0125, %v4166_v15 }
 0xc5e   :  { %v4170_v57 = vsub.f32 %v11335_v47, %v4168_v51  ;;  %v4171_v55 = vmul.f32 %v4169_v26, %v4169_v26  ;;  %v8114_v51 = vld [vmem:[%s12617_s12 + $0x1] ss:$0 sm:$0xff]  ;;  %s12851_s12 = smov 20  }
 0xc60   :  { %v4173_v21 = vsel %vm367_vm7, %v4171_v55, 0.0  ;;  %v4172_v46 = vmul.f32 %v4170_v57, %v4170_v57 }
 0xc61   :  { %4174 = vadd.xlane.f32.xlu1 %v4173_v21 }
 0xc62   :  { %v4176_v40 = vsel %vm371_vm8, %v4172_v46, 0.0 }
 0xc63   :  { %4177 = vadd.xlane.f32.xlu0 %v4176_v40 }
 0xcee   :  { %v4175_v19 = vpop.xlane.xlu1 %4174 }
 0xcef   :  { %v4179_v34 = vmul.f32 0.0125, %v4175_v19 }
 0xcf0   :  { %v4178_v11 = vpop.xlane.xlu0 %4177 }
 0xcf1   :  { %v4181_v53 = vadd.f32 1e-05, %v4179_v34  ;;  %v4180_v14 = vmul.f32 0.0125, %v4178_v11 }
 0xcf3   :  { %9614 = vrsqrt.f32 %v4181_v53  ;;  %v4182_v32 = vadd.f32 1e-05, %v4180_v14 }
 0xcf5   :  { %9616 = vrsqrt.f32 %v4182_v32 }
 0xcfd   :  { %v9615_v18 = vpop.eup %9614 }
 0xcfe   :  { %v4185_v25 = vmul.f32 %v9615_v18, %v4169_v26 }
 0xcff   :  { %v9617_v12 = vpop.eup %9616 }
 0xd00   :  { %v4193_v27 = vmul.f32 %v8065_v49, %v4185_v25  ;;  %v4186_v1 = vmul.f32 %v9617_v12, %v4170_v57 }
 0xd02   :  { %v4194_v29 = vmul.f32 %v8065_v49, %v4186_v1  ;;  %v4201_v28 = vadd.f32 %v8066_v2, %v4193_v27 }
 0xd04   :  { %v4202_v52 = vadd.f32 %v8066_v2, %v4194_v29 }
 0xd06   :  { %v4203_v41 = vpack.c.bf16 %v4202_v52, %v4201_v28 }
 0xd08   :  { %8936 = vmatmul.mubr.msk.bf16.vlgmr.msra.gmra.mrb[100].mxu0 %vm367_vm7, %v4203_v41  ;;  %8950 = vmatmul.mubr.msk.bf16.vlgmr.msra.gmra.mrb[100].mxu1 %vm367_vm7, %v4203_v41 }
 0xd09   :  { %8954 = vmatpush3.bf16.msra.mxu0 %v9372_v4  ;;  %8963 = vmatprep.mubr.msk.bf16.mxu0 %vm9809_vm0, %v12803_v38 }
 0xd0a   :  { %8955 = vmatprep.subr.bf16.mxu0 %v12803_v38  ;;  %8969 = vmatprep.mubr.msk.bf16.mxu1 %vm9809_vm0, %v12803_v38 }
 0xd0d   :  { %8956 = vmatpush3.bf16.msra.mxu0 %v9373_v6 }
 0xd0e   :  { %8957 = vmatprep.subr.bf16.mxu0 %v12803_v38 }
 0xd11   :  { %8958 = vmatpush3.bf16.msra.mxu0 %v9374_v31 }
 0xd12   :  { %8959 = vmatprep.subr.bf16.mxu0 %v12803_v38 }
 0xd15   :  { %8960 = vmatpush3.bf16.msra.mxu0 %v9375_v42 }
 0xd16   :  { %8961 = vmatprep.subr.bf16.mxu0 %v12803_v38 }
 0xd19   :  { %8962 = vmatpush3.bf16.msra.mxu0 %v9376_v24 }
 0xd1a   :  { %8985 = vmatprep.subr.bf16.mxu0 %v12803_v38 }
 0xd1c   :  { %8964 = vmatmul.mubr.msk.bf16.vlgmr.msra.gmra.mrb[104].mxu0 %vm367_vm7, %v4203_v41 }
 0xd1d   :  { %8987 = vmatprep.mubr.msk.bf16.mxu0 %vm9809_vm0, %v12803_v38 }
 0xddb   :  { %v4290_v33 = vpop.f32.mrb[100].mxu0  ;;  %v4380_v43 = vpop.f32.mrb[100].mxu1 }
 0xddc   :  { %v8937_v62 = vpop.f32.mrb[101].mxu0  ;;  %v8951_v22 = vpop.f32.mrb[101].mxu1  ;;  %v4291_v13 = vadd.f32 %v8078_v37, %v4290_v33  ;;  %v4381_v50 = vadd.f32 %v8096_v61, %v4380_v43 }
 0xddd   :  { %v4293_v54 = vpop.f32.mrb[102].mxu0  ;;  %v4383_v35 = vpop.f32.mrb[102].mxu1 }
 0xdde   :  { %v4294_v16 = vadd.f32 %v8078_v37, %v4293_v54  ;;  %v4384_v20 = vadd.f32 %v8096_v61, %v4383_v35  ;;  %v8938_v9 = vpop.f32.mrb[103].mxu0  ;;  %v8952_v56 = vpop.f32.mrb[103].mxu1 }
 0xde0   :  { %v11441_v59 = vpack.c.bf16 %v4294_v16, %v4291_v13  ;;  %v11443_v15 = vpack.c.bf16 %v4384_v20, %v4381_v50 }
 0xde2   :  { %v4484_v26 = vsel %vm683_vm9, %v11443_v15, 0 }
 0xde3   :  { %8968 = vmatpush3.bf16.xpose.msra.mxu1 %v4484_v26 }
 0xde4   :  { %8973 = vmatprep.subr.bf16.mxu1 %v12803_v38 }
 0xdea   :  { %8970 = vmatmul.mubr.msk.bf16.vlgmr.msra.gmra.mrb[104].mxu1 %vm683_vm9, %v11441_v59 }
 0xdeb   :  { %8975 = vmatprep.mubr.msk.bf16.mxu1 %vm9809_vm0, %v12803_v38 }
 0xdef   :  { %v4470_v57 = vpop.f32.mrb[104].mxu0 }
 0xdf0   :  { %v8965_v55 = vpop.f32.mrb[105].mxu0  ;;  %v4471_v46 = vadd.f32 %v8114_v51, %v4470_v57 }
 0xdf1   :  { %v4473_v21 = vpop.f32.mrb[106].mxu0 }
 0xdf2   :  { %v4474_v40 = vadd.f32 %v8114_v51, %v4473_v21  ;;  %v8966_v0 = vpop.f32.mrb[107].mxu0 }
 0xdf4   :  { %v11455_v60 = vpack.c.bf16 %v4474_v40, %v4471_v46 }
 0xdf6   :  { %v4554_v5 = vsel %vm359_vm4, %v11455_v60, 0 }
 0xdf7   :  { %8974 = vmatpush3.bf16.msra.mxu1 %v4554_v5 }
 0xdf8   :  { %8979 = vmatprep.subr.bf16.mxu1 %v12803_v38 }
 0xebd   :  { %v4520_v63 = vpop.f32.mrb[104].mxu1 }
 0xebe   :  { %v4521_v3 = vadd.f32 %v11463_v10, %v4520_v63  ;;  %v8971_v7 = vpop.f32.mrb[105].mxu1 }
 0xebf   :  { %v4523_v58 = vpop.f32.mrb[106].mxu1 }
 0xec0   :  { %v4524_v39 = vadd.f32 %v11469_v30, %v4523_v58  ;;  %v8972_v19 = vpop.f32.mrb[107].mxu1  ;;  %v4527_v34 = vsel %vm731_vm10, %v4521_v3, -inf }
 0xec1   :  { %4528 = vmax.xlane.f32.xlu1 %v4527_v34 }
 0xec2   :  { %v4530_v11 = vsel %vm735_vm11, %v4524_v39, -inf }
 0xec3   :  { %4531 = vmax.xlane.f32.xlu0 %v4530_v11 }
 0xf4e   :  { %v4529_v53 = vpop.xlane.xlu1 %4528 }
 0xf4f   :  { %v4533_v14 = vsub.f32 %v4521_v3, %v4529_v53 }
 0xf50   :  { %v4532_v32 = vpop.xlane.xlu0 %4531 }
 0xf51   :  { %v4535_v18 = vmul.f32 1.442695, %v4533_v14  ;;  %v4534_v49 = vsub.f32 %v4524_v39, %v4532_v32 }
 0xf53   :  { %9618 = vpow2.f32 %v4535_v18  ;;  %v4537_v25 = vmul.f32 1.442695, %v4534_v49 }
 0xf55   :  { %9620 = vpow2.f32 %v4537_v25 }
 0xf5d   :  { %v11474_v12 = vpop.eup %9618 }
 0xf5e   :  { %v4539_v27 = vsel %vm731_vm10, %v11474_v12, 0.0 }
 0xf5f   :  { %v11478_v1 = vpop.eup %9620  ;;  %4540 = vadd.xlane.f32.xlu1 %v4539_v27 }
 0xf60   :  { %v4542_v2 = vsel %vm735_vm11, %v11478_v1, 0.0 }
 0xf61   :  { %4543 = vadd.xlane.f32.xlu0 %v4542_v2 }
 0xf70   :  { %4603 = vrot.lane.b32.xlu1 %v11443_v15, %s12823_s4 }
 0xf74   :  { %4737 = vrot.lane.b32.xlu1 %v11443_v15, %s12824_s27 }
 0xf77   :  { %4600 = vrot.lane.b32.xlu0 %v11441_v59, %s12823_s4 }
 0xf78   :  { %4735 = vrot.lane.b32.xlu1 %v11441_v59, %s12824_s27 }
 0xf7b   :  { %4868 = vrot.lane.b32.xlu0 %v11441_v59, %s12825_s7 }
 0xf7c   :  { %4870 = vrot.lane.b32.xlu1 %v11443_v15, %s12825_s7 }
 0xf7f   :  { %5001 = vrot.lane.b32.xlu0 %v11441_v59, %s12826_s5 }
 0xf80   :  { %5003 = vrot.lane.b32.xlu1 %v11443_v15, %s12826_s5 }
 0xf83   :  { %5134 = vrot.lane.b32.xlu0 %v11441_v59, %s12785_s28 }
 0xf84   :  { %5136 = vrot.lane.b32.xlu1 %v11443_v15, %s12785_s28 }
 0xf87   :  { %5267 = vrot.lane.b32.xlu0 %v11441_v59, %s12827_s26 }
 0xf88   :  { %5269 = vrot.lane.b32.xlu1 %v11443_v15, %s12827_s26 }
 0xf8b   :  { %5400 = vrot.lane.b32.xlu0 %v11441_v59, %s12828_s9 }
 0xf8c   :  { %5402 = vrot.lane.b32.xlu1 %v11443_v15, %s12828_s9 }
 0xf8f   :  { %5533 = vrot.lane.b32.xlu0 %v11441_v59, %s12829_s6 }
 0xf90   :  { %5535 = vrot.lane.b32.xlu1 %v11443_v15, %s12829_s6 }
 0xf93   :  { %5666 = vrot.lane.b32.xlu0 %v11441_v59, %s12830_s0 }
 0xf94   :  { %5668 = vrot.lane.b32.xlu1 %v11443_v15, %s12830_s0 }
 0xf97   :  { %5799 = vrot.lane.b32.xlu0 %v11441_v59, %s12831_s11 }
 0xf98   :  { %5801 = vrot.lane.b32.xlu1 %v11443_v15, %s12831_s11 }
 0xf9b   :  { %5932 = vrot.lane.b32.xlu0 %v11441_v59, %s12832_s14 }
 0xf9c   :  { %5934 = vrot.lane.b32.xlu1 %v11443_v15, %s12832_s14 }
 0xf9f   :  { %6065 = vrot.lane.b32.xlu0 %v11441_v59, %s12833_s15 }
 0xfa0   :  { %6067 = vrot.lane.b32.xlu1 %v11443_v15, %s12833_s15 }
 0xfa3   :  { %6198 = vrot.lane.b32.xlu0 %v11441_v59, %s12801_s24 }
 0xfa4   :  { %6200 = vrot.lane.b32.xlu1 %v11443_v15, %s12801_s24 }
 0xfa7   :  { %6331 = vrot.lane.b32.xlu0 %v11441_v59, %s12802_s1 }
 0xfa8   :  { %6333 = vrot.lane.b32.xlu1 %v11443_v15, %s12802_s1 }
 0xfab   :  { %6464 = vrot.lane.b32.xlu0 %v11441_v59, %s12804_s2 }
 0xfac   :  { %6466 = vrot.lane.b32.xlu1 %v11443_v15, %s12804_s2 }
 0xfaf   :  { %6597 = vrot.lane.b32.xlu0 %v11441_v59, %s12834_s3 }
 0xfb0   :  { %6599 = vrot.lane.b32.xlu1 %v11443_v15, %s12834_s3 }
 0xfb3   :  { %6730 = vrot.lane.b32.xlu0 %v11441_v59, %s12835_s25 }
 0xfb4   :  { %6732 = vrot.lane.b32.xlu1 %v11443_v15, %s12835_s25 }
 0xfb7   :  { %6863 = vrot.lane.b32.xlu0 %v11441_v59, %s12836_s30 }
 0xfb8   :  { %6865 = vrot.lane.b32.xlu1 %v11443_v15, %s12836_s30 }
 0xfbb   :  { %6996 = vrot.lane.b32.xlu0 %v11441_v59, %s12837_s8 }
 0xfbc   :  { %6998 = vrot.lane.b32.xlu1 %v11443_v15, %s12837_s8 }
 0xfbf   :  { %4942 = vrot.lane.b32.xlu0 %v11455_v60, %s12825_s7  ;;  %s12855_s7 = smov 36  }
 0xfc0   :  { %4676 = vrot.lane.b32.xlu1 %v11455_v60, %s12823_s4  ;;  %s12853_s4 = smov 28  }
 0xfc3   :  { %5208 = vrot.lane.b32.xlu0 %v11455_v60, %s12785_s28  ;;  %s12847_s28 = smov 4  }
 0xfc4   :  { %4809 = vrot.lane.b32.xlu1 %v11455_v60, %s12824_s27  ;;  %s12854_s27 = smov 32  }
 0xfc7   :  { %5474 = vrot.lane.b32.xlu0 %v11455_v60, %s12828_s9  ;;  %s12862_s9 = smov 48  }
 0xfc8   :  { %5075 = vrot.lane.b32.xlu1 %v11455_v60, %s12826_s5  ;;  %s12857_s5 = smov 40  }
 0xfcb   :  { %5740 = vrot.lane.b32.xlu0 %v11455_v60, %s12830_s0 }
 0xfcc   :  { %5341 = vrot.lane.b32.xlu1 %v11455_v60, %s12827_s26  ;;  %s12859_s26 = smov 44  }
 0xfcf   :  { %6006 = vrot.lane.b32.xlu0 %v11455_v60, %s12832_s14 }
 0xfd0   :  { %5607 = vrot.lane.b32.xlu1 %v11455_v60, %s12829_s6 }
 0xfd4   :  { %5873 = vrot.lane.b32.xlu1 %v11455_v60, %s12831_s11  ;;  %s12868_s11 = sld [smem:[#allocation24_spill]] }
 0xfd8   :  { %6139 = vrot.lane.b32.xlu1 %v11455_v60, %s12833_s15 }
 0xfec   :  { %v4541_v29 = vpop.xlane.xlu1 %4540 }
 0xfed   :  { %9622 = vrcp.f32 %v4541_v29 }
 0xfee   :  { %v4544_v28 = vpop.xlane.xlu0 %4543 }
 0xfef   :  { %9624 = vrcp.f32 %v4544_v28 }
 0xff0   :  { %v4604_v52 = vpop.permute.xlu1 %4603 }
 0xff1   :  { %v4609_v61 = vsel %vm683_vm9, %v4604_v52, 0 }
 0xff2   :  { %v4601_v22 = vpop.permute.xlu0 %4600 }
 0xff4   :  { %v4738_v4 = vpop.permute.xlu1 %4737 }
 0xff5   :  { %v4743_v54 = vsel %vm683_vm9, %v4738_v4, 0 }
 0xff6   :  { %v4869_v9 = vpop.permute.xlu0 %4868 }
 0xff7   :  { %v9623_v41 = vpop.eup %9622 }
 0xff8   :  { %v4736_v6 = vpop.permute.xlu1 %4735  ;;  %v4547_v42 = vmul.f32 %v9623_v41, %v11474_v12 }
 0xff9   :  { %v9625_v31 = vpop.eup %9624 }
 0xffa   :  { %v4548_v24 = vmul.f32 %v9625_v31, %v11478_v1  ;;  %v5002_v26 = vpop.permute.xlu0 %5001 }
 0xffc   :  { %v4871_v37 = vpop.permute.xlu1 %4870  ;;  %v4549_v33 = vpack.c.bf16 %v4548_v24, %v4547_v42 }
 0xffd   :  { %v4876_v50 = vsel %vm683_vm9, %v4871_v37, 0 }
 0xffe   :  { %8976 = vmatmul.mubr.msk.bf16.vlgmr.msra.gmra.mrb[108].mxu1 %vm731_vm10, %v4549_v33  ;;  %v5135_v21 = vpop.permute.xlu0 %5134 }
 0xfff   :  { %8980 = vmatpush3.bf16.xpose.msra.mxu1 %v4609_v61  ;;  %8981 = vmatprep.mubr.msk.bf16.mxu1 %vm9809_vm0, %v12803_v38 }
0x1000   :  { %v5004_v43 = vpop.permute.xlu1 %5003  ;;  %8991 = vmatprep.subr.bf16.mxu1 %v12803_v38 }
0x1001   :  { %v5009_v56 = vsel %vm683_vm9, %v5004_v43, 0 }
0x1002   :  { %v5268_v5 = vpop.permute.xlu0 %5267 }
0x1004   :  { %v5137_v62 = vpop.permute.xlu1 %5136 }
0x1005   :  { %v5142_v51 = vsel %vm683_vm9, %v5137_v62, 0 }
0x1006   :  { %8982 = vmatmul.mubr.msk.bf16.vlgmr.msra.gmra.mrb[112].mxu1 %vm683_vm9, %v4601_v22  ;;  %v5401_v58 = vpop.permute.xlu0 %5400 }
0x1007   :  { %8992 = vmatpush3.bf16.xpose.msra.mxu1 %v4743_v54  ;;  %8993 = vmatprep.mubr.msk.bf16.mxu1 %vm9809_vm0, %v12803_v38 }
0x1008   :  { %v5270_v35 = vpop.permute.xlu1 %5269  ;;  %9003 = vmatprep.subr.bf16.mxu1 %v12803_v38 }
0x1009   :  { %v5275_v46 = vsel %vm683_vm9, %v5270_v35, 0 }
0x100a   :  { %v5534_v11 = vpop.permute.xlu0 %5533 }
0x100c   :  { %v5403_v13 = vpop.permute.xlu1 %5402 }
0x100d   :  { %v5408_v63 = vsel %vm683_vm9, %v5403_v13, 0 }
0x100e   :  { %8994 = vmatmul.mubr.msk.bf16.vlgmr.msra.gmra.mrb[116].mxu1 %vm683_vm9, %v4736_v6  ;;  %v5667_v18 = vpop.permute.xlu0 %5666 }
0x100f   :  { %9004 = vmatpush3.bf16.xpose.msra.mxu1 %v4876_v50  ;;  %9005 = vmatprep.mubr.msk.bf16.mxu1 %vm9809_vm0, %v12803_v38 }
0x1010   :  { %v5536_v16 = vpop.permute.xlu1 %5535  ;;  %9015 = vmatprep.subr.bf16.mxu1 %v12803_v38 }
0x1011   :  { %v5541_v39 = vsel %vm683_vm9, %v5536_v16, 0 }
0x1012   :  { %v5800_v25 = vpop.permute.xlu0 %5799 }
0x1014   :  { %v5669_v20 = vpop.permute.xlu1 %5668 }
0x1015   :  { %v5674_v53 = vsel %vm683_vm9, %v5669_v20, 0 }
0x1016   :  { %9006 = vmatmul.mubr.msk.bf16.vlgmr.msra.gmra.mrb[120].mxu1 %vm683_vm9, %v4869_v9  ;;  %v5933_v27 = vpop.permute.xlu0 %5932 }
0x1017   :  { %9016 = vmatpush3.bf16.xpose.msra.mxu1 %v5009_v56  ;;  %9017 = vmatprep.mubr.msk.bf16.mxu1 %vm9809_vm0, %v12803_v38 }
0x1018   :  { %v5802_v59 = vpop.permute.xlu1 %5801  ;;  %9027 = vmatprep.subr.bf16.mxu1 %v12803_v38 }
0x1019   :  { %v5807_v49 = vsel %vm683_vm9, %v5802_v59, 0 }
0x101a   :  { %v6066_v2 = vpop.permute.xlu0 %6065 }
0x101c   :  { %v5935_v15 = vpop.permute.xlu1 %5934 }
0x101d   :  { %v5940_v12 = vsel %vm683_vm9, %v5935_v15, 0 }
0x101e   :  { %9018 = vmatmul.mubr.msk.bf16.vlgmr.msra.gmra.mrb[124].mxu1 %vm683_vm9, %v5002_v26  ;;  %v6199_v28 = vpop.permute.xlu0 %6198 }
0x101f   :  { %9028 = vmatpush3.bf16.xpose.msra.mxu1 %v5142_v51  ;;  %9029 = vmatprep.mubr.msk.bf16.mxu1 %vm9809_vm0, %v12803_v38 }
0x1020   :  { %v6068_v57 = vpop.permute.xlu1 %6067  ;;  %9039 = vmatprep.subr.bf16.mxu1 %v12803_v38 }
0x1021   :  { %v6073_v1 = vsel %vm683_vm9, %v6068_v57, 0 }
0x1022   :  { %v6332_v4 = vpop.permute.xlu0 %6331 }
0x1024   :  { %v6201_v55 = vpop.permute.xlu1 %6200 }
0x1025   :  { %v6206_v29 = vsel %vm683_vm9, %v6201_v55, 0 }
0x1026   :  { %9030 = vmatmul.mubr.msk.bf16.vlgmr.msra.gmra.mrb[128].mxu1 %vm683_vm9, %v5135_v21  ;;  %v6465_v6 = vpop.permute.xlu0 %6464 }
0x1027   :  { %9040 = vmatpush3.bf16.xpose.msra.mxu1 %v5275_v46  ;;  %9041 = vmatprep.mubr.msk.bf16.mxu1 %vm9809_vm0, %v12803_v38 }
0x1028   :  { %v6334_v40 = vpop.permute.xlu1 %6333  ;;  %9051 = vmatprep.subr.bf16.mxu1 %v12803_v38 }
0x1029   :  { %v6339_v52 = vsel %vm683_vm9, %v6334_v40, 0 }
0x102a   :  { %v6598_v42 = vpop.permute.xlu0 %6597 }
0x102c   :  { %v6467_v0 = vpop.permute.xlu1 %6466 }
0x102d   :  { %v6472_v41 = vsel %vm683_vm9, %v6467_v0, 0 }
0x102e   :  { %9042 = vmatmul.mubr.msk.bf16.vlgmr.msra.gmra.mrb[132].mxu1 %vm683_vm9, %v5268_v5  ;;  %v6731_v37 = vpop.permute.xlu0 %6730 }
0x102f   :  { %9052 = vmatpush3.bf16.xpose.msra.mxu1 %v5408_v63  ;;  %9053 = vmatprep.mubr.msk.bf16.mxu1 %vm9809_vm0, %v12803_v38 }
0x1030   :  { %v6600_v3 = vpop.permute.xlu1 %6599  ;;  %9063 = vmatprep.subr.bf16.mxu1 %v12803_v38 }
0x1031   :  { %v6605_v31 = vsel %vm683_vm9, %v6600_v3, 0 }
0x1032   :  { %v6864_v61 = vpop.permute.xlu0 %6863 }
0x1034   :  { %v6733_v7 = vpop.permute.xlu1 %6732 }
0x1035   :  { %v6738_v24 = vsel %vm683_vm9, %v6733_v7, 0 }
0x1036   :  { %9054 = vmatmul.mubr.msk.bf16.vlgmr.msra.gmra.mrb[136].mxu1 %vm683_vm9, %v5401_v58  ;;  %v6997_v62 = vpop.permute.xlu0 %6996 }
0x1037   :  { %9064 = vmatpush3.bf16.xpose.msra.mxu1 %v5541_v39  ;;  %9065 = vmatprep.mubr.msk.bf16.mxu1 %vm9809_vm0, %v12803_v38 }
0x1038   :  { %v6866_v19 = vpop.permute.xlu1 %6865  ;;  %9075 = vmatprep.subr.bf16.mxu1 %v12803_v38 }
0x1039   :  { %v6871_v33 = vsel %vm683_vm9, %v6866_v19, 0 }
0x103c   :  { %v11624_v34 = vpop.permute.xlu1 %6998 }
0x103d   :  { %v7004_v43 = vsel %vm683_vm9, %v11624_v34, 0 }
0x103e   :  { %9066 = vmatmul.mubr.msk.bf16.vlgmr.msra.gmra.mrb[140].mxu1 %vm683_vm9, %v5534_v11 }
0x103f   :  { %9076 = vmatpush3.bf16.xpose.msra.mxu1 %v5674_v53  ;;  %9077 = vmatprep.mubr.msk.bf16.mxu1 %vm9809_vm0, %v12803_v38 }
0x1040   :  { %v4677_v14 = vpop.permute.xlu1 %4676  ;;  %9087 = vmatprep.subr.bf16.mxu1 %v12803_v38 }
0x1041   :  { %v4682_v32 = vsel %vm359_vm4, %v4677_v14, 0 }
0x1042   :  { %8986 = vmatpush3.bf16.msra.mxu0 %v4682_v32 }
0x1043   :  { %8997 = vmatprep.subr.bf16.mxu0 %v12803_v38 }
0x1046   :  { %9078 = vmatmul.mubr.msk.bf16.vlgmr.msra.gmra.mrb[144].mxu1 %vm683_vm9, %v5667_v18 }
0x1047   :  { %9088 = vmatpush3.bf16.xpose.msra.mxu1 %v5807_v49  ;;  %9089 = vmatprep.mubr.msk.bf16.mxu1 %vm9809_vm0, %v12803_v38 }
0x1048   :  { %9099 = vmatprep.subr.bf16.mxu1 %v12803_v38 }
0x104e   :  { %9090 = vmatmul.mubr.msk.bf16.vlgmr.msra.gmra.mrb[148].mxu1 %vm683_vm9, %v5800_v25 }
0x104f   :  { %9100 = vmatpush3.bf16.xpose.msra.mxu1 %v5940_v12  ;;  %9101 = vmatprep.mubr.msk.bf16.mxu1 %vm9809_vm0, %v12803_v38 }
0x1050   :  { %9111 = vmatprep.subr.bf16.mxu1 %v12803_v38 }
0x1056   :  { %9102 = vmatmul.mubr.msk.bf16.vlgmr.msra.gmra.mrb[152].mxu1 %vm683_vm9, %v5933_v27 }
0x1057   :  { %9112 = vmatpush3.bf16.xpose.msra.mxu1 %v6073_v1  ;;  %9113 = vmatprep.mubr.msk.bf16.mxu1 %vm9809_vm0, %v12803_v38 }
0x1058   :  { %9123 = vmatprep.subr.bf16.mxu1 %v12803_v38 }
0x105e   :  { %9114 = vmatmul.mubr.msk.bf16.vlgmr.msra.gmra.mrb[156].mxu1 %vm683_vm9, %v6066_v2 }
0x105f   :  { %9124 = vmatpush3.bf16.xpose.msra.mxu1 %v6206_v29  ;;  %9125 = vmatprep.mubr.msk.bf16.mxu1 %vm9809_vm0, %v12803_v38 }
0x1060   :  { %9135 = vmatprep.subr.bf16.mxu1 %v12803_v38 }
0x1066   :  { %9126 = vmatmul.mubr.msk.bf16.vlgmr.msra.gmra.mrb[160].mxu1 %vm683_vm9, %v6199_v28 }
0x1067   :  { %9136 = vmatpush3.bf16.xpose.msra.mxu1 %v6339_v52  ;;  %9137 = vmatprep.mubr.msk.bf16.mxu1 %vm9809_vm0, %v12803_v38 }
0x1068   :  { %9147 = vmatprep.subr.bf16.mxu1 %v12803_v38 }
0x106e   :  { %9138 = vmatmul.mubr.msk.bf16.vlgmr.msra.gmra.mrb[164].mxu1 %vm683_vm9, %v6332_v4 }
0x106f   :  { %9148 = vmatpush3.bf16.xpose.msra.mxu1 %v6472_v41  ;;  %9149 = vmatprep.mubr.msk.bf16.mxu1 %vm9809_vm0, %v12803_v38 }
0x1070   :  { %9159 = vmatprep.subr.bf16.mxu1 %v12803_v38 }
0x1076   :  { %9150 = vmatmul.mubr.msk.bf16.vlgmr.msra.gmra.mrb[168].mxu1 %vm683_vm9, %v6465_v6 }
0x1077   :  { %9160 = vmatpush3.bf16.xpose.msra.mxu1 %v6605_v31  ;;  %9161 = vmatprep.mubr.msk.bf16.mxu1 %vm9809_vm0, %v12803_v38 }
0x1078   :  { %9171 = vmatprep.subr.bf16.mxu1 %v12803_v38 }
0x107e   :  { %9162 = vmatmul.mubr.msk.bf16.vlgmr.msra.gmra.mrb[172].mxu1 %vm683_vm9, %v6598_v42 }
0x107f   :  { %9172 = vmatpush3.bf16.xpose.msra.mxu1 %v6738_v24  ;;  %9173 = vmatprep.mubr.msk.bf16.mxu1 %vm9809_vm0, %v12803_v38 }
0x1080   :  { %9183 = vmatprep.subr.bf16.mxu1 %v12803_v38 }
0x1086   :  { %9174 = vmatmul.mubr.msk.bf16.vlgmr.msra.gmra.mrb[176].mxu1 %vm683_vm9, %v6731_v37 }
0x1087   :  { %9184 = vmatpush3.bf16.xpose.msra.mxu1 %v6871_v33  ;;  %9185 = vmatprep.mubr.msk.bf16.mxu1 %vm9809_vm0, %v12803_v38 }
0x1088   :  { %9195 = vmatprep.subr.bf16.mxu1 %v12803_v38 }
0x108e   :  { %9186 = vmatmul.mubr.msk.bf16.vlgmr.msra.gmra.mrb[180].mxu1 %vm683_vm9, %v6864_v61 }
0x108f   :  { %9196 = vmatpush3.bf16.xpose.msra.mxu1 %v7004_v43  ;;  %9197 = vmatprep.mubr.msk.bf16.mxu1 %vm9809_vm0, %v12803_v38 }
0x1090   :  { %9207 = vmatprep.subr.bf16.mxu1 %v12803_v38 }
0x1096   :  { %9198 = vmatmul.mubr.msk.bf16.vlgmr.msra.gmra.mrb[184].mxu1 %vm683_vm9, %v6997_v62 }
0x1097   :  { %9217 = vmatprep.mubr.msk.bf16.mxu1 %vm9809_vm0, %v12803_v38 }
0x10d1   :  { %v4590_v22 = vpop.f32.mrb[108].mxu1 }
0x10d2   :  { %4597 = vst.msk [vmem:[#allocation2] sm:$0xff] %vm683_vm9, %v4590_v22  ;;  %v8977_v54 = vpop.f32.mrb[109].mxu1  ;;  %vm12858_vm9 = vcmask 97344  }
0x10d3   :  { %v4593_v35 = vpop.f32.mrb[110].mxu1 }
0x10d4   :  { %4598 = vst.msk [vmem:[#allocation2 + $0x8] sm:$0xf] %vm804_vm12, %v4593_v35  ;;  %v8978_v13 = vpop.f32.mrb[111].mxu1  ;;  %vm12863_vm12 = vcmask 126048  }
0x10d9   :  { %v4645_v50 = vpop.f32.mrb[112].mxu1 }
0x10da   :  { %v11690_v16 = vadd.f32 %v11463_v10, %v4645_v50  ;;  %v8983_v20 = vpop.f32.mrb[113].mxu1 }
0x10db   :  { %v4648_v9 = vpop.f32.mrb[114].mxu1 }
0x10dc   :  { %v11693_v56 = vadd.f32 %v11469_v30, %v4648_v9  ;;  %v8984_v59 = vpop.f32.mrb[115].mxu1  ;;  %v4652_v15 = vsel %vm731_vm10, %v11690_v16, -inf }
0x10dd   :  { %4653 = vmax.xlane.f32.xlu1 %v4652_v15 }
0x10de   :  { %v4655_v26 = vsel %vm735_vm11, %v11693_v56, -inf }
0x10df   :  { %4656 = vmax.xlane.f32.xlu0 %v4655_v26 }
0x10e1   :  { %v4779_v51 = vpop.f32.mrb[116].mxu1 }
0x10e2   :  { %v11700_v57 = vadd.f32 %v11463_v10, %v4779_v51  ;;  %v8995_v55 = vpop.f32.mrb[117].mxu1 }
0x10e3   :  { %v4782_v21 = vpop.f32.mrb[118].mxu1 }
0x10e4   :  { %v11703_v46 = vadd.f32 %v11469_v30, %v4782_v21  ;;  %v8996_v40 = vpop.f32.mrb[119].mxu1  ;;  %v4786_v0 = vsel %vm731_vm10, %v11700_v57, -inf }
0x10e5   :  { %4787 = vmax.xlane.f32.xlu0 %v4786_v0 }
0x10e6   :  { %v4789_v5 = vsel %vm735_vm11, %v11703_v46, -inf }
0x10e9   :  { %4790 = vmax.xlane.f32.xlu0 %v4789_v5  ;;  %v4912_v63 = vpop.f32.mrb[120].mxu1 }
0x10ea   :  { %v11710_v3 = vadd.f32 %v11463_v10, %v4912_v63  ;;  %v9007_v7 = vpop.f32.mrb[121].mxu1 }
0x10eb   :  { %v4915_v58 = vpop.f32.mrb[122].mxu1 }
0x10ec   :  { %v11713_v39 = vadd.f32 %v11469_v30, %v4915_v58  ;;  %v9008_v19 = vpop.f32.mrb[123].mxu1  ;;  %v4919_v34 = vsel %vm731_vm10, %v11710_v3, -inf }
0x10ed   :  { %4920 = vmax.xlane.f32.xlu1 %v4919_v34 }
0x10ee   :  { %v4922_v11 = vsel %vm735_vm11, %v11713_v39, -inf }
0x10ef   :  { %4923 = vmax.xlane.f32.xlu0 %v4922_v11 }
0x10f1   :  { %v5045_v53 = vpop.f32.mrb[124].mxu1 }
0x10f2   :  { %v11720_v14 = vadd.f32 %v11463_v10, %v5045_v53  ;;  %v9019_v32 = vpop.f32.mrb[125].mxu1 }
0x10f3   :  { %v5048_v18 = vpop.f32.mrb[126].mxu1 }
0x10f4   :  { %v11723_v49 = vadd.f32 %v11469_v30, %v5048_v18  ;;  %v9020_v25 = vpop.f32.mrb[127].mxu1  ;;  %v5052_v12 = vsel %vm731_vm10, %v11720_v14, -inf }
0x10f5   :  { %5053 = vmax.xlane.f32.xlu1 %v5052_v12 }
0x10f6   :  { %v5055_v27 = vsel %vm735_vm11, %v11723_v49, -inf }
0x10f7   :  { %5056 = vmax.xlane.f32.xlu0 %v5055_v27 }
0x10f9   :  { %v5178_v1 = vpop.f32.mrb[128].mxu1 }
0x10fa   :  { %v11730_v2 = vadd.f32 %v11463_v10, %v5178_v1  ;;  %v9031_v29 = vpop.f32.mrb[129].mxu1 }
0x10fb   :  { %v5181_v28 = vpop.f32.mrb[130].mxu1 }
0x10fc   :  { %v11733_v52 = vadd.f32 %v11469_v30, %v5181_v28  ;;  %v9032_v4 = vpop.f32.mrb[131].mxu1  ;;  %v5185_v41 = vsel %vm731_vm10, %v11730_v2, -inf }
0x10fd   :  { %5186 = vmax.xlane.f32.xlu1 %v5185_v41 }
0x10fe   :  { %v5188_v6 = vsel %vm735_vm11, %v11733_v52, -inf }
0x10ff   :  { %5189 = vmax.xlane.f32.xlu0 %v5188_v6 }
0x1101   :  { %v5311_v31 = vpop.f32.mrb[132].mxu1 }
0x1102   :  { %v11740_v42 = vadd.f32 %v11463_v10, %v5311_v31  ;;  %v9043_v24 = vpop.f32.mrb[133].mxu1 }
0x1103   :  { %v5314_v37 = vpop.f32.mrb[134].mxu1 }
0x1104   :  { %v11743_v33 = vadd.f32 %v11469_v30, %v5314_v37  ;;  %v9044_v61 = vpop.f32.mrb[135].mxu1  ;;  %v5318_v43 = vsel %vm731_vm10, %v11740_v42, -inf }
0x1105   :  { %5319 = vmax.xlane.f32.xlu1 %v5318_v43 }
0x1106   :  { %v5321_v62 = vsel %vm735_vm11, %v11743_v33, -inf }
0x1107   :  { %5322 = vmax.xlane.f32.xlu0 %v5321_v62 }
0x1109   :  { %v5444_v22 = vpop.f32.mrb[136].mxu1 }
0x110a   :  { %v11750_v54 = vadd.f32 %v11463_v10, %v5444_v22  ;;  %v9055_v35 = vpop.f32.mrb[137].mxu1 }
0x110b   :  { %v5447_v13 = vpop.f32.mrb[138].mxu1 }
0x110c   :  { %v11753_v50 = vadd.f32 %v11469_v30, %v5447_v13  ;;  %v9056_v20 = vpop.f32.mrb[139].mxu1  ;;  %v5451_v9 = vsel %vm731_vm10, %v11750_v54, -inf }
0x110d   :  { %5452 = vmax.xlane.f32.xlu1 %v5451_v9 }
0x110e   :  { %v5454_v59 = vsel %vm735_vm11, %v11753_v50, -inf }
0x110f   :  { %5455 = vmax.xlane.f32.xlu0 %v5454_v59 }
0x1111   :  { %v5577_v15 = vpop.f32.mrb[140].mxu1 }
0x1112   :  { %v11760_v26 = vadd.f32 %v11463_v10, %v5577_v15  ;;  %v9067_v51 = vpop.f32.mrb[141].mxu1 }
0x1113   :  { %v5580_v55 = vpop.f32.mrb[142].mxu1 }
0x1114   :  { %v11763_v21 = vadd.f32 %v11469_v30, %v5580_v55  ;;  %v9068_v40 = vpop.f32.mrb[143].mxu1  ;;  %v5584_v0 = vsel %vm731_vm10, %v11760_v26, -inf }
0x1115   :  { %5585 = vmax.xlane.f32.xlu1 %v5584_v0 }
0x1116   :  { %v5587_v5 = vsel %vm735_vm11, %v11763_v21, -inf }
0x1117   :  { %5588 = vmax.xlane.f32.xlu0 %v5587_v5 }
0x1119   :  { %v5710_v63 = vpop.f32.mrb[144].mxu1 }
0x111a   :  { %v11770_v7 = vadd.f32 %v11463_v10, %v5710_v63  ;;  %v9079_v58 = vpop.f32.mrb[145].mxu1 }
0x111b   :  { %v5713_v19 = vpop.f32.mrb[146].mxu1 }
0x111c   :  { %v11773_v34 = vadd.f32 %v11469_v30, %v5713_v19  ;;  %v9080_v11 = vpop.f32.mrb[147].mxu1  ;;  %v5717_v53 = vsel %vm731_vm10, %v11770_v7, -inf }
0x111d   :  { %5718 = vmax.xlane.f32.xlu1 %v5717_v53 }
0x111e   :  { %v5720_v32 = vsel %vm735_vm11, %v11773_v34, -inf }
0x111f   :  { %5721 = vmax.xlane.f32.xlu0 %v5720_v32 }
0x1121   :  { %v5843_v18 = vpop.f32.mrb[148].mxu1 }
0x1122   :  { %v11780_v25 = vadd.f32 %v11463_v10, %v5843_v18  ;;  %v9091_v12 = vpop.f32.mrb[149].mxu1 }
0x1123   :  { %v5846_v27 = vpop.f32.mrb[150].mxu1 }
0x1124   :  { %v11783_v1 = vadd.f32 %v11469_v30, %v5846_v27  ;;  %v9092_v29 = vpop.f32.mrb[151].mxu1  ;;  %v5850_v28 = vsel %vm731_vm10, %v11780_v25, -inf }
0x1125   :  { %5851 = vmax.xlane.f32.xlu1 %v5850_v28 }
0x1126   :  { %v5853_v4 = vsel %vm735_vm11, %v11783_v1, -inf }
0x1127   :  { %5854 = vmax.xlane.f32.xlu0 %v5853_v4 }
0x1129   :  { %v5976_v41 = vpop.f32.mrb[152].mxu1 }
0x112a   :  { %v11790_v6 = vadd.f32 %v11463_v10, %v5976_v41  ;;  %v9103_v31 = vpop.f32.mrb[153].mxu1  ;;  %v11829_v41 = vpop.permute.xlu1 %4809 }
0x112b   :  { %v5979_v24 = vpop.f32.mrb[154].mxu1 }
0x112c   :  { %v11793_v37 = vadd.f32 %v11469_v30, %v5979_v24  ;;  %v9104_v61 = vpop.f32.mrb[155].mxu1  ;;  %v5983_v43 = vsel %vm731_vm10, %v11790_v6, -inf }
0x112d   :  { %5984 = vmax.xlane.f32.xlu1 %v5983_v43 }
0x112e   :  { %v5986_v62 = vsel %vm735_vm11, %v11793_v37, -inf }
0x112f   :  { %5987 = vmax.xlane.f32.xlu0 %v5986_v62 }
0x1131   :  { %v6109_v22 = vpop.f32.mrb[156].mxu1 }
0x1132   :  { %v11800_v35 = vadd.f32 %v11463_v10, %v6109_v22  ;;  %v9115_v13 = vpop.f32.mrb[157].mxu1 }
0x1133   :  { %v6112_v20 = vpop.f32.mrb[158].mxu1 }
0x1134   :  { %v11803_v9 = vadd.f32 %v11469_v30, %v6112_v20  ;;  %v9116_v59 = vpop.f32.mrb[159].mxu1  ;;  %v6116_v15 = vsel %vm731_vm10, %v11800_v35, -inf  ;;  %v11839_v20 = vpop.permute.xlu1 %5075 }
0x1135   :  { %6117 = vmax.xlane.f32.xlu1 %v6116_v15  ;;  %v11843_v15 = vpop.permute.xlu0 %4942 }
0x1136   :  { %v6119_v51 = vsel %vm735_vm11, %v11803_v9, -inf }
0x1137   :  { %6120 = vmax.xlane.f32.xlu0 %v6119_v51 }
0x1139   :  { %v6242_v55 = vpop.f32.mrb[160].mxu1 }
0x113a   :  { %v11810_v40 = vadd.f32 %v11463_v10, %v6242_v55  ;;  %v9127_v0 = vpop.f32.mrb[161].mxu1 }
0x113b   :  { %v6245_v5 = vpop.f32.mrb[162].mxu1 }
0x113c   :  { %v11813_v63 = vadd.f32 %v11469_v30, %v6245_v5  ;;  %v9128_v58 = vpop.f32.mrb[163].mxu1  ;;  %v6249_v19 = vsel %vm731_vm10, %v11810_v40, -inf }
0x113d   :  { %6250 = vmax.xlane.f32.xlu1 %v6249_v19  ;;  %v11848_v58 = vpop.permute.xlu1 %5341 }
0x113e   :  { %v6252_v11 = vsel %vm735_vm11, %v11813_v63, -inf }
0x113f   :  { %6253 = vmax.xlane.f32.xlu0 %v6252_v11 }
0x1141   :  { %v6375_v53 = vpop.f32.mrb[164].mxu1 }
0x1142   :  { %v11820_v32 = vadd.f32 %v11463_v10, %v6375_v53  ;;  %v9139_v18 = vpop.f32.mrb[165].mxu1 }
0x1143   :  { %v6378_v12 = vpop.f32.mrb[166].mxu1  ;;  %v11855_v18 = vpop.permute.xlu0 %5208 }
0x1144   :  { %v11823_v27 = vadd.f32 %v11469_v30, %v6378_v12  ;;  %v9140_v29 = vpop.f32.mrb[167].mxu1  ;;  %v6382_v28 = vsel %vm731_vm10, %v11820_v32, -inf }
0x1145   :  { %6383 = vmax.xlane.f32.xlu1 %v6382_v28  ;;  %v11859_v28 = vpop.permute.xlu1 %5607 }
0x1146   :  { %v6385_v4 = vsel %vm735_vm11, %v11823_v27, -inf }
0x1147   :  { %6386 = vmax.xlane.f32.xlu0 %v6385_v4 }
0x1149   :  { %v6508_v31 = vpop.f32.mrb[168].mxu1 }
0x114a   :  { %v11832_v24 = vadd.f32 %v11463_v10, %v6508_v31  ;;  %v9151_v61 = vpop.f32.mrb[169].mxu1 }
0x114b   :  { %v6511_v43 = vpop.f32.mrb[170].mxu1 }
0x114c   :  { %v11835_v62 = vadd.f32 %v11469_v30, %v6511_v43  ;;  %v9152_v22 = vpop.f32.mrb[171].mxu1  ;;  %v6515_v13 = vsel %vm731_vm10, %v11832_v24, -inf  ;;  %v11864_v43 = vpop.permute.xlu0 %5474 }
0x114d   :  { %6516 = vmax.xlane.f32.xlu1 %v6515_v13 }
0x114e   :  { %v6518_v59 = vsel %vm735_vm11, %v11835_v62, -inf }
0x114f   :  { %6519 = vmax.xlane.f32.xlu0 %v6518_v59 }
0x1151   :  { %v6641_v51 = vpop.f32.mrb[172].mxu1 }
0x1152   :  { %v11846_v55 = vadd.f32 %v11463_v10, %v6641_v51  ;;  %v9163_v0 = vpop.f32.mrb[173].mxu1  ;;  %v11871_v51 = vpop.permute.xlu1 %5873 }
0x1153   :  { %v6644_v5 = vpop.f32.mrb[174].mxu1  ;;  %12838 = vst [vmem:[#allocation10_spill] sm:$0xff] %v11871_v51 }
0x1154   :  { %v11851_v19 = vadd.f32 %v11469_v30, %v6644_v5  ;;  %v9164_v11 = vpop.f32.mrb[175].mxu1  ;;  %v6648_v53 = vsel %vm731_vm10, %v11846_v55, -inf }
0x1155   :  { %6649 = vmax.xlane.f32.xlu0 %v6648_v53  ;;  %v11875_v11 = vpop.permute.xlu0 %5740 }
0x1156   :  { %v6651_v12 = vsel %vm735_vm11, %v11851_v19, -inf  ;;  %12839 = vst [vmem:[#allocation9_spill] sm:$0xff] %v11875_v11 }
0x1159   :  { %6652 = vmax.xlane.f32.xlu0 %v6651_v12  ;;  %v6774_v29 = vpop.f32.mrb[176].mxu1  ;;  %v11887_v44 = vpop.permute.xlu0 %6006 }
0x115a   :  { %v11862_v4 = vadd.f32 %v11463_v10, %v6774_v29  ;;  %v9175_v31 = vpop.f32.mrb[177].mxu1  ;;  %12841 = vst [vmem:[#allocation11_spill] sm:$0xff] %v11887_v44 }
0x115b   :  { %v6777_v61 = vpop.f32.mrb[178].mxu1 }
0x115c   :  { %v11867_v22 = vadd.f32 %v11469_v30, %v6777_v61  ;;  %v9176_v13 = vpop.f32.mrb[179].mxu1  ;;  %v6781_v59 = vsel %vm731_vm10, %v11862_v4, -inf }
0x115d   :  { %6782 = vmax.xlane.f32.xlu0 %v6781_v59  ;;  %v11885_v59 = vpop.permute.xlu1 %6139 }
0x115e   :  { %v6784_v0 = vsel %vm735_vm11, %v11867_v22, -inf  ;;  %12840 = vst [vmem:[#allocation12_spill] sm:$0xff] %v11885_v59 }
0x1161   :  { %6785 = vmax.xlane.f32.xlu0 %v6784_v0  ;;  %v6907_v5 = vpop.f32.mrb[180].mxu1 }
0x1162   :  { %v11878_v53 = vadd.f32 %v11463_v10, %v6907_v5  ;;  %v9187_v12 = vpop.f32.mrb[181].mxu1 }
0x1163   :  { %v6910_v29 = vpop.f32.mrb[182].mxu1 }
0x1164   :  { %v11881_v31 = vadd.f32 %v11469_v30, %v6910_v29  ;;  %v9188_v61 = vpop.f32.mrb[183].mxu1  ;;  %v6914_v13 = vsel %vm731_vm10, %v11878_v53, -inf }
0x1165   :  { %6915 = vmax.xlane.f32.xlu1 %v6914_v13 }
0x1166   :  { %v6917_v0 = vsel %vm735_vm11, %v11881_v31, -inf }
0x1169   :  { %6918 = vmax.xlane.f32.xlu1 %v6917_v0  ;;  %v7040_v5 = vpop.f32.mrb[184].mxu1 }
0x116a   :  { %v11892_v12 = vadd.f32 %v11463_v10, %v7040_v5  ;;  %v4654_v23 = vpop.xlane.xlu1 %4653  ;;  %v9199_v29 = vpop.f32.mrb[185].mxu1 }
0x116b   :  { %v4658_v61 = vsub.f32 %v11690_v16, %v4654_v23  ;;  %v7043_v45 = vpop.f32.mrb[186].mxu1 }
0x116c   :  { %v11896_v8 = vadd.f32 %v11469_v30, %v7043_v45  ;;  %v4657_v13 = vpop.xlane.xlu0 %4656  ;;  %v9200_v17 = vpop.f32.mrb[187].mxu1  ;;  %v7047_v48 = vsel %vm731_vm10, %v11892_v12, -inf }
0x116d   :  { %v4660_v47 = vmul.f32 1.442695, %v4658_v61  ;;  %v4659_v0 = vsub.f32 %v11693_v56, %v4657_v13  ;;  %7048 = vmax.xlane.f32.xlu0 %v7047_v48 }
0x116e   :  { %v7050_v5 = vsel %vm735_vm11, %v11896_v8, -inf }
0x116f   :  { %9626 = vpow2.f32 %v4660_v47  ;;  %v4662_v10 = vmul.f32 1.442695, %v4659_v0 }
0x1171   :  { %9628 = vpow2.f32 %v4662_v10  ;;  %7051 = vmax.xlane.f32.xlu0 %v7050_v5 }
0x1172   :  { %v4788_v23 = vpop.xlane.xlu0 %4787 }
0x1173   :  { %v4792_v45 = vsub.f32 %v11700_v57, %v4788_v23 }
0x1175   :  { %v4794_v30 = vmul.f32 1.442695, %v4792_v45 }
0x1176   :  { %v4791_v16 = vpop.xlane.xlu0 %4790 }
0x1177   :  { %9630 = vpow2.f32 %v4794_v30  ;;  %v4793_v17 = vsub.f32 %v11703_v46, %v4791_v16 }
0x1179   :  { %v11905_v29 = vpop.eup %9626  ;;  %v4796_v61 = vmul.f32 1.442695, %v4793_v17 }
0x117a   :  { %v4921_v56 = vpop.xlane.xlu1 %4920  ;;  %v4664_v48 = vsel %vm731_vm10, %v11905_v29, 0.0 }
0x117b   :  { %v11909_v47 = vpop.eup %9628  ;;  %9632 = vpow2.f32 %v4796_v61  ;;  %v4925_v13 = vsub.f32 %v11710_v3, %v4921_v56  ;;  %4665 = vadd.xlane.f32.xlu1 %v4664_v48 }
0x117c   :  { %v4924_v0 = vpop.xlane.xlu0 %4923  ;;  %v4667_v57 = vsel %vm735_vm11, %v11909_v47, 0.0 }
0x117d   :  { %v4927_v10 = vmul.f32 1.442695, %v4925_v13  ;;  %v4926_v46 = vsub.f32 %v11713_v39, %v4924_v0  ;;  %4668 = vadd.xlane.f32.xlu0 %v4667_v57 }
0x117f   :  { %9634 = vpow2.f32 %v4927_v10  ;;  %v4929_v5 = vmul.f32 1.442695, %v4926_v46 }
0x1181   :  { %v11915_v23 = vpop.eup %9630  ;;  %9636 = vpow2.f32 %v4929_v5 }
0x1182   :  { %v5054_v45 = vpop.xlane.xlu1 %5053  ;;  %v4798_v30 = vsel %vm731_vm10, %v11915_v23, 0.0 }
0x1183   :  { %v5058_v3 = vsub.f32 %v11720_v14, %v5054_v45  ;;  %4799 = vadd.xlane.f32.xlu1 %v4798_v30 }
0x1184   :  { %v5057_v16 = vpop.xlane.xlu0 %5056 }
0x1185   :  { %v11920_v17 = vpop.eup %9632  ;;  %v5060_v61 = vmul.f32 1.442695, %v5058_v3  ;;  %v5059_v56 = vsub.f32 %v11723_v49, %v5057_v16 }
0x1186   :  { %v4801_v39 = vsel %vm735_vm11, %v11920_v17, 0.0 }
0x1187   :  { %9638 = vpow2.f32 %v5060_v61  ;;  %v5062_v48 = vmul.f32 1.442695, %v5059_v56  ;;  %4802 = vadd.xlane.f32.xlu0 %v4801_v39 }
0x1189   :  { %v11925_v13 = vpop.eup %9634  ;;  %9640 = vpow2.f32 %v5062_v48 }
0x118a   :  { %v5187_v0 = vpop.xlane.xlu1 %5186  ;;  %v4931_v14 = vsel %vm731_vm10, %v11925_v13, 0.0 }
0x118b   :  { %v11929_v57 = vpop.eup %9636  ;;  %v5191_v10 = vsub.f32 %v11730_v2, %v5187_v0  ;;  %4932 = vadd.xlane.f32.xlu1 %v4931_v14 }
0x118c   :  { %v5190_v46 = vpop.xlane.xlu0 %5189  ;;  %v4934_v49 = vsel %vm735_vm11, %v11929_v57, 0.0 }
0x118d   :  { %v5193_v5 = vmul.f32 1.442695, %v5191_v10  ;;  %v5192_v45 = vsub.f32 %v11733_v52, %v5190_v46  ;;  %4935 = vadd.xlane.f32.xlu0 %v4934_v49 }
0x118f   :  { %9642 = vpow2.f32 %v5193_v5  ;;  %v5195_v30 = vmul.f32 1.442695, %v5192_v45 }
0x1191   :  { %v11935_v3 = vpop.eup %9638  ;;  %9644 = vpow2.f32 %v5195_v30 }
0x1192   :  { %v5064_v16 = vsel %vm731_vm10, %v11935_v3, 0.0  ;;  %v5320_v0 = vpop.xlane.xlu1 %5319 }
0x1193   :  { %v11939_v61 = vpop.eup %9640  ;;  %5065 = vadd.xlane.f32.xlu1 %v5064_v16  ;;  %v5324_v59 = vsub.f32 %v11740_v42, %v5320_v0 }
0x1194   :  { %v5067_v2 = vsel %vm735_vm11, %v11939_v61, 0.0  ;;  %v5323_v14 = vpop.xlane.xlu0 %5322 }
0x1195   :  { %5068 = vadd.xlane.f32.xlu0 %v5067_v2  ;;  %v5325_v10 = vsub.f32 %v11743_v33, %v5323_v14  ;;  %v5326_v11 = vmul.f32 1.442695, %v5324_v59 }
0x1197   :  { %v5328_v5 = vmul.f32 1.442695, %v5325_v10 }
0x1199   :  { %v11943_v56 = vpop.eup %9642  ;;  %9646 = vpow2.f32 %v5328_v5 }
0x119a   :  { %v5197_v52 = vsel %vm731_vm10, %v11943_v56, 0.0  ;;  %v5453_v46 = vpop.xlane.xlu1 %5452 }
0x119b   :  { %v11947_v39 = vpop.eup %9644  ;;  %5198 = vadd.xlane.f32.xlu0 %v5197_v52  ;;  %v5457_v10 = vsub.f32 %v11750_v54, %v5453_v46 }
0x119c   :  { %v5200_v48 = vsel %vm735_vm11, %v11947_v39, 0.0  ;;  %v5456_v49 = vpop.xlane.xlu0 %5455 }
0x119d   :  { %v5458_v45 = vsub.f32 %v11753_v50, %v5456_v49 }
0x119f   :  { %5201 = vadd.xlane.f32.xlu0 %v5200_v48  ;;  %v5461_v2 = vmul.f32 1.442695, %v5458_v45 }
0x11a1   :  { %9648 = vpow2.f32 %v5461_v2 }
0x11a2   :  { %v5586_v30 = vpop.xlane.xlu1 %5585 }
0x11a3   :  { %v5590_v42 = vsub.f32 %v11760_v26, %v5586_v30 }
0x11a4   :  { %6405 = vrot.lane.b32.xlu1 %v11455_v60, %s12802_s1  ;;  %v5589_v16 = vpop.xlane.xlu0 %5588 }
0x11a5   :  { %v5591_v52 = vsub.f32 %v11763_v21, %v5589_v16  ;;  %v11962_v21 = vpop.eup %9646  ;;  %v5459_v16 = vmul.f32 1.442695, %v5457_v10 }
0x11a6   :  { %v5333_v54 = vsel %vm735_vm11, %v11962_v21, 0.0 }
0x11a7   :  { %v5594_v33 = vmul.f32 1.442695, %v5591_v52 }
0x11a9   :  { %9650 = vpow2.f32 %v5594_v33 }
0x11aa   :  { %v5719_v48 = vpop.xlane.xlu1 %5718  ;;  %9652 = vpow2.f32 %v5326_v11 }
0x11ab   :  { %v11968_v59 = vpop.eup %9648 }
0x11ac   :  { %v5722_v36 = vpop.xlane.xlu0 %5721  ;;  %v5466_v30 = vsel %vm735_vm11, %v11968_v59, 0.0 }
0x11ad   :  { %v5724_v14 = vsub.f32 %v11773_v34, %v5722_v36 }
0x11af   :  { %v5727_v50 = vmul.f32 1.442695, %v5724_v14 }
0x11b1   :  { %9654 = vpow2.f32 %v5727_v50 }
0x11b2   :  { %v5852_v44 = vpop.xlane.xlu1 %5851  ;;  %9656 = vpow2.f32 %v5459_v16 }
0x11b3   :  { %v5856_v49 = vsub.f32 %v11780_v25, %v5852_v44  ;;  %v5592_v44 = vmul.f32 1.442695, %v5590_v42  ;;  %v5723_v25 = vsub.f32 %v11770_v7, %v5719_v48 }
0x11b4   :  { %v5855_v51 = vpop.xlane.xlu0 %5854 }
0x11b5   :  { %6272 = vrot.lane.b32.xlu0 %v11455_v60, %s12801_s24  ;;  %v5858_v0 = vmul.f32 1.442695, %v5856_v49  ;;  %v5725_v52 = vmul.f32 1.442695, %v5723_v25  ;;  %v5857_v33 = vsub.f32 %v11783_v1, %v5855_v51 }
0x11b7   :  { %9658 = vpow2.f32 %v5858_v0  ;;  %v5860_v49 = vmul.f32 1.442695, %v5857_v33 }
0x11b8   :  { %9660 = vpow2.f32 %v5592_v44 }
0x11ba   :  { %v5985_v5 = vpop.xlane.xlu1 %5984 }
0x11bc   :  { %v5988_v45 = vpop.xlane.xlu0 %5987 }
0x11bd   :  { %v5990_v36 = vsub.f32 %v11793_v37, %v5988_v45  ;;  %v11974_v37 = vpop.eup %9650  ;;  %v5989_v45 = vsub.f32 %v11790_v6, %v5985_v5 }
0x11be   :  { %v11978_v48 = vpop.eup %9652 }
0x11bf   :  { %v5993_v11 = vmul.f32 1.442695, %v5990_v36  ;;  %v11982_v50 = vpop.eup %9654  ;;  %v5330_v0 = vsel %vm731_vm10, %v11978_v48, 0.0 }
0x11c0   :  { %v11985_v51 = vpop.eup %9656 }
0x11c1   :  { %9662 = vpow2.f32 %v5993_v11  ;;  %v11992_v36 = vpop.eup %9658  ;;  %v5463_v44 = vsel %vm731_vm10, %v11985_v51, 0.0 }
0x11c2   :  { %v6118_v34 = vpop.xlane.xlu1 %6117  ;;  %9664 = vpow2.f32 %v5725_v52 }
0x11c3   :  { %v6122_v26 = vsub.f32 %v11800_v35, %v6118_v34  ;;  %v5599_v35 = vsel %vm735_vm11, %v11974_v37, 0.0  ;;  %v5991_v34 = vmul.f32 1.442695, %v5989_v45 }
0x11c4   :  { %v6121_v46 = vpop.xlane.xlu0 %6120 }
0x11c5   :  { %v6124_v14 = vmul.f32 1.442695, %v6122_v26  ;;  %v6123_v6 = vsub.f32 %v11803_v9, %v6121_v46 }
0x11c7   :  { %9666 = vpow2.f32 %v6124_v14  ;;  %v6126_v26 = vmul.f32 1.442695, %v6123_v6 }
0x11c8   :  { %5334 = vadd.xlane.f32.xlu1 %v5333_v54  ;;  %9668 = vpow2.f32 %v5860_v49  ;;  %v11995_v54 = vpop.eup %9660 }
0x11ca   :  { %v6251_v10 = vpop.xlane.xlu1 %6250 }
0x11cb   :  { %v12001_v25 = vpop.eup %9662 }
0x11cc   :  { %v6254_v2 = vpop.xlane.xlu0 %6253  ;;  %5467 = vadd.xlane.f32.xlu1 %v5466_v30  ;;  %v6255_v30 = vsub.f32 %v11810_v40, %v6251_v10  ;;  %v12004_v9 = vpop.eup %9664  ;;  %v5998_v46 = vsel %vm735_vm11, %v12001_v25, 0.0 }
0x11cd   :  { %v6256_v7 = vsub.f32 %v11813_v63, %v6254_v2  ;;  %v5732_v63 = vsel %vm735_vm11, %v11982_v50, 0.0  ;;  %v5596_v2 = vsel %vm731_vm10, %v11995_v54, 0.0 }
0x11cf   :  { %v6259_v16 = vmul.f32 1.442695, %v6256_v7  ;;  %v6257_v7 = vmul.f32 1.442695, %v6255_v30 }
0x11d0   :  { %5600 = vadd.xlane.f32.xlu1 %v5599_v35 }
0x11d1   :  { %9670 = vpow2.f32 %v6259_v16  ;;  %v12010_v52 = vpop.eup %9666  ;;  %v5729_v16 = vsel %vm731_vm10, %v12004_v9, 0.0 }
0x11d2   :  { %v6384_v1 = vpop.xlane.xlu1 %6383  ;;  %9672 = vpow2.f32 %v5991_v34  ;;  %v12014_v10 = vpop.eup %9668  ;;  %v6128_v45 = vsel %vm731_vm10, %v12010_v52, 0.0 }
0x11d3   :  { %v6388_v42 = vsub.f32 %v11820_v32, %v6384_v1  ;;  %v5862_v32 = vsel %vm731_vm10, %v11992_v36, 0.0  ;;  %v5865_v6 = vsel %vm735_vm11, %v12014_v10, 0.0 }
0x11d4   :  { %5733 = vadd.xlane.f32.xlu1 %v5732_v63  ;;  %5331 = vadd.xlane.f32.xlu0 %v5330_v0  ;;  %v6387_v11 = vpop.xlane.xlu0 %6386 }
0x11d5   :  { %v6390_v5 = vmul.f32 1.442695, %v6388_v42  ;;  %v6389_v40 = vsub.f32 %v11823_v27, %v6387_v11 }
0x11d7   :  { %9674 = vpow2.f32 %v6390_v5 }
0x11d8   :  { %5863 = vadd.xlane.f32.xlu1 %v5862_v32  ;;  %5464 = vadd.xlane.f32.xlu0 %v5463_v44  ;;  %9676 = vpow2.f32 %v6126_v26 }
0x11da   :  { %v6517_v35 = vpop.xlane.xlu1 %6516 }
0x11db   :  { %v12020_v1 = vpop.eup %9670  ;;  %v6521_v42 = vsub.f32 %v11832_v24, %v6517_v35 }
0x11dc   :  { %v6520_v33 = vpop.xlane.xlu0 %6519  ;;  %5999 = vadd.xlane.f32.xlu1 %v5998_v46  ;;  %5597 = vadd.xlane.f32.xlu0 %v5596_v2  ;;  %v12023_v63 = vpop.eup %9672  ;;  %v6264_v34 = vsel %vm735_vm11, %v12020_v1, 0.0 }
0x11dd   :  { %v6522_v14 = vsub.f32 %v11835_v62, %v6520_v33  ;;  %v6392_v62 = vmul.f32 1.442695, %v6389_v40  ;;  %v6523_v44 = vmul.f32 1.442695, %v6521_v42  ;;  %v5995_v26 = vsel %vm731_vm10, %v12023_v63, 0.0 }
0x11df   :  { %v6525_v49 = vmul.f32 1.442695, %v6522_v14 }
0x11e0   :  { %6129 = vadd.xlane.f32.xlu1 %v6128_v45  ;;  %5730 = vadd.xlane.f32.xlu0 %v5729_v16 }
0x11e1   :  { %9678 = vpow2.f32 %v6525_v49  ;;  %v12030_v5 = vpop.eup %9674 }
0x11e2   :  { %9680 = vpow2.f32 %v6257_v7  ;;  %v6650_v27 = vpop.xlane.xlu0 %6649  ;;  %v12037_v30 = vpop.eup %9676 }
0x11e3   :  { %v6654_v0 = vsub.f32 %v11846_v55, %v6650_v27  ;;  %9682 = vpow2.f32 %v6392_v62  ;;  %v6394_v55 = vsel %vm731_vm10, %v12030_v5, 0.0 }
0x11e4   :  { %6265 = vadd.xlane.f32.xlu1 %v6264_v34  ;;  %5866 = vadd.xlane.f32.xlu0 %v5865_v6 }
0x11e5   :  { %v6656_v32 = vmul.f32 1.442695, %v6654_v0 }
0x11e6   :  { %v6653_v11 = vpop.xlane.xlu0 %6652 }
0x11e7   :  { %9684 = vpow2.f32 %v6656_v32  ;;  %v6655_v24 = vsub.f32 %v11851_v19, %v6653_v11  ;;  %v6131_v19 = vsel %vm735_vm11, %v12037_v30, 0.0 }
0x11e8   :  { %6395 = vadd.xlane.f32.xlu1 %v6394_v55  ;;  %5996 = vadd.xlane.f32.xlu0 %v5995_v26  ;;  %9686 = vpow2.f32 %v6523_v44 }
0x11e9   :  { %v6658_v46 = vmul.f32 1.442695, %v6655_v24 }
0x11ea   :  { %v6783_v2 = vpop.xlane.xlu0 %6782 }
0x11eb   :  { %v12039_v33 = vpop.eup %9678  ;;  %v6787_v14 = vsub.f32 %v11862_v4, %v6783_v2  ;;  %9688 = vpow2.f32 %v6658_v46 }
0x11ec   :  { %v12044_v7 = vpop.eup %9680  ;;  %6132 = vadd.xlane.f32.xlu0 %v6131_v19  ;;  %v6530_v40 = vsel %vm735_vm11, %v12039_v33, 0.0 }
0x11ed   :  { %6531 = vadd.xlane.f32.xlu1 %v6530_v40  ;;  %v6789_v35 = vmul.f32 1.442695, %v6787_v14  ;;  %v6261_v49 = vsel %vm731_vm10, %v12044_v7, 0.0  ;;  %v12050_v45 = vpop.eup %9682 }
0x11ee   :  { %v6397_v62 = vsel %vm735_vm11, %v12050_v45, 0.0  ;;  %v6786_v32 = vpop.xlane.xlu0 %6785 }
0x11ef   :  { %9690 = vpow2.f32 %v6789_v35 }
0x11f0   :  { %6262 = vadd.xlane.f32.xlu0 %v6261_v49  ;;  %v6788_v49 = vsub.f32 %v11867_v22, %v6786_v32 }
0x11f1   :  { %v12052_v16 = vpop.eup %9684 }
0x11f2   :  { %v6660_v4 = vsel %vm731_vm10, %v12052_v16, 0.0  ;;  %v12058_v42 = vpop.eup %9686  ;;  %v6916_v44 = vpop.xlane.xlu1 %6915 }
0x11f3   :  { %6661 = vadd.xlane.f32.xlu1 %v6660_v4  ;;  %v6527_v27 = vsel %vm731_vm10, %v12058_v42, 0.0 }
0x11f4   :  { %6398 = vadd.xlane.f32.xlu0 %v6397_v62 }
0x11f5   :  { %v12062_v0 = vpop.eup %9688 }
0x11f6   :  { %v6663_v34 = vsel %vm735_vm11, %v12062_v0, 0.0  ;;  %v6919_v55 = vpop.xlane.xlu1 %6918 }
0x11f8   :  { %6528 = vadd.xlane.f32.xlu0 %v6527_v27 }
0x11f9   :  { %v12066_v6 = vpop.eup %9690 }
0x11fa   :  { %v6793_v11 = vsel %vm731_vm10, %v12066_v6, 0.0  ;;  %v7049_v24 = vpop.xlane.xlu0 %7048 }
0x11fc   :  { %6664 = vadd.xlane.f32.xlu0 %v6663_v34 }
0x11fe   :  { %v7052_v26 = vpop.xlane.xlu0 %7051 }
0x1200   :  { %6794 = vadd.xlane.f32.xlu0 %v6793_v11  ;;  %v6920_v11 = vsub.f32 %v11878_v53, %v6916_v44  ;;  %v7054_v53 = vsub.f32 %v11896_v8, %v7052_v26  ;;  %v4948_v8 = vsel %vm359_vm4, %v11843_v15, 0 }
0x1204   :  { %6671 = vrot.lane.b32.xlu1 %v11455_v60, %s12834_s3 }
0x1208   :  { %6804 = vrot.lane.b32.xlu1 %v11455_v60, %s12835_s25  ;;  %v4666_v46 = vpop.xlane.xlu1 %4665 }
0x1209   :  { %9692 = vrcp.f32 %v4666_v46  ;;  %v4815_v46 = vsel %vm359_vm4, %v11829_v41, 0  ;;  %v6921_v41 = vsub.f32 %v11881_v31, %v6919_v55 }
0x120a   :  { %v4669_v2 = vpop.xlane.xlu0 %4668 }
0x120b   :  { %9694 = vrcp.f32 %v4669_v2  ;;  %v6791_v2 = vmul.f32 1.442695, %v6788_v49 }
0x1210   :  { %v4800_v14 = vpop.xlane.xlu1 %4799 }
0x1211   :  { %9696 = vrcp.f32 %v4800_v14 }
0x1213   :  { %v9693_v19 = vpop.eup %9692 }
0x1214   :  { %v4803_v40 = vpop.xlane.xlu0 %4802  ;;  %v4672_v4 = vmul.f32 %v9693_v19, %v11905_v29  ;;  %v6922_v29 = vmul.f32 1.442695, %v6920_v11 }
0x1215   :  { %v9695_v35 = vpop.eup %9694  ;;  %9698 = vrcp.f32 %v4803_v40  ;;  %v7053_v40 = vsub.f32 %v11892_v12, %v7049_v24 }
0x1216   :  { %v4673_v62 = vmul.f32 %v9695_v35, %v11909_v47  ;;  %6538 = vrot.lane.b32.xlu0 %v11455_v60, %s12804_s2  ;;  %v7057_v35 = vmul.f32 1.442695, %v7054_v53 }
0x1218   :  { %v4933_v27 = vpop.xlane.xlu1 %4932  ;;  %v4674_v34 = vpack.c.bf16 %v4673_v62, %v4672_v4  ;;  %v6924_v62 = vmul.f32 1.442695, %v6921_v41 }
0x1219   :  { %9700 = vrcp.f32 %v4933_v27 }
0x121a   :  { %8988 = vmatmul.mubr.msk.bf16.vlgmr.msra.gmra.mrb[108].mxu0 %vm731_vm10, %v4674_v34  ;;  %v4936_v14 = vpop.xlane.xlu0 %4935 }
0x121b   :  { %8998 = vmatpush3.bf16.msra.mxu0 %v4815_v46  ;;  %9702 = vrcp.f32 %v4936_v14  ;;  %8999 = vmatprep.mubr.msk.bf16.mxu0 %vm9809_vm0, %v12803_v38  ;;  %v9697_v22 = vpop.eup %9696 }
0x121c   :  { %9009 = vmatprep.subr.bf16.mxu0 %v12803_v38  ;;  %9704 = vpow2.f32 %v6791_v2  ;;  %v4806_v32 = vmul.f32 %v9697_v22, %v11915_v23  ;;  %v7055_v23 = vmul.f32 1.442695, %v7053_v40 }
0x121d   :  { %9706 = vpow2.f32 %v6922_v29 }
0x121f   :  { %v9699_v47 = vpop.eup %9698 }
0x1220   :  { %v4807_v44 = vmul.f32 %v9699_v47, %v11920_v17  ;;  %v5066_v19 = vpop.xlane.xlu1 %5065 }
0x1221   :  { %9708 = vrcp.f32 %v5066_v19 }
0x1222   :  { %v5069_v49 = vpop.xlane.xlu0 %5068  ;;  %v4808_v4 = vpack.c.bf16 %v4807_v44, %v4806_v32 }
0x1223   :  { %9710 = vrcp.f32 %v5069_v49  ;;  %v9701_v27 = vpop.eup %9700  ;;  %v5347_v49 = vsel %vm359_vm4, %v11848_v58, 0 }
0x1224   :  { %9000 = vmatmul.mubr.msk.bf16.vlgmr.msra.gmra.mrb[112].mxu0 %vm731_vm10, %v4808_v4  ;;  %9712 = vpow2.f32 %v7057_v35  ;;  %v4939_v24 = vmul.f32 %v9701_v27, %v11925_v13 }
0x1225   :  { %v9703_v31 = vpop.eup %9702  ;;  %9010 = vmatpush3.bf16.msra.mxu0 %v4948_v8  ;;  %9011 = vmatprep.mubr.msk.bf16.mxu0 %vm9809_vm0, %v12803_v38  ;;  %9714 = vpow2.f32 %v6924_v62 }
0x1226   :  { %v4940_v12 = vmul.f32 %v9703_v31, %v11929_v57  ;;  %9021 = vmatprep.subr.bf16.mxu0 %v12803_v38  ;;  %v12098_v17 = vpop.eup %9704  ;;  %9716 = vpow2.f32 %v7055_v23  ;;  %v5081_v57 = vsel %vm359_vm4, %v11839_v20, 0 }
0x1227   :  { %v12101_v26 = vpop.eup %9706  ;;  %v6796_v34 = vsel %vm735_vm11, %v12098_v17, 0.0 }
0x1228   :  { %v5199_v55 = vpop.xlane.xlu0 %5198  ;;  %v4941_v15 = vpack.c.bf16 %v4940_v12, %v4939_v24  ;;  %v6926_v14 = vsel %vm731_vm10, %v12101_v26, 0.0 }
0x1229   :  { %9718 = vrcp.f32 %v5199_v55 }
0x122b   :  { %v9709_v11 = vpop.eup %9708 }
0x122c   :  { %6797 = vadd.xlane.f32.xlu1 %v6796_v34  ;;  %9012 = vmatmul.mubr.msk.bf16.vlgmr.msra.gmra.mrb[116].mxu0 %vm731_vm10, %v4941_v15  ;;  %v5202_v46 = vpop.xlane.xlu0 %5201  ;;  %v5072_v20 = vmul.f32 %v9709_v11, %v11935_v3  ;;  %v5480_v34 = vsel %vm359_vm4, %v11864_v43, 0  ;;  %v5613_v43 = vsel %vm359_vm4, %v11859_v28, 0  ;;  %v12842_v28 = vld [vmem:[#allocation9_spill] sm:$0xff] }
0x122d   :  { %v9711_v2 = vpop.eup %9710  ;;  %9022 = vmatpush3.bf16.msra.mxu0 %v5081_v57  ;;  %9720 = vrcp.f32 %v5202_v46  ;;  %9023 = vmatprep.mubr.msk.bf16.mxu0 %vm9809_vm0, %v12803_v38 }
0x122e   :  { %v5073_v13 = vmul.f32 %v9711_v2, %v11939_v61  ;;  %9033 = vmatprep.subr.bf16.mxu0 %v12803_v38  ;;  %v12114_v22 = vpop.eup %9712  ;;  %v5214_v61 = vsel %vm359_vm4, %v11855_v18, 0 }
0x122f   :  { %v12117_v29 = vpop.eup %9714  ;;  %v7062_v47 = vsel %vm735_vm11, %v12114_v22, 0.0 }
0x1230   :  { %6927 = vadd.xlane.f32.xlu1 %v6926_v14  ;;  %v5074_v53 = vpack.c.bf16 %v5073_v13, %v5072_v20  ;;  %v12121_v41 = vpop.eup %9716  ;;  %v6929_v32 = vsel %vm735_vm11, %v12117_v29, 0.0  ;;  %vm12861_vm11 = vcmask 130144  }
0x1231   :  { %v7059_v18 = vsel %vm731_vm10, %v12121_v41, 0.0 }
0x1233   :  { %v9719_v44 = vpop.eup %9718 }
0x1234   :  { %7063 = vadd.xlane.f32.xlu1 %v7062_v47  ;;  %9024 = vmatmul.mubr.msk.bf16.vlgmr.msra.gmra.mrb[120].mxu0 %vm731_vm10, %v5074_v53  ;;  %v5205_v19 = vmul.f32 %v9719_v44, %v11943_v56  ;;  %v12145_v56 = vpop.permute.xlu1 %6405 }
0x1235   :  { %9034 = vmatpush3.bf16.msra.mxu0 %v5214_v61  ;;  %6930 = vadd.xlane.f32.xlu0 %v6929_v32  ;;  %v5746_v32 = vsel %vm359_vm4, %v12842_v28, 0 }
0x1236   :  { %9035 = vmatprep.mubr.msk.bf16.mxu0 %vm9809_vm0, %v12803_v38  ;;  %9045 = vmatprep.subr.bf16.mxu0 %v12803_v38 }
0x1237   :  { %v9721_v3 = vpop.eup %9720 }
0x1238   :  { %v5206_v40 = vmul.f32 %v9721_v3, %v11947_v39  ;;  %v12147_v39 = vpop.permute.xlu0 %6272 }
0x1239   :  { %7060 = vadd.xlane.f32.xlu0 %v7059_v18 }
0x123a   :  { %v5207_v35 = vpack.c.bf16 %v5206_v40, %v5205_v19 }
0x123c   :  { %9036 = vmatmul.mubr.msk.bf16.vlgmr.msra.gmra.mrb[124].mxu0 %vm731_vm10, %v5207_v35  ;;  %v12843_v35 = vld [vmem:[#allocation10_spill] sm:$0xff] }
0x123d   :  { %9046 = vmatpush3.bf16.msra.mxu0 %v5347_v49  ;;  %9047 = vmatprep.mubr.msk.bf16.mxu0 %vm9809_vm0, %v12803_v38  ;;  %v5879_v49 = vsel %vm359_vm4, %v12843_v35, 0 }
0x123e   :  { %9057 = vmatprep.subr.bf16.mxu0 %v12803_v38 }
0x1245   :  { %6937 = vrot.lane.b32.xlu1 %v11455_v60, %s12836_s30 }
0x124f   :  { %7070 = vrot.lane.b32.xlu0 %v11455_v60, %s12837_s8 }
0x1255   :  { %v5335_v4 = vpop.xlane.xlu1 %5334 }
0x1256   :  { %9722 = vrcp.f32 %v5335_v4 }
0x1259   :  { %v5468_v27 = vpop.xlane.xlu1 %5467 }
0x125d   :  { %v5601_v24 = vpop.xlane.xlu1 %5600 }
0x1260   :  { %v9723_v8 = vpop.eup %9722 }
0x1261   :  { %v5332_v58 = vpop.xlane.xlu0 %5331  ;;  %v5339_v12 = vmul.f32 %v9723_v8, %v11962_v21  ;;  %v5734_v46 = vpop.xlane.xlu1 %5733 }
0x1262   :  { %9724 = vrcp.f32 %v5332_v58 }
0x1265   :  { %v5465_v62 = vpop.xlane.xlu0 %5464  ;;  %v5864_v53 = vpop.xlane.xlu1 %5863 }
0x1266   :  { %9726 = vrcp.f32 %v5465_v62 }
0x1267   :  { %9728 = vrcp.f32 %v5468_v27 }
0x1269   :  { %v5598_v31 = vpop.xlane.xlu0 %5597  ;;  %v6000_v19 = vpop.xlane.xlu1 %5999 }
0x126a   :  { %9730 = vrcp.f32 %v5598_v31 }
0x126b   :  { %9732 = vrcp.f32 %v5601_v24 }
0x126c   :  { %v9725_v23 = vpop.eup %9724 }
0x126d   :  { %v5338_v60 = vmul.f32 %v9725_v23, %v11978_v48  ;;  %v5731_v21 = vpop.xlane.xlu0 %5730  ;;  %v6130_v62 = vpop.xlane.xlu1 %6129  ;;  %v12844_v23 = vld [vmem:[#allocation11_spill] sm:$0xff] }
0x126e   :  { %9734 = vrcp.f32 %v5731_v21 }
0x126f   :  { %v5340_v55 = vpack.c.bf16 %v5339_v12, %v5338_v60  ;;  %9736 = vrcp.f32 %v5734_v46  ;;  %v6012_v12 = vsel %vm359_vm4, %v12844_v23, 0 }
0x1270   :  { %v9727_v15 = vpop.eup %9726 }
0x1271   :  { %9048 = vmatmul.mubr.msk.bf16.vlgmr.msra.gmra.mrb[128].mxu0 %vm731_vm10, %v5340_v55  ;;  %v9729_v11 = vpop.eup %9728  ;;  %v5471_v57 = vmul.f32 %v9727_v15, %v11985_v51  ;;  %v5867_v20 = vpop.xlane.xlu0 %5866 }
0x1272   :  { %9058 = vmatpush3.bf16.msra.mxu0 %v5480_v34  ;;  %9059 = vmatprep.mubr.msk.bf16.mxu0 %vm9809_vm0, %v12803_v38  ;;  %v5472_v48 = vmul.f32 %v9729_v11, %v11968_v59  ;;  %9738 = vrcp.f32 %v5867_v20  ;;  %v6266_v60 = vpop.xlane.xlu1 %6265  ;;  %v12845_v11 = vld [vmem:[#allocation12_spill] sm:$0xff] }
0x1273   :  { %9069 = vmatprep.subr.bf16.mxu0 %v12803_v38  ;;  %9740 = vrcp.f32 %v5864_v53 }
0x1274   :  { %v5473_v2 = vpack.c.bf16 %v5472_v48, %v5471_v57  ;;  %v9731_v13 = vpop.eup %9730  ;;  %v6145_v57 = vsel %vm359_vm4, %v12845_v11, 0 }
0x1275   :  { %v9733_v14 = vpop.eup %9732  ;;  %v5604_v51 = vmul.f32 %v9731_v13, %v11995_v54  ;;  %v5997_v3 = vpop.xlane.xlu0 %5996 }
0x1276   :  { %v5605_v59 = vmul.f32 %v9733_v14, %v11974_v37  ;;  %9742 = vrcp.f32 %v5997_v3  ;;  %v6396_v46 = vpop.xlane.xlu1 %6395 }
0x1277   :  { %9744 = vrcp.f32 %v6000_v19 }
0x1278   :  { %v5606_v47 = vpack.c.bf16 %v5605_v59, %v5604_v51  ;;  %v9735_v61 = vpop.eup %9734 }
0x1279   :  { %9060 = vmatmul.mubr.msk.bf16.vlgmr.msra.gmra.mrb[132].mxu0 %vm731_vm10, %v5473_v2  ;;  %v9737_v44 = vpop.eup %9736  ;;  %v5737_v54 = vmul.f32 %v9735_v61, %v12004_v9  ;;  %v6133_v58 = vpop.xlane.xlu0 %6132  ;;  %v6411_v61 = vsel %vm359_vm4, %v12145_v56, 0 }
0x127a   :  { %9070 = vmatpush3.bf16.msra.mxu0 %v5613_v43  ;;  %9071 = vmatprep.mubr.msk.bf16.mxu0 %vm9809_vm0, %v12803_v38  ;;  %v5738_v37 = vmul.f32 %v9737_v44, %v11982_v50  ;;  %9746 = vrcp.f32 %v6133_v58  ;;  %v6278_v43 = vsel %vm359_vm4, %v12147_v39, 0 }
0x127b   :  { %9081 = vmatprep.subr.bf16.mxu0 %v12803_v38  ;;  %9748 = vrcp.f32 %v6130_v62 }
0x127c   :  { %v5739_v40 = vpack.c.bf16 %v5738_v37, %v5737_v54  ;;  %v9739_v18 = vpop.eup %9738 }
0x127d   :  { %v9741_v4 = vpop.eup %9740  ;;  %v5871_v9 = vmul.f32 %v9739_v18, %v12014_v10  ;;  %v6263_v31 = vpop.xlane.xlu0 %6262 }
0x127e   :  { %v5870_v50 = vmul.f32 %v9741_v4, %v11992_v36  ;;  %9750 = vrcp.f32 %v6263_v31 }
0x127f   :  { %9752 = vrcp.f32 %v6266_v60 }
0x1280   :  { %v5872_v27 = vpack.c.bf16 %v5871_v9, %v5870_v50  ;;  %v9743_v8 = vpop.eup %9742 }
0x1281   :  { %9072 = vmatmul.mubr.msk.bf16.vlgmr.msra.gmra.mrb[136].mxu0 %vm731_vm10, %v5606_v47  ;;  %v9745_v24 = vpop.eup %9744  ;;  %v6003_v10 = vmul.f32 %v9743_v8, %v12023_v63  ;;  %v6399_v55 = vpop.xlane.xlu0 %6398 }
0x1282   :  { %9082 = vmatpush3.bf16.msra.mxu0 %v5746_v32  ;;  %9083 = vmatprep.mubr.msk.bf16.mxu0 %vm9809_vm0, %v12803_v38  ;;  %v6004_v36 = vmul.f32 %v9745_v24, %v12001_v25  ;;  %9754 = vrcp.f32 %v6399_v55 }
0x1283   :  { %9093 = vmatprep.subr.bf16.mxu0 %v12803_v38  ;;  %9756 = vrcp.f32 %v6396_v46 }
0x1284   :  { %v6005_v15 = vpack.c.bf16 %v6004_v36, %v6003_v10  ;;  %v9747_v34 = vpop.eup %9746 }
0x1285   :  { %v9749_v21 = vpop.eup %9748  ;;  %v6137_v63 = vmul.f32 %v9747_v34, %v12037_v30  ;;  %v6529_v25 = vpop.xlane.xlu0 %6528 }
0x1286   :  { %v6136_v48 = vmul.f32 %v9749_v21, %v12010_v52  ;;  %v6532_v52 = vpop.xlane.xlu1 %6531  ;;  %9758 = vrcp.f32 %v6529_v25 }
0x1287   :  { %9760 = vrcp.f32 %v6532_v52 }
0x1288   :  { %v6138_v2 = vpack.c.bf16 %v6137_v63, %v6136_v48  ;;  %v9751_v13 = vpop.eup %9750 }
0x1289   :  { %9084 = vmatmul.mubr.msk.bf16.vlgmr.msra.gmra.mrb[140].mxu0 %vm731_vm10, %v5739_v40  ;;  %v9753_v14 = vpop.eup %9752  ;;  %v6665_v51 = vpop.xlane.xlu0 %6664  ;;  %v6269_v30 = vmul.f32 %v9751_v13, %v12044_v7 }
0x128a   :  { %9094 = vmatpush3.bf16.msra.mxu0 %v5879_v49  ;;  %9095 = vmatprep.mubr.msk.bf16.mxu0 %vm9809_vm0, %v12803_v38  ;;  %v6270_v20 = vmul.f32 %v9753_v14, %v12020_v1  ;;  %v6662_v39 = vpop.xlane.xlu1 %6661  ;;  %9762 = vrcp.f32 %v6665_v51 }
0x128b   :  { %9105 = vmatprep.subr.bf16.mxu0 %v12803_v38  ;;  %9764 = vrcp.f32 %v6662_v39 }
0x128c   :  { %v6271_v59 = vpack.c.bf16 %v6270_v20, %v6269_v30  ;;  %v9755_v53 = vpop.eup %9754 }
0x128d   :  { %v6795_v47 = vpop.xlane.xlu0 %6794  ;;  %v9757_v28 = vpop.eup %9756  ;;  %v6403_v7 = vmul.f32 %v9755_v53, %v12050_v45 }
0x128e   :  { %v6402_v1 = vmul.f32 %v9757_v28, %v12030_v5  ;;  %v6672_v32 = vpop.permute.xlu1 %6671  ;;  %9766 = vrcp.f32 %v6795_v47 }
0x128f   :  { %v6677_v49 = vsel %vm359_vm4, %v6672_v32, 0 }
0x1290   :  { %v6404_v54 = vpack.c.bf16 %v6403_v7, %v6402_v1  ;;  %v9759_v3 = vpop.eup %9758 }
0x1291   :  { %9096 = vmatmul.mubr.msk.bf16.vlgmr.msra.gmra.mrb[144].mxu0 %vm731_vm10, %v5872_v27  ;;  %v6539_v44 = vpop.permute.xlu0 %6538  ;;  %v9761_v37 = vpop.eup %9760  ;;  %v6535_v45 = vmul.f32 %v9759_v3, %v12058_v42 }
0x1292   :  { %9106 = vmatpush3.bf16.msra.mxu0 %v6012_v12  ;;  %9107 = vmatprep.mubr.msk.bf16.mxu0 %vm9809_vm0, %v12803_v38  ;;  %v6544_v56 = vsel %vm359_vm4, %v6539_v44, 0  ;;  %v6805_v5 = vpop.permute.xlu1 %6804  ;;  %v6536_v19 = vmul.f32 %v9761_v37, %v12039_v33 }
0x1293   :  { %9117 = vmatprep.subr.bf16.mxu0 %v12803_v38  ;;  %v6810_v27 = vsel %vm359_vm4, %v6805_v5, 0 }
0x1294   :  { %v6537_v40 = vpack.c.bf16 %v6536_v19, %v6535_v45  ;;  %v9763_v18 = vpop.eup %9762 }
0x1295   :  { %v9765_v4 = vpop.eup %9764  ;;  %v6669_v42 = vmul.f32 %v9763_v18, %v12062_v0 }
0x1296   :  { %v6668_v33 = vmul.f32 %v9765_v4, %v12052_v16 }
0x1298   :  { %v6670_v9 = vpack.c.bf16 %v6669_v42, %v6668_v33  ;;  %v9767_v62 = vpop.eup %9766 }
0x1299   :  { %9108 = vmatmul.mubr.msk.bf16.vlgmr.msra.gmra.mrb[148].mxu0 %vm731_vm10, %v6005_v15  ;;  %v6801_v31 = vmul.f32 %v9767_v62, %v12066_v6 }
0x129a   :  { %9118 = vmatpush3.bf16.msra.mxu0 %v6145_v57  ;;  %9119 = vmatprep.mubr.msk.bf16.mxu0 %vm9809_vm0, %v12803_v38 }
0x129b   :  { %9129 = vmatprep.subr.bf16.mxu0 %v12803_v38 }
0x12a1   :  { %9120 = vmatmul.mubr.msk.bf16.vlgmr.msra.gmra.mrb[152].mxu0 %vm731_vm10, %v6138_v2 }
0x12a2   :  { %9130 = vmatpush3.bf16.msra.mxu0 %v6278_v43  ;;  %9131 = vmatprep.mubr.msk.bf16.mxu0 %vm9809_vm0, %v12803_v38 }
0x12a3   :  { %9141 = vmatprep.subr.bf16.mxu0 %v12803_v38 }
0x12a9   :  { %9132 = vmatmul.mubr.msk.bf16.vlgmr.msra.gmra.mrb[156].mxu0 %vm731_vm10, %v6271_v59 }
0x12aa   :  { %9142 = vmatpush3.bf16.msra.mxu0 %v6411_v61  ;;  %9143 = vmatprep.mubr.msk.bf16.mxu0 %vm9809_vm0, %v12803_v38 }
0x12ab   :  { %9153 = vmatprep.subr.bf16.mxu0 %v12803_v38 }
0x12b1   :  { %9144 = vmatmul.mubr.msk.bf16.vlgmr.msra.gmra.mrb[160].mxu0 %vm731_vm10, %v6404_v54 }
0x12b2   :  { %9154 = vmatpush3.bf16.msra.mxu0 %v6544_v56  ;;  %9155 = vmatprep.mubr.msk.bf16.mxu0 %vm9809_vm0, %v12803_v38 }
0x12b3   :  { %9165 = vmatprep.subr.bf16.mxu0 %v12803_v38 }
0x12b9   :  { %v6798_v35 = vpop.xlane.xlu1 %6797  ;;  %9156 = vmatmul.mubr.msk.bf16.vlgmr.msra.gmra.mrb[164].mxu0 %vm731_vm10, %v6537_v40 }
0x12ba   :  { %9768 = vrcp.f32 %v6798_v35  ;;  %9166 = vmatpush3.bf16.msra.mxu0 %v6677_v49  ;;  %9167 = vmatprep.mubr.msk.bf16.mxu0 %vm9809_vm0, %v12803_v38 }
0x12bb   :  { %9177 = vmatprep.subr.bf16.mxu0 %v12803_v38 }
0x12bd   :  { %v6928_v58 = vpop.xlane.xlu1 %6927 }
0x12be   :  { %9770 = vrcp.f32 %v6928_v58 }
0x12c1   :  { %v7064_v50 = vpop.xlane.xlu1 %7063  ;;  %9168 = vmatmul.mubr.msk.bf16.vlgmr.msra.gmra.mrb[168].mxu0 %vm731_vm10, %v6670_v9 }
0x12c2   :  { %v6931_v8 = vpop.xlane.xlu0 %6930  ;;  %9178 = vmatpush3.bf16.msra.mxu0 %v6810_v27  ;;  %9179 = vmatprep.mubr.msk.bf16.mxu0 %vm9809_vm0, %v12803_v38 }
0x12c3   :  { %9772 = vrcp.f32 %v6931_v8  ;;  %9189 = vmatprep.subr.bf16.mxu0 %v12803_v38 }
0x12c4   :  { %v9769_v0 = vpop.eup %9768 }
0x12c5   :  { %v6802_v16 = vmul.f32 %v9769_v0, %v12098_v17  ;;  %v6938_v12 = vpop.permute.xlu1 %6937 }
0x12c6   :  { %v7061_v23 = vpop.xlane.xlu0 %7060  ;;  %v6943_v10 = vsel %vm359_vm4, %v6938_v12, 0 }
0x12c7   :  { %9774 = vrcp.f32 %v7061_v23  ;;  %v6803_v24 = vpack.c.bf16 %v6802_v16, %v6801_v31 }
0x12c8   :  { %9776 = vrcp.f32 %v7064_v50  ;;  %v9771_v36 = vpop.eup %9770 }
0x12c9   :  { %9180 = vmatmul.mubr.msk.bf16.vlgmr.msra.gmra.mrb[172].mxu0 %vm731_vm10, %v6803_v24  ;;  %v6934_v6 = vmul.f32 %v9771_v36, %v12101_v26  ;;  %v12846_v26 = vmov 0  }
0x12ca   :  { %9190 = vmatpush3.bf16.msra.mxu0 %v6943_v10  ;;  %9191 = vmatprep.mubr.msk.bf16.mxu0 %vm9809_vm0, %v12803_v38  ;;  %v7071_v55 = vpop.permute.xlu0 %7070 }
0x12cb   :  { %9201 = vmatprep.subr.bf16.mxu0 %v12803_v38  ;;  %v7076_v11 = vsel %vm359_vm4, %v7071_v55, 0  ;;  %vm12856_vm4 = vcmask 60448  }
0x12cd   :  { %v9773_v60 = vpop.eup %9772 }
0x12ce   :  { %v6935_v17 = vmul.f32 %v9773_v60, %v12117_v29 }
0x12d0   :  { %v6936_v15 = vpack.c.bf16 %v6935_v17, %v6934_v6 }
0x12d1   :  { %v9775_v34 = vpop.eup %9774 }
0x12d2   :  { %9192 = vmatmul.mubr.msk.bf16.vlgmr.msra.gmra.mrb[176].mxu0 %vm731_vm10, %v6936_v15  ;;  %v9777_v57 = vpop.eup %9776  ;;  %v7067_v21 = vmul.f32 %v9775_v34, %v12121_v41 }
0x12d3   :  { %9202 = vmatpush3.bf16.msra.mxu0 %v7076_v11  ;;  %9203 = vmatprep.mubr.msk.bf16.mxu0 %vm9809_vm0, %v12803_v38  ;;  %v7068_v63 = vmul.f32 %v9777_v57, %v12114_v22 }
0x12d5   :  { %v7069_v25 = vpack.c.bf16 %v7068_v63, %v7067_v21 }
0x12da   :  { %9204 = vmatmul.mubr.msk.bf16.vlgmr.msra.gmra.mrb[180].mxu0 %vm731_vm10, %v7069_v25  ;;  %vm12860_vm10 = vcmask 93248  }
0x12db   :  { %7438 = vmatprep.mubr.bf16.mxu0 %v12846_v26 }
0x12ed   :  { %v4718_v29 = vpop.f32.mrb[108].mxu0 }
0x12ee   :  { %4727 = vrot.lane.b32.xlu1 %v4718_v29, %s12847_s28  ;;  %v8989_v48 = vpop.f32.mrb[109].mxu0 }
0x12ef   :  { %v4721_v46 = vpop.f32.mrb[110].mxu0 }
0x12f0   :  { %v8990_v2 = vpop.f32.mrb[111].mxu0 }
0x12f2   :  { %4729 = vrot.lane.b32.xlu1 %v4721_v46, %s12847_s28 }
0x12f7   :  { %v4851_v13 = vpop.f32.mrb[112].mxu0 }
0x12f8   :  { %4860 = vrot.lane.b32.xlu1 %v4851_v13, %s12848_s10  ;;  %v9001_v43 = vpop.f32.mrb[113].mxu0 }
0x12f9   :  { %v4854_v41 = vpop.f32.mrb[114].mxu0 }
0x12fa   :  { %v9002_v14 = vpop.f32.mrb[115].mxu0 }
0x12fc   :  { %4862 = vrot.lane.b32.xlu1 %v4854_v41, %s12848_s10  ;;  %s12894_s10 = sld [smem:[#allocation25_spill]] }
0x12ff   :  { %v4984_v22 = vpop.f32.mrb[116].mxu0 }
0x1300   :  { %4993 = vrot.lane.b32.xlu1 %v4984_v22, %s12849_s29  ;;  %v9013_v51 = vpop.f32.mrb[117].mxu0 }
0x1301   :  { %v4987_v30 = vpop.f32.mrb[118].mxu0 }
0x1302   :  { %v9014_v52 = vpop.f32.mrb[119].mxu0 }
0x1303   :  { %v9377_v52 = vld [vmem:[%s12868_s11 + $0x28] sm:$0xff]  }
0x1304   :  { %4995 = vrot.lane.b32.xlu1 %v4987_v30, %s12849_s29  ;;  %9208 = vmatpush3.bf16.msra.mxu1 %v9377_v52 }
0x1305   :  { %9209 = vmatprep.subr.bf16.mxu1 %v12803_v38 }
0x1307   :  { %v5117_v20 = vpop.f32.mrb[120].mxu0 }
0x1308   :  { %5126 = vrot.lane.b32.xlu0 %v5117_v20, %s12850_s13  ;;  %v9025_v59 = vpop.f32.mrb[121].mxu0  ;;  %v9378_v20 = vld [vmem:[%s12868_s11 + $0x30] sm:$0xff]  }
0x1309   :  { %v5120_v53 = vpop.f32.mrb[122].mxu0  ;;  %9210 = vmatpush3.bf16.msra.mxu1 %v9378_v20 }
0x130a   :  { %5128 = vrot.lane.b32.xlu1 %v5120_v53, %s12850_s13  ;;  %v9026_v39 = vpop.f32.mrb[123].mxu0  ;;  %9211 = vmatprep.subr.bf16.mxu1 %v12803_v38 }
0x130f   :  { %v5250_v47 = vpop.f32.mrb[124].mxu0 }
0x1310   :  { %5259 = vrot.lane.b32.xlu0 %v5250_v47, %s12851_s12  ;;  %v9037_v61 = vpop.f32.mrb[125].mxu0 }
0x1311   :  { %v5253_v28 = vpop.f32.mrb[126].mxu0  ;;  %v9379_v61 = vld [vmem:[%s12868_s11 + $0x38] sm:$0xff]  }
0x1312   :  { %5261 = vrot.lane.b32.xlu1 %v5253_v28, %s12851_s12  ;;  %v9038_v7 = vpop.f32.mrb[127].mxu0  ;;  %9212 = vmatpush3.bf16.msra.mxu1 %v9379_v61  ;;  %v9380_v28 = vld [vmem:[%s12868_s11 + $0x40] sm:$0xff]   ;;  %s12895_s12 = sld [smem:[#allocation26_spill]] }
0x1313   :  { %9213 = vmatprep.subr.bf16.mxu1 %v12803_v38 }
0x1316   :  { %9214 = vmatpush3.bf16.msra.mxu1 %v9380_v28 }
0x1317   :  { %9215 = vmatprep.subr.bf16.mxu1 %v12803_v38 }
0x1344   :  { %v5383_v1 = vpop.f32.mrb[128].mxu0 }
0x1345   :  { %5392 = vrot.lane.b32.xlu0 %v5383_v1, %s12852_s23  ;;  %v9049_v32 = vpop.f32.mrb[129].mxu0 }
0x1346   :  { %v5386_v44 = vpop.f32.mrb[130].mxu0 }
0x1347   :  { %5394 = vrot.lane.b32.xlu1 %v5386_v44, %s12852_s23  ;;  %v9050_v54 = vpop.f32.mrb[131].mxu0  ;;  %v9381_v44 = vld [vmem:[%s12868_s11 + $0x48] sm:$0xff]  }
0x1348   :  { %9216 = vmatpush3.bf16.msra.mxu1 %v9381_v44  ;;  %v9384_v44 = vld [vmem:[%s12622_s18 + $0x7c] ss:$12 sps:$4 sm:$0xff]  }
0x1349   :  { %9221 = vmatprep.subr.bf16.mxu1 %v12803_v38  ;;  %7406 = vmatprep.subr.bf16.mxu0 %v9384_v44 }
0x134c   :  { %v5516_v3 = vpop.f32.mrb[132].mxu0 }
0x134d   :  { %5525 = vrot.lane.b32.xlu0 %v5516_v3, %s12853_s4  ;;  %v9061_v56 = vpop.f32.mrb[133].mxu0 }
0x134e   :  { %v5519_v37 = vpop.f32.mrb[134].mxu0 }
0x134f   :  { %5527 = vrot.lane.b32.xlu1 %v5519_v37, %s12853_s4  ;;  %v9062_v45 = vpop.f32.mrb[135].mxu0  ;;  %s12903_s4 = sld [smem:[#allocation27_spill]] }
0x1354   :  { %v5649_v5 = vpop.f32.mrb[136].mxu0 }
0x1355   :  { %5658 = vrot.lane.b32.xlu0 %v5649_v5, %s12854_s27  ;;  %v9073_v19 = vpop.f32.mrb[137].mxu0 }
0x1356   :  { %v5652_v40 = vpop.f32.mrb[138].mxu0 }
0x1357   :  { %5660 = vrot.lane.b32.xlu1 %v5652_v40, %s12854_s27  ;;  %v9074_v18 = vpop.f32.mrb[139].mxu0 }
0x135c   :  { %v5782_v35 = vpop.f32.mrb[140].mxu0 }
0x135d   :  { %5791 = vrot.lane.b32.xlu0 %v5782_v35, %s12855_s7  ;;  %v9085_v49 = vpop.f32.mrb[141].mxu0 }
0x135e   :  { %v5785_v4 = vpop.f32.mrb[142].mxu0 }
0x135f   :  { %5793 = vrot.lane.b32.xlu1 %v5785_v4, %s12855_s7  ;;  %v9086_v42 = vpop.f32.mrb[143].mxu0 }
0x1360   :  { %v4728_v58 = vpop.permute.xlu1 %4727 }
0x1361   :  { %4733 = vst.msk [vmem:[#allocation2] sm:$0xff] %vm940_vm13, %v4728_v58  ;;  %vm12864_vm13 = vcmask 162944  }
0x1364   :  { %v4730_v33 = vpop.permute.xlu1 %4729  ;;  %v5915_v9 = vpop.f32.mrb[144].mxu0 }
0x1365   :  { %4734 = vst.msk [vmem:[#allocation2 + $0x8] sm:$0xf] %vm12856_vm4, %v4730_v33  ;;  %5924 = vrot.lane.b32.xlu0 %v5915_v9, %s12857_s5  ;;  %v9097_v50 = vpop.f32.mrb[145].mxu0  ;;  %vm12866_vm4 = vcmask 195744  }
0x1366   :  { %v5918_v62 = vpop.f32.mrb[146].mxu0 }
0x1367   :  { %5926 = vrot.lane.b32.xlu1 %v5918_v62, %s12857_s5  ;;  %v9098_v27 = vpop.f32.mrb[147].mxu0 }
0x136a   :  { %v4861_v8 = vpop.permute.xlu1 %4860 }
0x136b   :  { %4866 = vst.msk [vmem:[#allocation2] sm:$0xff] %vm12858_vm9, %v4861_v8  ;;  %vm12867_vm9 = vcmask 191648  }
0x136c   :  { %v6048_v0 = vpop.f32.mrb[148].mxu0 }
0x136d   :  { %6057 = vrot.lane.b32.xlu0 %v6048_v0, %s12859_s26  ;;  %v9109_v31 = vpop.f32.mrb[149].mxu0 }
0x136e   :  { %v4863_v16 = vpop.permute.xlu1 %4862  ;;  %v6051_v23 = vpop.f32.mrb[150].mxu0 }
0x136f   :  { %4867 = vst.msk [vmem:[#allocation2 + $0x8] sm:$0xf] %vm12860_vm10, %v4863_v16  ;;  %6059 = vrot.lane.b32.xlu1 %v6051_v23, %s12859_s26  ;;  %v9110_v12 = vpop.f32.mrb[151].mxu0  ;;  %vm12869_vm10 = vcmask 228544  }
0x1372   :  { %v4994_v24 = vpop.permute.xlu1 %4993 }
0x1373   :  { %4999 = vst.msk [vmem:[#allocation2] sm:$0xff] %vm12861_vm11, %v4994_v24  ;;  %vm12870_vm11 = vcmask 224448  }
0x1374   :  { %v6181_v10 = vpop.f32.mrb[152].mxu0 }
0x1375   :  { %6190 = vrot.lane.b32.xlu0 %v6181_v10, %s12862_s9  ;;  %v9121_v36 = vpop.f32.mrb[153].mxu0 }
0x1376   :  { %v4996_v60 = vpop.permute.xlu1 %4995  ;;  %v6184_v6 = vpop.f32.mrb[154].mxu0 }
0x1377   :  { %5000 = vst.msk [vmem:[#allocation2 + $0x8] sm:$0xf] %vm12863_vm12, %v4996_v60  ;;  %6192 = vrot.lane.b32.xlu1 %v6184_v6, %s12862_s9  ;;  %v9122_v17 = vpop.f32.mrb[155].mxu0  ;;  %vm12871_vm12 = vcmask 261344  }
0x137a   :  { %v5127_v55 = vpop.permute.xlu0 %5126 }
0x137b   :  { %5132 = vst.msk [vmem:[#allocation2] sm:$0xff] %vm12864_vm13, %v5127_v55  ;;  %vm12872_vm13 = vcmask 257248  }
0x137c   :  { %v5129_v15 = vpop.permute.xlu1 %5128  ;;  %v6314_v34 = vpop.f32.mrb[156].mxu0 }
0x137d   :  { %5133 = vst.msk [vmem:[#allocation2 + $0x8] sm:$0xf] %vm12865_vm1, %v5129_v15  ;;  %6323 = vrot.lane.b32.xlu0 %v6314_v34, %s12837_s8  ;;  %v9133_v11 = vpop.f32.mrb[157].mxu0  ;;  %vm12873_vm1 = vcmask 294144  }
0x137e   :  { %v6317_v57 = vpop.f32.mrb[158].mxu0 }
0x137f   :  { %6325 = vrot.lane.b32.xlu1 %v6317_v57, %s12837_s8  ;;  %v9134_v21 = vpop.f32.mrb[159].mxu0 }
0x1380   :  { %v8172_v21 = vld [vmem:[%s12894_s10 + $0x1] ss:$0 sm:$0xff] }
0x1382   :  { %v5260_v63 = vpop.permute.xlu0 %5259 }
0x1383   :  { %5265 = vst.msk [vmem:[#allocation2] sm:$0xff] %vm12866_vm4, %v5260_v63  ;;  %vm12874_vm4 = vcmask 290048  }
0x1384   :  { %v5262_v25 = vpop.permute.xlu1 %5261  ;;  %v6447_v26 = vpop.f32.mrb[160].mxu0 }
0x1385   :  { %5266 = vst.msk [vmem:[#allocation2 + $0x8] sm:$0xf] %vm12867_vm9, %v5262_v25  ;;  %6456 = vrot.lane.b32.xlu0 %v6447_v26, %s12836_s30  ;;  %v9145_v29 = vpop.f32.mrb[161].mxu0  ;;  %vm12875_vm9 = vcmask 326944   ;;  %v8180_v25 = vld [vmem:[%s12895_s12 + $0x1] ss:$0 sm:$0xff] }
0x1386   :  { %v6450_v48 = vpop.f32.mrb[162].mxu0 }
0x1387   :  { %6458 = vrot.lane.b32.xlu1 %v6450_v48, %s12836_s30  ;;  %v9146_v46 = vpop.f32.mrb[163].mxu0 }
0x138c   :  { %v6580_v2 = vpop.f32.mrb[164].mxu0 }
0x138d   :  { %6589 = vrot.lane.b32.xlu0 %v6580_v2, %s12835_s25  ;;  %v9157_v13 = vpop.f32.mrb[165].mxu0 }
0x138e   :  { %v6583_v43 = vpop.f32.mrb[166].mxu0 }
0x138f   :  { %6591 = vrot.lane.b32.xlu1 %v6583_v43, %s12835_s25  ;;  %v9158_v41 = vpop.f32.mrb[167].mxu0  ;;  %v12896_v43 = vld [vmem:[#allocation8_spill] sm:$0xff] }
0x1394   :  { %v6713_v14 = vpop.f32.mrb[168].mxu0 }
0x1395   :  { %6722 = vrot.lane.b32.xlu0 %v6713_v14, %s12834_s3  ;;  %v9169_v22 = vpop.f32.mrb[169].mxu0 }
0x1396   :  { %v6716_v51 = vpop.f32.mrb[170].mxu0  ;;  %v12897_v22 = vld [vmem:[#allocation7_spill] sm:$0xff] }
0x1397   :  { %6724 = vrot.lane.b32.xlu1 %v6716_v51, %s12834_s3  ;;  %v9170_v30 = vpop.f32.mrb[171].mxu0 }
0x139c   :  { %v6846_v59 = vpop.f32.mrb[172].mxu0 }
0x139d   :  { %6855 = vrot.lane.b32.xlu0 %v6846_v59, %s12804_s2  ;;  %v9181_v53 = vpop.f32.mrb[173].mxu0 }
0x139e   :  { %v6849_v39 = vpop.f32.mrb[174].mxu0 }
0x139f   :  { %6857 = vrot.lane.b32.xlu1 %v6849_v39, %s12804_s2  ;;  %v9182_v47 = vpop.f32.mrb[175].mxu0 }
0x13a5   :  { %v6979_v7 = vpop.f32.mrb[176].mxu0 }
0x13a6   :  { %6988 = vrot.lane.b32.xlu0 %v6979_v7, %s12802_s1  ;;  %v9193_v1 = vpop.f32.mrb[177].mxu0 }
0x13a7   :  { %v6982_v32 = vpop.f32.mrb[178].mxu0 }
0x13a8   :  { %6990 = vrot.lane.b32.xlu1 %v6982_v32, %s12802_s1  ;;  %v9194_v54 = vpop.f32.mrb[179].mxu0 }
0x13a9   :  { %v9382_v54 = vld [vmem:[%s12622_s18 + $0x78] ss:$12 sps:$4 sm:$0xff]  }
0x13aa   :  { %7407 = vmatpush1.bf16.msra.mxu0 %v9382_v54 }
0x13ad   :  { %v7112_v3 = vpop.f32.mrb[180].mxu0 }
0x13ae   :  { %7121 = vrot.lane.b32.xlu0 %v7112_v3, %s12801_s24  ;;  %v9205_v56 = vpop.f32.mrb[181].mxu0  ;;  %v9385_v3 = vld [vmem:[%s12622_s18 + $0x80] ss:$12 sps:$4 sm:$0xff]  }
0x13af   :  { %v7115_v37 = vpop.f32.mrb[182].mxu0  ;;  %v9388_v56 = vld [vmem:[%s12622_s18 + $0x94] ss:$12 sps:$4 sm:$0xff]  }
0x13b0   :  { %7123 = vrot.lane.b32.xlu1 %v7115_v37, %s12801_s24  ;;  %v9206_v45 = vpop.f32.mrb[183].mxu0  ;;  %v9386_v37 = vld [vmem:[%s12622_s18 + $0x90] ss:$12 sps:$4 sm:$0xff]   ;;  %7408 = vmatprep.subr.bf16.mxu0 %v9388_v56 }
0x13b1   :  { %v9389_v45 = vld [vmem:[%s12622_s18 + $0x98] ss:$12 sps:$4 sm:$0xff]   ;;  %7409 = vmatpush1.bf16.msra.mxu0 %v9386_v37 }
0x13b7   :  { %v5393_v5 = vpop.permute.xlu0 %5392 }
0x13b8   :  { %5398 = vst.msk [vmem:[#allocation2] sm:$0xff] %vm12869_vm10, %v5393_v5  ;;  %vm12876_vm10 = vcmask 322848   ;;  %v9392_v5 = vld [vmem:[%s12622_s18 + $0xac] ss:$12 sps:$4 sm:$0xff]  }
0x13b9   :  { %v5395_v19 = vpop.permute.xlu1 %5394  ;;  %7410 = vmatprep.subr.bf16.mxu0 %v9392_v5 }
0x13ba   :  { %5399 = vst.msk [vmem:[#allocation2 + $0x8] sm:$0xf] %vm12870_vm11, %v5395_v19  ;;  %vm12877_vm11 = vcmask 359744   ;;  %v9390_v19 = vld [vmem:[%s12622_s18 + $0xa8] ss:$12 sps:$4 sm:$0xff]  }
0x13bb   :  { %7411 = vmatpush1.bf16.msra.mxu0 %v9390_v19 }
0x13bf   :  { %v5526_v40 = vpop.permute.xlu0 %5525 }
0x13c0   :  { %5531 = vst.msk [vmem:[#allocation2] sm:$0xff] %vm12871_vm12, %v5526_v40  ;;  %vm12878_vm12 = vcmask 355648   ;;  %v9393_v40 = vld [vmem:[%s12622_s18 + $0xb0] ss:$12 sps:$4 sm:$0xff]  }
0x13c1   :  { %v5528_v18 = vpop.permute.xlu1 %5527 }
0x13c2   :  { %5532 = vst.msk [vmem:[#allocation2 + $0x8] sm:$0xf] %vm12872_vm13, %v5528_v18  ;;  %vm12879_vm13 = vcmask 392544   ;;  %v9396_v18 = vld [vmem:[%s12622_s18 + $0xc4] ss:$12 sps:$4 sm:$0xff]  }
0x13c3   :  { %7412 = vmatprep.subr.bf16.mxu0 %v9396_v18 }
0x13c7   :  { %v5659_v35 = vpop.permute.xlu0 %5658 }
0x13c8   :  { %5664 = vst.msk [vmem:[#allocation2] sm:$0xff] %vm12873_vm1, %v5659_v35  ;;  %vm12880_vm1 = vcmask 388448   ;;  %v9394_v35 = vld [vmem:[%s12622_s18 + $0xc0] ss:$12 sps:$4 sm:$0xff]  }
0x13c9   :  { %v5661_v49 = vpop.permute.xlu1 %5660  ;;  %7413 = vmatpush1.bf16.msra.mxu0 %v9394_v35 }
0x13ca   :  { %5665 = vst.msk [vmem:[#allocation2 + $0x8] sm:$0xf] %vm12874_vm4, %v5661_v49  ;;  %vm12881_vm4 = vcmask 425344   ;;  %v9397_v49 = vld [vmem:[%s12622_s18 + $0xc8] ss:$12 sps:$4 sm:$0xff]  }
0x13cf   :  { %v5792_v4 = vpop.permute.xlu0 %5791 }
0x13d0   :  { %5797 = vst.msk [vmem:[#allocation2] sm:$0xff] %vm12875_vm9, %v5792_v4  ;;  %vm12882_vm9 = vcmask 421248   ;;  %v9400_v4 = vld [vmem:[%s12622_s18 + $0xdc] ss:$12 sps:$4 sm:$0xff]  }
0x13d1   :  { %v5794_v42 = vpop.permute.xlu1 %5793  ;;  %7414 = vmatprep.subr.bf16.mxu0 %v9400_v4 }
0x13d2   :  { %5798 = vst.msk [vmem:[#allocation2 + $0x8] sm:$0xf] %vm12876_vm10, %v5794_v42  ;;  %vm12883_vm10 = vcmask 458144   ;;  %v9398_v42 = vld [vmem:[%s12622_s18 + $0xd8] ss:$12 sps:$4 sm:$0xff]  }
0x13d3   :  { %7415 = vmatpush1.bf16.msra.mxu0 %v9398_v42 }
0x13d7   :  { %v5925_v58 = vpop.permute.xlu0 %5924 }
0x13d8   :  { %5930 = vst.msk [vmem:[#allocation2] sm:$0xff] %vm12877_vm11, %v5925_v58  ;;  %vm12884_vm11 = vcmask 454048   ;;  %v9401_v58 = vld [vmem:[%s12622_s18 + $0xe0] ss:$12 sps:$4 sm:$0xff]  }
0x13d9   :  { %v5927_v33 = vpop.permute.xlu1 %5926 }
0x13da   :  { %5931 = vst.msk [vmem:[#allocation2 + $0x8] sm:$0xf] %vm12878_vm12, %v5927_v33  ;;  %vm12885_vm12 = vcmask 490944  }
0x13df   :  { %v6058_v9 = vpop.permute.xlu0 %6057 }
0x13e0   :  { %6063 = vst.msk [vmem:[#allocation2] sm:$0xff] %vm12879_vm13, %v6058_v9  ;;  %vm12886_vm13 = vcmask 486848  }
0x13e1   :  { %v6060_v50 = vpop.permute.xlu1 %6059 }
0x13e2   :  { %6064 = vst.msk [vmem:[#allocation2 + $0x8] sm:$0xf] %vm12880_vm1, %v6060_v50  ;;  %vm12887_vm1 = vcmask 523744  }
0x13e7   :  { %v6191_v62 = vpop.permute.xlu0 %6190 }
0x13e8   :  { %6196 = vst.msk [vmem:[#allocation2] sm:$0xff] %vm12881_vm4, %v6191_v62  ;;  %vm12888_vm4 = vcmask 519648  }
0x13e9   :  { %v6193_v27 = vpop.permute.xlu1 %6192 }
0x13ea   :  { %6197 = vst.msk [vmem:[#allocation2 + $0x8] sm:$0xf] %vm12882_vm9, %v6193_v27  ;;  %vm12889_vm9 = vcmask 556544  }
0x13ef   :  { %v6324_v8 = vpop.permute.xlu0 %6323 }
0x13f0   :  { %6329 = vst.msk [vmem:[#allocation2] sm:$0xff] %vm12883_vm10, %v6324_v8  ;;  %vm12890_vm10 = vcmask 622144  }
0x13f1   :  { %v6326_v0 = vpop.permute.xlu1 %6325 }
0x13f2   :  { %6330 = vst.msk [vmem:[#allocation2 + $0x8] sm:$0xf] %vm12884_vm11, %v6326_v0  ;;  %vm12891_vm11 = vcmask 618048  }
0x13f7   :  { %v6457_v31 = vpop.permute.xlu0 %6456 }
0x13f8   :  { %6462 = vst.msk [vmem:[#allocation2] sm:$0xff] %vm12885_vm12, %v6457_v31  ;;  %vm12892_vm12 = vcmask 654944  }
0x13f9   :  { %v6459_v16 = vpop.permute.xlu1 %6458 }
0x13fa   :  { %6463 = vst.msk [vmem:[#allocation2 + $0x8] sm:$0xf] %vm12886_vm13, %v6459_v16  ;;  %vm12893_vm13 = vcmask 650848   ;;  %v8183_v16 = vld [vmem:[%s12623_s16 + $0x1] ss:$0 sm:$0xff] }
0x13ff   :  { %v6590_v23 = vpop.permute.xlu0 %6589 }
0x1400   :  { %6595 = vst.msk [vmem:[#allocation2] sm:$0xff] %vm12887_vm1, %v6590_v23 }
0x1401   :  { %v6592_v12 = vpop.permute.xlu1 %6591 }
0x1402   :  { %6596 = vst.msk [vmem:[#allocation2 + $0x8] sm:$0xf] %vm12888_vm4, %v6592_v12 }
0x1407   :  { %v6723_v24 = vpop.permute.xlu0 %6722 }
0x1408   :  { %6728 = vst.msk [vmem:[#allocation2] sm:$0xff] %vm12889_vm9, %v6723_v24 }
0x1409   :  { %v6725_v10 = vpop.permute.xlu1 %6724 }
0x140a   :  { %6729 = vst.msk [vmem:[#allocation2 + $0x8] sm:$0xf] %vm2967_vm14, %v6725_v10  ;;  %v8184_v10 = vld [vmem:[%s12624_s17 + $0x1] ss:$0 sm:$0xff] }
0x140f   :  { %v6856_v36 = vpop.permute.xlu0 %6855 }
0x1410   :  { %6861 = vst.msk [vmem:[#allocation2] sm:$0xff] %vm3100_vm3, %v6856_v36 }
0x1411   :  { %v6858_v60 = vpop.permute.xlu1 %6857 }
0x1412   :  { %6862 = vst.msk [vmem:[#allocation2 + $0x8] sm:$0xf] %vm3102_vm5, %v6858_v60 }
0x1418   :  { %v6989_v6 = vpop.permute.xlu0 %6988 }
0x1419   :  { %6994 = vst.msk [vmem:[#allocation2] sm:$0xff] %vm12890_vm10, %v6989_v6 }
0x141a   :  { %v6991_v17 = vpop.permute.xlu1 %6990 }
0x141b   :  { %6995 = vst.msk [vmem:[#allocation2 + $0x8] sm:$0xf] %vm12891_vm11, %v6991_v17 }
0x1420   :  { %v7122_v55 = vpop.permute.xlu0 %7121 }
0x1421   :  { %7127 = vst.msk [vmem:[#allocation2] sm:$0xff] %vm12892_vm12, %v7122_v55  ;;  %v9402_v55 = vld [vmem:[%s12625_s20 + $0xe0] sm:$0xff]  }
0x1422   :  { %v7124_v15 = vpop.permute.xlu1 %7123  ;;  %8564 = vmatprep.subr.bf16.mxu0 %v9402_v55 }
0x1423   :  { %7128 = vst.msk [vmem:[#allocation2 + $0x8] sm:$0xf] %vm12893_vm13, %v7124_v15  ;;  %v9403_v15 = vld [vmem:[%s12625_s20 + $0xa0] sm:$0xff]  }
0x1428   :  { %v7129_v34 = vld [vmem:[#allocation2] sm:$0xff] }
0x142a   :  { %v7130_v11 = vld [vmem:[#allocation2 + $0x8] sm:$0xf] }
0x142b   :  { %v7131_v57 = vpack.c.bf16 %v7130_v11, %v7129_v34  ;;  %v9404_v34 = vld [vmem:[%s12625_s20 + $0xe8] sm:$0xff]  }
0x142c   :  { %v9405_v11 = vld [vmem:[%s12625_s20 + $0xa8] sm:$0xff]  }
0x142d   :  { %9218 = vmatmul.mubr.msk.bf16.vlgmr.msra.gmra.mrb[188].mxu1 %vm367_vm7, %v7131_v57  ;;  %v9406_v57 = vld [vmem:[%s12625_s20 + $0xf0] sm:$0xff]  }
0x142e   :  { %9231 = vmatprep.mubr.msk.bf16.mxu1 %vm9809_vm0, %v12803_v38  ;;  %9222 = vmatpush3.bf16.msra.mxu1 %v9385_v3 }
0x142f   :  { %9223 = vmatprep.subr.bf16.mxu1 %v12803_v38 }
0x1432   :  { %9224 = vmatpush3.bf16.msra.mxu1 %v9389_v45 }
0x1433   :  { %9225 = vmatprep.subr.bf16.mxu1 %v12803_v38 }
0x1436   :  { %9226 = vmatpush3.bf16.msra.mxu1 %v9393_v40 }
0x1437   :  { %9227 = vmatprep.subr.bf16.mxu1 %v12803_v38 }
0x143a   :  { %9228 = vmatpush3.bf16.msra.mxu1 %v9397_v49 }
0x143b   :  { %9229 = vmatprep.subr.bf16.mxu1 %v12803_v38 }
0x143e   :  { %9230 = vmatpush3.bf16.msra.mxu1 %v9401_v58 }
0x143f   :  { %9235 = vmatprep.subr.bf16.mxu1 %v12803_v38 }
0x1500   :  { %v7218_v63 = vpop.f32.mrb[188].mxu1 }
0x1501   :  { %v7219_v26 = vadd.f32 %v8172_v21, %v7218_v63  ;;  %v9219_v29 = vpop.f32.mrb[189].mxu1  ;;  %v9408_v63 = vld [vmem:[%s12625_s20 + $0xf8] sm:$0xff]  }
0x1502   :  { %v7221_v48 = vpop.f32.mrb[190].mxu1  ;;  %v9411_v29 = vld [vmem:[%s12625_s20 + $0x100] sm:$0xff]  }
0x1503   :  { %v7233_v46 = vmul.f32 %v8180_v25, %v7219_v26  ;;  %v7222_v2 = vadd.f32 %v8172_v21, %v7221_v48  ;;  %v9220_v13 = vpop.f32.mrb[191].mxu1  ;;  %v9407_v21 = vld [vmem:[%s12625_s20 + $0xb0] sm:$0xff]   ;;  %v9410_v26 = vld [vmem:[%s12625_s20 + $0x120] sm:$0xff]  }
0x1504   :  { %v9412_v48 = vld [vmem:[%s12625_s20 + $0xc0] sm:$0xff]   ;;  %v9415_v13 = vld [vmem:[%s12625_s20 + $0xc8] sm:$0xff]  }
0x1505   :  { %v12357_v41 = vadd.f32 %v7233_v46, %v12896_v43  ;;  %v7234_v14 = vmul.f32 %v8180_v25, %v7222_v2  ;;  %v9409_v25 = vld [vmem:[%s12625_s20 + $0xb8] sm:$0xff]   ;;  %v9413_v46 = vld [vmem:[%s12625_s20 + $0x128] sm:$0xff]   ;;  %v9416_v43 = vld [vmem:[%s12625_s20 + $0x130] sm:$0xff]  }
0x1506   :  { %v9414_v2 = vld [vmem:[%s12625_s20 + $0x108] sm:$0xff]  }
0x1507   :  { %v12360_v51 = vadd.f32 %v7234_v14, %v12897_v22  ;;  %v7241_v30 = vsel %vm367_vm7, %v12357_v41, 0.0  ;;  %v9417_v14 = vld [vmem:[%s12625_s20 + $0x110] sm:$0xff]  }
0x1508   :  { %7242 = vadd.xlane.f32.xlu0 %v7241_v30  ;;  %v9418_v22 = vld [vmem:[%s12625_s20 + $0xd0] sm:$0xff]   ;;  %v9419_v30 = vld [vmem:[%s12625_s20 + $0x138] sm:$0xff]  }
0x1509   :  { %v7244_v52 = vsel %vm371_vm8, %v12360_v51, 0.0 }
0x150a   :  { %7245 = vadd.xlane.f32.xlu1 %v7244_v52  ;;  %v9420_v52 = vld [vmem:[%s12625_s20 + $0x118] sm:$0xff]  }
0x1595   :  { %v7243_v20 = vpop.xlane.xlu0 %7242 }
0x1596   :  { %v7247_v59 = vmul.f32 0.0125, %v7243_v20  ;;  %v9421_v20 = vld [vmem:[%s12625_s20 + $0xd8] sm:$0xff]  }
0x1597   :  { %v7246_v53 = vpop.xlane.xlu1 %7245 }
0x1598   :  { %v7249_v39 = vsub.f32 %v12357_v41, %v7247_v59  ;;  %v7248_v47 = vmul.f32 0.0125, %v7246_v53  ;;  %v12898_v59 = vld [vmem:[#allocation4_spill] sm:$0xff] }
0x159a   :  { %v7250_v61 = vsub.f32 %v12360_v51, %v7248_v47  ;;  %v7251_v28 = vmul.f32 %v7249_v39, %v7249_v39 }
0x159c   :  { %v7253_v7 = vsel %vm367_vm7, %v7251_v28, 0.0  ;;  %v7252_v1 = vmul.f32 %v7250_v61, %v7250_v61 }
0x159d   :  { %7254 = vadd.xlane.f32.xlu0 %v7253_v7 }
0x159e   :  { %v7256_v32 = vsel %vm371_vm8, %v7252_v1, 0.0 }
0x15a1   :  { %7257 = vadd.xlane.f32.xlu0 %v7256_v32 }
0x162a   :  { %v7255_v33 = vpop.xlane.xlu0 %7254 }
0x162b   :  { %v7259_v9 = vmul.f32 0.0125, %v7255_v33 }
0x162d   :  { %v7261_v50 = vadd.f32 1e-05, %v7259_v9 }
0x162e   :  { %v7258_v62 = vpop.xlane.xlu0 %7257 }
0x162f   :  { %9778 = vrsqrt.f32 %v7261_v50  ;;  %v7260_v27 = vmul.f32 0.0125, %v7258_v62 }
0x1631   :  { %v7262_v8 = vadd.f32 1e-05, %v7260_v27 }
0x1633   :  { %9780 = vrsqrt.f32 %v7262_v8 }
0x1639   :  { %v9779_v0 = vpop.eup %9778 }
0x163a   :  { %v7265_v31 = vmul.f32 %v9779_v0, %v7249_v39  ;;  %v12899_v39 = vld [vmem:[#allocation3_spill] sm:$0xff] }
0x163b   :  { %v12900_v47 = vsub.s32 2, %v12899_v39  ;;  %v12901_v28 = vsub.s32 1, %v12899_v39 }
0x163c   :  { %v7273_v12 = vmul.f32 %v8183_v16, %v7265_v31 }
0x163d   :  { %v9781_v23 = vpop.eup %9780 }
0x163e   :  { %v7266_v24 = vmul.f32 %v9781_v23, %v7250_v61  ;;  %v7281_v60 = vadd.f32 %v8184_v10, %v7273_v12 }
0x1640   :  { %v7274_v36 = vmul.f32 %v8183_v16, %v7266_v24 }
0x1642   :  { %v7282_v6 = vadd.f32 %v8184_v10, %v7274_v36 }
0x1644   :  { %v7283_v17 = vpack.c.bf16 %v7282_v6, %v7281_v60 }
0x1646   :  { %8221 = vmatmul.mubr.msk.bf16.vlgmr.msra.gmra.mrb[184].mxu0 %vm367_vm7, %v7283_v17  ;;  %9232 = vmatmul.mubr.msk.bf16.vlgmr.msra.gmra.mrb[192].mxu1 %vm367_vm7, %v7283_v17 }
0x1647   :  { %9243 = vmatprep.mubr.msk.bf16.mxu1 %vm9809_vm0, %v12803_v38  ;;  %8565 = vmatpush3.bf16.msra.mxu0 %v9403_v15 }
0x1648   :  { %8566 = vmatprep.subr.bf16.mxu0 %v9404_v34  ;;  %9236 = vmatpush3.bf16.msra.mxu1 %v9410_v26 }
0x1649   :  { %9237 = vmatprep.subr.bf16.mxu1 %v12803_v38 }
0x164b   :  { %8567 = vmatpush3.bf16.msra.mxu0 %v9405_v11 }
0x164c   :  { %8568 = vmatprep.subr.bf16.mxu0 %v9406_v57  ;;  %9238 = vmatpush3.bf16.msra.mxu1 %v9413_v46 }
0x164d   :  { %9239 = vmatprep.subr.bf16.mxu1 %v12803_v38 }
0x164f   :  { %8569 = vmatpush3.bf16.msra.mxu0 %v9407_v21 }
0x1650   :  { %8570 = vmatprep.subr.bf16.mxu0 %v9408_v63  ;;  %9240 = vmatpush3.bf16.msra.mxu1 %v9416_v43 }
0x1651   :  { %9241 = vmatprep.subr.bf16.mxu1 %v12803_v38  ;;  %v8205_v38 = vld [vmem:[%s12626_s19 + $0x3] sm:$0x7] }
0x1652   :  { %v7311_v53 = vrot.slane %v8205_v38, %v12898_v59  ;;  %v7319_v61 = vrot.slane %v8205_v38, %v12900_v47  ;;  %v7315_v7 = vrot.slane %v8205_v38, %v12901_v28 }
0x1653   :  { %8571 = vmatpush3.bf16.msra.mxu0 %v9409_v25 }
0x1654   :  { %8572 = vmatprep.subr.bf16.mxu0 %v9411_v29  ;;  %9242 = vmatpush3.bf16.msra.mxu1 %v9419_v30 }
0x1657   :  { %8573 = vmatpush3.bf16.msra.mxu0 %v9412_v48 }
0x1658   :  { %8574 = vmatprep.subr.bf16.mxu0 %v9414_v2 }
0x165b   :  { %8575 = vmatpush3.bf16.msra.mxu0 %v9415_v13 }
0x165c   :  { %8576 = vmatprep.subr.bf16.mxu0 %v9417_v14 }
0x165f   :  { %8577 = vmatpush3.bf16.msra.mxu0 %v9418_v22 }
0x1660   :  { %8578 = vmatprep.subr.bf16.mxu0 %v9420_v52 }
0x1663   :  { %8579 = vmatpush3.bf16.msra.mxu0 %v9421_v20 }
0x1719   :  { %v7440_v1 = vpop.f32.mrb[184].mxu0  ;;  %v7483_v32 = vpop.f32.mrb[192].mxu1 }
0x171a   :  { %v12501_v44 = vadd.f32 %v7440_v1, %v7311_v53  ;;  %v12503_v54 = vadd.f32 %v7483_v32, %v7319_v61  ;;  %v7442_v3 = vpop.f32.mrb[185].mxu0  ;;  %v9233_v56 = vpop.f32.mrb[193].mxu1 }
0x171b   :  { %v12505_v37 = vadd.f32 %v7442_v3, %v7315_v7  ;;  %v7444_v45 = vpop.f32.mrb[186].mxu0  ;;  %v7486_v5 = vpop.f32.mrb[194].mxu1 }
0x171c   :  { %v12508_v19 = vmul.f32 0.70710677, %v12501_v44  ;;  %v12511_v40 = vmul.f32 0.70710677, %v12503_v54  ;;  %v7446_v35 = vpop.f32.mrb[187].mxu0  ;;  %v9234_v49 = vpop.f32.mrb[195].mxu1  ;;  %v12519_v33 = vadd.f32 %v7444_v45, %v7311_v53  ;;  %v12521_v62 = vadd.f32 %v7486_v5, %v7319_v61 }
0x171d   :  { %v12514_v18 = vmul.f32 0.70710677, %v12505_v37  ;;  %v12531_v60 = vadd.f32 %v7446_v35, %v7315_v7 }
0x171e   :  { %v7514_v4 = vand.u32 2147483647, %v12508_v19  ;;  %v7516_v42 = vand.u32 2147483647, %v12511_v40  ;;  %v12524_v31 = vmul.f32 0.70710677, %v12519_v33 }
0x171f   :  { %v7515_v58 = vand.u32 2147483647, %v12514_v18  ;;  %v12527_v23 = vmul.f32 0.70710677, %v12521_v62  ;;  %v12534_v15 = vmul.f32 0.70710677, %v12531_v60 }
0x1720   :  { %v7520_v9 = vmul.f32 0.3275911, %v7514_v4  ;;  %v7522_v50 = vmul.f32 0.3275911, %v7516_v42  ;;  %v7517_v12 = vand.u32 2147483647, %v12524_v31 }
0x1721   :  { %v7521_v27 = vmul.f32 0.3275911, %v7515_v58  ;;  %v7519_v24 = vand.u32 2147483647, %v12527_v23  ;;  %v7592_v17 = vsub.f32 0.0, %v7514_v4  ;;  %v7594_v34 = vsub.f32 0.0, %v7516_v42 }
0x1722   :  { %v7526_v8 = vadd.f32 1.0, %v7520_v9  ;;  %v7528_v0 = vadd.f32 1.0, %v7522_v50  ;;  %v7523_v10 = vmul.f32 0.3275911, %v7517_v12  ;;  %v7518_v11 = vand.u32 2147483647, %v12534_v15 }
0x1723   :  { %v7527_v16 = vadd.f32 1.0, %v7521_v27  ;;  %v7525_v36 = vmul.f32 0.3275911, %v7519_v24  ;;  %v7593_v57 = vsub.f32 0.0, %v7515_v58  ;;  %v7598_v63 = vmul.f32 %v7592_v17, %v7514_v4 }
0x1724   :  { %9782 = vrcp.f32 %v7526_v8  ;;  %v7529_v6 = vadd.f32 1.0, %v7523_v10  ;;  %v7524_v25 = vmul.f32 0.3275911, %v7518_v11  ;;  %v7600_v48 = vmul.f32 %v7594_v34, %v7516_v42 }
0x1725   :  { %9784 = vrcp.f32 %v7528_v0  ;;  %v7531_v55 = vadd.f32 1.0, %v7525_v36  ;;  %v7595_v2 = vsub.f32 0.0, %v7517_v12  ;;  %v7599_v14 = vmul.f32 %v7593_v57, %v7515_v58 }
0x1726   :  { %9786 = vrcp.f32 %v7527_v16  ;;  %v7530_v13 = vadd.f32 1.0, %v7524_v25  ;;  %v7604_v30 = vmul.f32 1.442695, %v7598_v63  ;;  %v7597_v20 = vsub.f32 0.0, %v7519_v24 }
0x1727   :  { %9788 = vrcp.f32 %v7529_v6  ;;  %v7608_v59 = vmul.f32 1.442695, %v7600_v48  ;;  %v7601_v47 = vmul.f32 %v7595_v2, %v7517_v12  ;;  %v7606_v1 = vmul.f32 1.442695, %v7599_v14 }
0x1728   :  { %9790 = vrcp.f32 %v7531_v55  ;;  %v7603_v45 = vmul.f32 %v7597_v20, %v7519_v24  ;;  %v7596_v9 = vsub.f32 0.0, %v7518_v11  ;;  %vm7502_vm0 = vcmp.ge.f32.partialorder %v12508_v19, 0.0 }
0x1729   :  { %9792 = vrcp.f32 %v7530_v13  ;;  %v7610_v58 = vmul.f32 1.442695, %v7601_v47  ;;  %vm7504_vm7 = vcmp.ge.f32.partialorder %v12511_v40, 0.0  ;;  %vm7505_vm14 = vcmp.ge.f32.partialorder %v12524_v31, 0.0 }
0x172a   :  { %9794 = vpow2.f32 %v7604_v30  ;;  %v7614_v12 = vmul.f32 1.442695, %v7603_v45  ;;  %v7602_v25 = vmul.f32 %v7596_v9, %v7518_v11  ;;  %vm7507_vm3 = vcmp.ge.f32.partialorder %v12527_v23, 0.0 }
0x172b   :  { %9796 = vpow2.f32 %v7608_v59  ;;  %vm7503_vm5 = vcmp.ge.f32.partialorder %v12514_v18, 0.0  ;;  %vm7506_vm1 = vcmp.ge.f32.partialorder %v12534_v15, 0.0  ;;  %v7491_v18 = vmul.f32 0.5, %v12505_v37 }
0x172c   :  { %9798 = vpow2.f32 %v7606_v1  ;;  %v7612_v11 = vmul.f32 1.442695, %v7602_v25  ;;  %v7492_v25 = vmul.f32 0.5, %v12503_v54 }
0x172d   :  { %9800 = vpow2.f32 %v7610_v58 }
0x172e   :  { %v9783_v21 = vpop.eup %9782  ;;  %9802 = vpow2.f32 %v7614_v12 }
0x172f   :  { %v9785_v26 = vpop.eup %9784  ;;  %v7538_v29 = vmul.f32 1.0614054, %v9783_v21  ;;  %9804 = vpow2.f32 %v7612_v11 }
0x1730   :  { %v7540_v46 = vmul.f32 1.0614054, %v9785_v26  ;;  %v12537_v22 = vpop.eup %9786 }
0x1731   :  { %v7544_v43 = vadd.f32 -1.4531521, %v7538_v29  ;;  %v7539_v53 = vmul.f32 1.0614054, %v12537_v22  ;;  %v12540_v61 = vpop.eup %9788 }
0x1732   :  { %v7546_v52 = vadd.f32 -1.4531521, %v7540_v46  ;;  %v12542_v32 = vpop.eup %9790  ;;  %v7541_v56 = vmul.f32 1.0614054, %v12540_v61 }
0x1733   :  { %v7550_v38 = vmul.f32 %v9783_v21, %v7544_v43  ;;  %v7545_v7 = vadd.f32 -1.4531521, %v7539_v53  ;;  %v7543_v49 = vmul.f32 1.0614054, %v12542_v32  ;;  %v12550_v6 = vpop.eup %9792 }
0x1734   :  { %v7552_v39 = vmul.f32 %v9785_v26, %v7546_v52  ;;  %v7547_v42 = vadd.f32 -1.4531521, %v7541_v56  ;;  %v7542_v46 = vmul.f32 1.0614054, %v12550_v6  ;;  %v9795_v14 = vpop.eup %9794 }
0x1735   :  { %v7556_v28 = vadd.f32 1.4214138, %v7550_v38  ;;  %v7551_v35 = vmul.f32 %v12537_v22, %v7545_v7  ;;  %v7549_v8 = vadd.f32 -1.4531521, %v7543_v49  ;;  %v9797_v38 = vpop.eup %9796 }
0x1736   :  { %v7558_v3 = vadd.f32 1.4214138, %v7552_v39  ;;  %v7553_v16 = vmul.f32 %v12540_v61, %v7547_v42  ;;  %v7548_v20 = vadd.f32 -1.4531521, %v7542_v46  ;;  %v9799_v45 = vpop.eup %9798 }
0x1737   :  { %v7562_v5 = vmul.f32 %v9783_v21, %v7556_v28  ;;  %v7557_v27 = vadd.f32 1.4214138, %v7551_v35  ;;  %v7555_v36 = vmul.f32 %v12542_v32, %v7549_v8  ;;  %v9801_v49 = vpop.eup %9800 }
0x1738   :  { %v7564_v4 = vmul.f32 %v9785_v26, %v7558_v3  ;;  %v7559_v55 = vadd.f32 1.4214138, %v7553_v16  ;;  %v7554_v7 = vmul.f32 %v12550_v6, %v7548_v20  ;;  %v9803_v9 = vpop.eup %9802 }
0x1739   :  { %v7568_v50 = vadd.f32 -0.28449672, %v7562_v5  ;;  %v7563_v24 = vmul.f32 %v12537_v22, %v7557_v27  ;;  %v7561_v63 = vadd.f32 1.4214138, %v7555_v36 }
0x173a   :  { %v7570_v0 = vadd.f32 -0.28449672, %v7564_v4  ;;  %v7565_v48 = vmul.f32 %v12540_v61, %v7559_v55  ;;  %v7560_v56 = vadd.f32 1.4214138, %v7554_v7  ;;  %v12902_v4 = vmov -1.0  }
0x173b   :  { %v7574_v10 = vmul.f32 %v9783_v21, %v7568_v50  ;;  %v7569_v57 = vadd.f32 -0.28449672, %v7563_v24  ;;  %v7567_v43 = vmul.f32 %v12542_v32, %v7561_v63  ;;  %v7508_v42 = vsel %vm7502_vm0, 1.0, %v12902_v4 }
0x173c   :  { %v7576_v17 = vmul.f32 %v9785_v26, %v7570_v0  ;;  %v7571_v52 = vadd.f32 -0.28449672, %v7565_v48  ;;  %v7566_v19 = vmul.f32 %v12550_v6, %v7560_v56  ;;  %v7510_v40 = vsel %vm7504_vm7, 1.0, %v12902_v4 }
0x173d   :  { %v7580_v34 = vadd.f32 0.2548296, %v7574_v10  ;;  %v7575_v13 = vmul.f32 %v12537_v22, %v7569_v57  ;;  %v7573_v39 = vadd.f32 -0.28449672, %v7567_v43  ;;  %v7511_v24 = vsel %vm7505_vm14, 1.0, %v12902_v4 }
0x173e   :  { %v7582_v29 = vadd.f32 0.2548296, %v7576_v17  ;;  %v7577_v28 = vmul.f32 %v12540_v61, %v7571_v52  ;;  %v7572_v0 = vadd.f32 -0.28449672, %v7566_v19  ;;  %v7513_v31 = vsel %vm7507_vm3, 1.0, %v12902_v4 }
0x173f   :  { %v7586_v2 = vmul.f32 %v9783_v21, %v7580_v34  ;;  %v7581_v53 = vadd.f32 0.2548296, %v7575_v13  ;;  %v7579_v21 = vmul.f32 %v12542_v32, %v7573_v39  ;;  %v7490_v34 = vmul.f32 0.5, %v12501_v44 }
0x1740   :  { %v7588_v30 = vmul.f32 %v9785_v26, %v7582_v29  ;;  %v7583_v3 = vadd.f32 0.2548296, %v7577_v28  ;;  %v7493_v29 = vmul.f32 0.5, %v12519_v33  ;;  %v7509_v13 = vsel %vm7503_vm5, 1.0, %v12902_v4 }
0x1741   :  { %v7616_v59 = vmul.f32 %v9795_v14, %v7586_v2  ;;  %v7587_v26 = vmul.f32 %v12537_v22, %v7581_v53  ;;  %v7585_v35 = vadd.f32 0.2548296, %v7579_v21  ;;  %v9805_v2 = vpop.eup %9804  ;;  %v7495_v43 = vmul.f32 0.5, %v12521_v62 }
0x1742   :  { %v7618_v47 = vmul.f32 %v9797_v38, %v7588_v30  ;;  %v7589_v58 = vmul.f32 %v12540_v61, %v7583_v3  ;;  %v7578_v61 = vmul.f32 %v12550_v6, %v7572_v0  ;;  %v7494_v62 = vmul.f32 0.5, %v12531_v60 }
0x1743   :  { %v7622_v1 = vsub.f32 1.0, %v7616_v59  ;;  %v7591_v22 = vmul.f32 %v12542_v32, %v7585_v35  ;;  %v7617_v27 = vmul.f32 %v9799_v45, %v7587_v26  ;;  %v8264_v45 = vld [vmem:[%s12627_s21 + $0x1] ss:$0 sm:$0xff] }
0x1744   :  { %v7624_v5 = vsub.f32 1.0, %v7618_v47  ;;  %v7619_v8 = vmul.f32 %v9801_v49, %v7589_v58  ;;  %v7584_v55 = vadd.f32 0.2548296, %v7578_v61 }
0x1745   :  { %v7628_v50 = vmul.f32 %v7622_v1, %v7508_v42  ;;  %v7621_v12 = vmul.f32 %v9803_v9, %v7591_v22  ;;  %v7623_v17 = vsub.f32 1.0, %v7617_v27  ;;  %v8287_v42 = vld [vmem:[%s12628_s22 + $0x1] ss:$0 sm:$0xff] }
0x1746   :  { %v7630_v16 = vmul.f32 %v7624_v5, %v7510_v40  ;;  %v7625_v10 = vsub.f32 1.0, %v7619_v8  ;;  %v7590_v46 = vmul.f32 %v12550_v6, %v7584_v55  ;;  %v7512_v6 = vsel %vm7506_vm1, 1.0, %v12902_v4 }
0x1747   :  { %v7627_v36 = vsub.f32 1.0, %v7621_v12  ;;  %v7634_v23 = vadd.f32 1.0, %v7628_v50  ;;  %v7629_v30 = vmul.f32 %v7623_v17, %v7509_v13 }
0x1748   :  { %v7631_v32 = vmul.f32 %v7625_v10, %v7511_v24  ;;  %v7636_v57 = vadd.f32 1.0, %v7630_v16  ;;  %v7620_v20 = vmul.f32 %v9805_v2, %v7590_v46 }
0x1749   :  { %v7633_v63 = vmul.f32 %v7627_v36, %v7513_v31  ;;  %v7640_v44 = vmul.f32 %v7634_v23, %v7490_v34  ;;  %v7635_v39 = vadd.f32 1.0, %v7629_v30 }
0x174a   :  { %v7637_v48 = vadd.f32 1.0, %v7631_v32  ;;  %v7642_v54 = vmul.f32 %v7636_v57, %v7492_v25  ;;  %v7626_v59 = vsub.f32 1.0, %v7620_v20 }
0x174b   :  { %v7639_v14 = vadd.f32 1.0, %v7633_v63  ;;  %v7641_v47 = vmul.f32 %v7635_v39, %v7491_v18 }
0x174c   :  { %v7643_v52 = vmul.f32 %v7637_v48, %v7493_v29  ;;  %v7632_v11 = vmul.f32 %v7626_v59, %v7512_v6 }
0x174d   :  { %v7645_v38 = vmul.f32 %v7639_v14, %v7495_v43 }
0x174e   :  { %v7646_v33 = vpack.c.bf16 %v7643_v52, %v7640_v44  ;;  %v7638_v15 = vadd.f32 1.0, %v7632_v11 }
0x174f   :  { %v7648_v53 = vpack.c.bf16 %v7645_v38, %v7642_v54 }
0x1750   :  { %v7644_v28 = vmul.f32 %v7638_v15, %v7494_v62 }
0x1751   :  { %9244 = vmatmul.mubr.msk.bf16.vlgmr.msra.gmra.mrb[196].mxu1 %vm4054_vm2, %v7648_v53 }
0x1752   :  { %v7647_v7 = vpack.c.bf16 %v7644_v28, %v7641_v47 }
0x1754   :  { %7853 = vmatprep.mubr.bf16.mxu0 %v7647_v7 }
0x1755   :  { %7854 = vmatmul.mubr.bf16.vlgmr.msra.gmra.mrb[188].mxu0 %v7646_v33 }
0x1824   :  { %v7896_v21 = vpop.f32.mrb[196].mxu1 }
0x1825   :  { %v9245_v1 = vpop.f32.mrb[197].mxu1 }
0x1826   :  { %v7899_v26 = vpop.f32.mrb[198].mxu1 }
0x1827   :  { %v9246_v3 = vpop.f32.mrb[199].mxu1 }
0x1828   :  { %v8580_v56 = vpop.f32.mrb[188].mxu0 }
0x1829   :  { %v8581_v5 = vpop.f32.mrb[189].mxu0 }
0x182a   :  { %v8582_v35 = vadd.f32 %v8581_v5, %v8580_v56  ;;  %v8583_v37 = vpop.f32.mrb[190].mxu0 }
0x182b   :  { %v8584_v49 = vpop.f32.mrb[191].mxu0 }
0x182c   :  { %v7856_v60 = vadd.f32 %v8582_v35, %v8264_v45  ;;  %v8585_v4 = vadd.f32 %v8584_v49, %v8583_v37 }
0x182e   :  { %v7897_v58 = vadd.f32 %v7896_v21, %v7856_v60  ;;  %v7859_v19 = vadd.f32 %v8585_v4, %v8264_v45 }
0x1830   :  { %v7911_v40 = vmul.f32 %v8287_v42, %v7897_v58  ;;  %v7900_v22 = vadd.f32 %v7899_v26, %v7859_v19 }
0x1832   :  { %v7913_v9 = vadd.f32 %v7911_v40, %v12357_v41  ;;  %v7912_v50 = vmul.f32 %v8287_v42, %v7900_v22 }
0x1834   :  { %7915 = vst.msk [vmem:[%s12903_s4] sm:$0x3f] %vm4151_vm6, %v7913_v9  ;;  %v7914_v27 = vadd.f32 %v7912_v50, %v12360_v51 }
0x1835   :  { %8288 = vst.msk [vmem:[%s12903_s4 + $0x2] sm:$0xc0] %vm4154_vm15, %v7913_v9 }
0x1836   :  { %8289 = vst.msk [vmem:[%s12903_s4 + $0xa] sm:$0xf] %vm371_vm8, %v7914_v27 }

</bundles_post_ra>
